<compile_context>
chip_gen: v6e
topology: v6e:2x2x1
jax: 0.10.0
libtpu: 0.0.40
codegen_flags: <defaults>
</compile_context>

<pallas_src>
import numpy as np
import jax
import jax.numpy as jnp
from jax import lax
from jax.experimental import pallas as pl
from jax.experimental.pallas import tpu as pltpu

LATENT_DIM = 15
OUT_PAD = 128                         # lane-dense padded output width
IMG_HW = 28
IN_FEATURES = IMG_HW * IMG_HW         # 784 (single channel, height-major raster)
FLAT_DIM = 32 * 3 * 3                 # 288 features after the conv stack
BN_EPS = 1e-5                         # PyTorch BatchNorm default
LEAKY_SLOPE = 0.01                    # PyTorch LeakyReLU default
COMPUTE_DTYPE = jnp.bfloat16


# --------------------------------------------------------------------------
# Static geometry of the banded (row-group) conv lowering.
# Activations are kept "height-major":  idx = row*(C*W) + c*W + w
# A group of G output rows is one GEMM:
#     out[:, out_off:out_off+N] = act[:, in_off:in_off+K] @ M_g + bias_g
# --------------------------------------------------------------------------
def _conv_geometry(Cin, H_in, W_in, Cout, stride, pad, G):
    KH = KW = 3
    OH = (H_in + 2 * pad - KH) // stride + 1
    OW = (W_in + 2 * pad - KW) // stride + 1
    RIN, ROUT = Cin * W_in, Cout * OW
    nrows = (G - 1) * stride + KH               # consecutive input rows per group
    K, N = nrows * RIN, G * ROUT
    n_g = -(-OH // G)
    offs = []
    for g in range(n_g):
        r0 = min(g * G, OH - G)                 # first output row (clamped; overlap is exact)
        ih0 = min(max(r0 * stride - pad, 0), H_in - nrows)
        offs.append((ih0 * RIN, r0 * ROUT, ih0, r0))
    return dict(Cin=Cin, Cout=Cout, H_in=H_in, W_in=W_in, stride=stride, pad=pad,
                G=G, OH=OH, OW=OW, RIN=RIN, ROUT=ROUT, K=K, N=N, n_g=n_g, offs=offs,
                in_width=H_in * RIN, out_width=OH * ROUT)


CONV_GEOM = (
    _conv_geometry(1, 28, 28, 8, stride=2, pad=0, G=2),    # (1,28,28) -> (8,13,13)
    _conv_geometry(8, 13, 13, 16, stride=2, pad=1, G=1),   # (8,13,13) -> (16,7,7)
    _conv_geometry(16, 7, 7, 32, stride=2, pad=0, G=1),    # (16,7,7)  -> (32,3,3)
)
ACT_WIDTHS = tuple(g["out_width"] for g in CONV_GEOM)       # 1352, 784, 288


# --------------------------------------------------------------------------
# Offline lowering (exact): conv -> banded group GEMMs, BN folding (eval mode)
# --------------------------------------------------------------------------
def _build_conv_group_mats(Wc, geom):
    Wc = np.asarray(Wc, np.float32)
    Cout, Cin, KH, KW = Wc.shape
    s, p = geom["stride"], geom["pad"]
    H_in, W_in = geom["H_in"], geom["W_in"]
    OW, RIN, ROUT = geom["OW"], geom["RIN"], geom["ROUT"]
    nrows = geom["K"] // RIN
    mats = np.zeros((geom["n_g"], geom["K"], geom["N"]), np.float32)
    co_idx = np.arange(Cout) * OW
    for g, (_, _, ih0, r0) in enumerate(geom["offs"]):
        for od in range(geom["G"]):
            oh = r0 + od
            for kh in range(KH):
                ih = oh * s + kh - p
                if ih < 0 or ih >= H_in:
                    continue                      # vertical zero-padding tap
                assert ih0 <= ih < ih0 + nrows
                for kw in range(KW):
                    for ow in range(OW):
                        iw = ow * s + kw - p
                        if iw < 0 or iw >= W_in:
                            continue              # horizontal zero-padding tap
                        for cin in range(Cin):
                            row = (ih - ih0) * RIN + cin * W_in + iw
                            cols = od * ROUT + co_idx + ow
                            mats[g, row, cols] += Wc[:, cin, kh, kw]
    return mats


def _fold_conv_bn(conv_params, geom):
    Wc, b, gamma, beta, mean, var = (np.asarray(x, np.float32) for x in conv_params)
    mats = _build_conv_group_mats(Wc, geom)
    scale = gamma / np.sqrt(var + BN_EPS)
    col_scale = np.tile(np.repeat(scale, geom["OW"]), geom["G"])          # per (od, co, ow)
    col_bias = np.tile(np.repeat(scale * (b - mean) + beta, geom["OW"]), geom["G"])
    mats = mats * col_scale[None, None, :]
    biases = np.tile(col_bias[None, :], (geom["n_g"], 1))                 # (n_g, N)
    return mats, biases


def _fold_linear_bn(lin_params, in_perm=None):
    W, b, gamma, beta, mean, var = (np.asarray(x, np.float32) for x in lin_params)
    scale = gamma / np.sqrt(var + BN_EPS)
    Wt = W.T * scale[None, :]                      # (in, out)
    if in_perm is not None:
        Wt = Wt[in_perm, :]
    return Wt, scale * (b - mean) + beta


def build_folded_params(raw_params):
    """Fold the whole module into banded conv GEMMs + dense linears (f32, torch-exact)."""
    conv1, conv2, conv3, lin1, lin2, lin3 = raw_params
    c1m, c1b = _fold_conv_bn(conv1, CONV_GEOM[0])          # (7, 140, 208)
    c2m, c2b = _fold_conv_bn(conv2, CONV_GEOM[1])          # (7, 312, 112)
    c3m, c3b = _fold_conv_bn(conv3, CONV_GEOM[2])          # (3, 336,  96)

    # conv3 output is height-major (oh, co, ow); torch flatten is channel-major
    # (co, oh, ow) -> permute lin1's input rows so the kernel needs no transpose.
    OH3 = OW3 = 3
    C3 = 32
    t_of_m = np.zeros(FLAT_DIM, np.int32)
    for oh in range(OH3):
        for co in range(C3):
            for ow in range(OW3):
                t_of_m[oh * (C3 * OW3) + co * OW3 + ow] = co * (OH3 * OW3) + oh * OW3 + ow
    wl1, bl1 = _fold_linear_bn(lin1, in_perm=t_of_m)        # (288, 128)
    wl2, bl2 = _fold_linear_bn(lin2)                        # (128, 256)

    W3, b3 = (np.asarray(p, np.float32) for p in lin3)
    wl3 = np.zeros((W3.shape[1], OUT_PAD), np.float32)      # pad 15 -> 128 lanes
    wl3[:, :LATENT_DIM] = W3.T
    bl3 = np.zeros((OUT_PAD,), np.float32)
    bl3[:LATENT_DIM] = b3

    return dict(c1m=c1m, c1b=c1b, c2m=c2m, c2b=c2b, c3m=c3m, c3b=c3b,
                wl1=wl1, bl1=bl1, wl2=wl2, bl2=bl2, wl3=wl3, bl3=bl3)


def prepare_kernel_params(folded):
    """bf16 weight stacks, f32 broadcastable biases — exactly what the kernel gets."""
    f = folded
    return (
        jnp.asarray(f["c1m"], COMPUTE_DTYPE), jnp.asarray(f["c1b"], jnp.float32)[:, None, :],
        jnp.asarray(f["c2m"], COMPUTE_DTYPE), jnp.asarray(f["c2b"], jnp.float32)[:, None, :],
        jnp.asarray(f["c3m"], COMPUTE_DTYPE), jnp.asarray(f["c3b"], jnp.float32)[:, None, :],
        jnp.asarray(f["wl1"], COMPUTE_DTYPE), jnp.asarray(f["bl1"], jnp.float32)[None, :],
        jnp.asarray(f["wl2"], COMPUTE_DTYPE), jnp.asarray(f["bl2"], jnp.float32)[None, :],
        jnp.asarray(f["wl3"], COMPUTE_DTYPE), jnp.asarray(f["bl3"], jnp.float32)[None, :],
    )


# --------------------------------------------------------------------------
# Pallas kernel
# --------------------------------------------------------------------------
def _encoder_kernel(x_ref, c1w, c1b, c2w, c2b, c3w, c3b,
                    wl1, bl1, wl2, bl2, wl3, bl3,
                    o_ref, a1_ref, a2_ref, a3_ref):
    def conv_band(src_ref, w_ref, b_ref, dst_ref, geom):
        K, N = geom["K"], geom["N"]
        for g, (i_off, o_off, _, _) in enumerate(geom["offs"]):
            acc = jnp.dot(src_ref[:, i_off:i_off + K], w_ref[g],
                          preferred_element_type=jnp.float32) + b_ref[g]
            dst_ref[:, o_off:o_off + N] = jnp.maximum(acc, 0.0).astype(dst_ref.dtype)

    conv_band(x_ref, c1w, c1b, a1_ref, CONV_GEOM[0])        # conv1 + BN + ReLU
    conv_band(a1_ref, c2w, c2b, a2_ref, CONV_GEOM[1])       # conv2 + BN + ReLU
    conv_band(a2_ref, c3w, c3b, a3_ref, CONV_GEOM[2])       # conv3 + BN + ReLU

    a3 = a3_ref[...]                                        # (TB, 288) bf16
    h = jnp.dot(a3, wl1[...], preferred_element_type=jnp.float32) + bl1[...]
    h = jnp.where(h >= 0.0, h, LEAKY_SLOPE * h)             # Linear(288,128)+BN+LeakyReLU
    h = jnp.dot(h.astype(COMPUTE_DTYPE), wl2[...],
                preferred_element_type=jnp.float32) + bl2[...]
    h = jnp.maximum(h, 0.0)                                 # Linear(128,256)+BN+ReLU
    z = jnp.dot(h.astype(COMPUTE_DTYPE), wl3[...],
                preferred_element_type=jnp.float32) + bl3[...]
    o_ref[...] = jnp.tanh(z).astype(o_ref.dtype)            # Linear(256,15 pad 128)+Tanh


def _pick_tb(batch, max_tb=512):
    """Adaptive batch tile: no huge zero-padding at small B, >=2 tiles at large B (v7x)."""
    b8 = ((batch + 7) // 8) * 8
    if b8 <= 256:
        return b8
    return max(8, min(max_tb, ((b8 // 2 + 7) // 8) * 8))


def encoder_forward(x_img, kernel_params, *, max_tb=512):
    """x_img: (B, 1, 28, 28) NCHW, any float dtype. Returns (B, 15) f32 latent."""
    B = x_img.shape[0]
    x = x_img.reshape(B, -1).astype(COMPUTE_DTYPE)          # height-major raster (C=1)
    assert x.shape[1] == IN_FEATURES

    tb = _pick_tb(B, max_tb)
    assert tb % 8 == 0
    n_tiles = -(-B // tb)
    Bp = n_tiles * tb
    if Bp != B:
        x = jnp.pad(x, ((0, Bp - B), (0, 0)))               # zero rows, sliced off below

    x_spec = pl.BlockSpec((tb, IN_FEATURES), lambda i: (i, 0))
    out_spec = pl.BlockSpec((tb, OUT_PAD), lambda i: (i, 0))
    scratch = [pltpu.VMEM((tb, ACT_WIDTHS[0]), COMPUTE_DTYPE),
               pltpu.VMEM((tb, ACT_WIDTHS[1]), COMPUTE_DTYPE),
               pltpu.VMEM((tb, ACT_WIDTHS[2]), COMPUTE_DTYPE)]

    weights = kernel_params[0::2]
    macs_per_row = sum(int(np.prod(w.shape)) for w in weights)
    weight_bytes = sum(int(np.prod(p.shape)) * p.dtype.itemsize for p in kernel_params)
    cost = pl.CostEstimate(
        flops=2 * macs_per_row * Bp,
        transcendentals=Bp * OUT_PAD,
        bytes_accessed=Bp * (IN_FEATURES + OUT_PAD) * 2 + weight_bytes)

    def run(single_buffer_weights):
        w_specs = []
        for p in kernel_params:
            idx_map = (lambda i, n=p.ndim: (0,) * n)        # weights resident across tiles
            if single_buffer_weights:
                w_specs.append(pl.BlockSpec(p.shape, idx_map,
                                            pipeline_mode=pl.Buffered(1)))
            else:
                w_specs.append(pl.BlockSpec(p.shape, idx_map))
        out = pl.pallas_call(
            _encoder_kernel,
            out_shape=jax.ShapeDtypeStruct((Bp, OUT_PAD), COMPUTE_DTYPE),
            grid_spec=pltpu.PrefetchScalarGridSpec(
                num_scalar_prefetch=0,
                grid=(n_tiles,),
                in_specs=[x_spec] + w_specs,
                out_specs=out_spec,
                scratch_shapes=scratch),
            compiler_params=pltpu.CompilerParams(
                dimension_semantics=("parallel",),
                vmem_limit_bytes=32 * 1024 * 1024),
            cost_estimate=cost,
        )(x, *kernel_params)
        return jax.block_until_ready(out)

    if hasattr(pl, "Buffered"):
        try:
            out = run(True)
        except Exception:        # jax version without Buffered(1) support on inputs
            out = run(False)
    else:
        out = run(False)

    return out[:B, :LATENT_DIM].astype(jnp.float32)


# --------------------------------------------------------------------------
# Parameter init (mimics torch defaults; BN stats randomized as "pretrained")
# --------------------------------------------------------------------------
def init_raw_params(key):
    ks = iter(jax.random.split(key, 32))

    def uni(k, shape, bound):
        return jax.random.uniform(k, shape, jnp.float32, -bound, bound)

    def conv_layer(cin, cout, k=3):
        bound = 1.0 / np.sqrt(cin * k * k)
        return (uni(next(ks), (cout, cin, k, k), bound), uni(next(ks), (cout,), bound),
                jax.random.uniform(next(ks), (cout,), jnp.float32, 0.5, 1.5),
                uni(next(ks), (cout,), 0.1), uni(next(ks), (cout,), 0.1),
                jax.random.uniform(next(ks), (cout,), jnp.float32, 0.5, 1.5))

    def linear_bn_layer(fin, fout):
        bound = 1.0 / np.sqrt(fin)
        return (uni(next(ks), (fout, fin), bound), uni(next(ks), (fout,), bound),
                jax.random.uniform(next(ks), (fout,), jnp.float32, 0.5, 1.5),
                uni(next(ks), (fout,), 0.1), uni(next(ks), (fout,), 0.1),
                jax.random.uniform(next(ks), (fout,), jnp.float32, 0.5, 1.5))

    def linear_layer(fin, fout):
        bound = 1.0 / np.sqrt(fin)
        return (uni(next(ks), (fout, fin), bound), uni(next(ks), (fout,), bound))

    return (conv_layer(1, 8), conv_layer(8, 16), conv_layer(16, 32),
            linear_bn_layer(FLAT_DIM, 128), linear_bn_layer(128, 256),
            linear_layer(256, LATENT_DIM))


# --------------------------------------------------------------------------
# References for correctness checks
# --------------------------------------------------------------------------
def torch_reference(x_img, raw_params):
    """Faithful eval-mode conv/BN/linear forward (f32, highest precision)."""
    conv1, conv2, conv3, lin1, lin2, lin3 = raw_params
    h = x_img.astype(jnp.float32)
    for params, geom in zip((conv1, conv2, conv3), CONV_GEOM):
        W, b, gamma, beta, mean, var = params
        stride, pad = geom["stride"], geom["pad"]
        h = lax.conv_general_dilated(
            h, W, window_strides=(stride, stride), padding=[(pad, pad), (pad, pad)],
            dimension_numbers=("NCHW", "OIHW", "NCHW"), precision=lax.Precision.HIGHEST)
        h = h + b[None, :, None, None]
        h = (h - mean[None, :, None, None]) / jnp.sqrt(var[None, :, None, None] + BN_EPS)
        h = h * gamma[None, :, None, None] + beta[None, :, None, None]
        h = jnp.maximum(h, 0.0)
    h = h.reshape(h.shape[0], -1)                           # Flatten(start_dim=1)

    def lin_bn(v, params, act):
        W, b, gamma, beta, mean, var = params
        v = jnp.dot(v, W.T, precision=lax.Precision.HIGHEST) + b
        v = (v - mean) / jnp.sqrt(var + BN_EPS) * gamma + beta
        return act(v)

    h = lin_bn(h, lin1, lambda v: jnp.where(v >= 0.0, v, LEAKY_SLOPE * v))
    h = lin_bn(h, lin2, lambda v: jnp.maximum(v, 0.0))
    W3, b3 = lin3
    return jnp.tanh(jnp.dot(h, W3.T, precision=lax.Precision.HIGHEST) + b3)


def banded_reference(x_img, folded, compute_dtype):
    """Pure-JAX version of the exact kernel math (same banded GEMMs / dtypes)."""
    B = x_img.shape[0]
    prec = lax.Precision.HIGHEST if compute_dtype == jnp.float32 else None

    def gemm(a, M, v):
        return jnp.dot(a.astype(compute_dtype), jnp.asarray(M, compute_dtype),
                       preferred_element_type=jnp.float32, precision=prec) \
            + jnp.asarray(v, jnp.float32)

    def conv(a, mats, biases, geom):
        out = jnp.zeros((B, geom["out_width"]), compute_dtype)
        K, N = geom["K"], geom["N"]
        for g, (i_off, o_off, _, _) in enumerate(geom["offs"]):
            blk = jnp.maximum(gemm(a[:, i_off:i_off + K], mats[g], biases[g]), 0.0)
            out = out.at[:, o_off:o_off + N].set(blk.astype(compute_dtype))
        return out

    x = jnp.asarray(x_img.reshape(B, -1), compute_dtype)
    a1 = conv(x, folded["c1m"], folded["c1b"], CONV_GEOM[0])
    a2 = conv(a1, folded["c2m"], folded["c2b"], CONV_GEOM[1])
    a3 = conv(a2, folded["c3m"], folded["c3b"], CONV_GEOM[2])
    h = gemm(a3, folded["wl1"], folded["bl1"])
    h = jnp.where(h >= 0.0, h, LEAKY_SLOPE * h)
    h = jnp.maximum(gemm(h, folded["wl2"], folded["bl2"]), 0.0)
    z = gemm(h, folded["wl3"], folded["bl3"])
    return jnp.tanh(z)[:, :LATENT_DIM]


if __name__ == "__main__":
    key = jax.random.PRNGKey(0)
    k_x, k_p = jax.random.split(key)

    B = 2
    x = jax.random.uniform(k_x, (B, 1, 28, 28), jnp.float32)   # MNIST-like NCHW

    raw = init_raw_params(k_p)
    folded = build_folded_params(raw)
    kparams = prepare_kernel_params(folded)

    out = encoder_forward(x, kparams)
    out = jax.block_until_ready(out)
    assert out.shape == (B, LATENT_DIM)
    assert bool(jnp.all(jnp.isfinite(out)))

    # Check 1: banded conv lowering + BN folding is exact (f32 vs faithful conv path).
    ref_exact = torch_reference(x, raw)
    ref_banded_f32 = banded_reference(x, folded, jnp.float32)
    err1 = float(jnp.max(jnp.abs(ref_banded_f32 - ref_exact)))
    assert err1 < 1e-4, f"banded lowering mismatch: {err1}"

    # Check 2: Pallas kernel matches the same-math bf16 reference tightly.
    ref_banded_bf16 = banded_reference(x, folded, COMPUTE_DTYPE)
    err2 = float(jnp.max(jnp.abs(out - ref_banded_bf16)))
    assert err2 < 2e-2, f"kernel vs bf16 reference mismatch: {err2}"

    # Check 3: end-to-end vs exact module semantics (loose bf16 tolerance).
    err3 = float(jnp.max(jnp.abs(out - ref_exact)))
    assert err3 < 1e-1, f"kernel vs exact reference mismatch: {err3}"

    print("KERNEL_OK")
</pallas_src>

<mosaic_0001>
module attributes {stable_mosaic.version = 11 : i64} {
  func.func @_encoder_kernel(%arg0: i32, %arg1: memref<8x784xbf16, #tpu.memory_space<vmem>>, %arg2: memref<7x140x208xbf16, #tpu.memory_space<vmem>>, %arg3: memref<7x1x208xf32, #tpu.memory_space<vmem>>, %arg4: memref<7x312x112xbf16, #tpu.memory_space<vmem>>, %arg5: memref<7x1x112xf32, #tpu.memory_space<vmem>>, %arg6: memref<3x336x96xbf16, #tpu.memory_space<vmem>>, %arg7: memref<3x1x96xf32, #tpu.memory_space<vmem>>, %arg8: memref<288x128xbf16, #tpu.memory_space<vmem>>, %arg9: memref<1x128xf32, #tpu.memory_space<vmem>>, %arg10: memref<128x256xbf16, #tpu.memory_space<vmem>>, %arg11: memref<1x256xf32, #tpu.memory_space<vmem>>, %arg12: memref<256x128xbf16, #tpu.memory_space<vmem>>, %arg13: memref<1x128xf32, #tpu.memory_space<vmem>>, %arg14: memref<8x128xbf16, #tpu.memory_space<vmem>>, %arg15: memref<8x1352xbf16, #tpu.memory_space<vmem>>, %arg16: memref<8x784xbf16, #tpu.memory_space<vmem>>, %arg17: memref<8x288xbf16, #tpu.memory_space<vmem>>) attributes {dimension_semantics = [#tpu.dimension_semantics<parallel>], iteration_bounds = array<i64: 1>, scalar_prefetch = 0 : i64, scratch_operands = 3 : i64, tpu.core_type = #tpu.core_type<tc>, window_params = [{transform_indices = @transform_0, window_bounds = array<i64: 8, 784>}, {pipeline_mode = #tpu.pipeline_mode<synchronous>, transform_indices = @transform_1, window_bounds = array<i64: 7, 140, 208>}, {pipeline_mode = #tpu.pipeline_mode<synchronous>, transform_indices = @transform_2, window_bounds = array<i64: 7, 1, 208>}, {pipeline_mode = #tpu.pipeline_mode<synchronous>, transform_indices = @transform_3, window_bounds = array<i64: 7, 312, 112>}, {pipeline_mode = #tpu.pipeline_mode<synchronous>, transform_indices = @transform_4, window_bounds = array<i64: 7, 1, 112>}, {pipeline_mode = #tpu.pipeline_mode<synchronous>, transform_indices = @transform_5, window_bounds = array<i64: 3, 336, 96>}, {pipeline_mode = #tpu.pipeline_mode<synchronous>, transform_indices = @transform_6, window_bounds = array<i64: 3, 1, 96>}, {pipeline_mode = #tpu.pipeline_mode<synchronous>, transform_indices = @transform_7, window_bounds = array<i64: 288, 128>}, {pipeline_mode = #tpu.pipeline_mode<synchronous>, transform_indices = @transform_8, window_bounds = array<i64: 1, 128>}, {pipeline_mode = #tpu.pipeline_mode<synchronous>, transform_indices = @transform_9, window_bounds = array<i64: 128, 256>}, {pipeline_mode = #tpu.pipeline_mode<synchronous>, transform_indices = @transform_10, window_bounds = array<i64: 1, 256>}, {pipeline_mode = #tpu.pipeline_mode<synchronous>, transform_indices = @transform_11, window_bounds = array<i64: 256, 128>}, {pipeline_mode = #tpu.pipeline_mode<synchronous>, transform_indices = @transform_12, window_bounds = array<i64: 1, 128>}, {transform_indices = @transform_13, window_bounds = array<i64: 8, 128>}]} {
    %c0 = arith.constant 0 : index
    %c0_0 = arith.constant 0 : index
    %0 = vector.load %arg1[%c0, %c0_0] : memref<8x784xbf16, #tpu.memory_space<vmem>>, vector<8x140xbf16>
    %c0_1 = arith.constant 0 : index
    %c0_2 = arith.constant 0 : index
    %c0_3 = arith.constant 0 : index
    %1 = vector.load %arg2[%c0_1, %c0_2, %c0_3] : memref<7x140x208xbf16, #tpu.memory_space<vmem>>, vector<1x140x208xbf16>
    %2 = vector.shape_cast %1 : vector<1x140x208xbf16> to vector<140x208xbf16>
    %cst = arith.constant dense<0.000000e+00> : vector<8x208xf32>
    %3 = tpu.matmul %0, %2, %cst {dimension_numbers = #tpu.dot_dimension_numbers<[1], [0], [0], [1], [0, 0, 1, 1], [], []>} : vector<8x140xbf16>, vector<140x208xbf16>, vector<8x208xf32> -> vector<8x208xf32>
    %c0_4 = arith.constant 0 : index
    %c0_5 = arith.constant 0 : index
    %c0_6 = arith.constant 0 : index
    %4 = vector.load %arg3[%c0_4, %c0_5, %c0_6] : memref<7x1x208xf32, #tpu.memory_space<vmem>>, vector<1x1x208xf32>
    %5 = vector.shape_cast %4 : vector<1x1x208xf32> to vector<1x208xf32>
    %6 = vector.broadcast %5 : vector<1x208xf32> to vector<8x208xf32>
    %7 = arith.addf %3, %6 : vector<8x208xf32>
    %cst_7 = arith.constant 0.000000e+00 : f32
    %8 = vector.broadcast %cst_7 : f32 to vector<8x208xf32>
    %9 = arith.maximumf %7, %8 : vector<8x208xf32>
    %10 = arith.truncf %9 : vector<8x208xf32> to vector<8x208xbf16>
    %c0_8 = arith.constant 0 : index
    %c0_9 = arith.constant 0 : index
    %11 = vector.load %arg15[%c0_8, %c0_9] : memref<8x1352xbf16, #tpu.memory_space<vmem>>, vector<8x208xbf16>
    tpu.vector_store %arg15[%c0_8, %c0_9], %10 {strides = array<i32>} : memref<8x1352xbf16, #tpu.memory_space<vmem>>, vector<8x208xbf16>,
    %c0_10 = arith.constant 0 : index
    %c112 = arith.constant 112 : index
    %12 = vector.load %arg1[%c0_10, %c112] : memref<8x784xbf16, #tpu.memory_space<vmem>>, vector<8x140xbf16>
    %c1 = arith.constant 1 : index
    %c0_11 = arith.constant 0 : index
    %c0_12 = arith.constant 0 : index
    %13 = vector.load %arg2[%c1, %c0_11, %c0_12] : memref<7x140x208xbf16, #tpu.memory_space<vmem>>, vector<1x140x208xbf16>
    %14 = vector.shape_cast %13 : vector<1x140x208xbf16> to vector<140x208xbf16>
    %cst_13 = arith.constant dense<0.000000e+00> : vector<8x208xf32>
    %15 = tpu.matmul %12, %14, %cst_13 {dimension_numbers = #tpu.dot_dimension_numbers<[1], [0], [0], [1], [0, 0, 1, 1], [], []>} : vector<8x140xbf16>, vector<140x208xbf16>, vector<8x208xf32> -> vector<8x208xf32>
    %c1_14 = arith.constant 1 : index
    %c0_15 = arith.constant 0 : index
    %c0_16 = arith.constant 0 : index
    %16 = vector.load %arg3[%c1_14, %c0_15, %c0_16] : memref<7x1x208xf32, #tpu.memory_space<vmem>>, vector<1x1x208xf32>
    %17 = vector.shape_cast %16 : vector<1x1x208xf32> to vector<1x208xf32>
    %18 = vector.broadcast %17 : vector<1x208xf32> to vector<8x208xf32>
    %19 = arith.addf %15, %18 : vector<8x208xf32>
    %cst_17 = arith.constant 0.000000e+00 : f32
    %20 = vector.broadcast %cst_17 : f32 to vector<8x208xf32>
    %21 = arith.maximumf %19, %20 : vector<8x208xf32>
    %22 = arith.truncf %21 : vector<8x208xf32> to vector<8x208xbf16>
    %c0_18 = arith.constant 0 : index
    %c208 = arith.constant 208 : index
    %23 = vector.load %arg15[%c0_18, %c208] : memref<8x1352xbf16, #tpu.memory_space<vmem>>, vector<8x208xbf16>
    tpu.vector_store %arg15[%c0_18, %c208], %22 {strides = array<i32>} : memref<8x1352xbf16, #tpu.memory_space<vmem>>, vector<8x208xbf16>,
    %c0_19 = arith.constant 0 : index
    %c224 = arith.constant 224 : index
    %24 = vector.load %arg1[%c0_19, %c224] : memref<8x784xbf16, #tpu.memory_space<vmem>>, vector<8x140xbf16>
    %c2 = arith.constant 2 : index
    %c0_20 = arith.constant 0 : index
    %c0_21 = arith.constant 0 : index
    %25 = vector.load %arg2[%c2, %c0_20, %c0_21] : memref<7x140x208xbf16, #tpu.memory_space<vmem>>, vector<1x140x208xbf16>
    %26 = vector.shape_cast %25 : vector<1x140x208xbf16> to vector<140x208xbf16>
    %cst_22 = arith.constant dense<0.000000e+00> : vector<8x208xf32>
    %27 = tpu.matmul %24, %26, %cst_22 {dimension_numbers = #tpu.dot_dimension_numbers<[1], [0], [0], [1], [0, 0, 1, 1], [], []>} : vector<8x140xbf16>, vector<140x208xbf16>, vector<8x208xf32> -> vector<8x208xf32>
    %c2_23 = arith.constant 2 : index
    %c0_24 = arith.constant 0 : index
    %c0_25 = arith.constant 0 : index
    %28 = vector.load %arg3[%c2_23, %c0_24, %c0_25] : memref<7x1x208xf32, #tpu.memory_space<vmem>>, vector<1x1x208xf32>
    %29 = vector.shape_cast %28 : vector<1x1x208xf32> to vector<1x208xf32>
    %30 = vector.broadcast %29 : vector<1x208xf32> to vector<8x208xf32>
    %31 = arith.addf %27, %30 : vector<8x208xf32>
    %cst_26 = arith.constant 0.000000e+00 : f32
    %32 = vector.broadcast %cst_26 : f32 to vector<8x208xf32>
    %33 = arith.maximumf %31, %32 : vector<8x208xf32>
    %34 = arith.truncf %33 : vector<8x208xf32> to vector<8x208xbf16>
    %c0_27 = arith.constant 0 : index
    %c416 = arith.constant 416 : index
    %35 = vector.load %arg15[%c0_27, %c416] : memref<8x1352xbf16, #tpu.memory_space<vmem>>, vector<8x208xbf16>
    tpu.vector_store %arg15[%c0_27, %c416], %34 {strides = array<i32>} : memref<8x1352xbf16, #tpu.memory_space<vmem>>, vector<8x208xbf16>,
    %c0_28 = arith.constant 0 : index
    %c336 = arith.constant 336 : index
    %36 = vector.load %arg1[%c0_28, %c336] : memref<8x784xbf16, #tpu.memory_space<vmem>>, vector<8x140xbf16>
    %c3 = arith.constant 3 : index
    %c0_29 = arith.constant 0 : index
    %c0_30 = arith.constant 0 : index
    %37 = vector.load %arg2[%c3, %c0_29, %c0_30] : memref<7x140x208xbf16, #tpu.memory_space<vmem>>, vector<1x140x208xbf16>
    %38 = vector.shape_cast %37 : vector<1x140x208xbf16> to vector<140x208xbf16>
    %cst_31 = arith.constant dense<0.000000e+00> : vector<8x208xf32>
    %39 = tpu.matmul %36, %38, %cst_31 {dimension_numbers = #tpu.dot_dimension_numbers<[1], [0], [0], [1], [0, 0, 1, 1], [], []>} : vector<8x140xbf16>, vector<140x208xbf16>, vector<8x208xf32> -> vector<8x208xf32>
    %c3_32 = arith.constant 3 : index
    %c0_33 = arith.constant 0 : index
    %c0_34 = arith.constant 0 : index
    %40 = vector.load %arg3[%c3_32, %c0_33, %c0_34] : memref<7x1x208xf32, #tpu.memory_space<vmem>>, vector<1x1x208xf32>
    %41 = vector.shape_cast %40 : vector<1x1x208xf32> to vector<1x208xf32>
    %42 = vector.broadcast %41 : vector<1x208xf32> to vector<8x208xf32>
    %43 = arith.addf %39, %42 : vector<8x208xf32>
    %cst_35 = arith.constant 0.000000e+00 : f32
    %44 = vector.broadcast %cst_35 : f32 to vector<8x208xf32>
    %45 = arith.maximumf %43, %44 : vector<8x208xf32>
    %46 = arith.truncf %45 : vector<8x208xf32> to vector<8x208xbf16>
    %c0_36 = arith.constant 0 : index
    %c624 = arith.constant 624 : index
    %47 = vector.load %arg15[%c0_36, %c624] : memref<8x1352xbf16, #tpu.memory_space<vmem>>, vector<8x208xbf16>
    tpu.vector_store %arg15[%c0_36, %c624], %46 {strides = array<i32>} : memref<8x1352xbf16, #tpu.memory_space<vmem>>, vector<8x208xbf16>,
    %c0_37 = arith.constant 0 : index
    %c448 = arith.constant 448 : index
    %48 = vector.load %arg1[%c0_37, %c448] : memref<8x784xbf16, #tpu.memory_space<vmem>>, vector<8x140xbf16>
    %c4 = arith.constant 4 : index
    %c0_38 = arith.constant 0 : index
    %c0_39 = arith.constant 0 : index
    %49 = vector.load %arg2[%c4, %c0_38, %c0_39] : memref<7x140x208xbf16, #tpu.memory_space<vmem>>, vector<1x140x208xbf16>
    %50 = vector.shape_cast %49 : vector<1x140x208xbf16> to vector<140x208xbf16>
    %cst_40 = arith.constant dense<0.000000e+00> : vector<8x208xf32>
    %51 = tpu.matmul %48, %50, %cst_40 {dimension_numbers = #tpu.dot_dimension_numbers<[1], [0], [0], [1], [0, 0, 1, 1], [], []>} : vector<8x140xbf16>, vector<140x208xbf16>, vector<8x208xf32> -> vector<8x208xf32>
    %c4_41 = arith.constant 4 : index
    %c0_42 = arith.constant 0 : index
    %c0_43 = arith.constant 0 : index
    %52 = vector.load %arg3[%c4_41, %c0_42, %c0_43] : memref<7x1x208xf32, #tpu.memory_space<vmem>>, vector<1x1x208xf32>
    %53 = vector.shape_cast %52 : vector<1x1x208xf32> to vector<1x208xf32>
    %54 = vector.broadcast %53 : vector<1x208xf32> to vector<8x208xf32>
    %55 = arith.addf %51, %54 : vector<8x208xf32>
    %cst_44 = arith.constant 0.000000e+00 : f32
    %56 = vector.broadcast %cst_44 : f32 to vector<8x208xf32>
    %57 = arith.maximumf %55, %56 : vector<8x208xf32>
    %58 = arith.truncf %57 : vector<8x208xf32> to vector<8x208xbf16>
    %c0_45 = arith.constant 0 : index
    %c832 = arith.constant 832 : index
    %59 = vector.load %arg15[%c0_45, %c832] : memref<8x1352xbf16, #tpu.memory_space<vmem>>, vector<8x208xbf16>
    tpu.vector_store %arg15[%c0_45, %c832], %58 {strides = array<i32>} : memref<8x1352xbf16, #tpu.memory_space<vmem>>, vector<8x208xbf16>,
    %c0_46 = arith.constant 0 : index
    %c560 = arith.constant 560 : index
    %60 = vector.load %arg1[%c0_46, %c560] : memref<8x784xbf16, #tpu.memory_space<vmem>>, vector<8x140xbf16>
    %c5 = arith.constant 5 : index
    %c0_47 = arith.constant 0 : index
    %c0_48 = arith.constant 0 : index
    %61 = vector.load %arg2[%c5, %c0_47, %c0_48] : memref<7x140x208xbf16, #tpu.memory_space<vmem>>, vector<1x140x208xbf16>
    %62 = vector.shape_cast %61 : vector<1x140x208xbf16> to vector<140x208xbf16>
    %cst_49 = arith.constant dense<0.000000e+00> : vector<8x208xf32>
    %63 = tpu.matmul %60, %62, %cst_49 {dimension_numbers = #tpu.dot_dimension_numbers<[1], [0], [0], [1], [0, 0, 1, 1], [], []>} : vector<8x140xbf16>, vector<140x208xbf16>, vector<8x208xf32> -> vector<8x208xf32>
    %c5_50 = arith.constant 5 : index
    %c0_51 = arith.constant 0 : index
    %c0_52 = arith.constant 0 : index
    %64 = vector.load %arg3[%c5_50, %c0_51, %c0_52] : memref<7x1x208xf32, #tpu.memory_space<vmem>>, vector<1x1x208xf32>
    %65 = vector.shape_cast %64 : vector<1x1x208xf32> to vector<1x208xf32>
    %66 = vector.broadcast %65 : vector<1x208xf32> to vector<8x208xf32>
    %67 = arith.addf %63, %66 : vector<8x208xf32>
    %cst_53 = arith.constant 0.000000e+00 : f32
    %68 = vector.broadcast %cst_53 : f32 to vector<8x208xf32>
    %69 = arith.maximumf %67, %68 : vector<8x208xf32>
    %70 = arith.truncf %69 : vector<8x208xf32> to vector<8x208xbf16>
    %c0_54 = arith.constant 0 : index
    %c1040 = arith.constant 1040 : index
    %71 = vector.load %arg15[%c0_54, %c1040] : memref<8x1352xbf16, #tpu.memory_space<vmem>>, vector<8x208xbf16>
    tpu.vector_store %arg15[%c0_54, %c1040], %70 {strides = array<i32>} : memref<8x1352xbf16, #tpu.memory_space<vmem>>, vector<8x208xbf16>,
    %c0_55 = arith.constant 0 : index
    %c616 = arith.constant 616 : index
    %72 = vector.load %arg1[%c0_55, %c616] : memref<8x784xbf16, #tpu.memory_space<vmem>>, vector<8x140xbf16>
    %c6 = arith.constant 6 : index
    %c0_56 = arith.constant 0 : index
    %c0_57 = arith.constant 0 : index
    %73 = vector.load %arg2[%c6, %c0_56, %c0_57] : memref<7x140x208xbf16, #tpu.memory_space<vmem>>, vector<1x140x208xbf16>
    %74 = vector.shape_cast %73 : vector<1x140x208xbf16> to vector<140x208xbf16>
    %cst_58 = arith.constant dense<0.000000e+00> : vector<8x208xf32>
    %75 = tpu.matmul %72, %74, %cst_58 {dimension_numbers = #tpu.dot_dimension_numbers<[1], [0], [0], [1], [0, 0, 1, 1], [], []>} : vector<8x140xbf16>, vector<140x208xbf16>, vector<8x208xf32> -> vector<8x208xf32>
    %c6_59 = arith.constant 6 : index
    %c0_60 = arith.constant 0 : index
    %c0_61 = arith.constant 0 : index
    %76 = vector.load %arg3[%c6_59, %c0_60, %c0_61] : memref<7x1x208xf32, #tpu.memory_space<vmem>>, vector<1x1x208xf32>
    %77 = vector.shape_cast %76 : vector<1x1x208xf32> to vector<1x208xf32>
    %78 = vector.broadcast %77 : vector<1x208xf32> to vector<8x208xf32>
    %79 = arith.addf %75, %78 : vector<8x208xf32>
    %cst_62 = arith.constant 0.000000e+00 : f32
    %80 = vector.broadcast %cst_62 : f32 to vector<8x208xf32>
    %81 = arith.maximumf %79, %80 : vector<8x208xf32>
    %82 = arith.truncf %81 : vector<8x208xf32> to vector<8x208xbf16>
    %c0_63 = arith.constant 0 : index
    %c1144 = arith.constant 1144 : index
    %83 = vector.load %arg15[%c0_63, %c1144] : memref<8x1352xbf16, #tpu.memory_space<vmem>>, vector<8x208xbf16>
    tpu.vector_store %arg15[%c0_63, %c1144], %82 {strides = array<i32>} : memref<8x1352xbf16, #tpu.memory_space<vmem>>, vector<8x208xbf16>,
    %c0_64 = arith.constant 0 : index
    %c0_65 = arith.constant 0 : index
    %84 = vector.load %arg15[%c0_64, %c0_65] : memref<8x1352xbf16, #tpu.memory_space<vmem>>, vector<8x312xbf16>
    %c0_66 = arith.constant 0 : index
    %c0_67 = arith.constant 0 : index
    %c0_68 = arith.constant 0 : index
    %85 = vector.load %arg4[%c0_66, %c0_67, %c0_68] : memref<7x312x112xbf16, #tpu.memory_space<vmem>>, vector<1x312x112xbf16>
    %86 = vector.shape_cast %85 : vector<1x312x112xbf16> to vector<312x112xbf16>
    %cst_69 = arith.constant dense<0.000000e+00> : vector<8x112xf32>
    %87 = tpu.matmul %84, %86, %cst_69 {dimension_numbers = #tpu.dot_dimension_numbers<[1], [0], [0], [1], [0, 0, 1, 1], [], []>} : vector<8x312xbf16>, vector<312x112xbf16>, vector<8x112xf32> -> vector<8x112xf32>
    %c0_70 = arith.constant 0 : index
    %c0_71 = arith.constant 0 : index
    %c0_72 = arith.constant 0 : index
    %88 = vector.load %arg5[%c0_70, %c0_71, %c0_72] : memref<7x1x112xf32, #tpu.memory_space<vmem>>, vector<1x1x112xf32>
    %89 = vector.shape_cast %88 : vector<1x1x112xf32> to vector<1x112xf32>
    %90 = vector.broadcast %89 : vector<1x112xf32> to vector<8x112xf32>
    %91 = arith.addf %87, %90 : vector<8x112xf32>
    %cst_73 = arith.constant 0.000000e+00 : f32
    %92 = vector.broadcast %cst_73 : f32 to vector<8x112xf32>
    %93 = arith.maximumf %91, %92 : vector<8x112xf32>
    %94 = arith.truncf %93 : vector<8x112xf32> to vector<8x112xbf16>
    %c0_74 = arith.constant 0 : index
    %c0_75 = arith.constant 0 : index
    %95 = vector.load %arg16[%c0_74, %c0_75] : memref<8x784xbf16, #tpu.memory_space<vmem>>, vector<8x112xbf16>
    tpu.vector_store %arg16[%c0_74, %c0_75], %94 {strides = array<i32>} : memref<8x784xbf16, #tpu.memory_space<vmem>>, vector<8x112xbf16>,
    %c0_76 = arith.constant 0 : index
    %c104 = arith.constant 104 : index
    %96 = vector.load %arg15[%c0_76, %c104] : memref<8x1352xbf16, #tpu.memory_space<vmem>>, vector<8x312xbf16>
    %c1_77 = arith.constant 1 : index
    %c0_78 = arith.constant 0 : index
    %c0_79 = arith.constant 0 : index
    %97 = vector.load %arg4[%c1_77, %c0_78, %c0_79] : memref<7x312x112xbf16, #tpu.memory_space<vmem>>, vector<1x312x112xbf16>
    %98 = vector.shape_cast %97 : vector<1x312x112xbf16> to vector<312x112xbf16>
    %cst_80 = arith.constant dense<0.000000e+00> : vector<8x112xf32>
    %99 = tpu.matmul %96, %98, %cst_80 {dimension_numbers = #tpu.dot_dimension_numbers<[1], [0], [0], [1], [0, 0, 1, 1], [], []>} : vector<8x312xbf16>, vector<312x112xbf16>, vector<8x112xf32> -> vector<8x112xf32>
    %c1_81 = arith.constant 1 : index
    %c0_82 = arith.constant 0 : index
    %c0_83 = arith.constant 0 : index
    %100 = vector.load %arg5[%c1_81, %c0_82, %c0_83] : memref<7x1x112xf32, #tpu.memory_space<vmem>>, vector<1x1x112xf32>
    %101 = vector.shape_cast %100 : vector<1x1x112xf32> to vector<1x112xf32>
    %102 = vector.broadcast %101 : vector<1x112xf32> to vector<8x112xf32>
    %103 = arith.addf %99, %102 : vector<8x112xf32>
    %cst_84 = arith.constant 0.000000e+00 : f32
    %104 = vector.broadcast %cst_84 : f32 to vector<8x112xf32>
    %105 = arith.maximumf %103, %104 : vector<8x112xf32>
    %106 = arith.truncf %105 : vector<8x112xf32> to vector<8x112xbf16>
    %c0_85 = arith.constant 0 : index
    %c112_86 = arith.constant 112 : index
    %107 = vector.load %arg16[%c0_85, %c112_86] : memref<8x784xbf16, #tpu.memory_space<vmem>>, vector<8x112xbf16>
    tpu.vector_store %arg16[%c0_85, %c112_86], %106 {strides = array<i32>} : memref<8x784xbf16, #tpu.memory_space<vmem>>, vector<8x112xbf16>,
    %c0_87 = arith.constant 0 : index
    %c312 = arith.constant 312 : index
    %108 = vector.load %arg15[%c0_87, %c312] : memref<8x1352xbf16, #tpu.memory_space<vmem>>, vector<8x312xbf16>
    %c2_88 = arith.constant 2 : index
    %c0_89 = arith.constant 0 : index
    %c0_90 = arith.constant 0 : index
    %109 = vector.load %arg4[%c2_88, %c0_89, %c0_90] : memref<7x312x112xbf16, #tpu.memory_space<vmem>>, vector<1x312x112xbf16>
    %110 = vector.shape_cast %109 : vector<1x312x112xbf16> to vector<312x112xbf16>
    %cst_91 = arith.constant dense<0.000000e+00> : vector<8x112xf32>
    %111 = tpu.matmul %108, %110, %cst_91 {dimension_numbers = #tpu.dot_dimension_numbers<[1], [0], [0], [1], [0, 0, 1, 1], [], []>} : vector<8x312xbf16>, vector<312x112xbf16>, vector<8x112xf32> -> vector<8x112xf32>
    %c2_92 = arith.constant 2 : index
    %c0_93 = arith.constant 0 : index
    %c0_94 = arith.constant 0 : index
    %112 = vector.load %arg5[%c2_92, %c0_93, %c0_94] : memref<7x1x112xf32, #tpu.memory_space<vmem>>, vector<1x1x112xf32>
    %113 = vector.shape_cast %112 : vector<1x1x112xf32> to vector<1x112xf32>
    %114 = vector.broadcast %113 : vector<1x112xf32> to vector<8x112xf32>
    %115 = arith.addf %111, %114 : vector<8x112xf32>
    %cst_95 = arith.constant 0.000000e+00 : f32
    %116 = vector.broadcast %cst_95 : f32 to vector<8x112xf32>
    %117 = arith.maximumf %115, %116 : vector<8x112xf32>
    %118 = arith.truncf %117 : vector<8x112xf32> to vector<8x112xbf16>
    %c0_96 = arith.constant 0 : index
    %c224_97 = arith.constant 224 : index
    %119 = vector.load %arg16[%c0_96, %c224_97] : memref<8x784xbf16, #tpu.memory_space<vmem>>, vector<8x112xbf16>
    tpu.vector_store %arg16[%c0_96, %c224_97], %118 {strides = array<i32>} : memref<8x784xbf16, #tpu.memory_space<vmem>>, vector<8x112xbf16>,
    %c0_98 = arith.constant 0 : index
    %c520 = arith.constant 520 : index
    %120 = vector.load %arg15[%c0_98, %c520] : memref<8x1352xbf16, #tpu.memory_space<vmem>>, vector<8x312xbf16>
    %c3_99 = arith.constant 3 : index
    %c0_100 = arith.constant 0 : index
    %c0_101 = arith.constant 0 : index
    %121 = vector.load %arg4[%c3_99, %c0_100, %c0_101] : memref<7x312x112xbf16, #tpu.memory_space<vmem>>, vector<1x312x112xbf16>
    %122 = vector.shape_cast %121 : vector<1x312x112xbf16> to vector<312x112xbf16>
    %cst_102 = arith.constant dense<0.000000e+00> : vector<8x112xf32>
    %123 = tpu.matmul %120, %122, %cst_102 {dimension_numbers = #tpu.dot_dimension_numbers<[1], [0], [0], [1], [0, 0, 1, 1], [], []>} : vector<8x312xbf16>, vector<312x112xbf16>, vector<8x112xf32> -> vector<8x112xf32>
    %c3_103 = arith.constant 3 : index
    %c0_104 = arith.constant 0 : index
    %c0_105 = arith.constant 0 : index
    %124 = vector.load %arg5[%c3_103, %c0_104, %c0_105] : memref<7x1x112xf32, #tpu.memory_space<vmem>>, vector<1x1x112xf32>
    %125 = vector.shape_cast %124 : vector<1x1x112xf32> to vector<1x112xf32>
    %126 = vector.broadcast %125 : vector<1x112xf32> to vector<8x112xf32>
    %127 = arith.addf %123, %126 : vector<8x112xf32>
    %cst_106 = arith.constant 0.000000e+00 : f32
    %128 = vector.broadcast %cst_106 : f32 to vector<8x112xf32>
    %129 = arith.maximumf %127, %128 : vector<8x112xf32>
    %130 = arith.truncf %129 : vector<8x112xf32> to vector<8x112xbf16>
    %c0_107 = arith.constant 0 : index
    %c336_108 = arith.constant 336 : index
    %131 = vector.load %arg16[%c0_107, %c336_108] : memref<8x784xbf16, #tpu.memory_space<vmem>>, vector<8x112xbf16>
    tpu.vector_store %arg16[%c0_107, %c336_108], %130 {strides = array<i32>} : memref<8x784xbf16, #tpu.memory_space<vmem>>, vector<8x112xbf16>,
    %c0_109 = arith.constant 0 : index
    %c728 = arith.constant 728 : index
    %132 = vector.load %arg15[%c0_109, %c728] : memref<8x1352xbf16, #tpu.memory_space<vmem>>, vector<8x312xbf16>
    %c4_110 = arith.constant 4 : index
    %c0_111 = arith.constant 0 : index
    %c0_112 = arith.constant 0 : index
    %133 = vector.load %arg4[%c4_110, %c0_111, %c0_112] : memref<7x312x112xbf16, #tpu.memory_space<vmem>>, vector<1x312x112xbf16>
    %134 = vector.shape_cast %133 : vector<1x312x112xbf16> to vector<312x112xbf16>
    %cst_113 = arith.constant dense<0.000000e+00> : vector<8x112xf32>
    %135 = tpu.matmul %132, %134, %cst_113 {dimension_numbers = #tpu.dot_dimension_numbers<[1], [0], [0], [1], [0, 0, 1, 1], [], []>} : vector<8x312xbf16>, vector<312x112xbf16>, vector<8x112xf32> -> vector<8x112xf32>
    %c4_114 = arith.constant 4 : index
    %c0_115 = arith.constant 0 : index
    %c0_116 = arith.constant 0 : index
    %136 = vector.load %arg5[%c4_114, %c0_115, %c0_116] : memref<7x1x112xf32, #tpu.memory_space<vmem>>, vector<1x1x112xf32>
    %137 = vector.shape_cast %136 : vector<1x1x112xf32> to vector<1x112xf32>
    %138 = vector.broadcast %137 : vector<1x112xf32> to vector<8x112xf32>
    %139 = arith.addf %135, %138 : vector<8x112xf32>
    %cst_117 = arith.constant 0.000000e+00 : f32
    %140 = vector.broadcast %cst_117 : f32 to vector<8x112xf32>
    %141 = arith.maximumf %139, %140 : vector<8x112xf32>
    %142 = arith.truncf %141 : vector<8x112xf32> to vector<8x112xbf16>
    %c0_118 = arith.constant 0 : index
    %c448_119 = arith.constant 448 : index
    %143 = vector.load %arg16[%c0_118, %c448_119] : memref<8x784xbf16, #tpu.memory_space<vmem>>, vector<8x112xbf16>
    tpu.vector_store %arg16[%c0_118, %c448_119], %142 {strides = array<i32>} : memref<8x784xbf16, #tpu.memory_space<vmem>>, vector<8x112xbf16>,
    %c0_120 = arith.constant 0 : index
    %c936 = arith.constant 936 : index
    %144 = vector.load %arg15[%c0_120, %c936] : memref<8x1352xbf16, #tpu.memory_space<vmem>>, vector<8x312xbf16>
    %c5_121 = arith.constant 5 : index
    %c0_122 = arith.constant 0 : index
    %c0_123 = arith.constant 0 : index
    %145 = vector.load %arg4[%c5_121, %c0_122, %c0_123] : memref<7x312x112xbf16, #tpu.memory_space<vmem>>, vector<1x312x112xbf16>
    %146 = vector.shape_cast %145 : vector<1x312x112xbf16> to vector<312x112xbf16>
    %cst_124 = arith.constant dense<0.000000e+00> : vector<8x112xf32>
    %147 = tpu.matmul %144, %146, %cst_124 {dimension_numbers = #tpu.dot_dimension_numbers<[1], [0], [0], [1], [0, 0, 1, 1], [], []>} : vector<8x312xbf16>, vector<312x112xbf16>, vector<8x112xf32> -> vector<8x112xf32>
    %c5_125 = arith.constant 5 : index
    %c0_126 = arith.constant 0 : index
    %c0_127 = arith.constant 0 : index
    %148 = vector.load %arg5[%c5_125, %c0_126, %c0_127] : memref<7x1x112xf32, #tpu.memory_space<vmem>>, vector<1x1x112xf32>
    %149 = vector.shape_cast %148 : vector<1x1x112xf32> to vector<1x112xf32>
    %150 = vector.broadcast %149 : vector<1x112xf32> to vector<8x112xf32>
    %151 = arith.addf %147, %150 : vector<8x112xf32>
    %cst_128 = arith.constant 0.000000e+00 : f32
    %152 = vector.broadcast %cst_128 : f32 to vector<8x112xf32>
    %153 = arith.maximumf %151, %152 : vector<8x112xf32>
    %154 = arith.truncf %153 : vector<8x112xf32> to vector<8x112xbf16>
    %c0_129 = arith.constant 0 : index
    %c560_130 = arith.constant 560 : index
    %155 = vector.load %arg16[%c0_129, %c560_130] : memref<8x784xbf16, #tpu.memory_space<vmem>>, vector<8x112xbf16>
    tpu.vector_store %arg16[%c0_129, %c560_130], %154 {strides = array<i32>} : memref<8x784xbf16, #tpu.memory_space<vmem>>, vector<8x112xbf16>,
    %c0_131 = arith.constant 0 : index
    %c1040_132 = arith.constant 1040 : index
    %156 = vector.load %arg15[%c0_131, %c1040_132] : memref<8x1352xbf16, #tpu.memory_space<vmem>>, vector<8x312xbf16>
    %c6_133 = arith.constant 6 : index
    %c0_134 = arith.constant 0 : index
    %c0_135 = arith.constant 0 : index
    %157 = vector.load %arg4[%c6_133, %c0_134, %c0_135] : memref<7x312x112xbf16, #tpu.memory_space<vmem>>, vector<1x312x112xbf16>
    %158 = vector.shape_cast %157 : vector<1x312x112xbf16> to vector<312x112xbf16>
    %cst_136 = arith.constant dense<0.000000e+00> : vector<8x112xf32>
    %159 = tpu.matmul %156, %158, %cst_136 {dimension_numbers = #tpu.dot_dimension_numbers<[1], [0], [0], [1], [0, 0, 1, 1], [], []>} : vector<8x312xbf16>, vector<312x112xbf16>, vector<8x112xf32> -> vector<8x112xf32>
    %c6_137 = arith.constant 6 : index
    %c0_138 = arith.constant 0 : index
    %c0_139 = arith.constant 0 : index
    %160 = vector.load %arg5[%c6_137, %c0_138, %c0_139] : memref<7x1x112xf32, #tpu.memory_space<vmem>>, vector<1x1x112xf32>
    %161 = vector.shape_cast %160 : vector<1x1x112xf32> to vector<1x112xf32>
    %162 = vector.broadcast %161 : vector<1x112xf32> to vector<8x112xf32>
    %163 = arith.addf %159, %162 : vector<8x112xf32>
    %cst_140 = arith.constant 0.000000e+00 : f32
    %164 = vector.broadcast %cst_140 : f32 to vector<8x112xf32>
    %165 = arith.maximumf %163, %164 : vector<8x112xf32>
    %166 = arith.truncf %165 : vector<8x112xf32> to vector<8x112xbf16>
    %c0_141 = arith.constant 0 : index
    %c672 = arith.constant 672 : index
    %167 = vector.load %arg16[%c0_141, %c672] : memref<8x784xbf16, #tpu.memory_space<vmem>>, vector<8x112xbf16>
    tpu.vector_store %arg16[%c0_141, %c672], %166 {strides = array<i32>} : memref<8x784xbf16, #tpu.memory_space<vmem>>, vector<8x112xbf16>,
    %c0_142 = arith.constant 0 : index
    %c0_143 = arith.constant 0 : index
    %168 = vector.load %arg16[%c0_142, %c0_143] : memref<8x784xbf16, #tpu.memory_space<vmem>>, vector<8x336xbf16>
    %c0_144 = arith.constant 0 : index
    %c0_145 = arith.constant 0 : index
    %c0_146 = arith.constant 0 : index
    %169 = vector.load %arg6[%c0_144, %c0_145, %c0_146] : memref<3x336x96xbf16, #tpu.memory_space<vmem>>, vector<1x336x96xbf16>
    %170 = vector.shape_cast %169 : vector<1x336x96xbf16> to vector<336x96xbf16>
    %cst_147 = arith.constant dense<0.000000e+00> : vector<8x96xf32>
    %171 = tpu.matmul %168, %170, %cst_147 {dimension_numbers = #tpu.dot_dimension_numbers<[1], [0], [0], [1], [0, 0, 1, 1], [], []>} : vector<8x336xbf16>, vector<336x96xbf16>, vector<8x96xf32> -> vector<8x96xf32>
    %c0_148 = arith.constant 0 : index
    %c0_149 = arith.constant 0 : index
    %c0_150 = arith.constant 0 : index
    %172 = vector.load %arg7[%c0_148, %c0_149, %c0_150] : memref<3x1x96xf32, #tpu.memory_space<vmem>>, vector<1x1x96xf32>
    %173 = vector.shape_cast %172 : vector<1x1x96xf32> to vector<1x96xf32>
    %174 = vector.broadcast %173 : vector<1x96xf32> to vector<8x96xf32>
    %175 = arith.addf %171, %174 : vector<8x96xf32>
    %cst_151 = arith.constant 0.000000e+00 : f32
    %176 = vector.broadcast %cst_151 : f32 to vector<8x96xf32>
    %177 = arith.maximumf %175, %176 : vector<8x96xf32>
    %178 = arith.truncf %177 : vector<8x96xf32> to vector<8x96xbf16>
    %c0_152 = arith.constant 0 : index
    %c0_153 = arith.constant 0 : index
    %179 = vector.load %arg17[%c0_152, %c0_153] : memref<8x288xbf16, #tpu.memory_space<vmem>>, vector<8x96xbf16>
    tpu.vector_store %arg17[%c0_152, %c0_153], %178 {strides = array<i32>} : memref<8x288xbf16, #tpu.memory_space<vmem>>, vector<8x96xbf16>,
    %c0_154 = arith.constant 0 : index
    %c224_155 = arith.constant 224 : index
    %180 = vector.load %arg16[%c0_154, %c224_155] : memref<8x784xbf16, #tpu.memory_space<vmem>>, vector<8x336xbf16>
    %c1_156 = arith.constant 1 : index
    %c0_157 = arith.constant 0 : index
    %c0_158 = arith.constant 0 : index
    %181 = vector.load %arg6[%c1_156, %c0_157, %c0_158] : memref<3x336x96xbf16, #tpu.memory_space<vmem>>, vector<1x336x96xbf16>
    %182 = vector.shape_cast %181 : vector<1x336x96xbf16> to vector<336x96xbf16>
    %cst_159 = arith.constant dense<0.000000e+00> : vector<8x96xf32>
    %183 = tpu.matmul %180, %182, %cst_159 {dimension_numbers = #tpu.dot_dimension_numbers<[1], [0], [0], [1], [0, 0, 1, 1], [], []>} : vector<8x336xbf16>, vector<336x96xbf16>, vector<8x96xf32> -> vector<8x96xf32>
    %c1_160 = arith.constant 1 : index
    %c0_161 = arith.constant 0 : index
    %c0_162 = arith.constant 0 : index
    %184 = vector.load %arg7[%c1_160, %c0_161, %c0_162] : memref<3x1x96xf32, #tpu.memory_space<vmem>>, vector<1x1x96xf32>
    %185 = vector.shape_cast %184 : vector<1x1x96xf32> to vector<1x96xf32>
    %186 = vector.broadcast %185 : vector<1x96xf32> to vector<8x96xf32>
    %187 = arith.addf %183, %186 : vector<8x96xf32>
    %cst_163 = arith.constant 0.000000e+00 : f32
    %188 = vector.broadcast %cst_163 : f32 to vector<8x96xf32>
    %189 = arith.maximumf %187, %188 : vector<8x96xf32>
    %190 = arith.truncf %189 : vector<8x96xf32> to vector<8x96xbf16>
    %c0_164 = arith.constant 0 : index
    %c96 = arith.constant 96 : index
    %191 = vector.load %arg17[%c0_164, %c96] : memref<8x288xbf16, #tpu.memory_space<vmem>>, vector<8x96xbf16>
    tpu.vector_store %arg17[%c0_164, %c96], %190 {strides = array<i32>} : memref<8x288xbf16, #tpu.memory_space<vmem>>, vector<8x96xbf16>,
    %c0_165 = arith.constant 0 : index
    %c448_166 = arith.constant 448 : index
    %192 = vector.load %arg16[%c0_165, %c448_166] : memref<8x784xbf16, #tpu.memory_space<vmem>>, vector<8x336xbf16>
    %c2_167 = arith.constant 2 : index
    %c0_168 = arith.constant 0 : index
    %c0_169 = arith.constant 0 : index
    %193 = vector.load %arg6[%c2_167, %c0_168, %c0_169] : memref<3x336x96xbf16, #tpu.memory_space<vmem>>, vector<1x336x96xbf16>
    %194 = vector.shape_cast %193 : vector<1x336x96xbf16> to vector<336x96xbf16>
    %cst_170 = arith.constant dense<0.000000e+00> : vector<8x96xf32>
    %195 = tpu.matmul %192, %194, %cst_170 {dimension_numbers = #tpu.dot_dimension_numbers<[1], [0], [0], [1], [0, 0, 1, 1], [], []>} : vector<8x336xbf16>, vector<336x96xbf16>, vector<8x96xf32> -> vector<8x96xf32>
    %c2_171 = arith.constant 2 : index
    %c0_172 = arith.constant 0 : index
    %c0_173 = arith.constant 0 : index
    %196 = vector.load %arg7[%c2_171, %c0_172, %c0_173] : memref<3x1x96xf32, #tpu.memory_space<vmem>>, vector<1x1x96xf32>
    %197 = vector.shape_cast %196 : vector<1x1x96xf32> to vector<1x96xf32>
    %198 = vector.broadcast %197 : vector<1x96xf32> to vector<8x96xf32>
    %199 = arith.addf %195, %198 : vector<8x96xf32>
    %cst_174 = arith.constant 0.000000e+00 : f32
    %200 = vector.broadcast %cst_174 : f32 to vector<8x96xf32>
    %201 = arith.maximumf %199, %200 : vector<8x96xf32>
    %202 = arith.truncf %201 : vector<8x96xf32> to vector<8x96xbf16>
    %c0_175 = arith.constant 0 : index
    %c192 = arith.constant 192 : index
    %203 = vector.load %arg17[%c0_175, %c192] : memref<8x288xbf16, #tpu.memory_space<vmem>>, vector<8x96xbf16>
    tpu.vector_store %arg17[%c0_175, %c192], %202 {strides = array<i32>} : memref<8x288xbf16, #tpu.memory_space<vmem>>, vector<8x96xbf16>,
    %c0_176 = arith.constant 0 : index
    %c0_177 = arith.constant 0 : index
    %204 = vector.load %arg17[%c0_176, %c0_177] : memref<8x288xbf16, #tpu.memory_space<vmem>>, vector<8x288xbf16>
    %c0_178 = arith.constant 0 : index
    %c0_179 = arith.constant 0 : index
    %205 = vector.load %arg8[%c0_178, %c0_179] : memref<288x128xbf16, #tpu.memory_space<vmem>>, vector<288x128xbf16>
    %cst_180 = arith.constant dense<0.000000e+00> : vector<8x128xf32>
    %206 = tpu.matmul %204, %205, %cst_180 {dimension_numbers = #tpu.dot_dimension_numbers<[1], [0], [0], [1], [0, 0, 1, 1], [], []>} : vector<8x288xbf16>, vector<288x128xbf16>, vector<8x128xf32> -> vector<8x128xf32>
    %c0_181 = arith.constant 0 : index
    %c0_182 = arith.constant 0 : index
    %207 = vector.load %arg9[%c0_181, %c0_182] : memref<1x128xf32, #tpu.memory_space<vmem>>, vector<1x128xf32>
    %208 = vector.broadcast %207 : vector<1x128xf32> to vector<8x128xf32>
    %209 = arith.addf %206, %208 : vector<8x128xf32>
    %cst_183 = arith.constant 0.000000e+00 : f32
    %210 = vector.broadcast %cst_183 : f32 to vector<8x128xf32>
    %211 = arith.cmpf oge, %209, %210 : vector<8x128xf32>
    %cst_184 = arith.constant 0.00999999977 : f32
    %212 = vector.broadcast %cst_184 : f32 to vector<8x128xf32>
    %213 = arith.mulf %212, %209 : vector<8x128xf32>
    %214 = arith.select %211, %209, %213 : vector<8x128xi1>, vector<8x128xf32>
    %215 = arith.truncf %214 : vector<8x128xf32> to vector<8x128xbf16>
    %c0_185 = arith.constant 0 : index
    %c0_186 = arith.constant 0 : index
    %216 = vector.load %arg10[%c0_185, %c0_186] : memref<128x256xbf16, #tpu.memory_space<vmem>>, vector<128x256xbf16>
    %cst_187 = arith.constant dense<0.000000e+00> : vector<8x256xf32>
    %217 = tpu.matmul %215, %216, %cst_187 {dimension_numbers = #tpu.dot_dimension_numbers<[1], [0], [0], [1], [0, 0, 1, 1], [], []>} : vector<8x128xbf16>, vector<128x256xbf16>, vector<8x256xf32> -> vector<8x256xf32>
    %c0_188 = arith.constant 0 : index
    %c0_189 = arith.constant 0 : index
    %218 = vector.load %arg11[%c0_188, %c0_189] : memref<1x256xf32, #tpu.memory_space<vmem>>, vector<1x256xf32>
    %219 = vector.broadcast %218 : vector<1x256xf32> to vector<8x256xf32>
    %220 = arith.addf %217, %219 : vector<8x256xf32>
    %cst_190 = arith.constant 0.000000e+00 : f32
    %221 = vector.broadcast %cst_190 : f32 to vector<8x256xf32>
    %222 = arith.maximumf %220, %221 : vector<8x256xf32>
    %223 = arith.truncf %222 : vector<8x256xf32> to vector<8x256xbf16>
    %c0_191 = arith.constant 0 : index
    %c0_192 = arith.constant 0 : index
    %224 = vector.load %arg12[%c0_191, %c0_192] : memref<256x128xbf16, #tpu.memory_space<vmem>>, vector<256x128xbf16>
    %cst_193 = arith.constant dense<0.000000e+00> : vector<8x128xf32>
    %225 = tpu.matmul %223, %224, %cst_193 {dimension_numbers = #tpu.dot_dimension_numbers<[1], [0], [0], [1], [0, 0, 1, 1], [], []>} : vector<8x256xbf16>, vector<256x128xbf16>, vector<8x128xf32> -> vector<8x128xf32>
    %c0_194 = arith.constant 0 : index
    %c0_195 = arith.constant 0 : index
    %226 = vector.load %arg13[%c0_194, %c0_195] : memref<1x128xf32, #tpu.memory_space<vmem>>, vector<1x128xf32>
    %227 = vector.broadcast %226 : vector<1x128xf32> to vector<8x128xf32>
    %228 = arith.addf %225, %227 : vector<8x128xf32>
    %229 = math.tanh %228 : vector<8x128xf32>
    %230 = arith.truncf %229 : vector<8x128xf32> to vector<8x128xbf16>
    %c0_196 = arith.constant 0 : index
    %c0_197 = arith.constant 0 : index
    %231 = vector.load %arg14[%c0_196, %c0_197] : memref<8x128xbf16, #tpu.memory_space<vmem>>, vector<8x128xbf16>
    tpu.vector_store %arg14[%c0_196, %c0_197], %230 {strides = array<i32>} : memref<8x128xbf16, #tpu.memory_space<vmem>>, vector<8x128xbf16>,
    return
  }
  func.func @transform_0(%arg0: i32) -> (i32, i32) {
    %c0_i32 = arith.constant 0 : i32
    %c0_i32_0 = arith.constant 0 : i32
    return %arg0, %c0_i32 : i32, i32
  }
  func.func @transform_1(%arg0: i32) -> (i32, i32, i32) {
    %c0_i32 = arith.constant 0 : i32
    %c0_i32_0 = arith.constant 0 : i32
    %c0_i32_1 = arith.constant 0 : i32
    %c0_i32_2 = arith.constant 0 : i32
    return %c0_i32, %c0_i32_0, %c0_i32_1 : i32, i32, i32
  }
  func.func @transform_2(%arg0: i32) -> (i32, i32, i32) {
    %c0_i32 = arith.constant 0 : i32
    %c0_i32_0 = arith.constant 0 : i32
    %c0_i32_1 = arith.constant 0 : i32
    %c0_i32_2 = arith.constant 0 : i32
    return %c0_i32, %c0_i32_0, %c0_i32_1 : i32, i32, i32
  }
  func.func @transform_3(%arg0: i32) -> (i32, i32, i32) {
    %c0_i32 = arith.constant 0 : i32
    %c0_i32_0 = arith.constant 0 : i32
    %c0_i32_1 = arith.constant 0 : i32
    %c0_i32_2 = arith.constant 0 : i32
    return %c0_i32, %c0_i32_0, %c0_i32_1 : i32, i32, i32
  }
  func.func @transform_4(%arg0: i32) -> (i32, i32, i32) {
    %c0_i32 = arith.constant 0 : i32
    %c0_i32_0 = arith.constant 0 : i32
    %c0_i32_1 = arith.constant 0 : i32
    %c0_i32_2 = arith.constant 0 : i32
    return %c0_i32, %c0_i32_0, %c0_i32_1 : i32, i32, i32
  }
  func.func @transform_5(%arg0: i32) -> (i32, i32, i32) {
    %c0_i32 = arith.constant 0 : i32
    %c0_i32_0 = arith.constant 0 : i32
    %c0_i32_1 = arith.constant 0 : i32
    %c0_i32_2 = arith.constant 0 : i32
    return %c0_i32, %c0_i32_0, %c0_i32_1 : i32, i32, i32
  }
  func.func @transform_6(%arg0: i32) -> (i32, i32, i32) {
    %c0_i32 = arith.constant 0 : i32
    %c0_i32_0 = arith.constant 0 : i32
    %c0_i32_1 = arith.constant 0 : i32
    %c0_i32_2 = arith.constant 0 : i32
    return %c0_i32, %c0_i32_0, %c0_i32_1 : i32, i32, i32
  }
  func.func @transform_7(%arg0: i32) -> (i32, i32) {
    %c0_i32 = arith.constant 0 : i32
    %c0_i32_0 = arith.constant 0 : i32
    %c0_i32_1 = arith.constant 0 : i32
    return %c0_i32, %c0_i32_0 : i32, i32
  }
  func.func @transform_8(%arg0: i32) -> (i32, i32) {
    %c0_i32 = arith.constant 0 : i32
    %c0_i32_0 = arith.constant 0 : i32
    %c0_i32_1 = arith.constant 0 : i32
    return %c0_i32, %c0_i32_0 : i32, i32
  }
  func.func @transform_9(%arg0: i32) -> (i32, i32) {
    %c0_i32 = arith.constant 0 : i32
    %c0_i32_0 = arith.constant 0 : i32
    %c0_i32_1 = arith.constant 0 : i32
    return %c0_i32, %c0_i32_0 : i32, i32
  }
  func.func @transform_10(%arg0: i32) -> (i32, i32) {
    %c0_i32 = arith.constant 0 : i32
    %c0_i32_0 = arith.constant 0 : i32
    %c0_i32_1 = arith.constant 0 : i32
    return %c0_i32, %c0_i32_0 : i32, i32
  }
  func.func @transform_11(%arg0: i32) -> (i32, i32) {
    %c0_i32 = arith.constant 0 : i32
    %c0_i32_0 = arith.constant 0 : i32
    %c0_i32_1 = arith.constant 0 : i32
    return %c0_i32, %c0_i32_0 : i32, i32
  }
  func.func @transform_12(%arg0: i32) -> (i32, i32) {
    %c0_i32 = arith.constant 0 : i32
    %c0_i32_0 = arith.constant 0 : i32
    %c0_i32_1 = arith.constant 0 : i32
    return %c0_i32, %c0_i32_0 : i32, i32
  }
  func.func @transform_13(%arg0: i32) -> (i32, i32) {
    %c0_i32 = arith.constant 0 : i32
    %c0_i32_0 = arith.constant 0 : i32
    return %arg0, %c0_i32 : i32, i32
  }
}

module attributes {stable_mosaic.version = 11 : i64} {
  func.func @_encoder_kernel(%arg0: i32, %arg1: memref<8x784xbf16, #tpu.memory_space<vmem>>, %arg2: memref<7x140x208xbf16, #tpu.memory_space<vmem>>, %arg3: memref<7x1x208xf32, #tpu.memory_space<vmem>>, %arg4: memref<7x312x112xbf16, #tpu.memory_space<vmem>>, %arg5: memref<7x1x112xf32, #tpu.memory_space<vmem>>, %arg6: memref<3x336x96xbf16, #tpu.memory_space<vmem>>, %arg7: memref<3x1x96xf32, #tpu.memory_space<vmem>>, %arg8: memref<288x128xbf16, #tpu.memory_space<vmem>>, %arg9: memref<1x128xf32, #tpu.memory_space<vmem>>, %arg10: memref<128x256xbf16, #tpu.memory_space<vmem>>, %arg11: memref<1x256xf32, #tpu.memory_space<vmem>>, %arg12: memref<256x128xbf16, #tpu.memory_space<vmem>>, %arg13: memref<1x128xf32, #tpu.memory_space<vmem>>, %arg14: memref<8x128xbf16, #tpu.memory_space<vmem>>, %arg15: memref<8x1352xbf16, #tpu.memory_space<vmem>>, %arg16: memref<8x784xbf16, #tpu.memory_space<vmem>>, %arg17: memref<8x288xbf16, #tpu.memory_space<vmem>>) attributes {dimension_semantics = [#tpu.dimension_semantics<parallel>], iteration_bounds = array<i64: 1>, scalar_prefetch = 0 : i64, scratch_operands = 3 : i64, tpu.core_type = #tpu.core_type<tc>, window_params = [{transform_indices = @transform_0, window_bounds = array<i64: 8, 784>}, {pipeline_mode = #tpu.pipeline_mode<synchronous>, transform_indices = @transform_1, window_bounds = array<i64: 7, 140, 208>}, {pipeline_mode = #tpu.pipeline_mode<synchronous>, transform_indices = @transform_2, window_bounds = array<i64: 7, 1, 208>}, {pipeline_mode = #tpu.pipeline_mode<synchronous>, transform_indices = @transform_3, window_bounds = array<i64: 7, 312, 112>}, {pipeline_mode = #tpu.pipeline_mode<synchronous>, transform_indices = @transform_4, window_bounds = array<i64: 7, 1, 112>}, {pipeline_mode = #tpu.pipeline_mode<synchronous>, transform_indices = @transform_5, window_bounds = array<i64: 3, 336, 96>}, {pipeline_mode = #tpu.pipeline_mode<synchronous>, transform_indices = @transform_6, window_bounds = array<i64: 3, 1, 96>}, {pipeline_mode = #tpu.pipeline_mode<synchronous>, transform_indices = @transform_7, window_bounds = array<i64: 288, 128>}, {pipeline_mode = #tpu.pipeline_mode<synchronous>, transform_indices = @transform_8, window_bounds = array<i64: 1, 128>}, {pipeline_mode = #tpu.pipeline_mode<synchronous>, transform_indices = @transform_9, window_bounds = array<i64: 128, 256>}, {pipeline_mode = #tpu.pipeline_mode<synchronous>, transform_indices = @transform_10, window_bounds = array<i64: 1, 256>}, {pipeline_mode = #tpu.pipeline_mode<synchronous>, transform_indices = @transform_11, window_bounds = array<i64: 256, 128>}, {pipeline_mode = #tpu.pipeline_mode<synchronous>, transform_indices = @transform_12, window_bounds = array<i64: 1, 128>}, {transform_indices = @transform_13, window_bounds = array<i64: 8, 128>}]} {
    %c0 = arith.constant 0 : index
    %c0_0 = arith.constant 0 : index
    %0 = vector.load %arg1[%c0, %c0_0] : memref<8x784xbf16, #tpu.memory_space<vmem>>, vector<8x140xbf16>
    %c0_1 = arith.constant 0 : index
    %c0_2 = arith.constant 0 : index
    %c0_3 = arith.constant 0 : index
    %1 = vector.load %arg2[%c0_1, %c0_2, %c0_3] : memref<7x140x208xbf16, #tpu.memory_space<vmem>>, vector<1x140x208xbf16>
    %2 = vector.shape_cast %1 : vector<1x140x208xbf16> to vector<140x208xbf16>
    %cst = arith.constant dense<0.000000e+00> : vector<8x208xf32>
    %3 = tpu.matmul %0, %2, %cst {dimension_numbers = #tpu.dot_dimension_numbers<[1], [0], [0], [1], [0, 0, 1, 1], [], []>} : vector<8x140xbf16>, vector<140x208xbf16>, vector<8x208xf32> -> vector<8x208xf32>
    %c0_4 = arith.constant 0 : index
    %c0_5 = arith.constant 0 : index
    %c0_6 = arith.constant 0 : index
    %4 = vector.load %arg3[%c0_4, %c0_5, %c0_6] : memref<7x1x208xf32, #tpu.memory_space<vmem>>, vector<1x1x208xf32>
    %5 = vector.shape_cast %4 : vector<1x1x208xf32> to vector<1x208xf32>
    %6 = vector.broadcast %5 : vector<1x208xf32> to vector<8x208xf32>
    %7 = arith.addf %3, %6 : vector<8x208xf32>
    %cst_7 = arith.constant 0.000000e+00 : f32
    %8 = vector.broadcast %cst_7 : f32 to vector<8x208xf32>
    %9 = arith.maximumf %7, %8 : vector<8x208xf32>
    %10 = arith.truncf %9 : vector<8x208xf32> to vector<8x208xbf16>
    %c0_8 = arith.constant 0 : index
    %c0_9 = arith.constant 0 : index
    %11 = vector.load %arg15[%c0_8, %c0_9] : memref<8x1352xbf16, #tpu.memory_space<vmem>>, vector<8x208xbf16>
    tpu.vector_store %arg15[%c0_8, %c0_9], %10 {strides = array<i32>} : memref<8x1352xbf16, #tpu.memory_space<vmem>>, vector<8x208xbf16>,
    %c0_10 = arith.constant 0 : index
    %c112 = arith.constant 112 : index
    %12 = vector.load %arg1[%c0_10, %c112] : memref<8x784xbf16, #tpu.memory_space<vmem>>, vector<8x140xbf16>
    %c1 = arith.constant 1 : index
    %c0_11 = arith.constant 0 : index
    %c0_12 = arith.constant 0 : index
    %13 = vector.load %arg2[%c1, %c0_11, %c0_12] : memref<7x140x208xbf16, #tpu.memory_space<vmem>>, vector<1x140x208xbf16>
    %14 = vector.shape_cast %13 : vector<1x140x208xbf16> to vector<140x208xbf16>
    %cst_13 = arith.constant dense<0.000000e+00> : vector<8x208xf32>
    %15 = tpu.matmul %12, %14, %cst_13 {dimension_numbers = #tpu.dot_dimension_numbers<[1], [0], [0], [1], [0, 0, 1, 1], [], []>} : vector<8x140xbf16>, vector<140x208xbf16>, vector<8x208xf32> -> vector<8x208xf32>
    %c1_14 = arith.constant 1 : index
    %c0_15 = arith.constant 0 : index
    %c0_16 = arith.constant 0 : index
    %16 = vector.load %arg3[%c1_14, %c0_15, %c0_16] : memref<7x1x208xf32, #tpu.memory_space<vmem>>, vector<1x1x208xf32>
    %17 = vector.shape_cast %16 : vector<1x1x208xf32> to vector<1x208xf32>
    %18 = vector.broadcast %17 : vector<1x208xf32> to vector<8x208xf32>
    %19 = arith.addf %15, %18 : vector<8x208xf32>
    %cst_17 = arith.constant 0.000000e+00 : f32
    %20 = vector.broadcast %cst_17 : f32 to vector<8x208xf32>
    %21 = arith.maximumf %19, %20 : vector<8x208xf32>
    %22 = arith.truncf %21 : vector<8x208xf32> to vector<8x208xbf16>
    %c0_18 = arith.constant 0 : index
    %c208 = arith.constant 208 : index
    %23 = vector.load %arg15[%c0_18, %c208] : memref<8x1352xbf16, #tpu.memory_space<vmem>>, vector<8x208xbf16>
    tpu.vector_store %arg15[%c0_18, %c208], %22 {strides = array<i32>} : memref<8x1352xbf16, #tpu.memory_space<vmem>>, vector<8x208xbf16>,
    %c0_19 = arith.constant 0 : index
    %c224 = arith.constant 224 : index
    %24 = vector.load %arg1[%c0_19, %c224] : memref<8x784xbf16, #tpu.memory_space<vmem>>, vector<8x140xbf16>
    %c2 = arith.constant 2 : index
    %c0_20 = arith.constant 0 : index
    %c0_21 = arith.constant 0 : index
    %25 = vector.load %arg2[%c2, %c0_20, %c0_21] : memref<7x140x208xbf16, #tpu.memory_space<vmem>>, vector<1x140x208xbf16>
    %26 = vector.shape_cast %25 : vector<1x140x208xbf16> to vector<140x208xbf16>
    %cst_22 = arith.constant dense<0.000000e+00> : vector<8x208xf32>
    %27 = tpu.matmul %24, %26, %cst_22 {dimension_numbers = #tpu.dot_dimension_numbers<[1], [0], [0], [1], [0, 0, 1, 1], [], []>} : vector<8x140xbf16>, vector<140x208xbf16>, vector<8x208xf32> -> vector<8x208xf32>
    %c2_23 = arith.constant 2 : index
    %c0_24 = arith.constant 0 : index
    %c0_25 = arith.constant 0 : index
    %28 = vector.load %arg3[%c2_23, %c0_24, %c0_25] : memref<7x1x208xf32, #tpu.memory_space<vmem>>, vector<1x1x208xf32>
    %29 = vector.shape_cast %28 : vector<1x1x208xf32> to vector<1x208xf32>
    %30 = vector.broadcast %29 : vector<1x208xf32> to vector<8x208xf32>
    %31 = arith.addf %27, %30 : vector<8x208xf32>
    %cst_26 = arith.constant 0.000000e+00 : f32
    %32 = vector.broadcast %cst_26 : f32 to vector<8x208xf32>
    %33 = arith.maximumf %31, %32 : vector<8x208xf32>
    %34 = arith.truncf %33 : vector<8x208xf32> to vector<8x208xbf16>
    %c0_27 = arith.constant 0 : index
    %c416 = arith.constant 416 : index
    %35 = vector.load %arg15[%c0_27, %c416] : memref<8x1352xbf16, #tpu.memory_space<vmem>>, vector<8x208xbf16>
    tpu.vector_store %arg15[%c0_27, %c416], %34 {strides = array<i32>} : memref<8x1352xbf16, #tpu.memory_space<vmem>>, vector<8x208xbf16>,
    %c0_28 = arith.constant 0 : index
    %c336 = arith.constant 336 : index
    %36 = vector.load %arg1[%c0_28, %c336] : memref<8x784xbf16, #tpu.memory_space<vmem>>, vector<8x140xbf16>
    %c3 = arith.constant 3 : index
    %c0_29 = arith.constant 0 : index
    %c0_30 = arith.constant 0 : index
    %37 = vector.load %arg2[%c3, %c0_29, %c0_30] : memref<7x140x208xbf16, #tpu.memory_space<vmem>>, vector<1x140x208xbf16>
    %38 = vector.shape_cast %37 : vector<1x140x208xbf16> to vector<140x208xbf16>
    %cst_31 = arith.constant dense<0.000000e+00> : vector<8x208xf32>
    %39 = tpu.matmul %36, %38, %cst_31 {dimension_numbers = #tpu.dot_dimension_numbers<[1], [0], [0], [1], [0, 0, 1, 1], [], []>} : vector<8x140xbf16>, vector<140x208xbf16>, vector<8x208xf32> -> vector<8x208xf32>
    %c3_32 = arith.constant 3 : index
    %c0_33 = arith.constant 0 : index
    %c0_34 = arith.constant 0 : index
    %40 = vector.load %arg3[%c3_32, %c0_33, %c0_34] : memref<7x1x208xf32, #tpu.memory_space<vmem>>, vector<1x1x208xf32>
    %41 = vector.shape_cast %40 : vector<1x1x208xf32> to vector<1x208xf32>
    %42 = vector.broadcast %41 : vector<1x208xf32> to vector<8x208xf32>
    %43 = arith.addf %39, %42 : vector<8x208xf32>
    %cst_35 = arith.constant 0.000000e+00 : f32
    %44 = vector.broadcast %cst_35 : f32 to vector<8x208xf32>
    %45 = arith.maximumf %43, %44 : vector<8x208xf32>
    %46 = arith.truncf %45 : vector<8x208xf32> to vector<8x208xbf16>
    %c0_36 = arith.constant 0 : index
    %c624 = arith.constant 624 : index
    %47 = vector.load %arg15[%c0_36, %c624] : memref<8x1352xbf16, #tpu.memory_space<vmem>>, vector<8x208xbf16>
    tpu.vector_store %arg15[%c0_36, %c624], %46 {strides = array<i32>} : memref<8x1352xbf16, #tpu.memory_space<vmem>>, vector<8x208xbf16>,
    %c0_37 = arith.constant 0 : index
    %c448 = arith.constant 448 : index
    %48 = vector.load %arg1[%c0_37, %c448] : memref<8x784xbf16, #tpu.memory_space<vmem>>, vector<8x140xbf16>
    %c4 = arith.constant 4 : index
    %c0_38 = arith.constant 0 : index
    %c0_39 = arith.constant 0 : index
    %49 = vector.load %arg2[%c4, %c0_38, %c0_39] : memref<7x140x208xbf16, #tpu.memory_space<vmem>>, vector<1x140x208xbf16>
    %50 = vector.shape_cast %49 : vector<1x140x208xbf16> to vector<140x208xbf16>
    %cst_40 = arith.constant dense<0.000000e+00> : vector<8x208xf32>
    %51 = tpu.matmul %48, %50, %cst_40 {dimension_numbers = #tpu.dot_dimension_numbers<[1], [0], [0], [1], [0, 0, 1, 1], [], []>} : vector<8x140xbf16>, vector<140x208xbf16>, vector<8x208xf32> -> vector<8x208xf32>
    %c4_41 = arith.constant 4 : index
    %c0_42 = arith.constant 0 : index
    %c0_43 = arith.constant 0 : index
    %52 = vector.load %arg3[%c4_41, %c0_42, %c0_43] : memref<7x1x208xf32, #tpu.memory_space<vmem>>, vector<1x1x208xf32>
    %53 = vector.shape_cast %52 : vector<1x1x208xf32> to vector<1x208xf32>
    %54 = vector.broadcast %53 : vector<1x208xf32> to vector<8x208xf32>
    %55 = arith.addf %51, %54 : vector<8x208xf32>
    %cst_44 = arith.constant 0.000000e+00 : f32
    %56 = vector.broadcast %cst_44 : f32 to vector<8x208xf32>
    %57 = arith.maximumf %55, %56 : vector<8x208xf32>
    %58 = arith.truncf %57 : vector<8x208xf32> to vector<8x208xbf16>
    %c0_45 = arith.constant 0 : index
    %c832 = arith.constant 832 : index
    %59 = vector.load %arg15[%c0_45, %c832] : memref<8x1352xbf16, #tpu.memory_space<vmem>>, vector<8x208xbf16>
    tpu.vector_store %arg15[%c0_45, %c832], %58 {strides = array<i32>} : memref<8x1352xbf16, #tpu.memory_space<vmem>>, vector<8x208xbf16>,
    %c0_46 = arith.constant 0 : index
    %c560 = arith.constant 560 : index
    %60 = vector.load %arg1[%c0_46, %c560] : memref<8x784xbf16, #tpu.memory_space<vmem>>, vector<8x140xbf16>
    %c5 = arith.constant 5 : index
    %c0_47 = arith.constant 0 : index
    %c0_48 = arith.constant 0 : index
    %61 = vector.load %arg2[%c5, %c0_47, %c0_48] : memref<7x140x208xbf16, #tpu.memory_space<vmem>>, vector<1x140x208xbf16>
    %62 = vector.shape_cast %61 : vector<1x140x208xbf16> to vector<140x208xbf16>
    %cst_49 = arith.constant dense<0.000000e+00> : vector<8x208xf32>
    %63 = tpu.matmul %60, %62, %cst_49 {dimension_numbers = #tpu.dot_dimension_numbers<[1], [0], [0], [1], [0, 0, 1, 1], [], []>} : vector<8x140xbf16>, vector<140x208xbf16>, vector<8x208xf32> -> vector<8x208xf32>
    %c5_50 = arith.constant 5 : index
    %c0_51 = arith.constant 0 : index
    %c0_52 = arith.constant 0 : index
    %64 = vector.load %arg3[%c5_50, %c0_51, %c0_52] : memref<7x1x208xf32, #tpu.memory_space<vmem>>, vector<1x1x208xf32>
    %65 = vector.shape_cast %64 : vector<1x1x208xf32> to vector<1x208xf32>
    %66 = vector.broadcast %65 : vector<1x208xf32> to vector<8x208xf32>
    %67 = arith.addf %63, %66 : vector<8x208xf32>
    %cst_53 = arith.constant 0.000000e+00 : f32
    %68 = vector.broadcast %cst_53 : f32 to vector<8x208xf32>
    %69 = arith.maximumf %67, %68 : vector<8x208xf32>
    %70 = arith.truncf %69 : vector<8x208xf32> to vector<8x208xbf16>
    %c0_54 = arith.constant 0 : index
    %c1040 = arith.constant 1040 : index
    %71 = vector.load %arg15[%c0_54, %c1040] : memref<8x1352xbf16, #tpu.memory_space<vmem>>, vector<8x208xbf16>
    tpu.vector_store %arg15[%c0_54, %c1040], %70 {strides = array<i32>} : memref<8x1352xbf16, #tpu.memory_space<vmem>>, vector<8x208xbf16>,
    %c0_55 = arith.constant 0 : index
    %c616 = arith.constant 616 : index
    %72 = vector.load %arg1[%c0_55, %c616] : memref<8x784xbf16, #tpu.memory_space<vmem>>, vector<8x140xbf16>
    %c6 = arith.constant 6 : index
    %c0_56 = arith.constant 0 : index
    %c0_57 = arith.constant 0 : index
    %73 = vector.load %arg2[%c6, %c0_56, %c0_57] : memref<7x140x208xbf16, #tpu.memory_space<vmem>>, vector<1x140x208xbf16>
    %74 = vector.shape_cast %73 : vector<1x140x208xbf16> to vector<140x208xbf16>
    %cst_58 = arith.constant dense<0.000000e+00> : vector<8x208xf32>
    %75 = tpu.matmul %72, %74, %cst_58 {dimension_numbers = #tpu.dot_dimension_numbers<[1], [0], [0], [1], [0, 0, 1, 1], [], []>} : vector<8x140xbf16>, vector<140x208xbf16>, vector<8x208xf32> -> vector<8x208xf32>
    %c6_59 = arith.constant 6 : index
    %c0_60 = arith.constant 0 : index
    %c0_61 = arith.constant 0 : index
    %76 = vector.load %arg3[%c6_59, %c0_60, %c0_61] : memref<7x1x208xf32, #tpu.memory_space<vmem>>, vector<1x1x208xf32>
    %77 = vector.shape_cast %76 : vector<1x1x208xf32> to vector<1x208xf32>
    %78 = vector.broadcast %77 : vector<1x208xf32> to vector<8x208xf32>
    %79 = arith.addf %75, %78 : vector<8x208xf32>
    %cst_62 = arith.constant 0.000000e+00 : f32
    %80 = vector.broadcast %cst_62 : f32 to vector<8x208xf32>
    %81 = arith.maximumf %79, %80 : vector<8x208xf32>
    %82 = arith.truncf %81 : vector<8x208xf32> to vector<8x208xbf16>
    %c0_63 = arith.constant 0 : index
    %c1144 = arith.constant 1144 : index
    %83 = vector.load %arg15[%c0_63, %c1144] : memref<8x1352xbf16, #tpu.memory_space<vmem>>, vector<8x208xbf16>
    tpu.vector_store %arg15[%c0_63, %c1144], %82 {strides = array<i32>} : memref<8x1352xbf16, #tpu.memory_space<vmem>>, vector<8x208xbf16>,
    %c0_64 = arith.constant 0 : index
    %c0_65 = arith.constant 0 : index
    %84 = vector.load %arg15[%c0_64, %c0_65] : memref<8x1352xbf16, #tpu.memory_space<vmem>>, vector<8x312xbf16>
    %c0_66 = arith.constant 0 : index
    %c0_67 = arith.constant 0 : index
    %c0_68 = arith.constant 0 : index
    %85 = vector.load %arg4[%c0_66, %c0_67, %c0_68] : memref<7x312x112xbf16, #tpu.memory_space<vmem>>, vector<1x312x112xbf16>
    %86 = vector.shape_cast %85 : vector<1x312x112xbf16> to vector<312x112xbf16>
    %cst_69 = arith.constant dense<0.000000e+00> : vector<8x112xf32>
    %87 = tpu.matmul %84, %86, %cst_69 {dimension_numbers = #tpu.dot_dimension_numbers<[1], [0], [0], [1], [0, 0, 1, 1], [], []>} : vector<8x312xbf16>, vector<312x112xbf16>, vector<8x112xf32> -> vector<8x112xf32>
    %c0_70 = arith.constant 0 : index
    %c0_71 = arith.constant 0 : index
    %c0_72 = arith.constant 0 : index
    %88 = vector.load %arg5[%c0_70, %c0_71, %c0_72] : memref<7x1x112xf32, #tpu.memory_space<vmem>>, vector<1x1x112xf32>
    %89 = vector.shape_cast %88 : vector<1x1x112xf32> to vector<1x112xf32>
    %90 = vector.broadcast %89 : vector<1x112xf32> to vector<8x112xf32>
    %91 = arith.addf %87, %90 : vector<8x112xf32>
    %cst_73 = arith.constant 0.000000e+00 : f32
    %92 = vector.broadcast %cst_73 : f32 to vector<8x112xf32>
    %93 = arith.maximumf %91, %92 : vector<8x112xf32>
    %94 = arith.truncf %93 : vector<8x112xf32> to vector<8x112xbf16>
    %c0_74 = arith.constant 0 : index
    %c0_75 = arith.constant 0 : index
    %95 = vector.load %arg16[%c0_74, %c0_75] : memref<8x784xbf16, #tpu.memory_space<vmem>>, vector<8x112xbf16>
    tpu.vector_store %arg16[%c0_74, %c0_75], %94 {strides = array<i32>} : memref<8x784xbf16, #tpu.memory_space<vmem>>, vector<8x112xbf16>,
    %c0_76 = arith.constant 0 : index
    %c104 = arith.constant 104 : index
    %96 = vector.load %arg15[%c0_76, %c104] : memref<8x1352xbf16, #tpu.memory_space<vmem>>, vector<8x312xbf16>
    %c1_77 = arith.constant 1 : index
    %c0_78 = arith.constant 0 : index
    %c0_79 = arith.constant 0 : index
    %97 = vector.load %arg4[%c1_77, %c0_78, %c0_79] : memref<7x312x112xbf16, #tpu.memory_space<vmem>>, vector<1x312x112xbf16>
    %98 = vector.shape_cast %97 : vector<1x312x112xbf16> to vector<312x112xbf16>
    %cst_80 = arith.constant dense<0.000000e+00> : vector<8x112xf32>
    %99 = tpu.matmul %96, %98, %cst_80 {dimension_numbers = #tpu.dot_dimension_numbers<[1], [0], [0], [1], [0, 0, 1, 1], [], []>} : vector<8x312xbf16>, vector<312x112xbf16>, vector<8x112xf32> -> vector<8x112xf32>
    %c1_81 = arith.constant 1 : index
    %c0_82 = arith.constant 0 : index
    %c0_83 = arith.constant 0 : index
    %100 = vector.load %arg5[%c1_81, %c0_82, %c0_83] : memref<7x1x112xf32, #tpu.memory_space<vmem>>, vector<1x1x112xf32>
    %101 = vector.shape_cast %100 : vector<1x1x112xf32> to vector<1x112xf32>
    %102 = vector.broadcast %101 : vector<1x112xf32> to vector<8x112xf32>
    %103 = arith.addf %99, %102 : vector<8x112xf32>
    %cst_84 = arith.constant 0.000000e+00 : f32
    %104 = vector.broadcast %cst_84 : f32 to vector<8x112xf32>
    %105 = arith.maximumf %103, %104 : vector<8x112xf32>
    %106 = arith.truncf %105 : vector<8x112xf32> to vector<8x112xbf16>
    %c0_85 = arith.constant 0 : index
    %c112_86 = arith.constant 112 : index
    %107 = vector.load %arg16[%c0_85, %c112_86] : memref<8x784xbf16, #tpu.memory_space<vmem>>, vector<8x112xbf16>
    tpu.vector_store %arg16[%c0_85, %c112_86], %106 {strides = array<i32>} : memref<8x784xbf16, #tpu.memory_space<vmem>>, vector<8x112xbf16>,
    %c0_87 = arith.constant 0 : index
    %c312 = arith.constant 312 : index
    %108 = vector.load %arg15[%c0_87, %c312] : memref<8x1352xbf16, #tpu.memory_space<vmem>>, vector<8x312xbf16>
    %c2_88 = arith.constant 2 : index
    %c0_89 = arith.constant 0 : index
    %c0_90 = arith.constant 0 : index
    %109 = vector.load %arg4[%c2_88, %c0_89, %c0_90] : memref<7x312x112xbf16, #tpu.memory_space<vmem>>, vector<1x312x112xbf16>
    %110 = vector.shape_cast %109 : vector<1x312x112xbf16> to vector<312x112xbf16>
    %cst_91 = arith.constant dense<0.000000e+00> : vector<8x112xf32>
    %111 = tpu.matmul %108, %110, %cst_91 {dimension_numbers = #tpu.dot_dimension_numbers<[1], [0], [0], [1], [0, 0, 1, 1], [], []>} : vector<8x312xbf16>, vector<312x112xbf16>, vector<8x112xf32> -> vector<8x112xf32>
    %c2_92 = arith.constant 2 : index
    %c0_93 = arith.constant 0 : index
    %c0_94 = arith.constant 0 : index
    %112 = vector.load %arg5[%c2_92, %c0_93, %c0_94] : memref<7x1x112xf32, #tpu.memory_space<vmem>>, vector<1x1x112xf32>
    %113 = vector.shape_cast %112 : vector<1x1x112xf32> to vector<1x112xf32>
    %114 = vector.broadcast %113 : vector<1x112xf32> to vector<8x112xf32>
    %115 = arith.addf %111, %114 : vector<8x112xf32>
    %cst_95 = arith.constant 0.000000e+00 : f32
    %116 = vector.broadcast %cst_95 : f32 to vector<8x112xf32>
    %117 = arith.maximumf %115, %116 : vector<8x112xf32>
    %118 = arith.truncf %117 : vector<8x112xf32> to vector<8x112xbf16>
    %c0_96 = arith.constant 0 : index
    %c224_97 = arith.constant 224 : index
    %119 = vector.load %arg16[%c0_96, %c224_97] : memref<8x784xbf16, #tpu.memory_space<vmem>>, vector<8x112xbf16>
    tpu.vector_store %arg16[%c0_96, %c224_97], %118 {strides = array<i32>} : memref<8x784xbf16, #tpu.memory_space<vmem>>, vector<8x112xbf16>,
    %c0_98 = arith.constant 0 : index
    %c520 = arith.constant 520 : index
    %120 = vector.load %arg15[%c0_98, %c520] : memref<8x1352xbf16, #tpu.memory_space<vmem>>, vector<8x312xbf16>
    %c3_99 = arith.constant 3 : index
    %c0_100 = arith.constant 0 : index
    %c0_101 = arith.constant 0 : index
    %121 = vector.load %arg4[%c3_99, %c0_100, %c0_101] : memref<7x312x112xbf16, #tpu.memory_space<vmem>>, vector<1x312x112xbf16>
    %122 = vector.shape_cast %121 : vector<1x312x112xbf16> to vector<312x112xbf16>
    %cst_102 = arith.constant dense<0.000000e+00> : vector<8x112xf32>
    %123 = tpu.matmul %120, %122, %cst_102 {dimension_numbers = #tpu.dot_dimension_numbers<[1], [0], [0], [1], [0, 0, 1, 1], [], []>} : vector<8x312xbf16>, vector<312x112xbf16>, vector<8x112xf32> -> vector<8x112xf32>
    %c3_103 = arith.constant 3 : index
    %c0_104 = arith.constant 0 : index
    %c0_105 = arith.constant 0 : index
    %124 = vector.load %arg5[%c3_103, %c0_104, %c0_105] : memref<7x1x112xf32, #tpu.memory_space<vmem>>, vector<1x1x112xf32>
    %125 = vector.shape_cast %124 : vector<1x1x112xf32> to vector<1x112xf32>
    %126 = vector.broadcast %125 : vector<1x112xf32> to vector<8x112xf32>
    %127 = arith.addf %123, %126 : vector<8x112xf32>
    %cst_106 = arith.constant 0.000000e+00 : f32
    %128 = vector.broadcast %cst_106 : f32 to vector<8x112xf32>
    %129 = arith.maximumf %127, %128 : vector<8x112xf32>
    %130 = arith.truncf %129 : vector<8x112xf32> to vector<8x112xbf16>
    %c0_107 = arith.constant 0 : index
    %c336_108 = arith.constant 336 : index
    %131 = vector.load %arg16[%c0_107, %c336_108] : memref<8x784xbf16, #tpu.memory_space<vmem>>, vector<8x112xbf16>
    tpu.vector_store %arg16[%c0_107, %c336_108], %130 {strides = array<i32>} : memref<8x784xbf16, #tpu.memory_space<vmem>>, vector<8x112xbf16>,
    %c0_109 = arith.constant 0 : index
    %c728 = arith.constant 728 : index
    %132 = vector.load %arg15[%c0_109, %c728] : memref<8x1352xbf16, #tpu.memory_space<vmem>>, vector<8x312xbf16>
    %c4_110 = arith.constant 4 : index
    %c0_111 = arith.constant 0 : index
    %c0_112 = arith.constant 0 : index
    %133 = vector.load %arg4[%c4_110, %c0_111, %c0_112] : memref<7x312x112xbf16, #tpu.memory_space<vmem>>, vector<1x312x112xbf16>
    %134 = vector.shape_cast %133 : vector<1x312x112xbf16> to vector<312x112xbf16>
    %cst_113 = arith.constant dense<0.000000e+00> : vector<8x112xf32>
    %135 = tpu.matmul %132, %134, %cst_113 {dimension_numbers = #tpu.dot_dimension_numbers<[1], [0], [0], [1], [0, 0, 1, 1], [], []>} : vector<8x312xbf16>, vector<312x112xbf16>, vector<8x112xf32> -> vector<8x112xf32>
    %c4_114 = arith.constant 4 : index
    %c0_115 = arith.constant 0 : index
    %c0_116 = arith.constant 0 : index
    %136 = vector.load %arg5[%c4_114, %c0_115, %c0_116] : memref<7x1x112xf32, #tpu.memory_space<vmem>>, vector<1x1x112xf32>
    %137 = vector.shape_cast %136 : vector<1x1x112xf32> to vector<1x112xf32>
    %138 = vector.broadcast %137 : vector<1x112xf32> to vector<8x112xf32>
    %139 = arith.addf %135, %138 : vector<8x112xf32>
    %cst_117 = arith.constant 0.000000e+00 : f32
    %140 = vector.broadcast %cst_117 : f32 to vector<8x112xf32>
    %141 = arith.maximumf %139, %140 : vector<8x112xf32>
    %142 = arith.truncf %141 : vector<8x112xf32> to vector<8x112xbf16>
    %c0_118 = arith.constant 0 : index
    %c448_119 = arith.constant 448 : index
    %143 = vector.load %arg16[%c0_118, %c448_119] : memref<8x784xbf16, #tpu.memory_space<vmem>>, vector<8x112xbf16>
    tpu.vector_store %arg16[%c0_118, %c448_119], %142 {strides = array<i32>} : memref<8x784xbf16, #tpu.memory_space<vmem>>, vector<8x112xbf16>,
    %c0_120 = arith.constant 0 : index
    %c936 = arith.constant 936 : index
    %144 = vector.load %arg15[%c0_120, %c936] : memref<8x1352xbf16, #tpu.memory_space<vmem>>, vector<8x312xbf16>
    %c5_121 = arith.constant 5 : index
    %c0_122 = arith.constant 0 : index
    %c0_123 = arith.constant 0 : index
    %145 = vector.load %arg4[%c5_121, %c0_122, %c0_123] : memref<7x312x112xbf16, #tpu.memory_space<vmem>>, vector<1x312x112xbf16>
    %146 = vector.shape_cast %145 : vector<1x312x112xbf16> to vector<312x112xbf16>
    %cst_124 = arith.constant dense<0.000000e+00> : vector<8x112xf32>
    %147 = tpu.matmul %144, %146, %cst_124 {dimension_numbers = #tpu.dot_dimension_numbers<[1], [0], [0], [1], [0, 0, 1, 1], [], []>} : vector<8x312xbf16>, vector<312x112xbf16>, vector<8x112xf32> -> vector<8x112xf32>
    %c5_125 = arith.constant 5 : index
    %c0_126 = arith.constant 0 : index
    %c0_127 = arith.constant 0 : index
    %148 = vector.load %arg5[%c5_125, %c0_126, %c0_127] : memref<7x1x112xf32, #tpu.memory_space<vmem>>, vector<1x1x112xf32>
    %149 = vector.shape_cast %148 : vector<1x1x112xf32> to vector<1x112xf32>
    %150 = vector.broadcast %149 : vector<1x112xf32> to vector<8x112xf32>
    %151 = arith.addf %147, %150 : vector<8x112xf32>
    %cst_128 = arith.constant 0.000000e+00 : f32
    %152 = vector.broadcast %cst_128 : f32 to vector<8x112xf32>
    %153 = arith.maximumf %151, %152 : vector<8x112xf32>
    %154 = arith.truncf %153 : vector<8x112xf32> to vector<8x112xbf16>
    %c0_129 = arith.constant 0 : index
    %c560_130 = arith.constant 560 : index
    %155 = vector.load %arg16[%c0_129, %c560_130] : memref<8x784xbf16, #tpu.memory_space<vmem>>, vector<8x112xbf16>
    tpu.vector_store %arg16[%c0_129, %c560_130], %154 {strides = array<i32>} : memref<8x784xbf16, #tpu.memory_space<vmem>>, vector<8x112xbf16>,
    %c0_131 = arith.constant 0 : index
    %c1040_132 = arith.constant 1040 : index
    %156 = vector.load %arg15[%c0_131, %c1040_132] : memref<8x1352xbf16, #tpu.memory_space<vmem>>, vector<8x312xbf16>
    %c6_133 = arith.constant 6 : index
    %c0_134 = arith.constant 0 : index
    %c0_135 = arith.constant 0 : index
    %157 = vector.load %arg4[%c6_133, %c0_134, %c0_135] : memref<7x312x112xbf16, #tpu.memory_space<vmem>>, vector<1x312x112xbf16>
    %158 = vector.shape_cast %157 : vector<1x312x112xbf16> to vector<312x112xbf16>
    %cst_136 = arith.constant dense<0.000000e+00> : vector<8x112xf32>
    %159 = tpu.matmul %156, %158, %cst_136 {dimension_numbers = #tpu.dot_dimension_numbers<[1], [0], [0], [1], [0, 0, 1, 1], [], []>} : vector<8x312xbf16>, vector<312x112xbf16>, vector<8x112xf32> -> vector<8x112xf32>
    %c6_137 = arith.constant 6 : index
    %c0_138 = arith.constant 0 : index
    %c0_139 = arith.constant 0 : index
    %160 = vector.load %arg5[%c6_137, %c0_138, %c0_139] : memref<7x1x112xf32, #tpu.memory_space<vmem>>, vector<1x1x112xf32>
    %161 = vector.shape_cast %160 : vector<1x1x112xf32> to vector<1x112xf32>
    %162 = vector.broadcast %161 : vector<1x112xf32> to vector<8x112xf32>
    %163 = arith.addf %159, %162 : vector<8x112xf32>
    %cst_140 = arith.constant 0.000000e+00 : f32
    %164 = vector.broadcast %cst_140 : f32 to vector<8x112xf32>
    %165 = arith.maximumf %163, %164 : vector<8x112xf32>
    %166 = arith.truncf %165 : vector<8x112xf32> to vector<8x112xbf16>
    %c0_141 = arith.constant 0 : index
    %c672 = arith.constant 672 : index
    %167 = vector.load %arg16[%c0_141, %c672] : memref<8x784xbf16, #tpu.memory_space<vmem>>, vector<8x112xbf16>
    tpu.vector_store %arg16[%c0_141, %c672], %166 {strides = array<i32>} : memref<8x784xbf16, #tpu.memory_space<vmem>>, vector<8x112xbf16>,
    %c0_142 = arith.constant 0 : index
    %c0_143 = arith.constant 0 : index
    %168 = vector.load %arg16[%c0_142, %c0_143] : memref<8x784xbf16, #tpu.memory_space<vmem>>, vector<8x336xbf16>
    %c0_144 = arith.constant 0 : index
    %c0_145 = arith.constant 0 : index
    %c0_146 = arith.constant 0 : index
    %169 = vector.load %arg6[%c0_144, %c0_145, %c0_146] : memref<3x336x96xbf16, #tpu.memory_space<vmem>>, vector<1x336x96xbf16>
    %170 = vector.shape_cast %169 : vector<1x336x96xbf16> to vector<336x96xbf16>
    %cst_147 = arith.constant dense<0.000000e+00> : vector<8x96xf32>
    %171 = tpu.matmul %168, %170, %cst_147 {dimension_numbers = #tpu.dot_dimension_numbers<[1], [0], [0], [1], [0, 0, 1, 1], [], []>} : vector<8x336xbf16>, vector<336x96xbf16>, vector<8x96xf32> -> vector<8x96xf32>
    %c0_148 = arith.constant 0 : index
    %c0_149 = arith.constant 0 : index
    %c0_150 = arith.constant 0 : index
    %172 = vector.load %arg7[%c0_148, %c0_149, %c0_150] : memref<3x1x96xf32, #tpu.memory_space<vmem>>, vector<1x1x96xf32>
    %173 = vector.shape_cast %172 : vector<1x1x96xf32> to vector<1x96xf32>
    %174 = vector.broadcast %173 : vector<1x96xf32> to vector<8x96xf32>
    %175 = arith.addf %171, %174 : vector<8x96xf32>
    %cst_151 = arith.constant 0.000000e+00 : f32
    %176 = vector.broadcast %cst_151 : f32 to vector<8x96xf32>
    %177 = arith.maximumf %175, %176 : vector<8x96xf32>
    %178 = arith.truncf %177 : vector<8x96xf32> to vector<8x96xbf16>
    %c0_152 = arith.constant 0 : index
    %c0_153 = arith.constant 0 : index
    %179 = vector.load %arg17[%c0_152, %c0_153] : memref<8x288xbf16, #tpu.memory_space<vmem>>, vector<8x96xbf16>
    tpu.vector_store %arg17[%c0_152, %c0_153], %178 {strides = array<i32>} : memref<8x288xbf16, #tpu.memory_space<vmem>>, vector<8x96xbf16>,
    %c0_154 = arith.constant 0 : index
    %c224_155 = arith.constant 224 : index
    %180 = vector.load %arg16[%c0_154, %c224_155] : memref<8x784xbf16, #tpu.memory_space<vmem>>, vector<8x336xbf16>
    %c1_156 = arith.constant 1 : index
    %c0_157 = arith.constant 0 : index
    %c0_158 = arith.constant 0 : index
    %181 = vector.load %arg6[%c1_156, %c0_157, %c0_158] : memref<3x336x96xbf16, #tpu.memory_space<vmem>>, vector<1x336x96xbf16>
    %182 = vector.shape_cast %181 : vector<1x336x96xbf16> to vector<336x96xbf16>
    %cst_159 = arith.constant dense<0.000000e+00> : vector<8x96xf32>
    %183 = tpu.matmul %180, %182, %cst_159 {dimension_numbers = #tpu.dot_dimension_numbers<[1], [0], [0], [1], [0, 0, 1, 1], [], []>} : vector<8x336xbf16>, vector<336x96xbf16>, vector<8x96xf32> -> vector<8x96xf32>
    %c1_160 = arith.constant 1 : index
    %c0_161 = arith.constant 0 : index
    %c0_162 = arith.constant 0 : index
    %184 = vector.load %arg7[%c1_160, %c0_161, %c0_162] : memref<3x1x96xf32, #tpu.memory_space<vmem>>, vector<1x1x96xf32>
    %185 = vector.shape_cast %184 : vector<1x1x96xf32> to vector<1x96xf32>
    %186 = vector.broadcast %185 : vector<1x96xf32> to vector<8x96xf32>
    %187 = arith.addf %183, %186 : vector<8x96xf32>
    %cst_163 = arith.constant 0.000000e+00 : f32
    %188 = vector.broadcast %cst_163 : f32 to vector<8x96xf32>
    %189 = arith.maximumf %187, %188 : vector<8x96xf32>
    %190 = arith.truncf %189 : vector<8x96xf32> to vector<8x96xbf16>
    %c0_164 = arith.constant 0 : index
    %c96 = arith.constant 96 : index
    %191 = vector.load %arg17[%c0_164, %c96] : memref<8x288xbf16, #tpu.memory_space<vmem>>, vector<8x96xbf16>
    tpu.vector_store %arg17[%c0_164, %c96], %190 {strides = array<i32>} : memref<8x288xbf16, #tpu.memory_space<vmem>>, vector<8x96xbf16>,
    %c0_165 = arith.constant 0 : index
    %c448_166 = arith.constant 448 : index
    %192 = vector.load %arg16[%c0_165, %c448_166] : memref<8x784xbf16, #tpu.memory_space<vmem>>, vector<8x336xbf16>
    %c2_167 = arith.constant 2 : index
    %c0_168 = arith.constant 0 : index
    %c0_169 = arith.constant 0 : index
    %193 = vector.load %arg6[%c2_167, %c0_168, %c0_169] : memref<3x336x96xbf16, #tpu.memory_space<vmem>>, vector<1x336x96xbf16>
    %194 = vector.shape_cast %193 : vector<1x336x96xbf16> to vector<336x96xbf16>
    %cst_170 = arith.constant dense<0.000000e+00> : vector<8x96xf32>
    %195 = tpu.matmul %192, %194, %cst_170 {dimension_numbers = #tpu.dot_dimension_numbers<[1], [0], [0], [1], [0, 0, 1, 1], [], []>} : vector<8x336xbf16>, vector<336x96xbf16>, vector<8x96xf32> -> vector<8x96xf32>
    %c2_171 = arith.constant 2 : index
    %c0_172 = arith.constant 0 : index
    %c0_173 = arith.constant 0 : index
    %196 = vector.load %arg7[%c2_171, %c0_172, %c0_173] : memref<3x1x96xf32, #tpu.memory_space<vmem>>, vector<1x1x96xf32>
    %197 = vector.shape_cast %196 : vector<1x1x96xf32> to vector<1x96xf32>
    %198 = vector.broadcast %197 : vector<1x96xf32> to vector<8x96xf32>
    %199 = arith.addf %195, %198 : vector<8x96xf32>
    %cst_174 = arith.constant 0.000000e+00 : f32
    %200 = vector.broadcast %cst_174 : f32 to vector<8x96xf32>
    %201 = arith.maximumf %199, %200 : vector<8x96xf32>
    %202 = arith.truncf %201 : vector<8x96xf32> to vector<8x96xbf16>
    %c0_175 = arith.constant 0 : index
    %c192 = arith.constant 192 : index
    %203 = vector.load %arg17[%c0_175, %c192] : memref<8x288xbf16, #tpu.memory_space<vmem>>, vector<8x96xbf16>
    tpu.vector_store %arg17[%c0_175, %c192], %202 {strides = array<i32>} : memref<8x288xbf16, #tpu.memory_space<vmem>>, vector<8x96xbf16>,
    %c0_176 = arith.constant 0 : index
    %c0_177 = arith.constant 0 : index
    %204 = vector.load %arg17[%c0_176, %c0_177] : memref<8x288xbf16, #tpu.memory_space<vmem>>, vector<8x288xbf16>
    %c0_178 = arith.constant 0 : index
    %c0_179 = arith.constant 0 : index
    %205 = vector.load %arg8[%c0_178, %c0_179] : memref<288x128xbf16, #tpu.memory_space<vmem>>, vector<288x128xbf16>
    %cst_180 = arith.constant dense<0.000000e+00> : vector<8x128xf32>
    %206 = tpu.matmul %204, %205, %cst_180 {dimension_numbers = #tpu.dot_dimension_numbers<[1], [0], [0], [1], [0, 0, 1, 1], [], []>} : vector<8x288xbf16>, vector<288x128xbf16>, vector<8x128xf32> -> vector<8x128xf32>
    %c0_181 = arith.constant 0 : index
    %c0_182 = arith.constant 0 : index
    %207 = vector.load %arg9[%c0_181, %c0_182] : memref<1x128xf32, #tpu.memory_space<vmem>>, vector<1x128xf32>
    %208 = vector.broadcast %207 : vector<1x128xf32> to vector<8x128xf32>
    %209 = arith.addf %206, %208 : vector<8x128xf32>
    %cst_183 = arith.constant 0.000000e+00 : f32
    %210 = vector.broadcast %cst_183 : f32 to vector<8x128xf32>
    %211 = arith.cmpf oge, %209, %210 : vector<8x128xf32>
    %cst_184 = arith.constant 0.00999999977 : f32
    %212 = vector.broadcast %cst_184 : f32 to vector<8x128xf32>
    %213 = arith.mulf %212, %209 : vector<8x128xf32>
    %214 = arith.select %211, %209, %213 : vector<8x128xi1>, vector<8x128xf32>
    %215 = arith.truncf %214 : vector<8x128xf32> to vector<8x128xbf16>
    %c0_185 = arith.constant 0 : index
    %c0_186 = arith.constant 0 : index
    %216 = vector.load %arg10[%c0_185, %c0_186] : memref<128x256xbf16, #tpu.memory_space<vmem>>, vector<128x256xbf16>
    %cst_187 = arith.constant dense<0.000000e+00> : vector<8x256xf32>
    %217 = tpu.matmul %215, %216, %cst_187 {dimension_numbers = #tpu.dot_dimension_numbers<[1], [0], [0], [1], [0, 0, 1, 1], [], []>} : vector<8x128xbf16>, vector<128x256xbf16>, vector<8x256xf32> -> vector<8x256xf32>
    %c0_188 = arith.constant 0 : index
    %c0_189 = arith.constant 0 : index
    %218 = vector.load %arg11[%c0_188, %c0_189] : memref<1x256xf32, #tpu.memory_space<vmem>>, vector<1x256xf32>
    %219 = vector.broadcast %218 : vector<1x256xf32> to vector<8x256xf32>
    %220 = arith.addf %217, %219 : vector<8x256xf32>
    %cst_190 = arith.constant 0.000000e+00 : f32
    %221 = vector.broadcast %cst_190 : f32 to vector<8x256xf32>
    %222 = arith.maximumf %220, %221 : vector<8x256xf32>
    %223 = arith.truncf %222 : vector<8x256xf32> to vector<8x256xbf16>
    %c0_191 = arith.constant 0 : index
    %c0_192 = arith.constant 0 : index
    %224 = vector.load %arg12[%c0_191, %c0_192] : memref<256x128xbf16, #tpu.memory_space<vmem>>, vector<256x128xbf16>
    %cst_193 = arith.constant dense<0.000000e+00> : vector<8x128xf32>
    %225 = tpu.matmul %223, %224, %cst_193 {dimension_numbers = #tpu.dot_dimension_numbers<[1], [0], [0], [1], [0, 0, 1, 1], [], []>} : vector<8x256xbf16>, vector<256x128xbf16>, vector<8x128xf32> -> vector<8x128xf32>
    %c0_194 = arith.constant 0 : index
    %c0_195 = arith.constant 0 : index
    %226 = vector.load %arg13[%c0_194, %c0_195] : memref<1x128xf32, #tpu.memory_space<vmem>>, vector<1x128xf32>
    %227 = vector.broadcast %226 : vector<1x128xf32> to vector<8x128xf32>
    %228 = arith.addf %225, %227 : vector<8x128xf32>
    %229 = math.tanh %228 : vector<8x128xf32>
    %230 = arith.truncf %229 : vector<8x128xf32> to vector<8x128xbf16>
    %c0_196 = arith.constant 0 : index
    %c0_197 = arith.constant 0 : index
    %231 = vector.load %arg14[%c0_196, %c0_197] : memref<8x128xbf16, #tpu.memory_space<vmem>>, vector<8x128xbf16>
    tpu.vector_store %arg14[%c0_196, %c0_197], %230 {strides = array<i32>} : memref<8x128xbf16, #tpu.memory_space<vmem>>, vector<8x128xbf16>,
    return
  }
  func.func @transform_0(%arg0: i32) -> (i32, i32) {
    %c0_i32 = arith.constant 0 : i32
    %c0_i32_0 = arith.constant 0 : i32
    return %arg0, %c0_i32 : i32, i32
  }
  func.func @transform_1(%arg0: i32) -> (i32, i32, i32) {
    %c0_i32 = arith.constant 0 : i32
    %c0_i32_0 = arith.constant 0 : i32
    %c0_i32_1 = arith.constant 0 : i32
    %c0_i32_2 = arith.constant 0 : i32
    return %c0_i32, %c0_i32_0, %c0_i32_1 : i32, i32, i32
  }
  func.func @transform_2(%arg0: i32) -> (i32, i32, i32) {
    %c0_i32 = arith.constant 0 : i32
    %c0_i32_0 = arith.constant 0 : i32
    %c0_i32_1 = arith.constant 0 : i32
    %c0_i32_2 = arith.constant 0 : i32
    return %c0_i32, %c0_i32_0, %c0_i32_1 : i32, i32, i32
  }
  func.func @transform_3(%arg0: i32) -> (i32, i32, i32) {
    %c0_i32 = arith.constant 0 : i32
    %c0_i32_0 = arith.constant 0 : i32
    %c0_i32_1 = arith.constant 0 : i32
    %c0_i32_2 = arith.constant 0 : i32
    return %c0_i32, %c0_i32_0, %c0_i32_1 : i32, i32, i32
  }
  func.func @transform_4(%arg0: i32) -> (i32, i32, i32) {
    %c0_i32 = arith.constant 0 : i32
    %c0_i32_0 = arith.constant 0 : i32
    %c0_i32_1 = arith.constant 0 : i32
    %c0_i32_2 = arith.constant 0 : i32
    return %c0_i32, %c0_i32_0, %c0_i32_1 : i32, i32, i32
  }
  func.func @transform_5(%arg0: i32) -> (i32, i32, i32) {
    %c0_i32 = arith.constant 0 : i32
    %c0_i32_0 = arith.constant 0 : i32
    %c0_i32_1 = arith.constant 0 : i32
    %c0_i32_2 = arith.constant 0 : i32
    return %c0_i32, %c0_i32_0, %c0_i32_1 : i32, i32, i32
  }
  func.func @transform_6(%arg0: i32) -> (i32, i32, i32) {
    %c0_i32 = arith.constant 0 : i32
    %c0_i32_0 = arith.constant 0 : i32
    %c0_i32_1 = arith.constant 0 : i32
    %c0_i32_2 = arith.constant 0 : i32
    return %c0_i32, %c0_i32_0, %c0_i32_1 : i32, i32, i32
  }
  func.func @transform_7(%arg0: i32) -> (i32, i32) {
    %c0_i32 = arith.constant 0 : i32
    %c0_i32_0 = arith.constant 0 : i32
    %c0_i32_1 = arith.constant 0 : i32
    return %c0_i32, %c0_i32_0 : i32, i32
  }
  func.func @transform_8(%arg0: i32) -> (i32, i32) {
    %c0_i32 = arith.constant 0 : i32
    %c0_i32_0 = arith.constant 0 : i32
    %c0_i32_1 = arith.constant 0 : i32
    return %c0_i32, %c0_i32_0 : i32, i32
  }
  func.func @transform_9(%arg0: i32) -> (i32, i32) {
    %c0_i32 = arith.constant 0 : i32
    %c0_i32_0 = arith.constant 0 : i32
    %c0_i32_1 = arith.constant 0 : i32
    return %c0_i32, %c0_i32_0 : i32, i32
  }
  func.func @transform_10(%arg0: i32) -> (i32, i32) {
    %c0_i32 = arith.constant 0 : i32
    %c0_i32_0 = arith.constant 0 : i32
    %c0_i32_1 = arith.constant 0 : i32
    return %c0_i32, %c0_i32_0 : i32, i32
  }
  func.func @transform_11(%arg0: i32) -> (i32, i32) {
    %c0_i32 = arith.constant 0 : i32
    %c0_i32_0 = arith.constant 0 : i32
    %c0_i32_1 = arith.constant 0 : i32
    return %c0_i32, %c0_i32_0 : i32, i32
  }
  func.func @transform_12(%arg0: i32) -> (i32, i32) {
    %c0_i32 = arith.constant 0 : i32
    %c0_i32_0 = arith.constant 0 : i32
    %c0_i32_1 = arith.constant 0 : i32
    return %c0_i32, %c0_i32_0 : i32, i32
  }
  func.func @transform_13(%arg0: i32) -> (i32, i32) {
    %c0_i32 = arith.constant 0 : i32
    %c0_i32_0 = arith.constant 0 : i32
    return %arg0, %c0_i32 : i32, i32
  }
}

</mosaic_0001>

<bundles_post_ra>
// kernel: tpu_custom_call.1
= control target key start
LH: loop header
LB: loop body
LE: loop exit
PB: predicated region body
PF: predicated region fallthrough
CT: control target
= control target key end

     0   :  { %18 = vsyncpa [#allocation6], 0  ;;  %s7348_s0 = inlined_call_operand.vmem [shape: bf16[8,784], index: 0, kind: input, shape index: {}]   ;;  %s7349_s1 = inlined_call_operand.hbm [shape: bf16[7,140,208], index: 1, kind: input, shape index: {}]   ;;  %s7350_s2 = inlined_call_operand.vmem [shape: f32[7,1,208], index: 2, kind: input, shape index: {}]   ;;  %s7351_s3 = inlined_call_operand.hbm [shape: bf16[7,312,112], index: 3, kind: input, shape index: {}]   ;;  %s7352_s4 = inlined_call_operand.vmem [shape: f32[7,1,112], index: 4, kind: input, shape index: {}]   ;;  %s7353_s5 = inlined_call_operand.vmem [shape: bf16[3,336,96], index: 5, kind: input, shape index: {}]   ;;  %s7354_s6 = inlined_call_operand.vmem [shape: f32[3,1,96], index: 6, kind: input, shape index: {}]   ;;  %s7355_s7 = inlined_call_operand.vmem [shape: bf16[288,128], index: 7, kind: input, shape index: {}]   ;;  %s7356_s8 = inlined_call_operand.vmem [shape: f32[1,128], index: 8, kind: input, shape index: {}]   ;;  %s7357_s9 = inlined_call_operand.vmem [shape: bf16[128,256], index: 9, kind: input, shape index: {}]   ;;  %s7358_s10 = inlined_call_operand.vmem [shape: f32[1,256], index: 10, kind: input, shape index: {}]   ;;  %s7359_s11 = inlined_call_operand.vmem [shape: bf16[256,128], index: 11, kind: input, shape index: {}]   ;;  %s7360_s12 = inlined_call_operand.vmem [shape: f32[1,128], index: 12, kind: input, shape index: {}]   ;;  %s7361_s13 = inlined_call_operand.hbm [shape: bf16[8,128], index: 13, kind: output, shape index: {}]  }
   0x1   :  { %19 = vsyncpa [#allocation9], 0 }
   0x2   :  { %20 = vsyncpa [#allocation7], 0  ;;  %s6560_s25 = smov [#allocation5]  }
   0x3   :  { %s28_s26 = sshll.u32 %s6560_s25, 4  ;;  %s29_s26 = int_to_ptr.vmem [resolvable:$true] %s28_s26 }
   0x4   :  { %s6502_s27 = scalar_lea.vmem %s29_s26, 16128  ;;  %p6507_p1 = scmp.lt.s32.totalorder %s29_s26, %s29_s26 }
   0x5   :  { %p6503_p0 = scmp.ne.s32.totalorder %s29_s26, %s6502_s27  ;;  %p6508_p2 = scmp.lt.s32.totalorder %s6502_s27, %s6502_s27 }
   0x7   :  { %p6509_p3 = por %p6508_p2, %p6507_p1 }
   0x9   :  { %p6510_p4 = pnand %p6509_p3, %p6503_p0 }
   0xb   :  { %6513 = shalt.err (!%p6510_p4)
}
   0xc   :  { %s6561_s28 = smov 128   ;;  %s6562_s29 = smov 8  }
   0xd   :  { %34 = dma.hbm_to_vmem [thread:$0]  %s7349_s1, 16128, %s29_s26, [#allocation6], %s6561_s28, %s6561_s28, %s6562_s29  }
   0xe   :  { %s6563_s15 = smov [#allocation8]  }
   0xf   :  { %s42_s16 = sshll.u32 %s6563_s15, 4  ;;  %s43_s16 = int_to_ptr.vmem [resolvable:$true] %s42_s16 }
  0x10   :  { %s6522_s17 = scalar_lea.vmem %s43_s16, 17472  ;;  %p6527_p6 = scmp.lt.s32.totalorder %s43_s16, %s43_s16 }
  0x11   :  { %p6523_p5 = scmp.ne.s32.totalorder %s43_s16, %s6522_s17  ;;  %p6528_p7 = scmp.lt.s32.totalorder %s6522_s17, %s6522_s17 }
  0x13   :  { %p6529_p8 = por %p6528_p7, %p6527_p6 }
  0x15   :  { %p6530_p9 = pnand %p6529_p8, %p6523_p5 }
  0x17   :  { %6533 = shalt.err (!%p6530_p9)
}
  0x18   :  { %s6564_s18 = smov 64   ;;  %s6565_s19 = smov 4  }
  0x19   :  { %48 = dma.hbm_to_vmem [thread:$0]  %s7351_s3, 17472, %s43_s16, [#allocation9], %s6564_s18, %s6564_s18, %s6565_s19  }
  0x1a   :  { %6554 = dma.done.wait [#allocation6], 16128  }
  0x1b   :  { %6555 = vsyncadd [#allocation6], 4294951168 }
  0x1c   :  { %6556 = dma.done.wait [#allocation9], 17472  }
  0x1d   :  { %6557 = vsyncadd [#allocation9], 4294949824  ;;  %v470_v0 = vld [vmem:[%s7348_s0 + $0x4] sm:$0xff]  ;;  %vm199_vm0 = vcmask 97280   ;;  %s6566_s3 = smov 32   ;;  %s6567_s25 = smov 16  }
  0x1e   :  { %v265_v1 = vld [vmem:[%s7348_s0] sm:$0xff]  ;;  %v4981_v2 = vcombine.low %v470_v0, %v470_v0  ;;  %v6009_v4 = vld [vmem:[#allocation5 + $0x74] ss:$8 sps:$4 sm:$0xff]   ;;  %v4982_v7 = vcombine.high %v470_v0, %v470_v0  ;;  %v6014_v10 = vld [vmem:[#allocation5 + $0x60] ss:$8 sps:$4 sm:$0xff]   ;;  %s6568_s28 = smov 48  }
  0x1f   :  { %v6665_v3 = vcombine.low %v265_v1, %v265_v1  ;;  %v4958_v5 = vcombine.high %v265_v1, %v265_v1  ;;  %v6011_v6 = vld [vmem:[#allocation5 + $0x70] ss:$8 sps:$4 sm:$0xff]   ;;  %v6012_v8 = vld [vmem:[#allocation5 + $0x64] ss:$8 sps:$4 sm:$0xff]   ;;  %210 = vmatprep.subr.bf16.mxu0 %v6009_v4  ;;  %v6015_v11 = vld [vmem:[#allocation5 + $0x54] ss:$8 sps:$4 sm:$0xff]  }
  0x20   :  { %508 = vrot.lane.b32.xlu1 %v4981_v2, %s6566_s3  ;;  %v671_v9 = vld [vmem:[%s7348_s0 + $0x8] sm:$0xff]  ;;  %211 = vmatpush1.bf16.msra.mxu0 %v6011_v6  ;;  %v6018_v15 = vld [vmem:[#allocation5 + $0x44] ss:$8 sps:$4 sm:$0xff]   ;;  %v6020_v17 = vld [vmem:[#allocation5 + $0x40] ss:$8 sps:$4 sm:$0xff]   ;;  %vm203_vm1 = vcmask 1045504  }
  0x21   :  { %303 = vrot.lane.b32.xlu0 %v6665_v3, %s6567_s25  ;;  %4954 = vmatprep.mubr.msk.bf16.mxu0 %vm199_vm0, %v4958_v5  ;;  %v5006_v12 = vcombine.high %v671_v9, %v671_v9  ;;  %v5005_v13 = vcombine.low %v671_v9, %v671_v9  ;;  %v6017_v14 = vld [vmem:[#allocation5 + $0x50] ss:$8 sps:$4 sm:$0xff]   ;;  %v6021_v20 = vld [vmem:[#allocation5 + $0x34] ss:$8 sps:$4 sm:$0xff]   ;;  %v6038_v21 = vld [vmem:[#allocation5 + $0x104] ss:$8 sps:$4 sm:$0xff]  }
  0x22   :  { %212 = vmatprep.subr.bf16.mxu0 %v6012_v8  ;;  %v875_v16 = vld [vmem:[%s7348_s0 + $0xc] sm:$0xff]  ;;  %v6040_v22 = vld [vmem:[#allocation5 + $0x100] ss:$8 sps:$4 sm:$0xff]   ;;  %407 = vmatprep.subr.bf16.mxu1 %v6038_v21  ;;  %v6024_v26 = vld [vmem:[#allocation5 + $0x24] ss:$8 sps:$4 sm:$0xff]   ;;  %s6569_s16 = smov 80  }
  0x23   :  { %v5030_v18 = vcombine.high %v875_v16, %v875_v16  ;;  %v5029_v19 = vcombine.low %v875_v16, %v875_v16  ;;  %v6023_v23 = vld [vmem:[#allocation5 + $0x30] ss:$8 sps:$4 sm:$0xff]   ;;  %v6044_v24 = vld [vmem:[#allocation5 + $0xf4] ss:$8 sps:$4 sm:$0xff]   ;;  %408 = vmatpush1.bf16.msra.mxu1 %v6040_v22  ;;  %v6050_v27 = vld [vmem:[#allocation5 + $0xe4] ss:$8 sps:$4 sm:$0xff]  }
  0x24   :  { %510 = vrot.lane.b32.xlu1 %v4982_v7, %s6566_s3  ;;  %213 = vmatpush1.bf16.msra.mxu0 %v6014_v10  ;;  %v6046_v25 = vld [vmem:[#allocation5 + $0xf0] ss:$8 sps:$4 sm:$0xff]   ;;  %v6026_v28 = vld [vmem:[#allocation5 + $0x20] ss:$8 sps:$4 sm:$0xff]   ;;  %v6027_v30 = vld [vmem:[#allocation5 + $0x14] ss:$8 sps:$4 sm:$0xff]  }
  0x25   :  { %305 = vrot.lane.b32.xlu0 %v4958_v5, %s6567_s25  ;;  %214 = vmatprep.subr.bf16.mxu0 %v6015_v11  ;;  %v6052_v29 = vld [vmem:[#allocation5 + $0xe0] ss:$8 sps:$4 sm:$0xff]   ;;  %v6056_v31 = vld [vmem:[#allocation5 + $0xd4] ss:$8 sps:$4 sm:$0xff]   ;;  %v6029_v32 = vld [vmem:[#allocation5 + $0x10] ss:$8 sps:$4 sm:$0xff]  }
  0x26   :  { %409 = vmatprep.subr.bf16.mxu1 %v6044_v24  ;;  %v6058_v33 = vld [vmem:[#allocation5 + $0xd0] ss:$8 sps:$4 sm:$0xff]   ;;  %v6030_v34 = vld [vmem:[#allocation5 + $0x4] ss:$8 sps:$4 sm:$0xff]   ;;  %v6032_v36 = vld [vmem:[#allocation5] ss:$8 sps:$4 sm:$0xff]  }
  0x27   :  { %410 = vmatpush1.bf16.msra.mxu1 %v6046_v25  ;;  %v6062_v35 = vld [vmem:[#allocation5 + $0xc4] ss:$8 sps:$4 sm:$0xff]   ;;  %v6064_v38 = vld [vmem:[#allocation5 + $0xc0] ss:$8 sps:$4 sm:$0xff]   ;;  %v6068_v40 = vld [vmem:[#allocation5 + $0xb4] ss:$8 sps:$4 sm:$0xff]  }
  0x28   :  { %711 = vrot.lane.b32.xlu1 %v5006_v12, %s6568_s28  ;;  %215 = vmatpush1.bf16.msra.mxu0 %v6017_v14  ;;  %v6035_v37 = vld [vmem:[#allocation5 + $0x84] ss:$8 sps:$4 sm:$0x3f]   ;;  %v6037_v39 = vld [vmem:[#allocation5 + $0x80] ss:$8 sps:$4 sm:$0x3f]   ;;  %v95_v12 = vlaneseq }
  0x29   :  { %709 = vrot.lane.b32.xlu0 %v5005_v13, %s6568_s28  ;;  %216 = vmatprep.subr.bf16.mxu0 %v6018_v15  ;;  %v6070_v41 = vld [vmem:[#allocation5 + $0xb0] ss:$8 sps:$4 sm:$0xff]   ;;  %v205_v42 = vsel %vm203_vm1, %v6037_v39, 0  ;;  %v6043_v43 = vld [vmem:[#allocation5 + $0x194] ss:$8 sps:$4 sm:$0xff]   ;;  %vm7362_vm2 = vcmask 261120  }
  0x2a   :  { %411 = vmatprep.subr.bf16.mxu1 %v6050_v27  ;;  %v6074_v44 = vld [vmem:[#allocation5 + $0xa4] ss:$8 sps:$4 sm:$0xff]   ;;  %v6041_v45 = vld [vmem:[#allocation5 + $0x190] ss:$8 sps:$4 sm:$0xff]   ;;  %v6076_v46 = vld [vmem:[#allocation5 + $0xa0] ss:$8 sps:$4 sm:$0xff]  }
  0x2b   :  { %412 = vmatpush1.bf16.msra.mxu1 %v6052_v29  ;;  %v6049_v47 = vld [vmem:[#allocation5 + $0x184] ss:$8 sps:$4 sm:$0xff]   ;;  %v6080_v48 = vld [vmem:[#allocation5 + $0x94] ss:$8 sps:$4 sm:$0xff]   ;;  %v6047_v49 = vld [vmem:[#allocation5 + $0x180] ss:$8 sps:$4 sm:$0xff]  }
  0x2c   :  { %915 = vrot.lane.b32.xlu1 %v5030_v18, %s6564_s18  ;;  %217 = vmatpush1.bf16.msra.mxu0 %v6020_v17  ;;  %v6055_v50 = vld [vmem:[#allocation5 + $0x174] ss:$8 sps:$4 sm:$0xff]   ;;  %v6082_v52 = vld [vmem:[#allocation5 + $0x90] ss:$8 sps:$4 sm:$0xff]   ;;  %v6061_v58 = vld [vmem:[#allocation5 + $0x164] ss:$8 sps:$4 sm:$0xff]  }
  0x2d   :  { %913 = vrot.lane.b32.xlu0 %v5029_v19, %s6564_s18  ;;  %218 = vmatprep.subr.bf16.mxu0 %v6021_v20  ;;  %v1078_v51 = vld [vmem:[%s7348_s0 + $0x10] sm:$0xff]  ;;  %v6088_v56 = vld [vmem:[#allocation5 + $0x110] ss:$8 sps:$4 sm:$0x3f]   ;;  %v6094_v60 = vld [vmem:[#allocation5 + $0x224] ss:$8 sps:$4 sm:$0xff]  }
  0x2e   :  { %413 = vmatprep.subr.bf16.mxu1 %v6056_v31  ;;  %v6086_v53 = vld [vmem:[#allocation5 + $0x114] ss:$8 sps:$4 sm:$0x3f]   ;;  %v5054_v54 = vcombine.high %v1078_v51, %v1078_v51  ;;  %v5053_v55 = vcombine.low %v1078_v51, %v1078_v51  ;;  %v6053_v57 = vld [vmem:[#allocation5 + $0x170] ss:$8 sps:$4 sm:$0xff]   ;;  %v402_v59 = vsel %vm203_vm1, %v6088_v56, 0 }
  0x2f   :  { %414 = vmatpush1.bf16.msra.mxu1 %v6058_v33  ;;  %s6570_s0 = smov 24   ;;  %v6059_v61 = vld [vmem:[#allocation5 + $0x160] ss:$8 sps:$4 sm:$0xff]   ;;  %v6067_v62 = vld [vmem:[#allocation5 + $0x154] ss:$8 sps:$4 sm:$0xff]   ;;  %vm307_vm3 = vcmask 130048  }
  0x30   :  { %219 = vmatpush1.bf16.msra.mxu0 %v6023_v23  ;;  %415 = vmatprep.subr.bf16.mxu1 %v6062_v35  ;;  %v6065_v63 = vld [vmem:[#allocation5 + $0x150] ss:$8 sps:$4 sm:$0xff]   ;;  %v6073_v0 = vld [vmem:[#allocation5 + $0x144] ss:$8 sps:$4 sm:$0xff]   ;;  %v6071_v1 = vld [vmem:[#allocation5 + $0x140] ss:$8 sps:$4 sm:$0xff]  }
  0x31   :  { %220 = vmatprep.subr.bf16.mxu0 %v6024_v26  ;;  %1118 = vrot.lane.b32.xlu1 %v5054_v54, %s6569_s16  ;;  %v6079_v2 = vld [vmem:[#allocation5 + $0x134] ss:$8 sps:$4 sm:$0xff]   ;;  %v6085_v4 = vld [vmem:[#allocation5 + $0x124] ss:$8 sps:$4 sm:$0xff]   ;;  %v6083_v5 = vld [vmem:[#allocation5 + $0x120] ss:$8 sps:$4 sm:$0xff]  }
  0x32   :  { %1116 = vrot.lane.b32.xlu0 %v5053_v55, %s6569_s16  ;;  %v6089_v6 = vld [vmem:[#allocation5 + $0x1a4] ss:$8 sps:$4 sm:$0x3f]   ;;  %v6091_v7 = vld [vmem:[#allocation5 + $0x1a0] ss:$8 sps:$4 sm:$0x3f]  }
  0x33   :  { %416 = vmatpush1.bf16.msra.mxu1 %v6064_v38  ;;  %v607_v8 = vsel %vm203_vm1, %v6091_v7, 0  ;;  %v6123_v9 = vld [vmem:[#allocation5 + $0x2b4] ss:$8 sps:$4 sm:$0xff]   ;;  %v6120_v10 = vld [vmem:[#allocation5 + $0x230] ss:$8 sps:$4 sm:$0x3f]  }
  0x34   :  { %221 = vmatpush1.bf16.msra.mxu0 %v6026_v28  ;;  %417 = vmatprep.subr.bf16.mxu1 %v6068_v40  ;;  %v6147_v11 = vld [vmem:[#allocation5 + $0x2c0] ss:$8 sps:$4 sm:$0x3f]   ;;  %v6698_v13 = vsel %vm203_vm1, %v6120_v10, 0  ;;  %v6703_v15 = vshrl.u32 %v95_v12, 7  ;;  %vm7364_vm4 = vcmask 392192  }
  0x35   :  { %222 = vmatprep.subr.bf16.mxu0 %v6027_v30  ;;  %1318 = vrot.lane.b32.xlu1 %v5054_v54, %s6570_s0  ;;  %v6701_v14 = vsel %vm203_vm1, %v6147_v11, 0  ;;  %v6092_v18 = vld [vmem:[#allocation5 + $0x220] ss:$8 sps:$4 sm:$0xff]   ;;  %v6121_v19 = vld [vmem:[#allocation5 + $0x2b0] ss:$8 sps:$4 sm:$0xff]   ;;  %vm7366_vm5 = vcmask 523264  }
  0x36   :  { %1316 = vrot.lane.b32.xlu0 %v5053_v55, %s6570_s0  ;;  %v6097_v20 = vld [vmem:[#allocation5 + $0x214] ss:$8 sps:$4 sm:$0xff]   ;;  %v6126_v21 = vld [vmem:[#allocation5 + $0x2a4] ss:$8 sps:$4 sm:$0xff]   ;;  %v6095_v26 = vld [vmem:[#allocation5 + $0x210] ss:$8 sps:$4 sm:$0xff]  }
  0x37   :  { %418 = vmatpush1.bf16.msra.mxu1 %v6070_v41  ;;  %v6124_v27 = vld [vmem:[#allocation5 + $0x2a0] ss:$8 sps:$4 sm:$0xff]   ;;  %v6102_v28 = vld [vmem:[#allocation5 + $0x204] ss:$8 sps:$4 sm:$0xff]   ;;  %v6129_v29 = vld [vmem:[#allocation5 + $0x294] ss:$8 sps:$4 sm:$0xff]  }
  0x38   :  { %223 = vmatpush1.bf16.msra.mxu0 %v6029_v32  ;;  %419 = vmatprep.subr.bf16.mxu1 %v6074_v44  ;;  %v6100_v31 = vld [vmem:[#allocation5 + $0x200] ss:$8 sps:$4 sm:$0xff]   ;;  %v6127_v32 = vld [vmem:[#allocation5 + $0x290] ss:$8 sps:$4 sm:$0xff]   ;;  %v6105_v33 = vld [vmem:[#allocation5 + $0x1f4] ss:$8 sps:$4 sm:$0xff]  }
  0x39   :  { %224 = vmatprep.subr.bf16.mxu0 %v6030_v34  ;;  %v6132_v34 = vld [vmem:[#allocation5 + $0x284] ss:$8 sps:$4 sm:$0xff]   ;;  %v6135_v39 = vld [vmem:[#allocation5 + $0x274] ss:$8 sps:$4 sm:$0xff]   ;;  %v6106_v40 = vld [vmem:[#allocation5 + $0x1e0] ss:$8 sps:$4 sm:$0xff]  }
  0x3a   :  { %v6108_v38 = vld [vmem:[#allocation5 + $0x1e4] ss:$8 sps:$4 sm:$0xff]   ;;  %v6133_v41 = vld [vmem:[#allocation5 + $0x270] ss:$8 sps:$4 sm:$0xff]   ;;  %v6165_v10 = vld [vmem:[#allocation5 + $0x314] ss:$8 sps:$4 sm:$0xff]  }
  0x3b   :  { %420 = vmatpush1.bf16.msra.mxu1 %v6076_v46  ;;  %v6109_v44 = vld [vmem:[#allocation5 + $0x1d0] ss:$8 sps:$4 sm:$0xff]   ;;  %v6114_v46 = vld [vmem:[#allocation5 + $0x1c4] ss:$8 sps:$4 sm:$0xff]   ;;  %vm7365_vm6 = vcmask 654336   ;;  %vm1320_vm7 = vcmask 195584  }
  0x3c   :  { %225 = vmatpush1.bf16.msra.mxu0 %v6032_v36  ;;  %421 = vmatprep.subr.bf16.mxu1 %v6080_v48  ;;  %v6103_v36 = vld [vmem:[#allocation5 + $0x1f0] ss:$8 sps:$4 sm:$0xff]   ;;  %v6112_v48 = vld [vmem:[#allocation5 + $0x1c0] ss:$8 sps:$4 sm:$0xff]   ;;  %v6144_v51 = vld [vmem:[#allocation5 + $0x244] ss:$8 sps:$4 sm:$0xff]  }
  0x3d   :  { %4953 = vmatprep.subr.msk.bf16.mxu0 %vm203_vm1, %v6035_v37  ;;  %v6130_v37 = vld [vmem:[#allocation5 + $0x280] ss:$8 sps:$4 sm:$0xff]   ;;  %v6118_v54 = vld [vmem:[#allocation5 + $0x234] ss:$8 sps:$4 sm:$0x3f]   ;;  %vm261_vm8 = vcmask 1043456  }
  0x3e   :  { %v6145_v55 = vld [vmem:[#allocation5 + $0x2c4] ss:$8 sps:$4 sm:$0x3f]   ;;  %v6163_v12 = vld [vmem:[#allocation5 + $0x310] ss:$8 sps:$4 sm:$0xff]   ;;  %vm262_vm9 = vcmask 654340  }
  0x3f   :  { %422 = vmatpush1.bf16.msra.mxu1 %v6082_v52  ;;  %v6115_v52 = vld [vmem:[#allocation5 + $0x1b0] ss:$8 sps:$4 sm:$0xff]   ;;  %v6174_v11 = vld [vmem:[#allocation5 + $0x3a4] ss:$8 sps:$4 sm:$0xff]   ;;  %vm263_vm10 = vmor %vm262_vm9, %vm261_vm8  ;;  %s6572_s29 = smov 112   ;;  %vm7368_vm11 = vcmask 1044096  }
  0x40   :  { %241 = vmatpush2.bf16.msra.mxu0 %v205_v42  ;;  %4977 = vmatprep.subr.msk.bf16.mxu1 %vm203_vm1, %v6086_v53  ;;  %v6111_v42 = vld [vmem:[#allocation5 + $0x1d4] ss:$8 sps:$4 sm:$0xff]   ;;  %v6142_v53 = vld [vmem:[#allocation5 + $0x240] ss:$8 sps:$4 sm:$0xff]   ;;  %vm465_vm12 = vcmask 1047556   ;;  %vm7363_vm13 = vcmask 1043712  }
  0x41   :  { %612 = vmatprep.subr.bf16.mxu0 %v6043_v43  ;;  %v6138_v43 = vld [vmem:[#allocation5 + $0x264] ss:$8 sps:$4 sm:$0xff]   ;;  %vm668_vm14 = vcmask 916484   ;;  %vm466_vm15 = vmor %vm465_vm12, %vm7368_vm11  ;;  %s6575_s19 = smov 72   ;;  %s6578_s26 = smov 96  }
  0x43   :  { %243 = vmatmul.mubr.bf16.vlgmr.msra.gmra.mxu0 %v6665_v3  ;;  %438 = vmatpush2.bf16.msra.mxu1 %v402_v59  ;;  %v6077_v3 = vld [vmem:[#allocation5 + $0x130] ss:$8 sps:$4 sm:$0xff]  }
  0x44   :  { %613 = vmatpush1.bf16.msra.mxu0 %v6041_v45  ;;  %813 = vmatprep.subr.bf16.mxu1 %v6094_v60  ;;  %v6136_v45 = vld [vmem:[#allocation5 + $0x260] ss:$8 sps:$4 sm:$0xff]  }
  0x45   :  { %614 = vmatprep.subr.bf16.mxu0 %v6049_v47  ;;  %v6141_v47 = vld [vmem:[#allocation5 + $0x254] ss:$8 sps:$4 sm:$0xff]   ;;  %v6148_v60 = vld [vmem:[#allocation5 + $0x340] ss:$8 sps:$4 sm:$0xff]  }
  0x48   :  { %615 = vmatpush1.bf16.msra.mxu0 %v6047_v49  ;;  %v6139_v49 = vld [vmem:[#allocation5 + $0x250] ss:$8 sps:$4 sm:$0xff]  }
  0x49   :  { %616 = vmatprep.subr.bf16.mxu0 %v6055_v50  ;;  %v6117_v50 = vld [vmem:[#allocation5 + $0x1b4] ss:$8 sps:$4 sm:$0xff]  }
  0x4c   :  { %617 = vmatpush1.bf16.msra.mxu0 %v6053_v57  ;;  %v6150_v57 = vld [vmem:[#allocation5 + $0x344] ss:$8 sps:$4 sm:$0xff]  }
  0x4d   :  { %618 = vmatprep.subr.bf16.mxu0 %v6061_v58  ;;  %v6156_v58 = vld [vmem:[#allocation5 + $0x3d4] ss:$8 sps:$4 sm:$0xff]  }
  0x50   :  { %619 = vmatpush1.bf16.msra.mxu0 %v6059_v61  ;;  %v6154_v61 = vld [vmem:[#allocation5 + $0x3d0] ss:$8 sps:$4 sm:$0xff]  }
  0x51   :  { %620 = vmatprep.subr.bf16.mxu0 %v6067_v62  ;;  %v6153_v62 = vld [vmem:[#allocation5 + $0x334] ss:$8 sps:$4 sm:$0xff]  }
  0x54   :  { %621 = vmatpush1.bf16.msra.mxu0 %v6065_v63  ;;  %v6162_v63 = vld [vmem:[#allocation5 + $0x3c4] ss:$8 sps:$4 sm:$0xff]  }
  0x55   :  { %622 = vmatprep.subr.bf16.mxu0 %v6073_v0 }
  0x58   :  { %623 = vmatpush1.bf16.msra.mxu0 %v6071_v1 }
  0x59   :  { %624 = vmatprep.subr.bf16.mxu0 %v6079_v2 }
  0x5c   :  { %625 = vmatpush1.bf16.msra.mxu0 %v6077_v3  ;;  %v6151_v3 = vld [vmem:[#allocation5 + $0x330] ss:$8 sps:$4 sm:$0xff]  }
  0x5d   :  { %626 = vmatprep.subr.bf16.mxu0 %v6085_v4  ;;  %v6160_v4 = vld [vmem:[#allocation5 + $0x3c0] ss:$8 sps:$4 sm:$0xff]  }
  0x60   :  { %627 = vmatpush1.bf16.msra.mxu0 %v6083_v5  ;;  %v6159_v5 = vld [vmem:[#allocation5 + $0x324] ss:$8 sps:$4 sm:$0xff]  }
  0x61   :  { %5001 = vmatprep.subr.msk.bf16.mxu0 %vm203_vm1, %v6089_v6  ;;  %v6168_v6 = vld [vmem:[#allocation5 + $0x3b4] ss:$8 sps:$4 sm:$0xff]  }
  0x64   :  { %643 = vmatpush2.bf16.msra.mxu0 %v607_v8  ;;  %v6157_v8 = vld [vmem:[#allocation5 + $0x320] ss:$8 sps:$4 sm:$0xff]  }
  0x65   :  { %1017 = vmatprep.subr.bf16.mxu0 %v6123_v9  ;;  %v6166_v9 = vld [vmem:[#allocation5 + $0x3b0] ss:$8 sps:$4 sm:$0xff]  }
  0x92   :  { %v509_v16 = vpop.permute.xlu1 %508 }
  0x93   :  { %v304_v17 = vpop.permute.xlu0 %303 }
  0x96   :  { %v511_v22 = vpop.permute.xlu1 %510 }
  0x97   :  { %v306_v23 = vpop.permute.xlu0 %305  ;;  %v513_v24 = vsel %vm7362_vm2, %v509_v16, %v511_v22  ;;  %5002 = vmatprep.mubr.msk.bf16.mxu0 %vm199_vm0, %v511_v22  ;;  %v6180_v16 = vld [vmem:[#allocation5 + $0x394] ss:$8 sps:$4 sm:$0xff]   ;;  %v6184_v22 = vld [vmem:[#allocation5 + $0x380] ss:$8 sps:$4 sm:$0xff]  }
  0x98   :  { %4978 = vmatprep.mubr.msk.bf16.mxu1 %vm199_vm0, %v306_v23  ;;  %v308_v25 = vsel %vm307_vm3, %v304_v17, %v306_v23  ;;  %645 = vmatmul.mubr.bf16.vlgmr.msra.gmra.mxu0 %v513_v24  ;;  %v6169_v17 = vld [vmem:[#allocation5 + $0x300] ss:$8 sps:$4 sm:$0xff]   ;;  %v6183_v23 = vld [vmem:[#allocation5 + $0x2e4] ss:$8 sps:$4 sm:$0xff]   ;;  %v6192_v24 = vld [vmem:[#allocation5 + $0x374] ss:$8 sps:$4 sm:$0xff]  }
  0x99   :  { %440 = vmatmul.mubr.bf16.vlgmr.msra.gmra.mxu1 %v308_v25  ;;  %1018 = vmatpush1.bf16.msra.mxu0 %v6121_v19  ;;  %v6177_v19 = vld [vmem:[#allocation5 + $0x2f4] ss:$8 sps:$4 sm:$0xff]   ;;  %v6181_v25 = vld [vmem:[#allocation5 + $0x2e0] ss:$8 sps:$4 sm:$0xff]  }
  0x9a   :  { %814 = vmatpush1.bf16.msra.mxu1 %v6092_v18  ;;  %v6709_v30 = vpop.permute.xlu1 %711  ;;  %1019 = vmatprep.subr.bf16.mxu0 %v6126_v21  ;;  %v6178_v18 = vld [vmem:[#allocation5 + $0x390] ss:$8 sps:$4 sm:$0xff]  }
  0x9b   :  { %815 = vmatprep.subr.bf16.mxu1 %v6097_v20  ;;  %5026 = vmatprep.mubr.msk.bf16.mxu1 %vm199_vm0, %v6709_v30  ;;  %v710_v56 = vpop.permute.xlu0 %709  ;;  %v6186_v20 = vld [vmem:[#allocation5 + $0x384] ss:$8 sps:$4 sm:$0xff]   ;;  %v6175_v21 = vld [vmem:[#allocation5 + $0x2f0] ss:$8 sps:$4 sm:$0xff]  }
  0x9c   :  { %v714_v0 = vsel %vm7364_vm4, %v710_v56, %v6709_v30  ;;  %v6201_v30 = vld [vmem:[#allocation5 + $0x3e0] ss:$8 sps:$4 sm:$0x3f]   ;;  %vm1076_vm4 = vcmask 125952  }
  0x9d   :  { %1020 = vmatpush1.bf16.msra.mxu0 %v6124_v27  ;;  %v6189_v27 = vld [vmem:[#allocation5 + $0x2d4] ss:$8 sps:$4 sm:$0xff]  }
  0x9e   :  { %816 = vmatpush1.bf16.msra.mxu1 %v6095_v26  ;;  %1021 = vmatprep.subr.bf16.mxu0 %v6129_v29  ;;  %v916_v35 = vpop.permute.xlu1 %915  ;;  %v6190_v26 = vld [vmem:[#allocation5 + $0x370] ss:$8 sps:$4 sm:$0xff]  }
  0x9f   :  { %817 = vmatprep.subr.bf16.mxu1 %v6102_v28  ;;  %5050 = vmatprep.mubr.msk.bf16.mxu0 %vm199_vm0, %v916_v35  ;;  %v914_v59 = vpop.permute.xlu0 %913  ;;  %v6197_v28 = vld [vmem:[#allocation5 + $0x364] ss:$8 sps:$4 sm:$0xff]   ;;  %v6198_v29 = vld [vmem:[#allocation5 + $0x350] ss:$8 sps:$4 sm:$0x3f]  }
  0xa0   :  { %v918_v1 = vsel %vm7366_vm5, %v914_v59, %v916_v35  ;;  %v6199_v35 = vld [vmem:[#allocation5 + $0x3e4] ss:$8 sps:$4 sm:$0x3f]   ;;  %v6208_v59 = vld [vmem:[#allocation8 + $0x60] sm:$0xff]  }
  0xa1   :  { %1022 = vmatpush1.bf16.msra.mxu0 %v6127_v32  ;;  %v6195_v32 = vld [vmem:[#allocation5 + $0x360] ss:$8 sps:$4 sm:$0xff]  }
  0xa2   :  { %818 = vmatpush1.bf16.msra.mxu1 %v6100_v31  ;;  %1023 = vmatprep.subr.bf16.mxu0 %v6132_v34  ;;  %v6187_v31 = vld [vmem:[#allocation5 + $0x2d0] ss:$8 sps:$4 sm:$0xff]  }
  0xa3   :  { %819 = vmatprep.subr.bf16.mxu1 %v6105_v33  ;;  %v6721_v2 = vpop.permute.xlu1 %1118  ;;  %v6193_v33 = vld [vmem:[#allocation5 + $0x354] ss:$8 sps:$4 sm:$0x3f]  }
  0xa4   :  { %v1117_v34 = vpop.permute.xlu0 %1116 }
  0xa5   :  { %1024 = vmatpush1.bf16.msra.mxu0 %v6130_v37  ;;  %v1415_v37 = vsel %vm203_vm1, %v6201_v30, 0 }
  0xa6   :  { %820 = vmatpush1.bf16.msra.mxu1 %v6103_v36  ;;  %1025 = vmatprep.subr.bf16.mxu0 %v6135_v39  ;;  %v1214_v36 = vsel %vm203_vm1, %v6198_v29, 0  ;;  %v1120_v39 = vsel %vm7365_vm6, %v1117_v34, %v6721_v2 }
  0xa7   :  { %821 = vmatprep.subr.bf16.mxu1 %v6108_v38  ;;  %v6723_v7 = vpop.permute.xlu1 %1318 }
  0xa8   :  { %v1317_v38 = vpop.permute.xlu0 %1316 }
  0xa9   :  { %1026 = vmatpush1.bf16.msra.mxu0 %v6133_v41  ;;  %v6738_v41 = vsub.s32 0, %v6703_v15 }
  0xaa   :  { %822 = vmatpush1.bf16.msra.mxu1 %v6106_v40  ;;  %1027 = vmatprep.subr.bf16.mxu0 %v6138_v43  ;;  %v1321_v40 = vsel %vm1320_vm7, %v1317_v38, %v6723_v7  ;;  %v93_v43 = vld [vmem:[%s7350_s2] sm:$0x3] }
  0xab   :  { %823 = vmatprep.subr.bf16.mxu1 %v6111_v42  ;;  %v6741_v42 = vsub.s32 1, %v6703_v15 }
  0xad   :  { %1028 = vmatpush1.bf16.msra.mxu0 %v6136_v45  ;;  %v102_v45 = vrot.slane %v93_v43, %v6741_v42 }
  0xae   :  { %824 = vmatpush1.bf16.msra.mxu1 %v6109_v44  ;;  %1029 = vmatprep.subr.bf16.mxu0 %v6141_v47  ;;  %v98_v44 = vrot.slane %v93_v43, %v6738_v41  ;;  %v6202_v47 = vld [vmem:[#allocation8 + $0x78] sm:$0xff]  }
  0xaf   :  { %825 = vmatprep.subr.bf16.mxu1 %v6114_v46 }
  0xb1   :  { %1030 = vmatpush1.bf16.msra.mxu0 %v6139_v49 }
  0xb2   :  { %826 = vmatpush1.bf16.msra.mxu1 %v6112_v48  ;;  %1031 = vmatprep.subr.bf16.mxu0 %v6144_v51  ;;  %v6203_v48 = vld [vmem:[#allocation8 + $0x38] sm:$0xff]  }
  0xb3   :  { %827 = vmatprep.subr.bf16.mxu1 %v6117_v50  ;;  %v6204_v50 = vld [vmem:[#allocation8 + $0x70] sm:$0xff]  }
  0xb5   :  { %1032 = vmatpush1.bf16.msra.mxu0 %v6142_v53  ;;  %v6205_v53 = vld [vmem:[#allocation8 + $0x30] sm:$0xff]  }
  0xb6   :  { %828 = vmatpush1.bf16.msra.mxu1 %v6115_v52  ;;  %5049 = vmatprep.subr.msk.bf16.mxu0 %vm203_vm1, %v6145_v55 }
  0xb7   :  { %5025 = vmatprep.subr.msk.bf16.mxu1 %vm203_vm1, %v6118_v54  ;;  %v6206_v54 = vld [vmem:[#allocation8 + $0x68] sm:$0xff]  }
  0xb9   :  { %1048 = vmatpush2.bf16.msra.mxu0 %v6701_v14  ;;  %v6171_v14 = vld [vmem:[#allocation5 + $0x304] ss:$8 sps:$4 sm:$0xff]  }
  0xba   :  { %844 = vmatpush2.bf16.msra.mxu1 %v6698_v13  ;;  %1420 = vmatprep.subr.bf16.mxu0 %v6156_v58  ;;  %v6172_v13 = vld [vmem:[#allocation5 + $0x3a0] ss:$8 sps:$4 sm:$0xff]  }
  0xbb   :  { %1219 = vmatprep.subr.bf16.mxu1 %v6150_v57  ;;  %v6207_v57 = vld [vmem:[#allocation8 + $0x28] sm:$0xff]  }
  0xbc   :  { %1050 = vmatmul.mubr.bf16.vlgmr.msra.gmra.mxu0 %v918_v1  ;;  %v4980_v1 = vld [vmem:[%s7350_s2 + $0x4] sm:$0x3] }
  0xbd   :  { %846 = vmatmul.mubr.bf16.vlgmr.msra.gmra.mxu1 %v714_v0  ;;  %1421 = vmatpush1.bf16.msra.mxu0 %v6154_v61  ;;  %v6209_v61 = vld [vmem:[#allocation8 + $0x20] sm:$0xff]   ;;  %v4956_v0 = vld [vmem:[%s7350_s2 + $0x2] sm:$0x3] }
  0xbe   :  { %1220 = vmatpush1.bf16.msra.mxu1 %v6148_v60  ;;  %1422 = vmatprep.subr.bf16.mxu0 %v6162_v63  ;;  %v6211_v63 = vld [vmem:[#allocation8 + $0x18] sm:$0xff]  }
  0xbf   :  { %1221 = vmatprep.subr.bf16.mxu1 %v6153_v62  ;;  %5074 = vmatprep.mubr.msk.bf16.mxu1 %vm199_vm0, %v6721_v2  ;;  %v6210_v62 = vld [vmem:[#allocation8 + $0x58] sm:$0xff]   ;;  %v6212_v2 = vld [vmem:[#allocation8 + $0x50] sm:$0xff]  }
  0xc0   :  { %5098 = vmatprep.mubr.msk.bf16.mxu0 %vm199_vm0, %v6723_v7  ;;  %v500_v7 = vrot.slane %v4980_v1, %v6741_v42  ;;  %vm468_vm0 = vcmask 257024  }
  0xc1   :  { %1423 = vmatpush1.bf16.msra.mxu0 %v6160_v4  ;;  %v496_v4 = vrot.slane %v4980_v1, %v6738_v41  ;;  %v5076_v1 = vld [vmem:[%s7350_s2 + $0xc] sm:$0x3] }
  0xc2   :  { %1222 = vmatpush1.bf16.msra.mxu1 %v6151_v3  ;;  %1424 = vmatprep.subr.bf16.mxu0 %v6168_v6  ;;  %v291_v3 = vrot.slane %v4956_v0, %v6738_v41  ;;  %v295_v6 = vrot.slane %v4956_v0, %v6741_v42 }
  0xc3   :  { %1223 = vmatprep.subr.bf16.mxu1 %v6159_v5  ;;  %v6213_v5 = vld [vmem:[#allocation8 + $0x10] sm:$0xff]  }
  0xc5   :  { %1425 = vmatpush1.bf16.msra.mxu0 %v6166_v9 }
  0xc6   :  { %1224 = vmatpush1.bf16.msra.mxu1 %v6157_v8  ;;  %1426 = vmatprep.subr.bf16.mxu0 %v6174_v11  ;;  %v6214_v8 = vld [vmem:[#allocation8 + $0x48] sm:$0xff]  }
  0xc7   :  { %1225 = vmatprep.subr.bf16.mxu1 %v6165_v10  ;;  %v6215_v11 = vld [vmem:[#allocation8 + $0x8] sm:$0xff]  }
  0xc9   :  { %1427 = vmatpush1.bf16.msra.mxu0 %v6172_v13 }
  0xca   :  { %1226 = vmatpush1.bf16.msra.mxu1 %v6163_v12  ;;  %1428 = vmatprep.subr.bf16.mxu0 %v6180_v16  ;;  %v6216_v12 = vld [vmem:[#allocation8 + $0x40] sm:$0xff]  }
  0xcb   :  { %1227 = vmatprep.subr.bf16.mxu1 %v6171_v14 }
  0xcd   :  { %1429 = vmatpush1.bf16.msra.mxu0 %v6178_v18 }
  0xce   :  { %1228 = vmatpush1.bf16.msra.mxu1 %v6169_v17  ;;  %1430 = vmatprep.subr.bf16.mxu0 %v6186_v20  ;;  %v6217_v20 = vld [vmem:[#allocation8] sm:$0xff]  }
  0xcf   :  { %1229 = vmatprep.subr.bf16.mxu1 %v6177_v19 }
  0xd1   :  { %1431 = vmatpush1.bf16.msra.mxu0 %v6184_v22 }
  0xd2   :  { %1230 = vmatpush1.bf16.msra.mxu1 %v6175_v21  ;;  %1432 = vmatprep.subr.bf16.mxu0 %v6192_v24 }
  0xd3   :  { %1231 = vmatprep.subr.bf16.mxu1 %v6183_v23 }
  0xd5   :  { %1433 = vmatpush1.bf16.msra.mxu0 %v6190_v26 }
  0xd6   :  { %1232 = vmatpush1.bf16.msra.mxu1 %v6181_v25  ;;  %1434 = vmatprep.subr.bf16.mxu0 %v6197_v28 }
  0xd7   :  { %1233 = vmatprep.subr.bf16.mxu1 %v6189_v27 }
  0xd9   :  { %1435 = vmatpush1.bf16.msra.mxu0 %v6195_v32  ;;  %v5004_v32 = vld [vmem:[%s7350_s2 + $0x6] sm:$0x3] }
  0xda   :  { %1234 = vmatpush1.bf16.msra.mxu1 %v6187_v31  ;;  %5097 = vmatprep.subr.msk.bf16.mxu0 %vm203_vm1, %v6199_v35  ;;  %v6571_v31 = vmov 0.0   ;;  %v697_v34 = vrot.slane %v5004_v32, %v6738_v41 }
  0xdb   :  { %5073 = vmatprep.subr.msk.bf16.mxu1 %vm203_vm1, %v6193_v33  ;;  %v5028_v33 = vld [vmem:[%s7350_s2 + $0x8] sm:$0x3]  ;;  %vm669_vm1 = vmor %vm668_vm14, %vm7363_vm13  ;;  %vm1657_vm14 = vcmask 457728   ;;  %vm873_vm13 = vcmask 519168  }
  0xdc   :  { %v901_v35 = vrot.slane %v5028_v33, %v6738_v41 }
  0xdd   :  { %1451 = vmatpush2.bf16.msra.mxu0 %v1415_v37  ;;  %v905_v37 = vrot.slane %v5028_v33, %v6741_v42  ;;  %v6243_v33 = vld [vmem:[#allocation8 + $0xcc] sm:$0xff]  }
  0xde   :  { %1250 = vmatpush2.bf16.msra.mxu1 %v1214_v36  ;;  %v701_v36 = vrot.slane %v5004_v32, %v6741_v42  ;;  %v6241_v32 = vld [vmem:[#allocation8 + $0x10c] sm:$0xff]  }
  0xdf   :  { %5528 = vmatprep.subr.bf16.mxu1 %v6202_v47 }
  0xe0   :  { %1453 = vmatmul.mubr.bf16.vlgmr.msra.gmra.mxu0 %v1321_v40 }
  0xe1   :  { %1252 = vmatmul.mubr.bf16.vlgmr.msra.gmra.mxu1 %v1120_v39 }
  0xe2   :  { %5529 = vmatpush3.bf16.msra.mxu1 %v6203_v48 }
  0xe3   :  { %5530 = vmatprep.subr.bf16.mxu1 %v6204_v50 }
  0xe6   :  { %5531 = vmatpush3.bf16.msra.mxu1 %v6205_v53 }
  0xe7   :  { %5532 = vmatprep.subr.bf16.mxu1 %v6206_v54 }
  0xea   :  { %5533 = vmatpush3.bf16.msra.mxu1 %v6207_v57 }
  0xeb   :  { %5534 = vmatprep.subr.bf16.mxu1 %v6208_v59 }
  0xee   :  { %5535 = vmatpush3.bf16.msra.mxu1 %v6209_v61 }
  0xef   :  { %5536 = vmatprep.subr.bf16.mxu1 %v6210_v62 }
  0xf2   :  { %5537 = vmatpush3.bf16.msra.mxu1 %v6211_v63 }
  0xf3   :  { %5538 = vmatprep.subr.bf16.mxu1 %v6212_v2  ;;  %v5052_v2 = vld [vmem:[%s7350_s2 + $0xa] sm:$0x3]  ;;  %s6574_s2 = smov 120  }
  0xf6   :  { %5539 = vmatpush3.bf16.msra.mxu1 %v6213_v5 }
  0xf7   :  { %5540 = vmatprep.subr.bf16.mxu1 %v6214_v8  ;;  %v1308_v8 = vrot.slane %v5076_v1, %v6741_v42 }
  0xfa   :  { %5541 = vmatpush3.bf16.msra.mxu1 %v6215_v11 }
  0xfb   :  { %5542 = vmatprep.subr.bf16.mxu1 %v6216_v12  ;;  %v1108_v12 = vrot.slane %v5052_v2, %v6741_v42 }
  0xfe   :  { %5543 = vmatpush3.bf16.msra.mxu1 %v6217_v20 }
  0xff   :  { %5848 = vmatprep.subr.bf16.mxu1 %v6571_v31 }
 0x103   :  { %v244_v46 = vpop.f32.mrf.mxu0 }
 0x104   :  { %v245_v49 = vadd.f32 %v244_v46, %v98_v44 }
 0x105   :  { %v246_v51 = vpop.f32.mrf.mxu0 }
 0x106   :  { %v251_v52 = vmax.f32 %v245_v49, 0.0  ;;  %v247_v15 = vadd.f32 %v246_v51, %v102_v45 }
 0x107   :  { %v248_v55 = vpop.f32.mrf.mxu0 }
 0x108   :  { %v252_v56 = vmax.f32 %v247_v15, 0.0 }
 0x109   :  { %v249_v58 = vpop.f32.mrf.mxu0 }
 0x10a   :  { %v5513_v60 = vpack.c.bf16 %v252_v56, %v251_v52 }
 0x10c   :  { %264 = vst.msk [vmem:[#allocation2] sm:$0xff] %vm263_vm10, %v5513_v60  ;;  %vm6573_vm10 = vmmov 0  }
 0x158   :  { %v646_v10 = vpop.f32.mrf.mxu0 }
 0x159   :  { %v441_v9 = vpop.f32.mrf.mxu1  ;;  %v647_v14 = vadd.f32 %v646_v10, %v496_v4 }
 0x15a   :  { %v442_v13 = vadd.f32 %v441_v9, %v291_v3  ;;  %v648_v17 = vpop.f32.mrf.mxu0  ;;  %v1104_v9 = vrot.slane %v5052_v2, %v6738_v41  ;;  %v6234_v2 = vld [vmem:[#allocation8 + $0x11c] sm:$0xff]  }
 0x15b   :  { %v443_v16 = vpop.f32.mrf.mxu1  ;;  %v649_v19 = vadd.f32 %v648_v17, %v500_v7  ;;  %v653_v24 = vmax.f32 %v647_v14, 0.0  ;;  %v1304_v7 = vrot.slane %v5076_v1, %v6738_v41  ;;  %v6276_v1 = vld [vmem:[#allocation8 + $0x24c] sm:$0xff]  }
 0x15c   :  { %v444_v18 = vadd.f32 %v443_v16, %v295_v6  ;;  %v650_v22 = vpop.f32.mrf.mxu0  ;;  %v448_v23 = vmax.f32 %v442_v13, 0.0 }
 0x15d   :  { %v445_v21 = vpop.f32.mrf.mxu1  ;;  %v654_v26 = vmax.f32 %v649_v19, 0.0  ;;  %v6239_v19 = vld [vmem:[#allocation8 + $0xd4] sm:$0xff]  }
 0x15e   :  { %v449_v25 = vmax.f32 %v444_v18, 0.0  ;;  %v651_v28 = vpop.f32.mrf.mxu0  ;;  %v6237_v18 = vld [vmem:[#allocation8 + $0x114] sm:$0xff]  }
 0x15f   :  { %v446_v27 = vpop.f32.mrf.mxu1  ;;  %v5515_v30 = vpack.c.bf16 %v654_v26, %v653_v24  ;;  %v6222_v22 = vld [vmem:[#allocation8 + $0x98] ss:$0 sps:$4 sm:$0xff]   ;;  %5555 = vmatprep.subr.bf16.mxu0 %v6237_v18  ;;  %v6242_v18 = vld [vmem:[#allocation8 + $0x1a0] sm:$0xff]  }
 0x160   :  { %v5514_v29 = vpack.c.bf16 %v449_v25, %v448_v23  ;;  %5556 = vmatpush3.bf16.msra.mxu0 %v6239_v19 }
 0x161   :  { %662 = vrot.lane.b32.xlu1 %v5515_v30, %s6566_s3  ;;  %5557 = vmatprep.subr.bf16.mxu0 %v6241_v32  ;;  %v6258_v32 = vld [vmem:[#allocation8 + $0x188] sm:$0xff]  }
 0x162   :  { %457 = vrot.lane.b32.xlu0 %v5514_v29, %s6569_s16 }
 0x164   :  { %5558 = vmatpush3.bf16.msra.mxu0 %v6243_v33 }
 0x17c   :  { %v1051_v39 = vpop.f32.mrf.mxu0 }
 0x17d   :  { %v847_v38 = vpop.f32.mrf.mxu1  ;;  %v1052_v43 = vadd.f32 %v1051_v39, %v901_v35  ;;  %v1662_v35 = vsel %vm261_vm8, %v6222_v22, 0  ;;  %v6223_v39 = vld [vmem:[#allocation8 + $0x90] sm:$0xff]  }
 0x17e   :  { %v848_v40 = vadd.f32 %v847_v38, %v697_v34  ;;  %v1053_v45 = vpop.f32.mrf.mxu0  ;;  %v6247_v38 = vld [vmem:[#allocation8 + $0xc4] sm:$0xff]  }
 0x17f   :  { %v849_v44 = vpop.f32.mrf.mxu1  ;;  %v1058_v48 = vmax.f32 %v1052_v43, 0.0  ;;  %v1054_v49 = vadd.f32 %v1053_v45, %v905_v37  ;;  %v6245_v37 = vld [vmem:[#allocation8 + $0x104] sm:$0xff]   ;;  %v6253_v43 = vld [vmem:[#allocation8 + $0xbc] sm:$0xff]   ;;  %v6257_v45 = vld [vmem:[#allocation8 + $0xf4] sm:$0xff]  }
 0x180   :  { %v854_v46 = vmax.f32 %v848_v40, 0.0  ;;  %v850_v47 = vadd.f32 %v849_v44, %v701_v36  ;;  %v1055_v51 = vpop.f32.mrf.mxu0  ;;  %5559 = vmatprep.subr.bf16.mxu0 %v6245_v37  ;;  %v6251_v40 = vld [vmem:[#allocation8 + $0xfc] sm:$0xff]   ;;  %v6224_v44 = vld [vmem:[#allocation8 + $0x88] sm:$0xff]  }
 0x181   :  { %v851_v50 = vpop.f32.mrf.mxu1  ;;  %v1059_v15 = vmax.f32 %v1054_v49, 0.0  ;;  %5560 = vmatpush3.bf16.msra.mxu0 %v6247_v38  ;;  %v6262_v49 = vld [vmem:[#allocation8 + $0xec] sm:$0xff]   ;;  %v6263_v37 = vld [vmem:[#allocation8 + $0x180] sm:$0xff]  }
 0x182   :  { %v855_v52 = vmax.f32 %v850_v47, 0.0  ;;  %v1056_v54 = vpop.f32.mrf.mxu0  ;;  %5561 = vmatprep.subr.bf16.mxu0 %v6251_v40  ;;  %v6225_v47 = vld [vmem:[#allocation8 + $0x80] sm:$0xff]   ;;  %v6264_v50 = vld [vmem:[#allocation8 + $0xac] sm:$0xff]  }
 0x183   :  { %v852_v53 = vpop.f32.mrf.mxu1  ;;  %v5517_v56 = vpack.c.bf16 %v1059_v15, %v1058_v48  ;;  %v6231_v48 = vld [vmem:[#allocation8 + $0x134] ss:$0 sps:$4 sm:$0xff]   ;;  %v6267_v15 = vld [vmem:[#allocation8 + $0xe4] sm:$0xff]   ;;  %v6232_v54 = vld [vmem:[#allocation8 + $0x12c] sm:$0xff]  }
 0x184   :  { %v5516_v55 = vpack.c.bf16 %v855_v52, %v854_v46  ;;  %v6259_v46 = vld [vmem:[#allocation8 + $0xb4] sm:$0xff]   ;;  %v1942_v52 = vsel %vm261_vm8, %v6231_v48, 0  ;;  %v6269_v53 = vld [vmem:[#allocation8 + $0xa4] sm:$0xff]   ;;  %v6275_v48 = vld [vmem:[#allocation8 + $0x1d0] ss:$0 sps:$4 sm:$0xff]  }
 0x185   :  { %1067 = vrot.lane.b32.xlu1 %v5517_v56, %s6564_s18  ;;  %5562 = vmatpush3.bf16.msra.mxu0 %v6253_v43  ;;  %v6265_v38 = vld [vmem:[#allocation8 + $0x140] sm:$0xff]   ;;  %v6268_v43 = vld [vmem:[#allocation8 + $0x178] sm:$0xff]   ;;  %v6277_v56 = vld [vmem:[#allocation8 + $0x1c8] sm:$0xff]  }
 0x186   :  { %863 = vrot.lane.b32.xlu0 %v5516_v55, %s6572_s29  ;;  %5563 = vmatprep.subr.bf16.mxu0 %v6257_v45  ;;  %v6273_v55 = vld [vmem:[#allocation8 + $0xdc] sm:$0xff]  }
 0x187   :  { %v6270_v45 = vld [vmem:[#allocation8 + $0x138] sm:$0xff]  }
 0x189   :  { %5564 = vmatpush3.bf16.msra.mxu0 %v6259_v46 }
 0x18a   :  { %5565 = vmatprep.subr.bf16.mxu0 %v6262_v49 }
 0x18d   :  { %5566 = vmatpush3.bf16.msra.mxu0 %v6264_v50 }
 0x18e   :  { %5567 = vmatprep.subr.bf16.mxu0 %v6267_v15  ;;  %v2226_v15 = vsel %vm261_vm8, %v6275_v48, 0  ;;  %v6314_v48 = vld [vmem:[#allocation8 + $0x2b8] sm:$0xff]  }
 0x191   :  { %5568 = vmatpush3.bf16.msra.mxu0 %v6269_v53 }
 0x192   :  { %5569 = vmatprep.subr.bf16.mxu0 %v6273_v55 }
 0x1a0   :  { %v1454_v58 = vpop.f32.mrf.mxu0 }
 0x1a1   :  { %v1253_v57 = vpop.f32.mrf.mxu1  ;;  %v1455_v13 = vadd.f32 %v1454_v58, %v1304_v7 }
 0x1a2   :  { %v1456_v60 = vpop.f32.mrf.mxu0  ;;  %v1254_v16 = vadd.f32 %v1253_v57, %v1104_v9  ;;  %v6236_v9 = vld [vmem:[#allocation8 + $0x170] sm:$0xff]  }
 0x1a3   :  { %v1255_v59 = vpop.f32.mrf.mxu1  ;;  %v1457_v14 = vadd.f32 %v1456_v60, %v1308_v8  ;;  %v1461_v20 = vmax.f32 %v1455_v13, 0.0 }
 0x1a4   :  { %v1458_v62 = vpop.f32.mrf.mxu0  ;;  %v1256_v17 = vadd.f32 %v1255_v59, %v1108_v12  ;;  %v1260_v23 = vmax.f32 %v1254_v16, 0.0  ;;  %v6238_v12 = vld [vmem:[#allocation8 + $0x1a8] sm:$0xff]  }
 0x1a5   :  { %v1257_v61 = vpop.f32.mrf.mxu1  ;;  %v1462_v21 = vmax.f32 %v1457_v14, 0.0  ;;  %v6274_v62 = vld [vmem:[#allocation8 + $0x9c] sm:$0xff]   ;;  %v6240_v14 = vld [vmem:[#allocation8 + $0x168] sm:$0xff]  }
 0x1a6   :  { %v1459_v0 = vpop.f32.mrf.mxu0  ;;  %v1261_v24 = vmax.f32 %v1256_v17, 0.0  ;;  %v6233_v61 = vld [vmem:[#allocation8 + $0x124] sm:$0xff]   ;;  %5570 = vmatpush3.bf16.msra.mxu0 %v6274_v62 }
 0x1a7   :  { %v1258_v63 = vpop.f32.mrf.mxu1  ;;  %v5519_v34 = vpack.c.bf16 %v1462_v21, %v1461_v20  ;;  %5609 = vmatprep.subr.bf16.mxu0 %v6276_v1  ;;  %v6280_v62 = vld [vmem:[#allocation8 + $0x1c0] sm:$0xff]  }
 0x1a8   :  { %v5518_v36 = vpack.c.bf16 %v1261_v24, %v1260_v23  ;;  %v6244_v23 = vld [vmem:[#allocation8 + $0x160] sm:$0xff]   ;;  %v6246_v24 = vld [vmem:[#allocation8 + $0x198] sm:$0xff]  }
 0x1a9   :  { %v6282_v1 = vld [vmem:[#allocation8 + $0x23c] sm:$0xff]  }
 0x1d3   :  { %v663_v4 = vpop.permute.xlu1 %662 }
 0x1d4   :  { %v458_v3 = vpop.permute.xlu0 %457  ;;  %v664_v6 = vrot.slane %v663_v4, 4 }
 0x1d5   :  { %v459_v5 = vrot.slane %v458_v3, 4 }
 0x1d6   :  { %v665_v11 = vsel %vm7362_vm2, %v664_v6, %v663_v4 }
 0x1d7   :  { %v461_v10 = vsel %vm7365_vm6, %v459_v5, %v458_v3  ;;  %469 = vst.msk [vmem:[#allocation2 + $0xc] sm:$0xf] %vm468_vm0, %v459_v5  ;;  %vm7367_vm0 = vcmask 1043968   ;;  %v6235_v3 = vld [vmem:[#allocation8 + $0x1b0] sm:$0xff]  }
 0x1d8   :  { %467 = vst.msk [vmem:[#allocation2 + $0x4] sm:$0xff] %vm466_vm15, %v461_v10  ;;  %vm870_vm15 = vcmask 1044352   ;;  %vm1074_vm6 = vmor %vm465_vm12, %vm7367_vm0 }
 0x1d9   :  { %670 = vst.msk [vmem:[#allocation2 + $0xc] sm:$0xff] %vm669_vm1, %v665_v11  ;;  %vm866_vm1 = vcmask 916480   ;;  %vm6814_vm2 = vmor %vm465_vm12, %vm870_vm15 }
 0x1df   :  { %v1482_v26 = vld [vmem:[#allocation2] sm:$0xff]  ;;  %v6226_v51 = vld [vmem:[#allocation2 + $0x8] ss:$0 sps:$4 sm:$0xff]  }
 0x1e0   :  { %v1749_v25 = vld [vmem:[#allocation2 + $0x8] sm:$0xff]  ;;  %v5101_v29 = vcombine.low %v1482_v26, %v1482_v26  ;;  %v6790_v30 = vcombine.high %v1482_v26, %v1482_v26  ;;  %v6252_v26 = vld [vmem:[#allocation8 + $0x190] sm:$0xff]  }
 0x1e1   :  { %v5130_v27 = vcombine.high %v1749_v25, %v1749_v25  ;;  %v5129_v28 = vcombine.low %v1749_v25, %v1749_v25  ;;  %v6248_v25 = vld [vmem:[#allocation8 + $0x158] sm:$0xff]  }
 0x1e2   :  { %1696 = vmatprep.mubr.bf16.mxu1 %v6790_v30 }
 0x1e3   :  { %1814 = vrot.lane.b32.xlu1 %v5130_v27, %s6570_s0  ;;  %1812 = vrot.lane.b32.xlu0 %v5129_v28, %s6570_s0 }
 0x1e4   :  { %1697 = vmatmul.mubr.bf16.vlgmr.msra.gmra.mxu1 %v5101_v29 }
 0x1e5   :  { %5849 = vmatpush3.bf16.msra.mxu1 %v1662_v35  ;;  %5856 = vmatprep.mubr.msk.bf16.mxu1 %vm6573_vm10, %v6571_v31 }
 0x1e6   :  { %5850 = vmatprep.subr.bf16.mxu1 %v6571_v31 }
 0x1e7   :  { %1470 = vrot.lane.b32.xlu1 %v5519_v34, %s6574_s2  ;;  %1269 = vrot.lane.b32.xlu0 %v5518_v36, %s6567_s25  ;;  %s6576_s25 = smov 40   ;;  %v6260_v34 = vld [vmem:[#allocation8 + $0x148] sm:$0xff]  }
 0x1e9   :  { %5851 = vmatpush3.bf16.msra.mxu1 %v6223_v39 }
 0x1ea   :  { %5852 = vmatprep.subr.bf16.mxu1 %v6571_v31 }
 0x1eb   :  { %2096 = vrot.lane.b32.xlu0 %v5130_v27, %s6575_s19 }
 0x1ed   :  { %5853 = vmatpush3.bf16.msra.mxu1 %v6224_v44 }
 0x1ee   :  { %5854 = vmatprep.subr.bf16.mxu1 %v6571_v31 }
 0x1ef   :  { %2094 = vrot.lane.b32.xlu0 %v5129_v28, %s6575_s19  ;;  %v6254_v28 = vld [vmem:[#allocation8 + $0x150] sm:$0xff]  }
 0x1f1   :  { %5855 = vmatpush3.bf16.msra.mxu1 %v6225_v47 }
 0x1f2   :  { %5860 = vmatprep.subr.bf16.mxu1 %v6571_v31 }
 0x1f3   :  { %1808 = vrot.lane.b32.xlu0 %v5101_v29, %s6570_s0 }
 0x1f4   :  { %5857 = vmatmul.mubr.msk.bf16.vlgmr.msra.gmra.mxu1 %vm1657_vm14, %v6226_v51 }
 0x1f5   :  { %5861 = vmatpush3.bf16.msra.mxu1 %v1942_v52  ;;  %5868 = vmatprep.mubr.msk.bf16.mxu1 %vm6573_vm10, %v6571_v31 }
 0x1f6   :  { %5862 = vmatprep.subr.bf16.mxu1 %v6571_v31 }
 0x1f7   :  { %v1068_v58 = vpop.permute.xlu1 %1067 }
 0x1f8   :  { %v864_v57 = vpop.permute.xlu0 %863  ;;  %v1069_v60 = vrot.slane %v1068_v58, 4 }
 0x1f9   :  { %v865_v59 = vrot.slane %v864_v57, 4  ;;  %5863 = vmatpush3.bf16.msra.mxu1 %v6232_v54 }
 0x1fa   :  { %5864 = vmatprep.subr.bf16.mxu1 %v6571_v31  ;;  %v1070_v0 = vsel %vm7366_vm5, %v1069_v60, %v1068_v58  ;;  %1077 = vst.msk [vmem:[#allocation2 + $0x20] sm:$0xf] %vm1076_vm4, %v1069_v60  ;;  %vm1275_vm4 = vcmask 785412   ;;  %vm1480_vm5 = vcmask 584704   ;;  %v6279_v60 = vld [vmem:[#allocation8 + $0x244] sm:$0xff]  }
 0x1fb   :  { %v867_v63 = vsel %vm866_vm1, %v865_v59, %v864_v57  ;;  %874 = vst.msk [vmem:[#allocation2 + $0x18] sm:$0xf] %vm873_vm13, %v865_v59  ;;  %vm1473_vm13 = vcmask 982016   ;;  %v6278_v57 = vld [vmem:[#allocation8 + $0x20c] sm:$0xff]  }
 0x1fc   :  { %872 = vst.msk [vmem:[#allocation2 + $0x10] sm:$0xff] %vm6814_vm2, %v867_v63  ;;  %vm1274_vm2 = vcmask 1043584   ;;  %v6281_v63 = vld [vmem:[#allocation8 + $0x204] sm:$0xff]  }
 0x1fd   :  { %1075 = vst.msk [vmem:[#allocation2 + $0x18] sm:$0xff] %vm1074_vm6, %v1070_v0  ;;  %5865 = vmatpush3.bf16.msra.mxu1 %v6233_v61  ;;  %vm1477_vm6 = vcmask 1044416   ;;  %vm1276_vm0 = vmor %vm1275_vm4, %vm1274_vm2  ;;  %vm7372_vm2 = vcmask 654336  }
 0x1fe   :  { %5866 = vmatprep.subr.bf16.mxu1 %v6571_v31  ;;  %vm1478_vm11 = vmor %vm465_vm12, %vm1477_vm6  ;;  %vm2319_vm12 = vcmask 1044224   ;;  %vm2893_vm6 = vcmask 392196  }
 0x201   :  { %5867 = vmatpush3.bf16.msra.mxu1 %v6234_v2 }
 0x202   :  { %5582 = vmatprep.subr.bf16.mxu1 %v6235_v3  ;;  %v6283_v3 = vld [vmem:[#allocation8 + $0x1b8] sm:$0xff]  }
 0x203   :  { %v6227_v4 = vld [vmem:[#allocation2 + $0x10] ss:$0 sps:$4 sm:$0xff]  }
 0x204   :  { %v6229_v5 = vld [vmem:[#allocation2 + $0x18] ss:$0 sps:$4 sm:$0xff]   ;;  %2098 = vrot.lane.b32.xlu1 %v6227_v4, %s6575_s19  ;;  %v2322_v6 = vld [vmem:[#allocation2 + $0x10] sm:$0xff]  ;;  %v6284_v4 = vld [vmem:[#allocation8 + $0x1fc] sm:$0xff]  }
 0x205   :  { %2384 = vrot.lane.b32.xlu0 %v6229_v5, %s6574_s2  ;;  %v5183_v7 = vcombine.high %v2322_v6, %v2322_v6  ;;  %v5182_v8 = vcombine.low %v2322_v6, %v2322_v6  ;;  %v2606_v33 = vld [vmem:[#allocation2 + $0x14] sm:$0xff]  ;;  %v6291_v6 = vld [vmem:[#allocation8 + $0x26c] ss:$0 sps:$4 sm:$0xff]  }
 0x206   :  { %v5209_v35 = vcombine.low %v2606_v33, %v2606_v33  ;;  %v5210_v36 = vcombine.high %v2606_v33, %v2606_v33  ;;  %v6285_v5 = vld [vmem:[#allocation8 + $0x234] sm:$0xff]  }
 0x207   :  { %v6305_v33 = vld [vmem:[#allocation8 + $0x2d0] sm:$0xff]  }
 0x208   :  { %1810 = vrot.lane.b32.xlu1 %v6790_v30, %s6570_s0  ;;  %s6577_s0 = smov 88  }
 0x20c   :  { %2382 = vrot.lane.b32.xlu1 %v5183_v7, %s6574_s2  ;;  %v6286_v7 = vld [vmem:[#allocation8 + $0x1f4] sm:$0xff]  }
 0x210   :  { %2380 = vrot.lane.b32.xlu1 %v5182_v8, %s6574_s2  ;;  %v6287_v8 = vld [vmem:[#allocation8 + $0x22c] sm:$0xff]  }
 0x255   :  { %v1815_v10 = vpop.permute.xlu1 %1814  ;;  %v6832_v11 = vpop.permute.xlu0 %1812 }
 0x256   :  { %v1818_v13 = vsel %vm1320_vm7, %v6832_v11, %v1815_v10  ;;  %v6288_v10 = vld [vmem:[#allocation8 + $0x1ec] sm:$0xff]  }
 0x257   :  { %5869 = vmatmul.mubr.msk.bf16.vlgmr.msra.gmra.mxu1 %vm1657_vm14, %v1818_v13  ;;  %v6290_v13 = vld [vmem:[#allocation8 + $0x1e4] sm:$0xff]  }
 0x258   :  { %5583 = vmatpush3.bf16.msra.mxu1 %v6236_v9  ;;  %v2511_v9 = vsel %vm261_vm8, %v6291_v6, 0  ;;  %v6324_v6 = vld [vmem:[#allocation8 + $0x374] sm:$0xff]  }
 0x259   :  { %v1471_v16 = vpop.permute.xlu1 %1470  ;;  %v1270_v17 = vpop.permute.xlu0 %1269  ;;  %5584 = vmatprep.subr.bf16.mxu1 %v6238_v12  ;;  %v6289_v12 = vld [vmem:[#allocation8 + $0x224] sm:$0xff]  }
 0x25a   :  { %v1472_v19 = vrot.slane %v1471_v16, 4  ;;  %v1271_v20 = vrot.slane %v1270_v17, 4 }
 0x25c   :  { %v1474_v21 = vsel %vm1473_vm13, %v1472_v19, %v1471_v16  ;;  %1481 = vst.msk [vmem:[#allocation2 + $0x28] sm:$0xf] %vm1480_vm5, %v1472_v19  ;;  %v1272_v22 = vsel %vm307_vm3, %v1271_v20, %v1270_v17  ;;  %5585 = vmatpush3.bf16.msra.mxu1 %v6240_v14  ;;  %vm2100_vm3 = vcmask 588800   ;;  %v6297_v14 = vld [vmem:[#allocation8 + $0x25c] sm:$0xff]   ;;  %v6295_v19 = vld [vmem:[#allocation8 + $0x214] sm:$0xff]   ;;  %v6299_v20 = vld [vmem:[#allocation8 + $0x2e8] sm:$0xff]  }
 0x25d   :  { %1277 = vst.msk [vmem:[#allocation2 + $0x20] sm:$0xff] %vm1276_vm0, %v1272_v22  ;;  %5586 = vmatprep.subr.bf16.mxu1 %v6242_v18  ;;  %v2097_v39 = vpop.permute.xlu0 %2096  ;;  %v6292_v16 = vld [vmem:[#allocation8 + $0x21c] sm:$0xff]   ;;  %v6298_v18 = vld [vmem:[#allocation8 + $0x254] sm:$0xff]   ;;  %v6300_v22 = vld [vmem:[#allocation8 + $0x2a8] sm:$0xff]   ;;  %vm1746_vm5 = vcmask 912384  }
 0x25e   :  { %1479 = vst.msk [vmem:[#allocation2 + $0x20] sm:$0xff] %vm1478_vm11, %v1474_v21  ;;  %v6293_v17 = vld [vmem:[#allocation8 + $0x1dc] sm:$0xff]   ;;  %v6296_v21 = vld [vmem:[#allocation8 + $0x1d4] sm:$0xff]   ;;  %vm2960_vm11 = vcmask 719872   ;;  %vm2320_vm0 = vmor %vm262_vm9, %vm2319_vm12  ;;  %vm2603_vm9 = vcmask 523268  }
 0x260   :  { %5587 = vmatpush3.bf16.msra.mxu1 %v6244_v23 }
 0x261   :  { %5588 = vmatprep.subr.bf16.mxu1 %v6246_v24  ;;  %v2095_v47 = vpop.permute.xlu0 %2094  ;;  %v6301_v24 = vld [vmem:[#allocation8 + $0x2e0] sm:$0xff]  }
 0x262   :  { %v2101_v53 = vsel %vm2100_vm3, %v2095_v47, %v2097_v39  ;;  %v6313_v47 = vld [vmem:[#allocation8 + $0x280] sm:$0xff]  }
 0x263   :  { %v6272_v50 = vld [vmem:[#allocation2 + $0x28] ss:$0 sps:$4 sm:$0xff]  }
 0x264   :  { %5589 = vmatpush3.bf16.msra.mxu1 %v6248_v25  ;;  %v6306_v25 = vld [vmem:[#allocation8 + $0x308] ss:$0 sps:$4 sm:$0xff]  }
 0x265   :  { %v2607_v27 = vld [vmem:[#allocation2 + $0x1c] sm:$0xff]  ;;  %5590 = vmatprep.subr.bf16.mxu1 %v6252_v26  ;;  %v6261_v40 = vld [vmem:[#allocation2 + $0x24] ss:$0 sps:$4 sm:$0xff]   ;;  %v1809_v54 = vpop.permute.xlu0 %1808 }
 0x266   :  { %v5212_v29 = vcombine.high %v2607_v27, %v2607_v27  ;;  %v5211_v30 = vcombine.low %v2607_v27, %v2607_v27  ;;  %v3182_v44 = vld [vmem:[#allocation2 + $0x20] sm:$0xff] }
 0x267   :  { %v5265_v46 = vcombine.high %v3182_v44, %v3182_v44  ;;  %v5264_v49 = vcombine.low %v3182_v44, %v3182_v44  ;;  %v6302_v27 = vld [vmem:[#allocation8 + $0x2a0] sm:$0xff]  }
 0x268   :  { %2672 = vrot.lane.b32.xlu1 %v5212_v29, %s6576_s25  ;;  %2670 = vrot.lane.b32.xlu0 %v5211_v30, %s6576_s25  ;;  %v6311_v44 = vld [vmem:[#allocation8 + $0x2c0] sm:$0xff]  }
 0x269   :  { %5591 = vmatpush3.bf16.msra.mxu1 %v6254_v28  ;;  %v6303_v28 = vld [vmem:[#allocation8 + $0x2d8] sm:$0xff]  }
 0x26a   :  { %5592 = vmatprep.subr.bf16.mxu1 %v6258_v32  ;;  %v6309_v32 = vld [vmem:[#allocation8 + $0x300] sm:$0xff]  }
 0x26c   :  { %2666 = vrot.lane.b32.xlu1 %v5209_v35, %s6576_s25  ;;  %2668 = vrot.lane.b32.xlu0 %v5210_v36, %s6576_s25  ;;  %v6312_v35 = vld [vmem:[#allocation8 + $0x2f8] sm:$0xff]  }
 0x26d   :  { %5593 = vmatpush3.bf16.msra.mxu1 %v6260_v34  ;;  %v6307_v34 = vld [vmem:[#allocation8 + $0x290] sm:$0xff]  }
 0x26e   :  { %5594 = vmatprep.subr.bf16.mxu1 %v6263_v37  ;;  %v6308_v37 = vld [vmem:[#allocation8 + $0x2c8] sm:$0xff]  }
 0x270   :  { %2958 = vrot.lane.b32.xlu1 %v6261_v40, %s6577_s0  ;;  %2956 = vrot.lane.b32.xlu0 %v5212_v29, %s6577_s0  ;;  %v2801_v29 = vsel %vm261_vm8, %v6306_v25, 0  ;;  %v6315_v40 = vld [vmem:[#allocation8 + $0x2f0] sm:$0xff]   ;;  %v6334_v25 = vld [vmem:[#allocation8 + $0x31c] sm:$0xff]  }
 0x271   :  { %5595 = vmatpush3.bf16.msra.mxu1 %v6265_v38 }
 0x272   :  { %5596 = vmatprep.subr.bf16.mxu1 %v6268_v43 }
 0x274   :  { %3242 = vrot.lane.b32.xlu1 %v5265_v46, %s6572_s29  ;;  %2954 = vrot.lane.b32.xlu0 %v5211_v30, %s6577_s0  ;;  %v6304_v30 = vld [vmem:[#allocation8 + $0x298] sm:$0xff]  }
 0x275   :  { %5597 = vmatpush3.bf16.msra.mxu1 %v6270_v45  ;;  %v6317_v45 = vld [vmem:[#allocation8 + $0x384] sm:$0xff]  }
 0x276   :  { %5872 = vmatprep.subr.bf16.mxu1 %v6571_v31  ;;  %v2099_v51 = vpop.permute.xlu1 %2098 }
 0x277   :  { %v2102_v52 = vsel %vm2100_vm3, %v2097_v39, %v2099_v51  ;;  %v2385_v61 = vpop.permute.xlu0 %2384  ;;  %v6310_v39 = vld [vmem:[#allocation8 + $0x288] sm:$0xff]  }
 0x278   :  { %3240 = vrot.lane.b32.xlu1 %v5264_v49, %s6572_s29  ;;  %3244 = vrot.lane.b32.xlu0 %v6272_v50, %s6572_s29  ;;  %v6316_v50 = vld [vmem:[#allocation8 + $0x278] sm:$0xff]  }
 0x279   :  { %2260 = vmatprep.mubr.bf16.mxu1 %v2102_v52  ;;  %v6318_v52 = vld [vmem:[#allocation8 + $0x2b0] sm:$0xff]  }
 0x27a   :  { %2261 = vmatmul.mubr.bf16.vlgmr.msra.gmra.mxu1 %v2101_v53  ;;  %v1811_v55 = vpop.permute.xlu1 %1810  ;;  %v6320_v53 = vld [vmem:[#allocation8 + $0x270] sm:$0xff]  }
 0x27b   :  { %5873 = vmatpush3.bf16.msra.mxu1 %v2226_v15  ;;  %5880 = vmatprep.mubr.msk.bf16.mxu1 %vm6573_vm10, %v6571_v31  ;;  %v1816_v58 = vsel %vm1320_vm7, %v1809_v54, %v1811_v55  ;;  %v1817_v59 = vsel %vm1320_vm7, %v1811_v55, %v6832_v11  ;;  %v6294_v11 = vld [vmem:[#allocation8 + $0x264] sm:$0xff]   ;;  %vm2674_vm7 = vcmask 326656  }
 0x27c   :  { %5874 = vmatprep.subr.bf16.mxu1 %v6571_v31  ;;  %1976 = vmatprep.mubr.bf16.mxu0 %v1817_v59 }
 0x27d   :  { %1977 = vmatmul.mubr.bf16.vlgmr.msra.gmra.mxu0 %v1816_v58 }
 0x27e   :  { %5610 = vmatpush3.bf16.msra.mxu0 %v6278_v57  ;;  %v2383_v0 = vpop.permute.xlu1 %2382 }
 0x27f   :  { %5875 = vmatpush3.bf16.msra.mxu1 %v6277_v56  ;;  %5611 = vmatprep.subr.bf16.mxu0 %v6279_v60  ;;  %v2387_v2 = vsel %vm1473_vm13, %v2383_v0, %v2385_v61 }
 0x280   :  { %5876 = vmatprep.subr.bf16.mxu1 %v6571_v31  ;;  %2545 = vmatprep.mubr.bf16.mxu0 %v2387_v2  ;;  %v6323_v2 = vld [vmem:[#allocation8 + $0x3a4] ss:$0 sps:$4 sm:$0xff]  }
 0x282   :  { %5612 = vmatpush3.bf16.msra.mxu0 %v6281_v63  ;;  %v2381_v23 = vpop.permute.xlu1 %2380 }
 0x283   :  { %5877 = vmatpush3.bf16.msra.mxu1 %v6280_v62  ;;  %5613 = vmatprep.subr.bf16.mxu0 %v6282_v1  ;;  %v2386_v26 = vsel %vm1473_vm13, %v2381_v23, %v2383_v0  ;;  %v6321_v0 = vld [vmem:[#allocation8 + $0x37c] sm:$0xff]   ;;  %vm7374_vm13 = vcmask 1043968  }
 0x284   :  { %5878 = vmatprep.subr.bf16.mxu1 %v6571_v31  ;;  %v6333_v23 = vld [vmem:[#allocation8 + $0x35c] sm:$0xff]   ;;  %vm2894_vm3 = vmor %vm2893_vm6, %vm7374_vm13  ;;  %vm3739_vm6 = vcmask 781312  }
 0x286   :  { %5614 = vmatpush3.bf16.msra.mxu0 %v6284_v4 }
 0x287   :  { %5879 = vmatpush3.bf16.msra.mxu1 %v6283_v3  ;;  %5615 = vmatprep.subr.bf16.mxu0 %v6285_v5  ;;  %v6322_v3 = vld [vmem:[#allocation8 + $0x33c] sm:$0xff]  }
 0x288   :  { %5884 = vmatprep.subr.bf16.mxu1 %v6571_v31 }
 0x28a   :  { %5881 = vmatmul.mubr.msk.bf16.vlgmr.msra.gmra.mxu1 %vm1657_vm14, %v2099_v51  ;;  %5616 = vmatpush3.bf16.msra.mxu0 %v6286_v7  ;;  %v5100_v51 = vld [vmem:[%s7352_s4] ss:$0 sm:$0xff] }
 0x28b   :  { %5885 = vmatpush3.bf16.msra.mxu1 %v2511_v9  ;;  %5617 = vmatprep.subr.bf16.mxu0 %v6287_v8  ;;  %v3086_v9 = vsel %vm261_vm8, %v6323_v2, 0  ;;  %v6363_v2 = vld [vmem:[%s7353_s5 + $0x68] sm:$0xff]  }
 0x28c   :  { %5886 = vmatprep.subr.bf16.mxu1 %v6571_v31  ;;  %5892 = vmatprep.mubr.msk.bf16.mxu1 %vm6573_vm10, %v6571_v31 }
 0x28e   :  { %5618 = vmatpush3.bf16.msra.mxu0 %v6288_v10  ;;  %v6325_v10 = vld [vmem:[#allocation8 + $0x334] sm:$0xff]  }
 0x28f   :  { %5887 = vmatpush3.bf16.msra.mxu1 %v6294_v11  ;;  %5619 = vmatprep.subr.bf16.mxu0 %v6289_v12 }
 0x290   :  { %5888 = vmatprep.subr.bf16.mxu1 %v6571_v31 }
 0x292   :  { %5620 = vmatpush3.bf16.msra.mxu0 %v6290_v13  ;;  %v6326_v13 = vld [vmem:[#allocation8 + $0x39c] sm:$0xff]  }
 0x293   :  { %5889 = vmatpush3.bf16.msra.mxu1 %v6297_v14  ;;  %5621 = vmatprep.subr.bf16.mxu0 %v6292_v16  ;;  %v6327_v14 = vld [vmem:[#allocation8 + $0x36c] sm:$0xff]  }
 0x294   :  { %5890 = vmatprep.subr.bf16.mxu1 %v6571_v31 }
 0x296   :  { %5622 = vmatpush3.bf16.msra.mxu0 %v6293_v17  ;;  %v6328_v17 = vld [vmem:[#allocation8 + $0x32c] sm:$0xff]  }
 0x297   :  { %5891 = vmatpush3.bf16.msra.mxu1 %v6298_v18  ;;  %5623 = vmatprep.subr.bf16.mxu0 %v6295_v19  ;;  %v6329_v18 = vld [vmem:[#allocation8 + $0x394] sm:$0xff]   ;;  %v6330_v19 = vld [vmem:[#allocation8 + $0x364] sm:$0xff]  }
 0x298   :  { %5636 = vmatprep.subr.bf16.mxu1 %v6299_v20 }
 0x29a   :  { %5893 = vmatmul.mubr.msk.bf16.vlgmr.msra.gmra.mxu1 %vm1657_vm14, %v2385_v61  ;;  %5624 = vmatpush3.bf16.msra.mxu0 %v6296_v21  ;;  %v6319_v61 = vld [vmem:[#allocation8 + $0x344] sm:$0xff]  }
 0x29b   :  { %5637 = vmatpush3.bf16.msra.mxu1 %v6300_v22  ;;  %5896 = vmatprep.subr.bf16.mxu0 %v6571_v31  ;;  %v6331_v21 = vld [vmem:[#allocation8 + $0x324] sm:$0xff]   ;;  %v6332_v22 = vld [vmem:[#allocation8 + $0x38c] sm:$0xff]  }
 0x29c   :  { %5638 = vmatprep.subr.bf16.mxu1 %v6301_v24  ;;  %v6335_v24 = vld [vmem:[#allocation8 + $0x420] sm:$0xff]  }
 0x29d   :  { %2546 = vmatmul.mubr.bf16.vlgmr.msra.gmra.mxu0 %v2386_v26 }
 0x29e   :  { %5897 = vmatpush3.bf16.msra.mxu0 %v2801_v29  ;;  %5904 = vmatprep.mubr.msk.bf16.mxu0 %vm6573_vm10, %v6571_v31  ;;  %v6339_v29 = vld [vmem:[#allocation8 + $0x418] sm:$0xff]  }
 0x29f   :  { %5639 = vmatpush3.bf16.msra.mxu1 %v6302_v27  ;;  %5898 = vmatprep.subr.bf16.mxu0 %v6571_v31  ;;  %v6336_v27 = vld [vmem:[#allocation8 + $0x3e0] sm:$0xff]  }
 0x2a0   :  { %5640 = vmatprep.subr.bf16.mxu1 %v6303_v28  ;;  %v6337_v28 = vld [vmem:[#allocation8 + $0x354] sm:$0xff]  }
 0x2a2   :  { %5899 = vmatpush3.bf16.msra.mxu0 %v6309_v32 }
 0x2a3   :  { %5641 = vmatpush3.bf16.msra.mxu1 %v6304_v30  ;;  %5900 = vmatprep.subr.bf16.mxu0 %v6571_v31 }
 0x2a4   :  { %v5544_v36 = vpop.f32.mrf.mxu1  ;;  %5642 = vmatprep.subr.bf16.mxu1 %v6305_v33  ;;  %v6338_v33 = vld [vmem:[#allocation8 + $0x314] sm:$0xff]  }
 0x2a6   :  { %v5545_v38 = vpop.f32.mrf.mxu1  ;;  %5901 = vmatpush3.bf16.msra.mxu0 %v6312_v35  ;;  %v6341_v35 = vld [vmem:[#allocation8 + $0x34c] sm:$0xff]  }
 0x2a7   :  { %5643 = vmatpush3.bf16.msra.mxu1 %v6307_v34  ;;  %5902 = vmatprep.subr.bf16.mxu0 %v6571_v31  ;;  %v5546_v49 = vadd.f32 %v5545_v38, %v5544_v36  ;;  %v6340_v34 = vld [vmem:[#allocation8 + $0x3d8] sm:$0xff]   ;;  %v6343_v36 = vld [vmem:[#allocation8 + $0x410] sm:$0xff]  }
 0x2a8   :  { %v5547_v43 = vpop.f32.mrf.mxu1  ;;  %5644 = vmatprep.subr.bf16.mxu1 %v6308_v37  ;;  %v6342_v37 = vld [vmem:[#allocation8 + $0x30c] sm:$0xff]  }
 0x2a9   :  { %v1699_v15 = vadd.f32 %v5546_v49, %v5100_v51  ;;  %v6344_v38 = vld [vmem:[#allocation8 + $0x3d0] sm:$0xff]   ;;  %v6351_v49 = vld [vmem:[#allocation8 + $0x3f8] sm:$0xff]  }
 0x2aa   :  { %v5548_v46 = vpop.f32.mrf.mxu1  ;;  %5903 = vmatpush3.bf16.msra.mxu0 %v6315_v40  ;;  %v6345_v40 = vld [vmem:[#allocation8 + $0x408] sm:$0xff]   ;;  %v6353_v51 = vld [vmem:[#allocation8 + $0x3b8] sm:$0xff]  }
 0x2ab   :  { %5645 = vmatpush3.bf16.msra.mxu1 %v6310_v39  ;;  %5663 = vmatprep.subr.bf16.mxu0 %v6317_v45  ;;  %v6346_v39 = vld [vmem:[#allocation8 + $0x440] ss:$0 sps:$4 sm:$0xff]  }
 0x2ac   :  { %5646 = vmatprep.subr.bf16.mxu1 %v6311_v44  ;;  %v3371_v43 = vsel %vm261_vm8, %v6346_v39, 0  ;;  %v6347_v44 = vld [vmem:[#allocation8 + $0x3c8] sm:$0xff]   ;;  %v6348_v46 = vld [vmem:[#allocation8 + $0x400] sm:$0xff]   ;;  %vm2034_vm8 = vmor %vm1275_vm4, %vm870_vm15  ;;  %vm7371_vm15 = vcmask 1044096  }
 0x2ad   :  { %vm7373_vm4 = vmmov %vm7372_vm2 }
 0x2af   :  { %5647 = vmatpush3.bf16.msra.mxu1 %v6313_v47  ;;  %v6349_v47 = vld [vmem:[#allocation8 + $0x438] sm:$0xff]  }
 0x2b0   :  { %5648 = vmatprep.subr.bf16.mxu1 %v6314_v48  ;;  %v6350_v48 = vld [vmem:[#allocation8 + $0x3c0] sm:$0xff]  }
 0x2b3   :  { %5649 = vmatpush3.bf16.msra.mxu1 %v6316_v50  ;;  %v6352_v50 = vld [vmem:[#allocation8 + $0x430] sm:$0xff]  }
 0x2b4   :  { %v1738_v54 = vpop.f32.mrf.mxu1  ;;  %5650 = vmatprep.subr.bf16.mxu1 %v6318_v52  ;;  %v6354_v52 = vld [vmem:[#allocation8 + $0x3f0] sm:$0xff]  }
 0x2b5   :  { %v1739_v55 = vadd.f32 %v1738_v54, %v1699_v15  ;;  %v6355_v15 = vld [vmem:[#allocation8 + $0x428] sm:$0xff]  }
 0x2b6   :  { %v5858_v56 = vpop.f32.mrf.mxu1  ;;  %v6357_v54 = vld [vmem:[#allocation8 + $0x3e8] sm:$0xff]  }
 0x2b7   :  { %v1744_v57 = vmax.f32 %v1739_v55, 0.0  ;;  %5651 = vmatpush3.bf16.msra.mxu1 %v6320_v53  ;;  %v6356_v53 = vld [vmem:[#allocation8 + $0x3b0] sm:$0xff]   ;;  %v6358_v55 = vld [vmem:[#allocation8 + $0x3a8] sm:$0xff]  }
 0x2b8   :  { %v1741_v58 = vpop.f32.mrf.mxu1  ;;  %5908 = vmatprep.subr.bf16.mxu1 %v6571_v31 }
 0x2b9   :  { %v1745_v59 = vpack.c.bf16 %v1744_v57, %v1744_v57 }
 0x2ba   :  { %v5859_v60 = vpop.f32.mrf.mxu1 }
 0x2bb   :  { %1747 = vst.msk [vmem:[#allocation3] sm:$0xf] %vm1746_vm5, %v1745_v59  ;;  %vm7375_vm5 = vcmask 523264  }
 0x2da   :  { %v2673_v62 = vpop.permute.xlu1 %2672  ;;  %v2671_v63 = vpop.permute.xlu0 %2670 }
 0x2db   :  { %v2677_v1 = vsel %vm2674_vm7, %v2671_v63, %v2673_v62  ;;  %v6359_v62 = vld [vmem:[%s7353_s5 + $0x78] sm:$0xff]  }
 0x2dc   :  { %5905 = vmatmul.mubr.msk.bf16.vlgmr.msra.gmra.mxu0 %vm1657_vm14, %v2677_v1  ;;  %v6362_v1 = vld [vmem:[%s7353_s5 + $0x30] sm:$0xff]  }
 0x2dd   :  { %5664 = vmatpush3.bf16.msra.mxu0 %v6319_v61 }
 0x2de   :  { %v2667_v4 = vpop.permute.xlu1 %2666  ;;  %v2669_v5 = vpop.permute.xlu0 %2668  ;;  %5665 = vmatprep.subr.bf16.mxu0 %v6321_v0  ;;  %v6361_v0 = vld [vmem:[%s7353_s5 + $0x70] sm:$0xff]  }
 0x2df   :  { %v2675_v7 = vsel %vm2674_vm7, %v2667_v4, %v2669_v5  ;;  %v2676_v8 = vsel %vm2674_vm7, %v2669_v5, %v2671_v63  ;;  %v6360_v63 = vld [vmem:[%s7353_s5 + $0x38] sm:$0xff]   ;;  %vm3178_vm7 = vcmask 1043840  }
 0x2e0   :  { %2835 = vmatprep.mubr.bf16.mxu1 %v2676_v8 }
 0x2e1   :  { %5666 = vmatpush3.bf16.msra.mxu0 %v6322_v3  ;;  %2836 = vmatmul.mubr.bf16.vlgmr.msra.gmra.mxu1 %v2675_v7  ;;  %v6364_v3 = vld [vmem:[%s7353_s5 + $0x28] sm:$0xff]   ;;  %v6366_v7 = vld [vmem:[%s7353_s5 + $0x20] sm:$0xff]  }
 0x2e2   :  { %5909 = vmatpush3.bf16.msra.mxu1 %v3086_v9  ;;  %v2959_v11 = vpop.permute.xlu1 %2958  ;;  %v2957_v12 = vpop.permute.xlu0 %2956  ;;  %5667 = vmatprep.subr.bf16.mxu0 %v6324_v6  ;;  %v6365_v6 = vld [vmem:[%s7353_s5 + $0x60] sm:$0xff]  }
 0x2e3   :  { %v2962_v16 = vsel %vm2960_vm11, %v2957_v12, %v2959_v11  ;;  %5910 = vmatprep.subr.bf16.mxu1 %v6571_v31  ;;  %5916 = vmatprep.mubr.msk.bf16.mxu1 %vm6573_vm10, %v6571_v31 }
 0x2e4   :  { %3120 = vmatprep.mubr.bf16.mxu0 %v2962_v16  ;;  %v6368_v16 = vld [vmem:[%s7353_s5 + $0x18] sm:$0xff]  }
 0x2e5   :  { %5668 = vmatpush3.bf16.msra.mxu0 %v6325_v10  ;;  %v5126_v10 = vld [vmem:[%s7352_s4 + $0x1] ss:$0 sm:$0xff] }
 0x2e6   :  { %5911 = vmatpush3.bf16.msra.mxu1 %v6326_v13  ;;  %5669 = vmatprep.subr.bf16.mxu0 %v6327_v14  ;;  %v2955_v20 = vpop.permute.xlu0 %2954  ;;  %v3243_v30 = vpop.permute.xlu1 %3242  ;;  %v6367_v13 = vld [vmem:[%s7353_s5 + $0x58] sm:$0xff]  }
 0x2e7   :  { %5912 = vmatprep.subr.bf16.mxu1 %v6571_v31  ;;  %v2961_v45 = vsel %vm2960_vm11, %v2955_v20, %v2957_v12  ;;  %v6369_v20 = vld [vmem:[%s7353_s5 + $0x50] sm:$0xff]   ;;  %vm3179_vm11 = vcmask 261124  }
 0x2e9   :  { %5670 = vmatpush3.bf16.msra.mxu0 %v6328_v17 }
 0x2ea   :  { %5913 = vmatpush3.bf16.msra.mxu1 %v6329_v18  ;;  %5671 = vmatprep.subr.bf16.mxu0 %v6330_v19  ;;  %v3245_v26 = vpop.permute.xlu0 %3244  ;;  %v3241_v56 = vpop.permute.xlu1 %3240 }
 0x2eb   :  { %5914 = vmatprep.subr.bf16.mxu1 %v6571_v31  ;;  %v3247_v32 = vsel %vm866_vm1, %v3243_v30, %v3245_v26  ;;  %v3246_v57 = vsel %vm866_vm1, %v3241_v56, %v3243_v30 }
 0x2ed   :  { %5672 = vmatpush3.bf16.msra.mxu0 %v6331_v21 }
 0x2ee   :  { %5915 = vmatpush3.bf16.msra.mxu1 %v6332_v22  ;;  %5673 = vmatprep.subr.bf16.mxu0 %v6333_v23  ;;  %v6370_v23 = vld [vmem:[%s7353_s5 + $0x10] sm:$0xff]  }
 0x2ef   :  { %5690 = vmatprep.subr.bf16.mxu1 %v6335_v24  ;;  %v5154_v24 = vld [vmem:[%s7352_s4 + $0x2] ss:$0 sm:$0xff] }
 0x2f1   :  { %5674 = vmatpush3.bf16.msra.mxu0 %v6334_v25  ;;  %5917 = vmatmul.mubr.msk.bf16.vlgmr.msra.gmra.mxu1 %vm1657_vm14, %v2959_v11 }
 0x2f2   :  { %5691 = vmatpush3.bf16.msra.mxu1 %v6336_v27  ;;  %3405 = vmatprep.mubr.bf16.mxu1 %v3247_v32 }
 0x2f3   :  { %5675 = vmatprep.subr.bf16.mxu0 %v6337_v28  ;;  %5692 = vmatprep.subr.bf16.mxu1 %v6339_v29  ;;  %v6372_v29 = vld [vmem:[%s7353_s5 + $0x8] sm:$0xff]  }
 0x2f5   :  { %5676 = vmatpush3.bf16.msra.mxu0 %v6338_v33 }
 0x2f6   :  { %5693 = vmatpush3.bf16.msra.mxu1 %v6340_v34  ;;  %5677 = vmatprep.subr.bf16.mxu0 %v6341_v35  ;;  %v6373_v34 = vld [vmem:[%s7353_s5 + $0x40] sm:$0xff]  }
 0x2f7   :  { %5694 = vmatprep.subr.bf16.mxu1 %v6343_v36  ;;  %v6374_v36 = vld [vmem:[%s7353_s5] sm:$0xff]  }
 0x2f9   :  { %5678 = vmatpush3.bf16.msra.mxu0 %v6342_v37 }
 0x2fa   :  { %5695 = vmatpush3.bf16.msra.mxu1 %v6344_v38  ;;  %5920 = vmatprep.subr.bf16.mxu0 %v6571_v31 }
 0x2fb   :  { %5696 = vmatprep.subr.bf16.mxu1 %v6345_v40  ;;  %v6377_v40 = vld [vmem:[%s7353_s5 + $0xa0] sm:$0xff]  }
 0x2fc   :  { %3121 = vmatmul.mubr.bf16.vlgmr.msra.gmra.mxu0 %v2961_v45 }
 0x2fd   :  { %5921 = vmatpush3.bf16.msra.mxu0 %v3371_v43  ;;  %5928 = vmatprep.mubr.msk.bf16.mxu0 %vm6573_vm10, %v6571_v31  ;;  %v6378_v43 = vld [vmem:[%s7353_s5 + $0x98] sm:$0xff]  }
 0x2fe   :  { %5697 = vmatpush3.bf16.msra.mxu1 %v6347_v44  ;;  %5922 = vmatprep.subr.bf16.mxu0 %v6571_v31 }
 0x2ff   :  { %5698 = vmatprep.subr.bf16.mxu1 %v6348_v46  ;;  %v6379_v46 = vld [vmem:[%s7353_s5 + $0x90] sm:$0xff]  }
 0x301   :  { %5923 = vmatpush3.bf16.msra.mxu0 %v6349_v47 }
 0x302   :  { %5699 = vmatpush3.bf16.msra.mxu1 %v6350_v48  ;;  %5924 = vmatprep.subr.bf16.mxu0 %v6571_v31 }
 0x303   :  { %5700 = vmatprep.subr.bf16.mxu1 %v6351_v49 }
 0x305   :  { %5925 = vmatpush3.bf16.msra.mxu0 %v6352_v50  ;;  %v5181_v50 = vld [vmem:[%s7352_s4 + $0x3] ss:$0 sm:$0xff] }
 0x306   :  { %5701 = vmatpush3.bf16.msra.mxu1 %v6353_v51  ;;  %5926 = vmatprep.subr.bf16.mxu0 %v6571_v31 }
 0x307   :  { %5702 = vmatprep.subr.bf16.mxu1 %v6354_v52 }
 0x309   :  { %5927 = vmatpush3.bf16.msra.mxu0 %v6355_v15  ;;  %v6380_v15 = vld [vmem:[%s7353_s5 + $0x88] sm:$0xff]  }
 0x30a   :  { %5703 = vmatpush3.bf16.msra.mxu1 %v6356_v53  ;;  %5717 = vmatprep.subr.bf16.mxu0 %v6359_v62 }
 0x30b   :  { %5704 = vmatprep.subr.bf16.mxu1 %v6357_v54 }
 0x30c   :  { %5929 = vmatmul.mubr.msk.bf16.vlgmr.msra.gmra.mxu0 %vm1657_vm14, %v3245_v26  ;;  %v6371_v26 = vld [vmem:[%s7353_s5 + $0x48] sm:$0xff]   ;;  %vm2316_vm14 = vcmask 785408  }
 0x30d   :  { %5718 = vmatpush3.bf16.msra.mxu0 %v6360_v63 }
 0x30e   :  { %5705 = vmatpush3.bf16.msra.mxu1 %v6358_v55  ;;  %5719 = vmatprep.subr.bf16.mxu0 %v6361_v0  ;;  %v6381_v55 = vld [vmem:[%s7353_s5 + $0x80] sm:$0xff]  }
 0x30f   :  { %5932 = vmatprep.subr.bf16.mxu1 %v6571_v31 }
 0x311   :  { %3406 = vmatmul.mubr.bf16.vlgmr.msra.gmra.mxu1 %v3246_v57  ;;  %5720 = vmatpush3.bf16.msra.mxu0 %v6362_v1  ;;  %v5208_v1 = vld [vmem:[%s7352_s4 + $0x4] ss:$0 sm:$0xff] }
 0x312   :  { %5942 = vmatprep.mubr.msk.bf16.mxu1 %vm6573_vm10, %v6571_v31  ;;  %5721 = vmatprep.subr.bf16.mxu0 %v6363_v2 }
 0x313   :  { %5933 = vmatpush3.bf16.msra.mxu1 %v6377_v40  ;;  %v5263_v40 = vld [vmem:[%s7352_s4 + $0x6] ss:$0 sm:$0xff] }
 0x314   :  { %5934 = vmatprep.subr.bf16.mxu1 %v6571_v31 }
 0x315   :  { %5722 = vmatpush3.bf16.msra.mxu0 %v6364_v3 }
 0x316   :  { %5723 = vmatprep.subr.bf16.mxu0 %v6365_v6 }
 0x317   :  { %v2018_v58 = vpop.f32.mrf.mxu1  ;;  %5935 = vmatpush3.bf16.msra.mxu1 %v6378_v43 }
 0x318   :  { %5936 = vmatprep.subr.bf16.mxu1 %v6571_v31 }
 0x319   :  { %v5870_v59 = vpop.f32.mrf.mxu1  ;;  %5724 = vmatpush3.bf16.msra.mxu0 %v6366_v7 }
 0x31a   :  { %5725 = vmatprep.subr.bf16.mxu0 %v6367_v13 }
 0x31b   :  { %v2021_v60 = vpop.f32.mrf.mxu1  ;;  %5937 = vmatpush3.bf16.msra.mxu1 %v6379_v46 }
 0x31c   :  { %5938 = vmatprep.subr.bf16.mxu1 %v6571_v31 }
 0x31d   :  { %v5871_v61 = vpop.f32.mrf.mxu1  ;;  %5726 = vmatpush3.bf16.msra.mxu0 %v6368_v16  ;;  %v5236_v16 = vld [vmem:[%s7352_s4 + $0x5] ss:$0 sm:$0xff] }
 0x31e   :  { %5727 = vmatprep.subr.bf16.mxu0 %v6369_v20 }
 0x31f   :  { %5939 = vmatpush3.bf16.msra.mxu1 %v6380_v15 }
 0x320   :  { %5940 = vmatprep.subr.bf16.mxu1 %v6571_v31 }
 0x321   :  { %5728 = vmatpush3.bf16.msra.mxu0 %v6370_v23 }
 0x322   :  { %5729 = vmatprep.subr.bf16.mxu0 %v6371_v26 }
 0x323   :  { %5941 = vmatpush3.bf16.msra.mxu1 %v6381_v55  ;;  %v6390_v55 = vld [vmem:[%s7353_s5 + $0xe0] sm:$0xff]  }
 0x324   :  { %5946 = vmatprep.subr.bf16.mxu1 %v6571_v31 }
 0x325   :  { %5730 = vmatpush3.bf16.msra.mxu0 %v6372_v29 }
 0x326   :  { %5731 = vmatprep.subr.bf16.mxu0 %v6373_v34 }
 0x329   :  { %5732 = vmatpush3.bf16.msra.mxu0 %v6374_v36 }
 0x33a   :  { %v5598_v4 = vpop.f32.mrf.mxu1 }
 0x33c   :  { %v5599_v5 = vpop.f32.mrf.mxu1 }
 0x33d   :  { %v5571_v8 = vpop.f32.mrf.mxu0  ;;  %v5600_v21 = vadd.f32 %v5599_v5, %v5598_v4 }
 0x33e   :  { %v5601_v9 = vpop.f32.mrf.mxu1 }
 0x33f   :  { %v5572_v11 = vpop.f32.mrf.mxu0  ;;  %v2263_v27 = vadd.f32 %v5600_v21, %v5154_v24 }
 0x340   :  { %v5602_v12 = vpop.f32.mrf.mxu1  ;;  %v5573_v14 = vadd.f32 %v5572_v11, %v5571_v8 }
 0x341   :  { %v5574_v17 = vpop.f32.mrf.mxu0 }
 0x342   :  { %v1979_v18 = vadd.f32 %v5573_v14, %v5126_v10 }
 0x343   :  { %v5575_v19 = vpop.f32.mrf.mxu0 }
 0x344   :  { %v2019_v22 = vadd.f32 %v2018_v58, %v1979_v18 }
 0x346   :  { %v2024_v25 = vmax.f32 %v2019_v22, 0.0 }
 0x348   :  { %v5520_v28 = vpack.c.bf16 %v2024_v25, %v2024_v25 }
 0x34a   :  { %v2302_v30 = vpop.f32.mrf.mxu1  ;;  %2029 = vrot.lane.b32.xlu0 %v5520_v28, %s6572_s29 }
 0x34b   :  { %v2303_v32 = vadd.f32 %v2302_v30, %v2263_v27 }
 0x34c   :  { %v5882_v33 = vpop.f32.mrf.mxu1 }
 0x34d   :  { %v2308_v35 = vmax.f32 %v2303_v32, 0.0 }
 0x34e   :  { %v2305_v37 = vpop.f32.mrf.mxu1 }
 0x34f   :  { %v5521_v38 = vpack.c.bf16 %v2308_v35, %v2308_v35 }
 0x350   :  { %v5883_v39 = vpop.f32.mrf.mxu1 }
 0x351   :  { %2313 = vrot.lane.b32.xlu1 %v5521_v38, %s6578_s26 }
 0x35a   :  { %v2587_v44 = vpop.f32.mrf.mxu1 }
 0x35c   :  { %v5894_v45 = vpop.f32.mrf.mxu1 }
 0x35d   :  { %v5625_v47 = vpop.f32.mrf.mxu0 }
 0x35e   :  { %v2590_v48 = vpop.f32.mrf.mxu1 }
 0x35f   :  { %v5626_v49 = vpop.f32.mrf.mxu0 }
 0x360   :  { %v5895_v51 = vpop.f32.mrf.mxu1  ;;  %v5627_v52 = vadd.f32 %v5626_v49, %v5625_v47 }
 0x361   :  { %v5628_v53 = vpop.f32.mrf.mxu0 }
 0x362   :  { %v2548_v54 = vadd.f32 %v5627_v52, %v5181_v50 }
 0x363   :  { %v5629_v56 = vpop.f32.mrf.mxu0 }
 0x364   :  { %v2588_v57 = vadd.f32 %v2587_v44, %v2548_v54  ;;  %v6389_v54 = vld [vmem:[%s7353_s5 + $0x120] sm:$0xff]   ;;  %v6391_v56 = vld [vmem:[%s7353_s5 + $0x118] sm:$0xff]  }
 0x365   :  { %5745 = vmatprep.subr.bf16.mxu0 %v6389_v54 }
 0x366   :  { %v2593_v58 = vmax.f32 %v2588_v57, 0.0  ;;  %v6393_v57 = vld [vmem:[%s7353_s5 + $0x148] sm:$0xff]  }
 0x368   :  { %v5522_v59 = vpack.c.bf16 %v2593_v58, %v2593_v58  ;;  %v6392_v58 = vld [vmem:[%s7353_s5 + $0xd8] sm:$0xff]  }
 0x36a   :  { %2598 = vrot.lane.b32.xlu0 %v5522_v59, %s6569_s16  ;;  %v6394_v59 = vld [vmem:[%s7353_s5 + $0x110] sm:$0xff]  }
 0x39c   :  { %v2877_v60 = vpop.f32.mrf.mxu0 }
 0x39e   :  { %v5906_v61 = vpop.f32.mrf.mxu0 }
 0x39f   :  { %v6395_v61 = vld [vmem:[%s7353_s5 + $0xd0] sm:$0xff]  }
 0x3a0   :  { %v2880_v62 = vpop.f32.mrf.mxu0 }
 0x3a1   :  { %v5652_v63 = vpop.f32.mrf.mxu1 }
 0x3a2   :  { %v5907_v0 = vpop.f32.mrf.mxu0 }
 0x3a3   :  { %v5653_v2 = vpop.f32.mrf.mxu1  ;;  %v6396_v0 = vld [vmem:[%s7353_s5 + $0x140] sm:$0xff]  }
 0x3a4   :  { %v5654_v3 = vadd.f32 %v5653_v2, %v5652_v63  ;;  %v6398_v2 = vld [vmem:[%s7353_s5 + $0xc8] sm:$0xff]  }
 0x3a5   :  { %v5655_v4 = vpop.f32.mrf.mxu1 }
 0x3a6   :  { %v2838_v5 = vadd.f32 %v5654_v3, %v5208_v1  ;;  %v6397_v1 = vld [vmem:[%s7353_s5 + $0x108] sm:$0xff]   ;;  %v6399_v3 = vld [vmem:[%s7353_s5 + $0x138] sm:$0xff]   ;;  %v6400_v4 = vld [vmem:[%s7353_s5 + $0x100] sm:$0xff]  }
 0x3a7   :  { %v5656_v6 = vpop.f32.mrf.mxu1 }
 0x3a8   :  { %v2878_v7 = vadd.f32 %v2877_v60, %v2838_v5  ;;  %v6401_v5 = vld [vmem:[%s7353_s5 + $0xc0] sm:$0xff]   ;;  %v6402_v6 = vld [vmem:[%s7353_s5 + $0x130] sm:$0xff]  }
 0x3aa   :  { %v2883_v8 = vmax.f32 %v2878_v7, 0.0  ;;  %v6403_v7 = vld [vmem:[%s7353_s5 + $0xf8] sm:$0xff]  }
 0x3ac   :  { %v5523_v9 = vpack.c.bf16 %v2883_v8, %v2883_v8  ;;  %v6404_v8 = vld [vmem:[%s7353_s5 + $0xb8] sm:$0xff]  }
 0x3ae   :  { %2888 = vrot.lane.b32.xlu1 %v5523_v9, %s6564_s18  ;;  %v6406_v9 = vld [vmem:[%s7353_s5 + $0xf0] sm:$0xff]  }
 0x3b1   :  { %v3162_v10 = vpop.f32.mrf.mxu1 }
 0x3b3   :  { %v5918_v11 = vpop.f32.mrf.mxu1 }
 0x3b4   :  { %v6407_v11 = vld [vmem:[%s7353_s5 + $0xb0] sm:$0xff]  }
 0x3b5   :  { %v3165_v12 = vpop.f32.mrf.mxu1 }
 0x3b7   :  { %v5919_v13 = vpop.f32.mrf.mxu1 }
 0x3b8   :  { %v6408_v13 = vld [vmem:[%s7353_s5 + $0x1c8] sm:$0xff]  }
 0x3bc   :  { %v5679_v14 = vpop.f32.mrf.mxu0  ;;  %v2030_v18 = vpop.permute.xlu0 %2029 }
 0x3bd   :  { %v2031_v20 = vrot.slane %v2030_v18, 4 }
 0x3be   :  { %v5680_v17 = vpop.f32.mrf.mxu0 }
 0x3bf   :  { %v5681_v19 = vadd.f32 %v5680_v17, %v5679_v14  ;;  %v2032_v23 = vsel %vm866_vm1, %v2031_v20, %v2030_v18  ;;  %vm2604_vm1 = vmor %vm2603_vm9, %vm7371_vm15  ;;  %v6411_v18 = vld [vmem:[%s7353_s5 + $0xa8] sm:$0xff]   ;;  %vm3463_vm15 = vcmask 130052  }
 0x3c0   :  { %v5682_v21 = vpop.f32.mrf.mxu0  ;;  %2035 = vst.msk [vmem:[#allocation3] sm:$0xff] %vm2034_vm8, %v2032_v23  ;;  %vm3180_vm8 = vmor %vm3179_vm11, %vm3178_vm7 }
 0x3c1   :  { %v3123_v22 = vadd.f32 %v5681_v19, %v5236_v16  ;;  %v6410_v16 = vld [vmem:[%s7353_s5 + $0xe8] sm:$0xff]  }
 0x3c2   :  { %v5683_v24 = vpop.f32.mrf.mxu0 }
 0x3c3   :  { %v3163_v25 = vadd.f32 %v3162_v10, %v3123_v22  ;;  %v2314_v26 = vpop.permute.xlu1 %2313  ;;  %v6405_v10 = vld [vmem:[%s7353_s5 + $0x128] sm:$0xff]  }
 0x3c4   :  { %v2315_v27 = vrot.slane %v2314_v26, 4 }
 0x3c5   :  { %v3168_v28 = vmax.f32 %v3163_v25, 0.0 }
 0x3c6   :  { %v2317_v29 = vsel %vm2316_vm14, %v2315_v27, %v2314_v26 }
 0x3c7   :  { %v5524_v30 = vpack.c.bf16 %v3168_v28, %v3168_v28  ;;  %2321 = vst.msk [vmem:[#allocation3 + $0x4] sm:$0xff] %vm2320_vm0, %v2317_v29  ;;  %vm7376_vm0 = vcmask 392192  }
 0x3c9   :  { %3173 = vrot.lane.b32.xlu0 %v5524_v30, %s6568_s28 }
 0x3cc   :  { %v3447_v32 = vpop.f32.mrf.mxu0 }
 0x3ce   :  { %v5930_v33 = vpop.f32.mrf.mxu0  ;;  %v3466_v34 = vld [vmem:[#allocation3] sm:$0xff] }
 0x3cf   :  { %v5290_v36 = vcombine.low %v3466_v34, %v3466_v34  ;;  %v5291_v37 = vcombine.high %v3466_v34, %v3466_v34 }
 0x3d0   :  { %v3450_v35 = vpop.f32.mrf.mxu0 }
 0x3d1   :  { %v5706_v38 = vpop.f32.mrf.mxu1  ;;  %3689 = vmatprep.mubr.bf16.mxu0 %v5291_v37  ;;  %v5289_v37 = vld [vmem:[%s7354_s6] ss:$0 sm:$0xff] }
 0x3d2   :  { %v5931_v39 = vpop.f32.mrf.mxu0  ;;  %3690 = vmatmul.mubr.bf16.vlgmr.msra.gmra.mxu0 %v5290_v36 }
 0x3d3   :  { %v5707_v43 = vpop.f32.mrf.mxu1  ;;  %5746 = vmatpush3.bf16.msra.mxu0 %v6390_v55  ;;  %v6414_v55 = vld [vmem:[%s7353_s5 + $0x1f0] sm:$0xff]  }
 0x3d4   :  { %v5708_v44 = vadd.f32 %v5707_v43, %v5706_v38  ;;  %5747 = vmatprep.subr.bf16.mxu0 %v6391_v56  ;;  %v6415_v56 = vld [vmem:[%s7353_s5 + $0x1b8] sm:$0xff]  }
 0x3d5   :  { %v5709_v45 = vpop.f32.mrf.mxu1 }
 0x3d6   :  { %v3408_v46 = vadd.f32 %v5708_v44, %v5263_v40 }
 0x3d7   :  { %v5710_v47 = vpop.f32.mrf.mxu1  ;;  %5748 = vmatpush3.bf16.msra.mxu0 %v6392_v58 }
 0x3d8   :  { %v3448_v48 = vadd.f32 %v3447_v32, %v3408_v46  ;;  %5749 = vmatprep.subr.bf16.mxu0 %v6394_v59  ;;  %v6416_v59 = vld [vmem:[%s7353_s5 + $0x178] sm:$0xff]  }
 0x3da   :  { %v3453_v49 = vmax.f32 %v3448_v48, 0.0  ;;  %v6409_v48 = vld [vmem:[%s7353_s5 + $0x188] sm:$0xff]  }
 0x3db   :  { %5750 = vmatpush3.bf16.msra.mxu0 %v6395_v61  ;;  %v6418_v61 = vld [vmem:[%s7353_s5 + $0x1b0] sm:$0xff]  }
 0x3dc   :  { %v5525_v50 = vpack.c.bf16 %v3453_v49, %v3453_v49  ;;  %v2599_v51 = vpop.permute.xlu0 %2598  ;;  %5751 = vmatprep.subr.bf16.mxu0 %v6397_v1  ;;  %v6422_v1 = vld [vmem:[%s7353_s5 + $0x168] sm:$0xff]  }
 0x3dd   :  { %v2600_v52 = vrot.slane %v2599_v51, 4 }
 0x3de   :  { %3458 = vrot.lane.b32.xlu1 %v5525_v50, %s6566_s3 }
 0x3df   :  { %v2601_v15 = vsel %vm7372_vm2, %v2600_v52, %v2599_v51  ;;  %5752 = vmatpush3.bf16.msra.mxu0 %v6398_v2  ;;  %v6412_v51 = vld [vmem:[%s7353_s5 + $0x1c0] sm:$0xff]   ;;  %v6423_v2 = vld [vmem:[%s7353_s5 + $0x1d8] sm:$0xff]  }
 0x3e0   :  { %2605 = vst.msk [vmem:[#allocation3 + $0x8] sm:$0xff] %vm2604_vm1, %v2601_v15  ;;  %5753 = vmatprep.subr.bf16.mxu0 %v6400_v4  ;;  %vm7377_vm1 = vcmask 1043712   ;;  %v6413_v15 = vld [vmem:[%s7353_s5 + $0x180] sm:$0xff]  }
 0x3e1   :  { %vm3464_vm2 = vmor %vm3463_vm15, %vm7377_vm1  ;;  %v6425_v4 = vld [vmem:[%s7353_s5 + $0x160] sm:$0xff]  }
 0x3e3   :  { %5754 = vmatpush3.bf16.msra.mxu0 %v6401_v5  ;;  %v6426_v5 = vld [vmem:[%s7353_s5 + $0x1d0] sm:$0xff]  }
 0x3e4   :  { %5755 = vmatprep.subr.bf16.mxu0 %v6403_v7 }
 0x3e7   :  { %v6382_v53 = vld [vmem:[#allocation3 + $0x8] ss:$0 sps:$4 sm:$0xff]   ;;  %5756 = vmatpush3.bf16.msra.mxu0 %v6404_v8 }
 0x3e8   :  { %5943 = vmatmul.mubr.msk.bf16.vlgmr.msra.gmra.mxu1 %vm7373_vm4, %v6382_v53  ;;  %5757 = vmatprep.subr.bf16.mxu0 %v6406_v9  ;;  %v3741_v22 = vld [vmem:[#allocation3 + $0x4] sm:$0xff]  ;;  %vm7378_vm4 = vcmask 261120  }
 0x3e9   :  { %5956 = vmatprep.mubr.msk.bf16.mxu1 %vm6573_vm10, %v6571_v31  ;;  %5947 = vmatpush3.bf16.msra.mxu1 %v6393_v57  ;;  %v5359_v23 = vcombine.low %v3741_v22, %v3741_v22  ;;  %v5360_v24 = vcombine.high %v3741_v22, %v3741_v22  ;;  %vm7379_vm13 = vmmov %vm7378_vm4 }
 0x3ea   :  { %5948 = vmatprep.subr.bf16.mxu1 %v6571_v31  ;;  %vm7382_vm7 = vmmov %vm7378_vm4 }
 0x3eb   :  { %5758 = vmatpush3.bf16.msra.mxu0 %v6407_v11  ;;  %v6429_v11 = vld [vmem:[%s7353_s5 + $0x190] sm:$0xff]  }
 0x3ec   :  { %5759 = vmatprep.subr.bf16.mxu0 %v6410_v16 }
 0x3ed   :  { %5949 = vmatpush3.bf16.msra.mxu1 %v6396_v0  ;;  %v6421_v0 = vld [vmem:[%s7353_s5 + $0x1a8] sm:$0xff]  }
 0x3ee   :  { %5950 = vmatprep.subr.bf16.mxu1 %v6571_v31 }
 0x3ef   :  { %5760 = vmatpush3.bf16.msra.mxu0 %v6411_v18 }
 0x3f0   :  { %5960 = vmatprep.subr.bf16.mxu0 %v6571_v31 }
 0x3f1   :  { %5951 = vmatpush3.bf16.msra.mxu1 %v6399_v3  ;;  %v6424_v3 = vld [vmem:[%s7353_s5 + $0x1a0] sm:$0xff]  }
 0x3f2   :  { %5952 = vmatprep.subr.bf16.mxu1 %v6571_v31 }
 0x3f5   :  { %5953 = vmatpush3.bf16.msra.mxu1 %v6402_v6  ;;  %v6427_v6 = vld [vmem:[%s7353_s5 + $0x198] sm:$0xff]  }
 0x3f6   :  { %5954 = vmatprep.subr.bf16.mxu1 %v6571_v31 }
 0x3f9   :  { %5955 = vmatpush3.bf16.msra.mxu1 %v6405_v10  ;;  %v6428_v10 = vld [vmem:[%s7353_s5 + $0x158] sm:$0xff]  }
 0x3fa   :  { %5773 = vmatprep.subr.bf16.mxu1 %v6408_v13 }
 0x420   :  { %v2889_v60 = vpop.permute.xlu1 %2888 }
 0x421   :  { %v2890_v62 = vrot.slane %v2889_v60, 4 }
 0x423   :  { %v2891_v63 = vsel %vm7375_vm5, %v2890_v62, %v2889_v60  ;;  %vm7381_vm5 = vmmov %vm7378_vm4  ;;  %v6417_v60 = vld [vmem:[%s7353_s5 + $0x1e8] sm:$0xff]   ;;  %v6419_v62 = vld [vmem:[%s7353_s5 + $0x170] sm:$0xff]  }
 0x424   :  { %2895 = vst.msk [vmem:[#allocation3 + $0xc] sm:$0xff] %vm2894_vm3, %v2891_v63  ;;  %vm7380_vm3 = vcmask 654336   ;;  %v6420_v63 = vld [vmem:[%s7353_s5 + $0x1e0] sm:$0xff]  }
 0x425   :  { %vm7385_vm15 = vmmov %vm7380_vm3 }
 0x43b   :  { %v3174_v12 = vpop.permute.xlu0 %3173 }
 0x43c   :  { %v3175_v14 = vrot.slane %v3174_v12, 4 }
 0x43e   :  { %v3176_v17 = vsel %vm7376_vm0, %v3175_v14, %v3174_v12  ;;  %v6430_v14 = vld [vmem:[%s7353_s5 + $0x150] sm:$0xff]  }
 0x43f   :  { %3181 = vst.msk [vmem:[#allocation3 + $0x10] sm:$0xff] %vm3180_vm8, %v3176_v17  ;;  %vm7383_vm8 = vcmask 523264  }
 0x440   :  { %vm7384_vm0 = vmmov %vm7383_vm8 }
 0x441   :  { %vm7386_vm1 = vmmov %vm7384_vm0 }
 0x446   :  { %v3742_v19 = vld [vmem:[#allocation3 + $0xc] sm:$0xff] }
 0x447   :  { %v5362_v20 = vcombine.high %v3742_v19, %v3742_v19  ;;  %v5361_v21 = vcombine.low %v3742_v19, %v3742_v19 }
 0x449   :  { %3810 = vrot.lane.b32.xlu1 %v5362_v20, %s6566_s3  ;;  %3808 = vrot.lane.b32.xlu0 %v5361_v21, %s6566_s3 }
 0x44d   :  { %3804 = vrot.lane.b32.xlu1 %v5359_v23, %s6566_s3  ;;  %3806 = vrot.lane.b32.xlu0 %v5360_v24, %s6566_s3  ;;  %v5358_v23 = vld [vmem:[%s7354_s6 + $0x1] ss:$0 sm:$0xff] }
 0x450   :  { %v3459_v25 = vpop.permute.xlu1 %3458 }
 0x451   :  { %v3460_v26 = vrot.slane %v3459_v25, 4  ;;  %4103 = vrot.lane.b32.xlu0 %v5362_v20, %s6564_s18 }
 0x453   :  { %v3461_v27 = vsel %vm7378_vm4, %v3460_v26, %v3459_v25  ;;  %v6431_v26 = vld [vmem:[%s7355_s7 + $0x78] sm:$0xff]  }
 0x454   :  { %3465 = vst.msk [vmem:[#allocation3 + $0x14] sm:$0xff] %vm3464_vm2, %v3461_v27  ;;  %v6432_v27 = vld [vmem:[%s7355_s7 + $0x38] sm:$0xff]   ;;  %vm7387_vm2 = vcmask 1043968  }
 0x455   :  { %4101 = vrot.lane.b32.xlu0 %v5361_v21, %s6564_s18  ;;  %vm4333_vm4 = vmor %vm3179_vm11, %vm7387_vm2 }
 0x45b   :  { %v4039_v28 = vld [vmem:[#allocation3 + $0x14] sm:$0xff] }
 0x45c   :  { %v5432_v29 = vcombine.low %v4039_v28, %v4039_v28  ;;  %v5433_v30 = vcombine.high %v4039_v28, %v4039_v28  ;;  %v6433_v28 = vld [vmem:[%s7355_s7 + $0x70] sm:$0xff]  }
 0x45e   :  { %4105 = vrot.lane.b32.xlu1 %v5432_v29, %s6564_s18 }
 0x462   :  { %4107 = vrot.lane.b32.xlu1 %v5433_v30, %s6564_s18 }
 0x492   :  { %v5733_v32 = vpop.f32.mrf.mxu0 }
 0x494   :  { %v5734_v33 = vpop.f32.mrf.mxu0 }
 0x495   :  { %v5735_v36 = vadd.f32 %v5734_v33, %v5733_v32  ;;  %v6434_v33 = vld [vmem:[%s7355_s7 + $0x30] sm:$0xff]  }
 0x496   :  { %v5736_v34 = vpop.f32.mrf.mxu0 }
 0x497   :  { %v3692_v38 = vadd.f32 %v5735_v36, %v5289_v37  ;;  %v6436_v37 = vld [vmem:[%s7355_s7 + $0x28] sm:$0xff]  }
 0x498   :  { %v5737_v35 = vpop.f32.mrf.mxu0 }
 0x499   :  { %v6435_v35 = vld [vmem:[%s7355_s7 + $0x68] sm:$0xff]  }
 0x4a8   :  { %v3731_v39 = vpop.f32.mrf.mxu1 }
 0x4a9   :  { %v3732_v40 = vadd.f32 %v3731_v39, %v3692_v38  ;;  %v6437_v39 = vld [vmem:[%s7355_s7 + $0x60] sm:$0xff]  }
 0x4aa   :  { %v5944_v43 = vpop.f32.mrf.mxu1 }
 0x4ab   :  { %v3737_v44 = vmax.f32 %v3732_v40, 0.0  ;;  %v6438_v40 = vld [vmem:[%s7355_s7 + $0x20] sm:$0xff]   ;;  %v6439_v43 = vld [vmem:[%s7355_s7 + $0x58] sm:$0xff]  }
 0x4ac   :  { %v3734_v45 = vpop.f32.mrf.mxu1 }
 0x4ad   :  { %v3738_v46 = vpack.c.bf16 %v3737_v44, %v3737_v44  ;;  %v6440_v44 = vld [vmem:[%s7355_s7 + $0x18] sm:$0xff]  }
 0x4ae   :  { %v5945_v47 = vpop.f32.mrf.mxu1 }
 0x4af   :  { %3740 = vst.msk [vmem:[#allocation4] sm:$0xf] %vm3739_vm6, %v3738_v46  ;;  %vm7388_vm6 = vmmov %vm7384_vm0 }
 0x4bb   :  { %v3811_v49 = vpop.permute.xlu1 %3810  ;;  %v3809_v50 = vpop.permute.xlu0 %3808 }
 0x4bc   :  { %v3814_v52 = vsel %vm7379_vm13, %v3809_v50, %v3811_v49 }
 0x4bd   :  { %5957 = vmatmul.mubr.msk.bf16.vlgmr.msra.gmra.mxu1 %vm7380_vm3, %v3814_v52  ;;  %v5429_v52 = vld [vmem:[%s7354_s6 + $0x2] ss:$0 sm:$0xff] }
 0x4be   :  { %5774 = vmatpush3.bf16.msra.mxu1 %v6409_v48 }
 0x4bf   :  { %v3805_v53 = vpop.permute.xlu1 %3804  ;;  %v3807_v54 = vpop.permute.xlu0 %3806  ;;  %5775 = vmatprep.subr.bf16.mxu1 %v6412_v51  ;;  %v6442_v51 = vld [vmem:[%s7355_s7 + $0x10] sm:$0xff]  }
 0x4c0   :  { %v3812_v57 = vsel %vm7381_vm5, %v3805_v53, %v3807_v54  ;;  %v3813_v58 = vsel %vm7382_vm7, %v3807_v54, %v3809_v50  ;;  %v6441_v50 = vld [vmem:[%s7355_s7 + $0x50] sm:$0xff]   ;;  %v6443_v54 = vld [vmem:[%s7355_s7 + $0x48] sm:$0xff]  }
 0x4c1   :  { %3978 = vmatprep.mubr.bf16.mxu0 %v3813_v58  ;;  %v6446_v58 = vld [vmem:[%s7355_s7 + $0x40] sm:$0xff]  }
 0x4c2   :  { %5776 = vmatpush3.bf16.msra.mxu1 %v6413_v15  ;;  %3979 = vmatmul.mubr.bf16.vlgmr.msra.gmra.mxu0 %v3812_v57 }
 0x4c3   :  { %5961 = vmatpush3.bf16.msra.mxu0 %v6414_v55  ;;  %5777 = vmatprep.subr.bf16.mxu1 %v6415_v56  ;;  %v4104_v7 = vpop.permute.xlu0 %4103  ;;  %v6444_v55 = vld [vmem:[%s7355_s7 + $0x88] sm:$0xff]  }
 0x4c4   :  { %5962 = vmatprep.subr.bf16.mxu0 %v6571_v31  ;;  %5970 = vmatprep.mubr.msk.bf16.mxu0 %vm6573_vm10, %v6571_v31  ;;  %v6445_v56 = vld [vmem:[%s7355_s7 + $0x8] sm:$0xff]  }
 0x4c6   :  { %5778 = vmatpush3.bf16.msra.mxu1 %v6416_v59 }
 0x4c7   :  { %5963 = vmatpush3.bf16.msra.mxu0 %v6417_v60  ;;  %5779 = vmatprep.subr.bf16.mxu1 %v6418_v61  ;;  %v4102_v16 = vpop.permute.xlu0 %4101  ;;  %v6447_v60 = vld [vmem:[%s7355_s7 + $0x80] sm:$0xff]  }
 0x4c8   :  { %5964 = vmatprep.subr.bf16.mxu0 %v6571_v31  ;;  %v4109_v17 = vsel %vm7386_vm1, %v4102_v16, %v4104_v7  ;;  %v6460_v16 = vld [vmem:[%s7357_s9 + $0x54] ss:$8 sps:$4 sm:$0xff]  }
 0x4ca   :  { %5780 = vmatpush3.bf16.msra.mxu1 %v6419_v62 }
 0x4cb   :  { %5965 = vmatpush3.bf16.msra.mxu0 %v6420_v63  ;;  %5781 = vmatprep.subr.bf16.mxu1 %v6421_v0  ;;  %v6448_v63 = vld [vmem:[%s7355_s7] sm:$0xff]  }
 0x4cc   :  { %5966 = vmatprep.subr.bf16.mxu0 %v6571_v31 }
 0x4ce   :  { %5782 = vmatpush3.bf16.msra.mxu1 %v6422_v1 }
 0x4cf   :  { %5967 = vmatpush3.bf16.msra.mxu0 %v6423_v2  ;;  %5783 = vmatprep.subr.bf16.mxu1 %v6424_v3  ;;  %v6454_v2 = vld [vmem:[%s7357_s9 + $0x74] ss:$8 sps:$4 sm:$0xff]  }
 0x4d0   :  { %v4106_v8 = vpop.permute.xlu1 %4105  ;;  %5968 = vmatprep.subr.bf16.mxu0 %v6571_v31 }
 0x4d1   :  { %v4110_v9 = vsel %vm7383_vm8, %v4104_v7, %v4106_v8 }
 0x4d2   :  { %5784 = vmatpush3.bf16.msra.mxu1 %v6425_v4  ;;  %4275 = vmatprep.mubr.bf16.mxu1 %v4110_v9  ;;  %v6457_v9 = vld [vmem:[%s7357_s9 + $0x64] ss:$8 sps:$4 sm:$0xff]  }
 0x4d3   :  { %5969 = vmatpush3.bf16.msra.mxu0 %v6426_v5  ;;  %5785 = vmatprep.subr.bf16.mxu1 %v6427_v6 }
 0x4d4   :  { %v4108_v12 = vpop.permute.xlu1 %4107  ;;  %5801 = vmatprep.subr.bf16.mxu0 %v6431_v26  ;;  %v6475_v26 = vld [vmem:[%s7357_s9 + $0x4] ss:$8 sps:$4 sm:$0xff]  }
 0x4d5   :  { %v4111_v13 = vsel %vm7384_vm0, %v4106_v8, %v4108_v12  ;;  %v6452_v8 = vld [vmem:[%s7357_s9 + $0x70] ss:$8 sps:$4 sm:$0xff]  }
 0x4d6   :  { %5786 = vmatpush3.bf16.msra.mxu1 %v6428_v10  ;;  %5971 = vmatmul.mubr.msk.bf16.vlgmr.msra.gmra.mxu0 %vm7385_vm15, %v4111_v13 }
 0x4d7   :  { %5787 = vmatprep.subr.bf16.mxu1 %v6429_v11  ;;  %5802 = vmatpush3.bf16.msra.mxu0 %v6432_v27  ;;  %v6473_v27 = vld [vmem:[%s7357_s9] ss:$8 sps:$4 sm:$0xff]  }
 0x4d8   :  { %5803 = vmatprep.subr.bf16.mxu0 %v6433_v28  ;;  %v6579_v28 = vmov 0  }
 0x4da   :  { %5788 = vmatpush3.bf16.msra.mxu1 %v6430_v14  ;;  %v6455_v14 = vld [vmem:[%s7357_s9 + $0x60] ss:$8 sps:$4 sm:$0xff]  }
 0x4db   :  { %5974 = vmatprep.subr.bf16.mxu1 %v6571_v31  ;;  %5804 = vmatpush3.bf16.msra.mxu0 %v6434_v33  ;;  %v6479_v33 = vld [vmem:[%s7359_s11 + $0x30] sm:$0xff]  }
 0x4dc   :  { %5805 = vmatprep.subr.bf16.mxu0 %v6435_v35  ;;  %v6481_v35 = vld [vmem:[%s7359_s11 + $0x28] sm:$0xff]  }
 0x4dd   :  { %4276 = vmatmul.mubr.bf16.vlgmr.msra.gmra.mxu1 %v4109_v17  ;;  %v6458_v17 = vld [vmem:[%s7357_s9 + $0x50] ss:$8 sps:$4 sm:$0xff]  }
 0x4de   :  { %5978 = vmatprep.mubr.msk.bf16.mxu1 %vm6573_vm10, %v6571_v31  ;;  %5975 = vmatpush3.bf16.msra.mxu1 %v6444_v55  ;;  %vm4036_vm10 = vmor %vm2603_vm9, %vm2319_vm12 }
 0x4df   :  { %5806 = vmatpush3.bf16.msra.mxu0 %v6436_v37  ;;  %5976 = vmatprep.subr.bf16.mxu1 %v6571_v31  ;;  %vm7389_vm12 = vmmov %vm7381_vm5  ;;  %v6483_v37 = vld [vmem:[%s7359_s11 + $0x20] sm:$0xff]  }
 0x4e0   :  { %5807 = vmatprep.subr.bf16.mxu0 %v6437_v39  ;;  %v6485_v39 = vld [vmem:[%s7359_s11 + $0x18] sm:$0xff]  }
 0x4e2   :  { %5977 = vmatpush3.bf16.msra.mxu1 %v6447_v60  ;;  %v6490_v60 = vld [vmem:[%s7359_s11 + $0x40] sm:$0xff]  }
 0x4e3   :  { %5808 = vmatpush3.bf16.msra.mxu0 %v6438_v40  ;;  %4694 = vmatprep.subr.bf16.mxu1 %v6454_v2  ;;  %v6486_v40 = vld [vmem:[%s7359_s11 + $0x50] sm:$0xff]  }
 0x4e4   :  { %5809 = vmatprep.subr.bf16.mxu0 %v6439_v43  ;;  %v6487_v43 = vld [vmem:[%s7359_s11 + $0x10] sm:$0xff]  }
 0x4e7   :  { %5810 = vmatpush3.bf16.msra.mxu0 %v6440_v44 }
 0x4e8   :  { %5811 = vmatprep.subr.bf16.mxu0 %v6441_v50 }
 0x4eb   :  { %5812 = vmatpush3.bf16.msra.mxu0 %v6442_v51 }
 0x4ec   :  { %5813 = vmatprep.subr.bf16.mxu0 %v6443_v54 }
 0x4ef   :  { %5814 = vmatpush3.bf16.msra.mxu0 %v6445_v56 }
 0x4f0   :  { %5815 = vmatprep.subr.bf16.mxu0 %v6446_v58  ;;  %v6488_v58 = vld [vmem:[%s7359_s11 + $0x48] sm:$0xff]  }
 0x4f3   :  { %5816 = vmatpush3.bf16.msra.mxu0 %v6448_v63 }
 0x57d   :  { %v4020_v18 = vpop.f32.mrf.mxu1 }
 0x57f   :  { %v5958_v19 = vpop.f32.mrf.mxu1 }
 0x580   :  { %v6461_v19 = vld [vmem:[%s7357_s9 + $0x40] ss:$8 sps:$4 sm:$0xff]  }
 0x581   :  { %v4023_v20 = vpop.f32.mrf.mxu1 }
 0x582   :  { %v5761_v21 = vpop.f32.mrf.mxu0  ;;  %v6466_v20 = vld [vmem:[%s7357_s9 + $0x34] ss:$8 sps:$4 sm:$0xff]  }
 0x583   :  { %v5959_v22 = vpop.f32.mrf.mxu1 }
 0x584   :  { %v5762_v24 = vpop.f32.mrf.mxu0  ;;  %v6469_v22 = vld [vmem:[%s7357_s9 + $0x24] ss:$8 sps:$4 sm:$0xff]  }
 0x585   :  { %v5763_v25 = vadd.f32 %v5762_v24, %v5761_v21  ;;  %v6464_v21 = vld [vmem:[%s7357_s9 + $0x30] ss:$8 sps:$4 sm:$0xff]   ;;  %v6472_v24 = vld [vmem:[%s7357_s9 + $0x14] ss:$8 sps:$4 sm:$0xff]  }
 0x586   :  { %v5764_v29 = vpop.f32.mrf.mxu0 }
 0x587   :  { %v3981_v30 = vadd.f32 %v5763_v25, %v5358_v23  ;;  %v6467_v23 = vld [vmem:[%s7357_s9 + $0x20] ss:$8 sps:$4 sm:$0xff]   ;;  %v6470_v25 = vld [vmem:[%s7357_s9 + $0x10] ss:$8 sps:$4 sm:$0xff]  }
 0x588   :  { %v5765_v32 = vpop.f32.mrf.mxu0  ;;  %v6476_v29 = vld [vmem:[%s7359_s11 + $0x78] sm:$0xff]  }
 0x589   :  { %v4021_v34 = vadd.f32 %v4020_v18, %v3981_v30  ;;  %v6463_v18 = vld [vmem:[%s7357_s9 + $0x44] ss:$8 sps:$4 sm:$0xff]   ;;  %v6477_v30 = vld [vmem:[%s7359_s11 + $0x38] sm:$0xff]   ;;  %v6478_v32 = vld [vmem:[%s7359_s11 + $0x70] sm:$0xff]   ;;  %5826 = vmatprep.subr.bf16.mxu0 %v6476_v29 }
 0x58b   :  { %v4026_v36 = vmax.f32 %v4021_v34, 0.0  ;;  %v6480_v34 = vld [vmem:[%s7359_s11 + $0x68] sm:$0xff]  }
 0x58d   :  { %v5526_v38 = vpack.c.bf16 %v4026_v36, %v4026_v36  ;;  %v6482_v36 = vld [vmem:[%s7359_s11 + $0x60] sm:$0xff]  }
 0x58f   :  { %4031 = vrot.lane.b32.xlu0 %v5526_v38, %s6578_s26  ;;  %v6484_v38 = vld [vmem:[%s7359_s11 + $0x58] sm:$0xff]  }
 0x596   :  { %v4317_v45 = vpop.f32.mrf.mxu0 }
 0x598   :  { %v5972_v46 = vpop.f32.mrf.mxu0 }
 0x59a   :  { %v4320_v47 = vpop.f32.mrf.mxu0 }
 0x59b   :  { %v5457_v47 = vld [vmem:[%s7356_s8] ss:$0 sm:$0xff] }
 0x59c   :  { %v5973_v48 = vpop.f32.mrf.mxu0 }
 0x59d   :  { %v5789_v49 = vpop.f32.mrf.mxu1 }
 0x59f   :  { %v5790_v15 = vpop.f32.mrf.mxu1 }
 0x5a0   :  { %v5791_v53 = vadd.f32 %v5790_v15, %v5789_v49 }
 0x5a1   :  { %v5792_v57 = vpop.f32.mrf.mxu1 }
 0x5a2   :  { %v4278_v59 = vadd.f32 %v5791_v53, %v5429_v52 }
 0x5a3   :  { %v5793_v61 = vpop.f32.mrf.mxu1 }
 0x5a4   :  { %v4318_v62 = vadd.f32 %v4317_v45, %v4278_v59  ;;  %v6489_v59 = vld [vmem:[%s7359_s11 + $0x8] sm:$0xff]   ;;  %v6491_v61 = vld [vmem:[%s7359_s11] sm:$0xff]  }
 0x5a6   :  { %v4323_v0 = vmax.f32 %v4318_v62, 0.0  ;;  %v4602_v62 = vld [vmem:[%s7358_s10] sm:$0x3]  ;;  %s6580_s10 = smov [#allocation10]  }
 0x5a7   :  { %v4607_v63 = vrot.slane %v4602_v62, %v6738_v41  ;;  %s4923_s16 = sshll.u32 %s6580_s10, 4  ;;  %s4924_s16 = int_to_ptr.vmem [resolvable:$true] %s4923_s16 }
 0x5a8   :  { %v5527_v1 = vpack.c.bf16 %v4323_v0, %v4323_v0  ;;  %v4611_v0 = vrot.slane %v4602_v62, %v6741_v42  ;;  %s6534_s23 = scalar_lea.vmem %s4924_s16, 64  ;;  %p6539_p11 = scmp.lt.s32.totalorder %s4924_s16, %s4924_s16 }
 0x5a9   :  { %p6535_p10 = scmp.ne.s32.totalorder %s4924_s16, %s6534_s23  ;;  %p6540_p12 = scmp.lt.s32.totalorder %s6534_s23, %s6534_s23 }
 0x5aa   :  { %4328 = vrot.lane.b32.xlu1 %v5527_v1, %s6564_s18 }
 0x5ab   :  { %p6541_p13 = por %p6540_p12, %p6539_p11 }
 0x5ad   :  { %p6542_p0 = pnand %p6541_p13, %p6535_p10 }
 0x601   :  { %v4032_v3 = vpop.permute.xlu0 %4031 }
 0x602   :  { %v4033_v31 = vrot.slane %v4032_v3, 4 }
 0x604   :  { %v4034_v4 = vsel %vm2316_vm14, %v4033_v31, %v4032_v3 }
 0x605   :  { %4037 = vst.msk [vmem:[#allocation4] sm:$0xff] %vm4036_vm10, %v4034_v4 }
 0x61c   :  { %v4329_v5 = vpop.permute.xlu1 %4328 }
 0x61d   :  { %v4330_v6 = vrot.slane %v4329_v5, 4 }
 0x61f   :  { %v4331_v7 = vsel %vm7388_vm6, %v4330_v6, %v4329_v5 }
 0x620   :  { %4334 = vst.msk [vmem:[#allocation4 + $0x4] sm:$0xff] %vm4333_vm4, %v4331_v7 }
 0x627   :  { %v4335_v10 = vld [vmem:[#allocation4] sm:$0xff]  ;;  %v6451_v11 = vld [vmem:[#allocation4 + $0x8] ss:$0 sps:$4 sm:$0xff]  }
 0x628   :  { %v5458_v12 = vcombine.low %v4335_v10, %v4335_v10  ;;  %v5459_v13 = vcombine.high %v4335_v10, %v4335_v10  ;;  %5979 = vmatmul.mubr.msk.bf16.vlgmr.msra.gmra.mxu1 %vm7389_vm12, %v6451_v11  ;;  %v5496_v11 = vld [vmem:[%s7360_s12] ss:$0 sm:$0xff] }
 0x629   :  { %4695 = vmatpush1.bf16.msra.mxu1 %v6452_v8  ;;  %4726 = vmatprep.mubr.bf16.mxu1 %v6579_v28 }
 0x62a   :  { %4534 = vmatprep.mubr.bf16.mxu0 %v5459_v13  ;;  %4696 = vmatprep.subr.bf16.mxu1 %v6457_v9 }
 0x62b   :  { %4535 = vmatmul.mubr.bf16.vlgmr.msra.gmra.mxu0 %v5458_v12 }
 0x62c   :  { %5827 = vmatpush3.bf16.msra.mxu0 %v6477_v30 }
 0x62d   :  { %4697 = vmatpush1.bf16.msra.mxu1 %v6455_v14  ;;  %5828 = vmatprep.subr.bf16.mxu0 %v6478_v32 }
 0x62e   :  { %4698 = vmatprep.subr.bf16.mxu1 %v6460_v16 }
 0x630   :  { %5829 = vmatpush3.bf16.msra.mxu0 %v6479_v33 }
 0x631   :  { %4699 = vmatpush1.bf16.msra.mxu1 %v6458_v17  ;;  %5830 = vmatprep.subr.bf16.mxu0 %v6480_v34 }
 0x632   :  { %4700 = vmatprep.subr.bf16.mxu1 %v6463_v18 }
 0x634   :  { %5831 = vmatpush3.bf16.msra.mxu0 %v6481_v35 }
 0x635   :  { %4701 = vmatpush1.bf16.msra.mxu1 %v6461_v19  ;;  %5832 = vmatprep.subr.bf16.mxu0 %v6482_v36 }
 0x636   :  { %4702 = vmatprep.subr.bf16.mxu1 %v6466_v20 }
 0x638   :  { %5833 = vmatpush3.bf16.msra.mxu0 %v6483_v37 }
 0x639   :  { %4703 = vmatpush1.bf16.msra.mxu1 %v6464_v21  ;;  %5834 = vmatprep.subr.bf16.mxu0 %v6484_v38 }
 0x63a   :  { %4704 = vmatprep.subr.bf16.mxu1 %v6469_v22 }
 0x63c   :  { %5835 = vmatpush3.bf16.msra.mxu0 %v6485_v39 }
 0x63d   :  { %4705 = vmatpush1.bf16.msra.mxu1 %v6467_v23  ;;  %5836 = vmatprep.subr.bf16.mxu0 %v6486_v40 }
 0x63e   :  { %4706 = vmatprep.subr.bf16.mxu1 %v6472_v24 }
 0x640   :  { %5837 = vmatpush3.bf16.msra.mxu0 %v6487_v43 }
 0x641   :  { %4707 = vmatpush1.bf16.msra.mxu1 %v6470_v25  ;;  %5838 = vmatprep.subr.bf16.mxu0 %v6488_v58 }
 0x642   :  { %4708 = vmatprep.subr.bf16.mxu1 %v6475_v26 }
 0x644   :  { %5839 = vmatpush3.bf16.msra.mxu0 %v6489_v59 }
 0x645   :  { %4709 = vmatpush1.bf16.msra.mxu1 %v6473_v27  ;;  %5840 = vmatprep.subr.bf16.mxu0 %v6490_v60 }
 0x648   :  { %5841 = vmatpush3.bf16.msra.mxu0 %v6491_v61 }
 0x6e8   :  { %v4576_v44 = vpop.f32.mrf.mxu1 }
 0x6ea   :  { %v5980_v46 = vpop.f32.mrf.mxu1 }
 0x6eb   :  { %v5817_v45 = vpop.f32.mrf.mxu0 }
 0x6ec   :  { %v4579_v49 = vpop.f32.mrf.mxu1 }
 0x6ed   :  { %v5818_v48 = vpop.f32.mrf.mxu0 }
 0x6ee   :  { %v5819_v50 = vadd.f32 %v5818_v48, %v5817_v45  ;;  %v5981_v52 = vpop.f32.mrf.mxu1 }
 0x6ef   :  { %v5820_v51 = vpop.f32.mrf.mxu0 }
 0x6f0   :  { %v4537_v15 = vadd.f32 %v5819_v50, %v5457_v47 }
 0x6f1   :  { %v5821_v53 = vpop.f32.mrf.mxu0 }
 0x6f2   :  { %v4577_v54 = vadd.f32 %v4576_v44, %v4537_v15 }
 0x6f4   :  { %vm4582_vm14 = vcmp.ge.f32.partialorder %v4577_v54, 0.0  ;;  %v4583_v55 = vmul.f32 0.01, %v4577_v54 }
 0x6f6   :  { %v4584_v56 = vsel %vm4582_vm14, %v4577_v54, %v4583_v55 }
 0x6f7   :  { %v4585_v57 = vpack.c.bf16 %v4584_v56, %v4584_v56 }
 0x6f9   :  { %4727 = vmatmul.mubr.bf16.vlgmr.msra.gmra.mxu1 %v4585_v57 }
 0x7b9   :  { %v4728_v1 = vpop.f32.mrf.mxu1 }
 0x7ba   :  { %v4729_v2 = vadd.f32 %v4728_v1, %v4607_v63 }
 0x7bb   :  { %v4730_v3 = vpop.f32.mrf.mxu1 }
 0x7bc   :  { %v4731_v31 = vadd.f32 %v4730_v3, %v4611_v0  ;;  %v4735_v4 = vmax.f32 %v4729_v2, 0.0 }
 0x7bd   :  { %v4732_v5 = vpop.f32.mrf.mxu1 }
 0x7be   :  { %v4736_v6 = vmax.f32 %v4731_v31, 0.0  ;;  %v4737_v9 = vpack.c.bf16 %v4735_v4, %v4735_v4 }
 0x7bf   :  { %v4733_v7 = vpop.f32.mrf.mxu1 }
 0x7c0   :  { %v4738_v8 = vpack.c.bf16 %v4736_v6, %v4736_v6 }
 0x7c2   :  { %4906 = vmatprep.mubr.bf16.mxu0 %v4738_v8 }
 0x7c3   :  { %4907 = vmatmul.mubr.bf16.vlgmr.msra.gmra.mxu0 %v4737_v9 }
 0x883   :  { %v5842_v10 = vpop.f32.mrf.mxu0 }
 0x885   :  { %v5843_v41 = vpop.f32.mrf.mxu0 }
 0x886   :  { %v5844_v12 = vadd.f32 %v5843_v41, %v5842_v10 }
 0x887   :  { %v5845_v42 = vpop.f32.mrf.mxu0 }
 0x888   :  { %v4909_v13 = vadd.f32 %v5844_v12, %v5496_v11 }
 0x889   :  { %v5846_v14 = vpop.f32.mrf.mxu0 }
 0x88a   :  { %6492 = vtanh.f32 %v4909_v13 }
 0x897   :  { %v6493_v16 = vpop.eup %6492 }
 0x898   :  { %v4915_v17 = vpack.c.bf16 %v6493_v16, %v6493_v16 }
 0x89a   :  { %4916 = vst [vmem:[#allocation10] sm:$0xf] %v4915_v17 }
 0x89b   :  { %6545 = shalt.err (!%p6542_p0)
}
 0x89c   :  { %4926 = dma.vmem_to_hbm [thread:$0]  %s4924_s16, 64, %s7361_s13, [#allocation7]  }
 0x89d   :  { %6558 = dma.done.wait [#allocation7], 64  }
 0x89e   :  { %6559 = vsyncadd [#allocation7], 4294967232 }
 0x89f   :  { %4930 = vsyncpa [#allocation6], 1 }
 0x8a0   :  { %4931 = vsyncpa [#allocation9], 1 }
 0x8a1   :  { %4932 = vsyncpa [#allocation7], 1 }

// kernel: tpu_custom_call.1
= control target key start
LH: loop header
LB: loop body
LE: loop exit
PB: predicated region body
PF: predicated region fallthrough
CT: control target
= control target key end

     0   :  { %18 = vsyncpa [#allocation6], 0  ;;  %s7348_s0 = inlined_call_operand.vmem [shape: bf16[8,784], index: 0, kind: input, shape index: {}]   ;;  %s7349_s1 = inlined_call_operand.hbm [shape: bf16[7,140,208], index: 1, kind: input, shape index: {}]   ;;  %s7350_s2 = inlined_call_operand.vmem [shape: f32[7,1,208], index: 2, kind: input, shape index: {}]   ;;  %s7351_s3 = inlined_call_operand.hbm [shape: bf16[7,312,112], index: 3, kind: input, shape index: {}]   ;;  %s7352_s4 = inlined_call_operand.vmem [shape: f32[7,1,112], index: 4, kind: input, shape index: {}]   ;;  %s7353_s5 = inlined_call_operand.vmem [shape: bf16[3,336,96], index: 5, kind: input, shape index: {}]   ;;  %s7354_s6 = inlined_call_operand.vmem [shape: f32[3,1,96], index: 6, kind: input, shape index: {}]   ;;  %s7355_s7 = inlined_call_operand.vmem [shape: bf16[288,128], index: 7, kind: input, shape index: {}]   ;;  %s7356_s8 = inlined_call_operand.vmem [shape: f32[1,128], index: 8, kind: input, shape index: {}]   ;;  %s7357_s9 = inlined_call_operand.vmem [shape: bf16[128,256], index: 9, kind: input, shape index: {}]   ;;  %s7358_s10 = inlined_call_operand.vmem [shape: f32[1,256], index: 10, kind: input, shape index: {}]   ;;  %s7359_s11 = inlined_call_operand.vmem [shape: bf16[256,128], index: 11, kind: input, shape index: {}]   ;;  %s7360_s12 = inlined_call_operand.vmem [shape: f32[1,128], index: 12, kind: input, shape index: {}]   ;;  %s7361_s13 = inlined_call_operand.hbm [shape: bf16[8,128], index: 13, kind: output, shape index: {}]  }
   0x1   :  { %19 = vsyncpa [#allocation9], 0 }
   0x2   :  { %20 = vsyncpa [#allocation7], 0  ;;  %s6560_s25 = smov [#allocation5]  }
   0x3   :  { %s28_s26 = sshll.u32 %s6560_s25, 4  ;;  %s29_s26 = int_to_ptr.vmem [resolvable:$true] %s28_s26 }
   0x4   :  { %s6502_s27 = scalar_lea.vmem %s29_s26, 16128  ;;  %p6507_p1 = scmp.lt.s32.totalorder %s29_s26, %s29_s26 }
   0x5   :  { %p6503_p0 = scmp.ne.s32.totalorder %s29_s26, %s6502_s27  ;;  %p6508_p2 = scmp.lt.s32.totalorder %s6502_s27, %s6502_s27 }
   0x7   :  { %p6509_p3 = por %p6508_p2, %p6507_p1 }
   0x9   :  { %p6510_p4 = pnand %p6509_p3, %p6503_p0 }
   0xb   :  { %6513 = shalt.err (!%p6510_p4)
}
   0xc   :  { %s6561_s28 = smov 128   ;;  %s6562_s29 = smov 8  }
   0xd   :  { %34 = dma.hbm_to_vmem [thread:$0]  %s7349_s1, 16128, %s29_s26, [#allocation6], %s6561_s28, %s6561_s28, %s6562_s29  }
   0xe   :  { %s6563_s15 = smov [#allocation8]  }
   0xf   :  { %s42_s16 = sshll.u32 %s6563_s15, 4  ;;  %s43_s16 = int_to_ptr.vmem [resolvable:$true] %s42_s16 }
  0x10   :  { %s6522_s17 = scalar_lea.vmem %s43_s16, 17472  ;;  %p6527_p6 = scmp.lt.s32.totalorder %s43_s16, %s43_s16 }
  0x11   :  { %p6523_p5 = scmp.ne.s32.totalorder %s43_s16, %s6522_s17  ;;  %p6528_p7 = scmp.lt.s32.totalorder %s6522_s17, %s6522_s17 }
  0x13   :  { %p6529_p8 = por %p6528_p7, %p6527_p6 }
  0x15   :  { %p6530_p9 = pnand %p6529_p8, %p6523_p5 }
  0x17   :  { %6533 = shalt.err (!%p6530_p9)
}
  0x18   :  { %s6564_s18 = smov 64   ;;  %s6565_s19 = smov 4  }
  0x19   :  { %48 = dma.hbm_to_vmem [thread:$0]  %s7351_s3, 17472, %s43_s16, [#allocation9], %s6564_s18, %s6564_s18, %s6565_s19  }
  0x1a   :  { %6554 = dma.done.wait [#allocation6], 16128  }
  0x1b   :  { %6555 = vsyncadd [#allocation6], 4294951168 }
  0x1c   :  { %6556 = dma.done.wait [#allocation9], 17472  }
  0x1d   :  { %6557 = vsyncadd [#allocation9], 4294949824  ;;  %v470_v0 = vld [vmem:[%s7348_s0 + $0x4] sm:$0xff]  ;;  %vm199_vm0 = vcmask 97280   ;;  %s6566_s3 = smov 32   ;;  %s6567_s25 = smov 16  }
  0x1e   :  { %v265_v1 = vld [vmem:[%s7348_s0] sm:$0xff]  ;;  %v4981_v2 = vcombine.low %v470_v0, %v470_v0  ;;  %v6009_v4 = vld [vmem:[#allocation5 + $0x74] ss:$8 sps:$4 sm:$0xff]   ;;  %v4982_v7 = vcombine.high %v470_v0, %v470_v0  ;;  %v6014_v10 = vld [vmem:[#allocation5 + $0x60] ss:$8 sps:$4 sm:$0xff]   ;;  %s6568_s28 = smov 48  }
  0x1f   :  { %v6665_v3 = vcombine.low %v265_v1, %v265_v1  ;;  %v4958_v5 = vcombine.high %v265_v1, %v265_v1  ;;  %v6011_v6 = vld [vmem:[#allocation5 + $0x70] ss:$8 sps:$4 sm:$0xff]   ;;  %v6012_v8 = vld [vmem:[#allocation5 + $0x64] ss:$8 sps:$4 sm:$0xff]   ;;  %210 = vmatprep.subr.bf16.mxu0 %v6009_v4  ;;  %v6015_v11 = vld [vmem:[#allocation5 + $0x54] ss:$8 sps:$4 sm:$0xff]  }
  0x20   :  { %508 = vrot.lane.b32.xlu1 %v4981_v2, %s6566_s3  ;;  %v671_v9 = vld [vmem:[%s7348_s0 + $0x8] sm:$0xff]  ;;  %211 = vmatpush1.bf16.msra.mxu0 %v6011_v6  ;;  %v6018_v15 = vld [vmem:[#allocation5 + $0x44] ss:$8 sps:$4 sm:$0xff]   ;;  %v6020_v17 = vld [vmem:[#allocation5 + $0x40] ss:$8 sps:$4 sm:$0xff]   ;;  %vm203_vm1 = vcmask 1045504  }
  0x21   :  { %303 = vrot.lane.b32.xlu0 %v6665_v3, %s6567_s25  ;;  %4954 = vmatprep.mubr.msk.bf16.mxu0 %vm199_vm0, %v4958_v5  ;;  %v5006_v12 = vcombine.high %v671_v9, %v671_v9  ;;  %v5005_v13 = vcombine.low %v671_v9, %v671_v9  ;;  %v6017_v14 = vld [vmem:[#allocation5 + $0x50] ss:$8 sps:$4 sm:$0xff]   ;;  %v6021_v20 = vld [vmem:[#allocation5 + $0x34] ss:$8 sps:$4 sm:$0xff]   ;;  %v6038_v21 = vld [vmem:[#allocation5 + $0x104] ss:$8 sps:$4 sm:$0xff]  }
  0x22   :  { %212 = vmatprep.subr.bf16.mxu0 %v6012_v8  ;;  %v875_v16 = vld [vmem:[%s7348_s0 + $0xc] sm:$0xff]  ;;  %v6040_v22 = vld [vmem:[#allocation5 + $0x100] ss:$8 sps:$4 sm:$0xff]   ;;  %407 = vmatprep.subr.bf16.mxu1 %v6038_v21  ;;  %v6024_v26 = vld [vmem:[#allocation5 + $0x24] ss:$8 sps:$4 sm:$0xff]   ;;  %s6569_s16 = smov 80  }
  0x23   :  { %v5030_v18 = vcombine.high %v875_v16, %v875_v16  ;;  %v5029_v19 = vcombine.low %v875_v16, %v875_v16  ;;  %v6023_v23 = vld [vmem:[#allocation5 + $0x30] ss:$8 sps:$4 sm:$0xff]   ;;  %v6044_v24 = vld [vmem:[#allocation5 + $0xf4] ss:$8 sps:$4 sm:$0xff]   ;;  %408 = vmatpush1.bf16.msra.mxu1 %v6040_v22  ;;  %v6050_v27 = vld [vmem:[#allocation5 + $0xe4] ss:$8 sps:$4 sm:$0xff]  }
  0x24   :  { %510 = vrot.lane.b32.xlu1 %v4982_v7, %s6566_s3  ;;  %213 = vmatpush1.bf16.msra.mxu0 %v6014_v10  ;;  %v6046_v25 = vld [vmem:[#allocation5 + $0xf0] ss:$8 sps:$4 sm:$0xff]   ;;  %v6026_v28 = vld [vmem:[#allocation5 + $0x20] ss:$8 sps:$4 sm:$0xff]   ;;  %v6027_v30 = vld [vmem:[#allocation5 + $0x14] ss:$8 sps:$4 sm:$0xff]  }
  0x25   :  { %305 = vrot.lane.b32.xlu0 %v4958_v5, %s6567_s25  ;;  %214 = vmatprep.subr.bf16.mxu0 %v6015_v11  ;;  %v6052_v29 = vld [vmem:[#allocation5 + $0xe0] ss:$8 sps:$4 sm:$0xff]   ;;  %v6056_v31 = vld [vmem:[#allocation5 + $0xd4] ss:$8 sps:$4 sm:$0xff]   ;;  %v6029_v32 = vld [vmem:[#allocation5 + $0x10] ss:$8 sps:$4 sm:$0xff]  }
  0x26   :  { %409 = vmatprep.subr.bf16.mxu1 %v6044_v24  ;;  %v6058_v33 = vld [vmem:[#allocation5 + $0xd0] ss:$8 sps:$4 sm:$0xff]   ;;  %v6030_v34 = vld [vmem:[#allocation5 + $0x4] ss:$8 sps:$4 sm:$0xff]   ;;  %v6032_v36 = vld [vmem:[#allocation5] ss:$8 sps:$4 sm:$0xff]  }
  0x27   :  { %410 = vmatpush1.bf16.msra.mxu1 %v6046_v25  ;;  %v6062_v35 = vld [vmem:[#allocation5 + $0xc4] ss:$8 sps:$4 sm:$0xff]   ;;  %v6064_v38 = vld [vmem:[#allocation5 + $0xc0] ss:$8 sps:$4 sm:$0xff]   ;;  %v6068_v40 = vld [vmem:[#allocation5 + $0xb4] ss:$8 sps:$4 sm:$0xff]  }
  0x28   :  { %711 = vrot.lane.b32.xlu1 %v5006_v12, %s6568_s28  ;;  %215 = vmatpush1.bf16.msra.mxu0 %v6017_v14  ;;  %v6035_v37 = vld [vmem:[#allocation5 + $0x84] ss:$8 sps:$4 sm:$0x3f]   ;;  %v6037_v39 = vld [vmem:[#allocation5 + $0x80] ss:$8 sps:$4 sm:$0x3f]   ;;  %v95_v12 = vlaneseq }
  0x29   :  { %709 = vrot.lane.b32.xlu0 %v5005_v13, %s6568_s28  ;;  %216 = vmatprep.subr.bf16.mxu0 %v6018_v15  ;;  %v6070_v41 = vld [vmem:[#allocation5 + $0xb0] ss:$8 sps:$4 sm:$0xff]   ;;  %v205_v42 = vsel %vm203_vm1, %v6037_v39, 0  ;;  %v6043_v43 = vld [vmem:[#allocation5 + $0x194] ss:$8 sps:$4 sm:$0xff]   ;;  %vm7362_vm2 = vcmask 261120  }
  0x2a   :  { %411 = vmatprep.subr.bf16.mxu1 %v6050_v27  ;;  %v6074_v44 = vld [vmem:[#allocation5 + $0xa4] ss:$8 sps:$4 sm:$0xff]   ;;  %v6041_v45 = vld [vmem:[#allocation5 + $0x190] ss:$8 sps:$4 sm:$0xff]   ;;  %v6076_v46 = vld [vmem:[#allocation5 + $0xa0] ss:$8 sps:$4 sm:$0xff]  }
  0x2b   :  { %412 = vmatpush1.bf16.msra.mxu1 %v6052_v29  ;;  %v6049_v47 = vld [vmem:[#allocation5 + $0x184] ss:$8 sps:$4 sm:$0xff]   ;;  %v6080_v48 = vld [vmem:[#allocation5 + $0x94] ss:$8 sps:$4 sm:$0xff]   ;;  %v6047_v49 = vld [vmem:[#allocation5 + $0x180] ss:$8 sps:$4 sm:$0xff]  }
  0x2c   :  { %915 = vrot.lane.b32.xlu1 %v5030_v18, %s6564_s18  ;;  %217 = vmatpush1.bf16.msra.mxu0 %v6020_v17  ;;  %v6055_v50 = vld [vmem:[#allocation5 + $0x174] ss:$8 sps:$4 sm:$0xff]   ;;  %v6082_v52 = vld [vmem:[#allocation5 + $0x90] ss:$8 sps:$4 sm:$0xff]   ;;  %v6061_v58 = vld [vmem:[#allocation5 + $0x164] ss:$8 sps:$4 sm:$0xff]  }
  0x2d   :  { %913 = vrot.lane.b32.xlu0 %v5029_v19, %s6564_s18  ;;  %218 = vmatprep.subr.bf16.mxu0 %v6021_v20  ;;  %v1078_v51 = vld [vmem:[%s7348_s0 + $0x10] sm:$0xff]  ;;  %v6088_v56 = vld [vmem:[#allocation5 + $0x110] ss:$8 sps:$4 sm:$0x3f]   ;;  %v6094_v60 = vld [vmem:[#allocation5 + $0x224] ss:$8 sps:$4 sm:$0xff]  }
  0x2e   :  { %413 = vmatprep.subr.bf16.mxu1 %v6056_v31  ;;  %v6086_v53 = vld [vmem:[#allocation5 + $0x114] ss:$8 sps:$4 sm:$0x3f]   ;;  %v5054_v54 = vcombine.high %v1078_v51, %v1078_v51  ;;  %v5053_v55 = vcombine.low %v1078_v51, %v1078_v51  ;;  %v6053_v57 = vld [vmem:[#allocation5 + $0x170] ss:$8 sps:$4 sm:$0xff]   ;;  %v402_v59 = vsel %vm203_vm1, %v6088_v56, 0 }
  0x2f   :  { %414 = vmatpush1.bf16.msra.mxu1 %v6058_v33  ;;  %s6570_s0 = smov 24   ;;  %v6059_v61 = vld [vmem:[#allocation5 + $0x160] ss:$8 sps:$4 sm:$0xff]   ;;  %v6067_v62 = vld [vmem:[#allocation5 + $0x154] ss:$8 sps:$4 sm:$0xff]   ;;  %vm307_vm3 = vcmask 130048  }
  0x30   :  { %219 = vmatpush1.bf16.msra.mxu0 %v6023_v23  ;;  %415 = vmatprep.subr.bf16.mxu1 %v6062_v35  ;;  %v6065_v63 = vld [vmem:[#allocation5 + $0x150] ss:$8 sps:$4 sm:$0xff]   ;;  %v6073_v0 = vld [vmem:[#allocation5 + $0x144] ss:$8 sps:$4 sm:$0xff]   ;;  %v6071_v1 = vld [vmem:[#allocation5 + $0x140] ss:$8 sps:$4 sm:$0xff]  }
  0x31   :  { %220 = vmatprep.subr.bf16.mxu0 %v6024_v26  ;;  %1118 = vrot.lane.b32.xlu1 %v5054_v54, %s6569_s16  ;;  %v6079_v2 = vld [vmem:[#allocation5 + $0x134] ss:$8 sps:$4 sm:$0xff]   ;;  %v6085_v4 = vld [vmem:[#allocation5 + $0x124] ss:$8 sps:$4 sm:$0xff]   ;;  %v6083_v5 = vld [vmem:[#allocation5 + $0x120] ss:$8 sps:$4 sm:$0xff]  }
  0x32   :  { %1116 = vrot.lane.b32.xlu0 %v5053_v55, %s6569_s16  ;;  %v6089_v6 = vld [vmem:[#allocation5 + $0x1a4] ss:$8 sps:$4 sm:$0x3f]   ;;  %v6091_v7 = vld [vmem:[#allocation5 + $0x1a0] ss:$8 sps:$4 sm:$0x3f]  }
  0x33   :  { %416 = vmatpush1.bf16.msra.mxu1 %v6064_v38  ;;  %v607_v8 = vsel %vm203_vm1, %v6091_v7, 0  ;;  %v6123_v9 = vld [vmem:[#allocation5 + $0x2b4] ss:$8 sps:$4 sm:$0xff]   ;;  %v6120_v10 = vld [vmem:[#allocation5 + $0x230] ss:$8 sps:$4 sm:$0x3f]  }
  0x34   :  { %221 = vmatpush1.bf16.msra.mxu0 %v6026_v28  ;;  %417 = vmatprep.subr.bf16.mxu1 %v6068_v40  ;;  %v6147_v11 = vld [vmem:[#allocation5 + $0x2c0] ss:$8 sps:$4 sm:$0x3f]   ;;  %v6698_v13 = vsel %vm203_vm1, %v6120_v10, 0  ;;  %v6703_v15 = vshrl.u32 %v95_v12, 7  ;;  %vm7364_vm4 = vcmask 392192  }
  0x35   :  { %222 = vmatprep.subr.bf16.mxu0 %v6027_v30  ;;  %1318 = vrot.lane.b32.xlu1 %v5054_v54, %s6570_s0  ;;  %v6701_v14 = vsel %vm203_vm1, %v6147_v11, 0  ;;  %v6092_v18 = vld [vmem:[#allocation5 + $0x220] ss:$8 sps:$4 sm:$0xff]   ;;  %v6121_v19 = vld [vmem:[#allocation5 + $0x2b0] ss:$8 sps:$4 sm:$0xff]   ;;  %vm7366_vm5 = vcmask 523264  }
  0x36   :  { %1316 = vrot.lane.b32.xlu0 %v5053_v55, %s6570_s0  ;;  %v6097_v20 = vld [vmem:[#allocation5 + $0x214] ss:$8 sps:$4 sm:$0xff]   ;;  %v6126_v21 = vld [vmem:[#allocation5 + $0x2a4] ss:$8 sps:$4 sm:$0xff]   ;;  %v6095_v26 = vld [vmem:[#allocation5 + $0x210] ss:$8 sps:$4 sm:$0xff]  }
  0x37   :  { %418 = vmatpush1.bf16.msra.mxu1 %v6070_v41  ;;  %v6124_v27 = vld [vmem:[#allocation5 + $0x2a0] ss:$8 sps:$4 sm:$0xff]   ;;  %v6102_v28 = vld [vmem:[#allocation5 + $0x204] ss:$8 sps:$4 sm:$0xff]   ;;  %v6129_v29 = vld [vmem:[#allocation5 + $0x294] ss:$8 sps:$4 sm:$0xff]  }
  0x38   :  { %223 = vmatpush1.bf16.msra.mxu0 %v6029_v32  ;;  %419 = vmatprep.subr.bf16.mxu1 %v6074_v44  ;;  %v6100_v31 = vld [vmem:[#allocation5 + $0x200] ss:$8 sps:$4 sm:$0xff]   ;;  %v6127_v32 = vld [vmem:[#allocation5 + $0x290] ss:$8 sps:$4 sm:$0xff]   ;;  %v6105_v33 = vld [vmem:[#allocation5 + $0x1f4] ss:$8 sps:$4 sm:$0xff]  }
  0x39   :  { %224 = vmatprep.subr.bf16.mxu0 %v6030_v34  ;;  %v6132_v34 = vld [vmem:[#allocation5 + $0x284] ss:$8 sps:$4 sm:$0xff]   ;;  %v6135_v39 = vld [vmem:[#allocation5 + $0x274] ss:$8 sps:$4 sm:$0xff]   ;;  %v6106_v40 = vld [vmem:[#allocation5 + $0x1e0] ss:$8 sps:$4 sm:$0xff]  }
  0x3a   :  { %v6108_v38 = vld [vmem:[#allocation5 + $0x1e4] ss:$8 sps:$4 sm:$0xff]   ;;  %v6133_v41 = vld [vmem:[#allocation5 + $0x270] ss:$8 sps:$4 sm:$0xff]   ;;  %v6165_v10 = vld [vmem:[#allocation5 + $0x314] ss:$8 sps:$4 sm:$0xff]  }
  0x3b   :  { %420 = vmatpush1.bf16.msra.mxu1 %v6076_v46  ;;  %v6109_v44 = vld [vmem:[#allocation5 + $0x1d0] ss:$8 sps:$4 sm:$0xff]   ;;  %v6114_v46 = vld [vmem:[#allocation5 + $0x1c4] ss:$8 sps:$4 sm:$0xff]   ;;  %vm7365_vm6 = vcmask 654336   ;;  %vm1320_vm7 = vcmask 195584  }
  0x3c   :  { %225 = vmatpush1.bf16.msra.mxu0 %v6032_v36  ;;  %421 = vmatprep.subr.bf16.mxu1 %v6080_v48  ;;  %v6103_v36 = vld [vmem:[#allocation5 + $0x1f0] ss:$8 sps:$4 sm:$0xff]   ;;  %v6112_v48 = vld [vmem:[#allocation5 + $0x1c0] ss:$8 sps:$4 sm:$0xff]   ;;  %v6144_v51 = vld [vmem:[#allocation5 + $0x244] ss:$8 sps:$4 sm:$0xff]  }
  0x3d   :  { %4953 = vmatprep.subr.msk.bf16.mxu0 %vm203_vm1, %v6035_v37  ;;  %v6130_v37 = vld [vmem:[#allocation5 + $0x280] ss:$8 sps:$4 sm:$0xff]   ;;  %v6118_v54 = vld [vmem:[#allocation5 + $0x234] ss:$8 sps:$4 sm:$0x3f]   ;;  %vm261_vm8 = vcmask 1043456  }
  0x3e   :  { %v6145_v55 = vld [vmem:[#allocation5 + $0x2c4] ss:$8 sps:$4 sm:$0x3f]   ;;  %v6163_v12 = vld [vmem:[#allocation5 + $0x310] ss:$8 sps:$4 sm:$0xff]   ;;  %vm262_vm9 = vcmask 654340  }
  0x3f   :  { %422 = vmatpush1.bf16.msra.mxu1 %v6082_v52  ;;  %v6115_v52 = vld [vmem:[#allocation5 + $0x1b0] ss:$8 sps:$4 sm:$0xff]   ;;  %v6174_v11 = vld [vmem:[#allocation5 + $0x3a4] ss:$8 sps:$4 sm:$0xff]   ;;  %vm263_vm10 = vmor %vm262_vm9, %vm261_vm8  ;;  %s6572_s29 = smov 112   ;;  %vm7368_vm11 = vcmask 1044096  }
  0x40   :  { %241 = vmatpush2.bf16.msra.mxu0 %v205_v42  ;;  %4977 = vmatprep.subr.msk.bf16.mxu1 %vm203_vm1, %v6086_v53  ;;  %v6111_v42 = vld [vmem:[#allocation5 + $0x1d4] ss:$8 sps:$4 sm:$0xff]   ;;  %v6142_v53 = vld [vmem:[#allocation5 + $0x240] ss:$8 sps:$4 sm:$0xff]   ;;  %vm465_vm12 = vcmask 1047556   ;;  %vm7363_vm13 = vcmask 1043712  }
  0x41   :  { %612 = vmatprep.subr.bf16.mxu0 %v6043_v43  ;;  %v6138_v43 = vld [vmem:[#allocation5 + $0x264] ss:$8 sps:$4 sm:$0xff]   ;;  %vm668_vm14 = vcmask 916484   ;;  %vm466_vm15 = vmor %vm465_vm12, %vm7368_vm11  ;;  %s6575_s19 = smov 72   ;;  %s6578_s26 = smov 96  }
  0x43   :  { %243 = vmatmul.mubr.bf16.vlgmr.msra.gmra.mxu0 %v6665_v3  ;;  %438 = vmatpush2.bf16.msra.mxu1 %v402_v59  ;;  %v6077_v3 = vld [vmem:[#allocation5 + $0x130] ss:$8 sps:$4 sm:$0xff]  }
  0x44   :  { %613 = vmatpush1.bf16.msra.mxu0 %v6041_v45  ;;  %813 = vmatprep.subr.bf16.mxu1 %v6094_v60  ;;  %v6136_v45 = vld [vmem:[#allocation5 + $0x260] ss:$8 sps:$4 sm:$0xff]  }
  0x45   :  { %614 = vmatprep.subr.bf16.mxu0 %v6049_v47  ;;  %v6141_v47 = vld [vmem:[#allocation5 + $0x254] ss:$8 sps:$4 sm:$0xff]   ;;  %v6148_v60 = vld [vmem:[#allocation5 + $0x340] ss:$8 sps:$4 sm:$0xff]  }
  0x48   :  { %615 = vmatpush1.bf16.msra.mxu0 %v6047_v49  ;;  %v6139_v49 = vld [vmem:[#allocation5 + $0x250] ss:$8 sps:$4 sm:$0xff]  }
  0x49   :  { %616 = vmatprep.subr.bf16.mxu0 %v6055_v50  ;;  %v6117_v50 = vld [vmem:[#allocation5 + $0x1b4] ss:$8 sps:$4 sm:$0xff]  }
  0x4c   :  { %617 = vmatpush1.bf16.msra.mxu0 %v6053_v57  ;;  %v6150_v57 = vld [vmem:[#allocation5 + $0x344] ss:$8 sps:$4 sm:$0xff]  }
  0x4d   :  { %618 = vmatprep.subr.bf16.mxu0 %v6061_v58  ;;  %v6156_v58 = vld [vmem:[#allocation5 + $0x3d4] ss:$8 sps:$4 sm:$0xff]  }
  0x50   :  { %619 = vmatpush1.bf16.msra.mxu0 %v6059_v61  ;;  %v6154_v61 = vld [vmem:[#allocation5 + $0x3d0] ss:$8 sps:$4 sm:$0xff]  }
  0x51   :  { %620 = vmatprep.subr.bf16.mxu0 %v6067_v62  ;;  %v6153_v62 = vld [vmem:[#allocation5 + $0x334] ss:$8 sps:$4 sm:$0xff]  }
  0x54   :  { %621 = vmatpush1.bf16.msra.mxu0 %v6065_v63  ;;  %v6162_v63 = vld [vmem:[#allocation5 + $0x3c4] ss:$8 sps:$4 sm:$0xff]  }
  0x55   :  { %622 = vmatprep.subr.bf16.mxu0 %v6073_v0 }
  0x58   :  { %623 = vmatpush1.bf16.msra.mxu0 %v6071_v1 }
  0x59   :  { %624 = vmatprep.subr.bf16.mxu0 %v6079_v2 }
  0x5c   :  { %625 = vmatpush1.bf16.msra.mxu0 %v6077_v3  ;;  %v6151_v3 = vld [vmem:[#allocation5 + $0x330] ss:$8 sps:$4 sm:$0xff]  }
  0x5d   :  { %626 = vmatprep.subr.bf16.mxu0 %v6085_v4  ;;  %v6160_v4 = vld [vmem:[#allocation5 + $0x3c0] ss:$8 sps:$4 sm:$0xff]  }
  0x60   :  { %627 = vmatpush1.bf16.msra.mxu0 %v6083_v5  ;;  %v6159_v5 = vld [vmem:[#allocation5 + $0x324] ss:$8 sps:$4 sm:$0xff]  }
  0x61   :  { %5001 = vmatprep.subr.msk.bf16.mxu0 %vm203_vm1, %v6089_v6  ;;  %v6168_v6 = vld [vmem:[#allocation5 + $0x3b4] ss:$8 sps:$4 sm:$0xff]  }
  0x64   :  { %643 = vmatpush2.bf16.msra.mxu0 %v607_v8  ;;  %v6157_v8 = vld [vmem:[#allocation5 + $0x320] ss:$8 sps:$4 sm:$0xff]  }
  0x65   :  { %1017 = vmatprep.subr.bf16.mxu0 %v6123_v9  ;;  %v6166_v9 = vld [vmem:[#allocation5 + $0x3b0] ss:$8 sps:$4 sm:$0xff]  }
  0x92   :  { %v509_v16 = vpop.permute.xlu1 %508 }
  0x93   :  { %v304_v17 = vpop.permute.xlu0 %303 }
  0x96   :  { %v511_v22 = vpop.permute.xlu1 %510 }
  0x97   :  { %v306_v23 = vpop.permute.xlu0 %305  ;;  %v513_v24 = vsel %vm7362_vm2, %v509_v16, %v511_v22  ;;  %5002 = vmatprep.mubr.msk.bf16.mxu0 %vm199_vm0, %v511_v22  ;;  %v6180_v16 = vld [vmem:[#allocation5 + $0x394] ss:$8 sps:$4 sm:$0xff]   ;;  %v6184_v22 = vld [vmem:[#allocation5 + $0x380] ss:$8 sps:$4 sm:$0xff]  }
  0x98   :  { %4978 = vmatprep.mubr.msk.bf16.mxu1 %vm199_vm0, %v306_v23  ;;  %v308_v25 = vsel %vm307_vm3, %v304_v17, %v306_v23  ;;  %645 = vmatmul.mubr.bf16.vlgmr.msra.gmra.mxu0 %v513_v24  ;;  %v6169_v17 = vld [vmem:[#allocation5 + $0x300] ss:$8 sps:$4 sm:$0xff]   ;;  %v6183_v23 = vld [vmem:[#allocation5 + $0x2e4] ss:$8 sps:$4 sm:$0xff]   ;;  %v6192_v24 = vld [vmem:[#allocation5 + $0x374] ss:$8 sps:$4 sm:$0xff]  }
  0x99   :  { %440 = vmatmul.mubr.bf16.vlgmr.msra.gmra.mxu1 %v308_v25  ;;  %1018 = vmatpush1.bf16.msra.mxu0 %v6121_v19  ;;  %v6177_v19 = vld [vmem:[#allocation5 + $0x2f4] ss:$8 sps:$4 sm:$0xff]   ;;  %v6181_v25 = vld [vmem:[#allocation5 + $0x2e0] ss:$8 sps:$4 sm:$0xff]  }
  0x9a   :  { %814 = vmatpush1.bf16.msra.mxu1 %v6092_v18  ;;  %v6709_v30 = vpop.permute.xlu1 %711  ;;  %1019 = vmatprep.subr.bf16.mxu0 %v6126_v21  ;;  %v6178_v18 = vld [vmem:[#allocation5 + $0x390] ss:$8 sps:$4 sm:$0xff]  }
  0x9b   :  { %815 = vmatprep.subr.bf16.mxu1 %v6097_v20  ;;  %5026 = vmatprep.mubr.msk.bf16.mxu1 %vm199_vm0, %v6709_v30  ;;  %v710_v56 = vpop.permute.xlu0 %709  ;;  %v6186_v20 = vld [vmem:[#allocation5 + $0x384] ss:$8 sps:$4 sm:$0xff]   ;;  %v6175_v21 = vld [vmem:[#allocation5 + $0x2f0] ss:$8 sps:$4 sm:$0xff]  }
  0x9c   :  { %v714_v0 = vsel %vm7364_vm4, %v710_v56, %v6709_v30  ;;  %v6201_v30 = vld [vmem:[#allocation5 + $0x3e0] ss:$8 sps:$4 sm:$0x3f]   ;;  %vm1076_vm4 = vcmask 125952  }
  0x9d   :  { %1020 = vmatpush1.bf16.msra.mxu0 %v6124_v27  ;;  %v6189_v27 = vld [vmem:[#allocation5 + $0x2d4] ss:$8 sps:$4 sm:$0xff]  }
  0x9e   :  { %816 = vmatpush1.bf16.msra.mxu1 %v6095_v26  ;;  %1021 = vmatprep.subr.bf16.mxu0 %v6129_v29  ;;  %v916_v35 = vpop.permute.xlu1 %915  ;;  %v6190_v26 = vld [vmem:[#allocation5 + $0x370] ss:$8 sps:$4 sm:$0xff]  }
  0x9f   :  { %817 = vmatprep.subr.bf16.mxu1 %v6102_v28  ;;  %5050 = vmatprep.mubr.msk.bf16.mxu0 %vm199_vm0, %v916_v35  ;;  %v914_v59 = vpop.permute.xlu0 %913  ;;  %v6197_v28 = vld [vmem:[#allocation5 + $0x364] ss:$8 sps:$4 sm:$0xff]   ;;  %v6198_v29 = vld [vmem:[#allocation5 + $0x350] ss:$8 sps:$4 sm:$0x3f]  }
  0xa0   :  { %v918_v1 = vsel %vm7366_vm5, %v914_v59, %v916_v35  ;;  %v6199_v35 = vld [vmem:[#allocation5 + $0x3e4] ss:$8 sps:$4 sm:$0x3f]   ;;  %v6208_v59 = vld [vmem:[#allocation8 + $0x60] sm:$0xff]  }
  0xa1   :  { %1022 = vmatpush1.bf16.msra.mxu0 %v6127_v32  ;;  %v6195_v32 = vld [vmem:[#allocation5 + $0x360] ss:$8 sps:$4 sm:$0xff]  }
  0xa2   :  { %818 = vmatpush1.bf16.msra.mxu1 %v6100_v31  ;;  %1023 = vmatprep.subr.bf16.mxu0 %v6132_v34  ;;  %v6187_v31 = vld [vmem:[#allocation5 + $0x2d0] ss:$8 sps:$4 sm:$0xff]  }
  0xa3   :  { %819 = vmatprep.subr.bf16.mxu1 %v6105_v33  ;;  %v6721_v2 = vpop.permute.xlu1 %1118  ;;  %v6193_v33 = vld [vmem:[#allocation5 + $0x354] ss:$8 sps:$4 sm:$0x3f]  }
  0xa4   :  { %v1117_v34 = vpop.permute.xlu0 %1116 }
  0xa5   :  { %1024 = vmatpush1.bf16.msra.mxu0 %v6130_v37  ;;  %v1415_v37 = vsel %vm203_vm1, %v6201_v30, 0 }
  0xa6   :  { %820 = vmatpush1.bf16.msra.mxu1 %v6103_v36  ;;  %1025 = vmatprep.subr.bf16.mxu0 %v6135_v39  ;;  %v1214_v36 = vsel %vm203_vm1, %v6198_v29, 0  ;;  %v1120_v39 = vsel %vm7365_vm6, %v1117_v34, %v6721_v2 }
  0xa7   :  { %821 = vmatprep.subr.bf16.mxu1 %v6108_v38  ;;  %v6723_v7 = vpop.permute.xlu1 %1318 }
  0xa8   :  { %v1317_v38 = vpop.permute.xlu0 %1316 }
  0xa9   :  { %1026 = vmatpush1.bf16.msra.mxu0 %v6133_v41  ;;  %v6738_v41 = vsub.s32 0, %v6703_v15 }
  0xaa   :  { %822 = vmatpush1.bf16.msra.mxu1 %v6106_v40  ;;  %1027 = vmatprep.subr.bf16.mxu0 %v6138_v43  ;;  %v1321_v40 = vsel %vm1320_vm7, %v1317_v38, %v6723_v7  ;;  %v93_v43 = vld [vmem:[%s7350_s2] sm:$0x3] }
  0xab   :  { %823 = vmatprep.subr.bf16.mxu1 %v6111_v42  ;;  %v6741_v42 = vsub.s32 1, %v6703_v15 }
  0xad   :  { %1028 = vmatpush1.bf16.msra.mxu0 %v6136_v45  ;;  %v102_v45 = vrot.slane %v93_v43, %v6741_v42 }
  0xae   :  { %824 = vmatpush1.bf16.msra.mxu1 %v6109_v44  ;;  %1029 = vmatprep.subr.bf16.mxu0 %v6141_v47  ;;  %v98_v44 = vrot.slane %v93_v43, %v6738_v41  ;;  %v6202_v47 = vld [vmem:[#allocation8 + $0x78] sm:$0xff]  }
  0xaf   :  { %825 = vmatprep.subr.bf16.mxu1 %v6114_v46 }
  0xb1   :  { %1030 = vmatpush1.bf16.msra.mxu0 %v6139_v49 }
  0xb2   :  { %826 = vmatpush1.bf16.msra.mxu1 %v6112_v48  ;;  %1031 = vmatprep.subr.bf16.mxu0 %v6144_v51  ;;  %v6203_v48 = vld [vmem:[#allocation8 + $0x38] sm:$0xff]  }
  0xb3   :  { %827 = vmatprep.subr.bf16.mxu1 %v6117_v50  ;;  %v6204_v50 = vld [vmem:[#allocation8 + $0x70] sm:$0xff]  }
  0xb5   :  { %1032 = vmatpush1.bf16.msra.mxu0 %v6142_v53  ;;  %v6205_v53 = vld [vmem:[#allocation8 + $0x30] sm:$0xff]  }
  0xb6   :  { %828 = vmatpush1.bf16.msra.mxu1 %v6115_v52  ;;  %5049 = vmatprep.subr.msk.bf16.mxu0 %vm203_vm1, %v6145_v55 }
  0xb7   :  { %5025 = vmatprep.subr.msk.bf16.mxu1 %vm203_vm1, %v6118_v54  ;;  %v6206_v54 = vld [vmem:[#allocation8 + $0x68] sm:$0xff]  }
  0xb9   :  { %1048 = vmatpush2.bf16.msra.mxu0 %v6701_v14  ;;  %v6171_v14 = vld [vmem:[#allocation5 + $0x304] ss:$8 sps:$4 sm:$0xff]  }
  0xba   :  { %844 = vmatpush2.bf16.msra.mxu1 %v6698_v13  ;;  %1420 = vmatprep.subr.bf16.mxu0 %v6156_v58  ;;  %v6172_v13 = vld [vmem:[#allocation5 + $0x3a0] ss:$8 sps:$4 sm:$0xff]  }
  0xbb   :  { %1219 = vmatprep.subr.bf16.mxu1 %v6150_v57  ;;  %v6207_v57 = vld [vmem:[#allocation8 + $0x28] sm:$0xff]  }
  0xbc   :  { %1050 = vmatmul.mubr.bf16.vlgmr.msra.gmra.mxu0 %v918_v1  ;;  %v4980_v1 = vld [vmem:[%s7350_s2 + $0x4] sm:$0x3] }
  0xbd   :  { %846 = vmatmul.mubr.bf16.vlgmr.msra.gmra.mxu1 %v714_v0  ;;  %1421 = vmatpush1.bf16.msra.mxu0 %v6154_v61  ;;  %v6209_v61 = vld [vmem:[#allocation8 + $0x20] sm:$0xff]   ;;  %v4956_v0 = vld [vmem:[%s7350_s2 + $0x2] sm:$0x3] }
  0xbe   :  { %1220 = vmatpush1.bf16.msra.mxu1 %v6148_v60  ;;  %1422 = vmatprep.subr.bf16.mxu0 %v6162_v63  ;;  %v6211_v63 = vld [vmem:[#allocation8 + $0x18] sm:$0xff]  }
  0xbf   :  { %1221 = vmatprep.subr.bf16.mxu1 %v6153_v62  ;;  %5074 = vmatprep.mubr.msk.bf16.mxu1 %vm199_vm0, %v6721_v2  ;;  %v6210_v62 = vld [vmem:[#allocation8 + $0x58] sm:$0xff]   ;;  %v6212_v2 = vld [vmem:[#allocation8 + $0x50] sm:$0xff]  }
  0xc0   :  { %5098 = vmatprep.mubr.msk.bf16.mxu0 %vm199_vm0, %v6723_v7  ;;  %v500_v7 = vrot.slane %v4980_v1, %v6741_v42  ;;  %vm468_vm0 = vcmask 257024  }
  0xc1   :  { %1423 = vmatpush1.bf16.msra.mxu0 %v6160_v4  ;;  %v496_v4 = vrot.slane %v4980_v1, %v6738_v41  ;;  %v5076_v1 = vld [vmem:[%s7350_s2 + $0xc] sm:$0x3] }
  0xc2   :  { %1222 = vmatpush1.bf16.msra.mxu1 %v6151_v3  ;;  %1424 = vmatprep.subr.bf16.mxu0 %v6168_v6  ;;  %v291_v3 = vrot.slane %v4956_v0, %v6738_v41  ;;  %v295_v6 = vrot.slane %v4956_v0, %v6741_v42 }
  0xc3   :  { %1223 = vmatprep.subr.bf16.mxu1 %v6159_v5  ;;  %v6213_v5 = vld [vmem:[#allocation8 + $0x10] sm:$0xff]  }
  0xc5   :  { %1425 = vmatpush1.bf16.msra.mxu0 %v6166_v9 }
  0xc6   :  { %1224 = vmatpush1.bf16.msra.mxu1 %v6157_v8  ;;  %1426 = vmatprep.subr.bf16.mxu0 %v6174_v11  ;;  %v6214_v8 = vld [vmem:[#allocation8 + $0x48] sm:$0xff]  }
  0xc7   :  { %1225 = vmatprep.subr.bf16.mxu1 %v6165_v10  ;;  %v6215_v11 = vld [vmem:[#allocation8 + $0x8] sm:$0xff]  }
  0xc9   :  { %1427 = vmatpush1.bf16.msra.mxu0 %v6172_v13 }
  0xca   :  { %1226 = vmatpush1.bf16.msra.mxu1 %v6163_v12  ;;  %1428 = vmatprep.subr.bf16.mxu0 %v6180_v16  ;;  %v6216_v12 = vld [vmem:[#allocation8 + $0x40] sm:$0xff]  }
  0xcb   :  { %1227 = vmatprep.subr.bf16.mxu1 %v6171_v14 }
  0xcd   :  { %1429 = vmatpush1.bf16.msra.mxu0 %v6178_v18 }
  0xce   :  { %1228 = vmatpush1.bf16.msra.mxu1 %v6169_v17  ;;  %1430 = vmatprep.subr.bf16.mxu0 %v6186_v20  ;;  %v6217_v20 = vld [vmem:[#allocation8] sm:$0xff]  }
  0xcf   :  { %1229 = vmatprep.subr.bf16.mxu1 %v6177_v19 }
  0xd1   :  { %1431 = vmatpush1.bf16.msra.mxu0 %v6184_v22 }
  0xd2   :  { %1230 = vmatpush1.bf16.msra.mxu1 %v6175_v21  ;;  %1432 = vmatprep.subr.bf16.mxu0 %v6192_v24 }
  0xd3   :  { %1231 = vmatprep.subr.bf16.mxu1 %v6183_v23 }
  0xd5   :  { %1433 = vmatpush1.bf16.msra.mxu0 %v6190_v26 }
  0xd6   :  { %1232 = vmatpush1.bf16.msra.mxu1 %v6181_v25  ;;  %1434 = vmatprep.subr.bf16.mxu0 %v6197_v28 }
  0xd7   :  { %1233 = vmatprep.subr.bf16.mxu1 %v6189_v27 }
  0xd9   :  { %1435 = vmatpush1.bf16.msra.mxu0 %v6195_v32  ;;  %v5004_v32 = vld [vmem:[%s7350_s2 + $0x6] sm:$0x3] }
  0xda   :  { %1234 = vmatpush1.bf16.msra.mxu1 %v6187_v31  ;;  %5097 = vmatprep.subr.msk.bf16.mxu0 %vm203_vm1, %v6199_v35  ;;  %v6571_v31 = vmov 0.0   ;;  %v697_v34 = vrot.slane %v5004_v32, %v6738_v41 }
  0xdb   :  { %5073 = vmatprep.subr.msk.bf16.mxu1 %vm203_vm1, %v6193_v33  ;;  %v5028_v33 = vld [vmem:[%s7350_s2 + $0x8] sm:$0x3]  ;;  %vm669_vm1 = vmor %vm668_vm14, %vm7363_vm13  ;;  %vm1657_vm14 = vcmask 457728   ;;  %vm873_vm13 = vcmask 519168  }
  0xdc   :  { %v901_v35 = vrot.slane %v5028_v33, %v6738_v41 }
  0xdd   :  { %1451 = vmatpush2.bf16.msra.mxu0 %v1415_v37  ;;  %v905_v37 = vrot.slane %v5028_v33, %v6741_v42  ;;  %v6243_v33 = vld [vmem:[#allocation8 + $0xcc] sm:$0xff]  }
  0xde   :  { %1250 = vmatpush2.bf16.msra.mxu1 %v1214_v36  ;;  %v701_v36 = vrot.slane %v5004_v32, %v6741_v42  ;;  %v6241_v32 = vld [vmem:[#allocation8 + $0x10c] sm:$0xff]  }
  0xdf   :  { %5528 = vmatprep.subr.bf16.mxu1 %v6202_v47 }
  0xe0   :  { %1453 = vmatmul.mubr.bf16.vlgmr.msra.gmra.mxu0 %v1321_v40 }
  0xe1   :  { %1252 = vmatmul.mubr.bf16.vlgmr.msra.gmra.mxu1 %v1120_v39 }
  0xe2   :  { %5529 = vmatpush3.bf16.msra.mxu1 %v6203_v48 }
  0xe3   :  { %5530 = vmatprep.subr.bf16.mxu1 %v6204_v50 }
  0xe6   :  { %5531 = vmatpush3.bf16.msra.mxu1 %v6205_v53 }
  0xe7   :  { %5532 = vmatprep.subr.bf16.mxu1 %v6206_v54 }
  0xea   :  { %5533 = vmatpush3.bf16.msra.mxu1 %v6207_v57 }
  0xeb   :  { %5534 = vmatprep.subr.bf16.mxu1 %v6208_v59 }
  0xee   :  { %5535 = vmatpush3.bf16.msra.mxu1 %v6209_v61 }
  0xef   :  { %5536 = vmatprep.subr.bf16.mxu1 %v6210_v62 }
  0xf2   :  { %5537 = vmatpush3.bf16.msra.mxu1 %v6211_v63 }
  0xf3   :  { %5538 = vmatprep.subr.bf16.mxu1 %v6212_v2  ;;  %v5052_v2 = vld [vmem:[%s7350_s2 + $0xa] sm:$0x3]  ;;  %s6574_s2 = smov 120  }
  0xf6   :  { %5539 = vmatpush3.bf16.msra.mxu1 %v6213_v5 }
  0xf7   :  { %5540 = vmatprep.subr.bf16.mxu1 %v6214_v8  ;;  %v1308_v8 = vrot.slane %v5076_v1, %v6741_v42 }
  0xfa   :  { %5541 = vmatpush3.bf16.msra.mxu1 %v6215_v11 }
  0xfb   :  { %5542 = vmatprep.subr.bf16.mxu1 %v6216_v12  ;;  %v1108_v12 = vrot.slane %v5052_v2, %v6741_v42 }
  0xfe   :  { %5543 = vmatpush3.bf16.msra.mxu1 %v6217_v20 }
  0xff   :  { %5848 = vmatprep.subr.bf16.mxu1 %v6571_v31 }
 0x103   :  { %v244_v46 = vpop.f32.mrf.mxu0 }
 0x104   :  { %v245_v49 = vadd.f32 %v244_v46, %v98_v44 }
 0x105   :  { %v246_v51 = vpop.f32.mrf.mxu0 }
 0x106   :  { %v251_v52 = vmax.f32 %v245_v49, 0.0  ;;  %v247_v15 = vadd.f32 %v246_v51, %v102_v45 }
 0x107   :  { %v248_v55 = vpop.f32.mrf.mxu0 }
 0x108   :  { %v252_v56 = vmax.f32 %v247_v15, 0.0 }
 0x109   :  { %v249_v58 = vpop.f32.mrf.mxu0 }
 0x10a   :  { %v5513_v60 = vpack.c.bf16 %v252_v56, %v251_v52 }
 0x10c   :  { %264 = vst.msk [vmem:[#allocation2] sm:$0xff] %vm263_vm10, %v5513_v60  ;;  %vm6573_vm10 = vmmov 0  }
 0x158   :  { %v646_v10 = vpop.f32.mrf.mxu0 }
 0x159   :  { %v441_v9 = vpop.f32.mrf.mxu1  ;;  %v647_v14 = vadd.f32 %v646_v10, %v496_v4 }
 0x15a   :  { %v442_v13 = vadd.f32 %v441_v9, %v291_v3  ;;  %v648_v17 = vpop.f32.mrf.mxu0  ;;  %v1104_v9 = vrot.slane %v5052_v2, %v6738_v41  ;;  %v6234_v2 = vld [vmem:[#allocation8 + $0x11c] sm:$0xff]  }
 0x15b   :  { %v443_v16 = vpop.f32.mrf.mxu1  ;;  %v649_v19 = vadd.f32 %v648_v17, %v500_v7  ;;  %v653_v24 = vmax.f32 %v647_v14, 0.0  ;;  %v1304_v7 = vrot.slane %v5076_v1, %v6738_v41  ;;  %v6276_v1 = vld [vmem:[#allocation8 + $0x24c] sm:$0xff]  }
 0x15c   :  { %v444_v18 = vadd.f32 %v443_v16, %v295_v6  ;;  %v650_v22 = vpop.f32.mrf.mxu0  ;;  %v448_v23 = vmax.f32 %v442_v13, 0.0 }
 0x15d   :  { %v445_v21 = vpop.f32.mrf.mxu1  ;;  %v654_v26 = vmax.f32 %v649_v19, 0.0  ;;  %v6239_v19 = vld [vmem:[#allocation8 + $0xd4] sm:$0xff]  }
 0x15e   :  { %v449_v25 = vmax.f32 %v444_v18, 0.0  ;;  %v651_v28 = vpop.f32.mrf.mxu0  ;;  %v6237_v18 = vld [vmem:[#allocation8 + $0x114] sm:$0xff]  }
 0x15f   :  { %v446_v27 = vpop.f32.mrf.mxu1  ;;  %v5515_v30 = vpack.c.bf16 %v654_v26, %v653_v24  ;;  %v6222_v22 = vld [vmem:[#allocation8 + $0x98] ss:$0 sps:$4 sm:$0xff]   ;;  %5555 = vmatprep.subr.bf16.mxu0 %v6237_v18  ;;  %v6242_v18 = vld [vmem:[#allocation8 + $0x1a0] sm:$0xff]  }
 0x160   :  { %v5514_v29 = vpack.c.bf16 %v449_v25, %v448_v23  ;;  %5556 = vmatpush3.bf16.msra.mxu0 %v6239_v19 }
 0x161   :  { %662 = vrot.lane.b32.xlu1 %v5515_v30, %s6566_s3  ;;  %5557 = vmatprep.subr.bf16.mxu0 %v6241_v32  ;;  %v6258_v32 = vld [vmem:[#allocation8 + $0x188] sm:$0xff]  }
 0x162   :  { %457 = vrot.lane.b32.xlu0 %v5514_v29, %s6569_s16 }
 0x164   :  { %5558 = vmatpush3.bf16.msra.mxu0 %v6243_v33 }
 0x17c   :  { %v1051_v39 = vpop.f32.mrf.mxu0 }
 0x17d   :  { %v847_v38 = vpop.f32.mrf.mxu1  ;;  %v1052_v43 = vadd.f32 %v1051_v39, %v901_v35  ;;  %v1662_v35 = vsel %vm261_vm8, %v6222_v22, 0  ;;  %v6223_v39 = vld [vmem:[#allocation8 + $0x90] sm:$0xff]  }
 0x17e   :  { %v848_v40 = vadd.f32 %v847_v38, %v697_v34  ;;  %v1053_v45 = vpop.f32.mrf.mxu0  ;;  %v6247_v38 = vld [vmem:[#allocation8 + $0xc4] sm:$0xff]  }
 0x17f   :  { %v849_v44 = vpop.f32.mrf.mxu1  ;;  %v1058_v48 = vmax.f32 %v1052_v43, 0.0  ;;  %v1054_v49 = vadd.f32 %v1053_v45, %v905_v37  ;;  %v6245_v37 = vld [vmem:[#allocation8 + $0x104] sm:$0xff]   ;;  %v6253_v43 = vld [vmem:[#allocation8 + $0xbc] sm:$0xff]   ;;  %v6257_v45 = vld [vmem:[#allocation8 + $0xf4] sm:$0xff]  }
 0x180   :  { %v854_v46 = vmax.f32 %v848_v40, 0.0  ;;  %v850_v47 = vadd.f32 %v849_v44, %v701_v36  ;;  %v1055_v51 = vpop.f32.mrf.mxu0  ;;  %5559 = vmatprep.subr.bf16.mxu0 %v6245_v37  ;;  %v6251_v40 = vld [vmem:[#allocation8 + $0xfc] sm:$0xff]   ;;  %v6224_v44 = vld [vmem:[#allocation8 + $0x88] sm:$0xff]  }
 0x181   :  { %v851_v50 = vpop.f32.mrf.mxu1  ;;  %v1059_v15 = vmax.f32 %v1054_v49, 0.0  ;;  %5560 = vmatpush3.bf16.msra.mxu0 %v6247_v38  ;;  %v6262_v49 = vld [vmem:[#allocation8 + $0xec] sm:$0xff]   ;;  %v6263_v37 = vld [vmem:[#allocation8 + $0x180] sm:$0xff]  }
 0x182   :  { %v855_v52 = vmax.f32 %v850_v47, 0.0  ;;  %v1056_v54 = vpop.f32.mrf.mxu0  ;;  %5561 = vmatprep.subr.bf16.mxu0 %v6251_v40  ;;  %v6225_v47 = vld [vmem:[#allocation8 + $0x80] sm:$0xff]   ;;  %v6264_v50 = vld [vmem:[#allocation8 + $0xac] sm:$0xff]  }
 0x183   :  { %v852_v53 = vpop.f32.mrf.mxu1  ;;  %v5517_v56 = vpack.c.bf16 %v1059_v15, %v1058_v48  ;;  %v6231_v48 = vld [vmem:[#allocation8 + $0x134] ss:$0 sps:$4 sm:$0xff]   ;;  %v6267_v15 = vld [vmem:[#allocation8 + $0xe4] sm:$0xff]   ;;  %v6232_v54 = vld [vmem:[#allocation8 + $0x12c] sm:$0xff]  }
 0x184   :  { %v5516_v55 = vpack.c.bf16 %v855_v52, %v854_v46  ;;  %v6259_v46 = vld [vmem:[#allocation8 + $0xb4] sm:$0xff]   ;;  %v1942_v52 = vsel %vm261_vm8, %v6231_v48, 0  ;;  %v6269_v53 = vld [vmem:[#allocation8 + $0xa4] sm:$0xff]   ;;  %v6275_v48 = vld [vmem:[#allocation8 + $0x1d0] ss:$0 sps:$4 sm:$0xff]  }
 0x185   :  { %1067 = vrot.lane.b32.xlu1 %v5517_v56, %s6564_s18  ;;  %5562 = vmatpush3.bf16.msra.mxu0 %v6253_v43  ;;  %v6265_v38 = vld [vmem:[#allocation8 + $0x140] sm:$0xff]   ;;  %v6268_v43 = vld [vmem:[#allocation8 + $0x178] sm:$0xff]   ;;  %v6277_v56 = vld [vmem:[#allocation8 + $0x1c8] sm:$0xff]  }
 0x186   :  { %863 = vrot.lane.b32.xlu0 %v5516_v55, %s6572_s29  ;;  %5563 = vmatprep.subr.bf16.mxu0 %v6257_v45  ;;  %v6273_v55 = vld [vmem:[#allocation8 + $0xdc] sm:$0xff]  }
 0x187   :  { %v6270_v45 = vld [vmem:[#allocation8 + $0x138] sm:$0xff]  }
 0x189   :  { %5564 = vmatpush3.bf16.msra.mxu0 %v6259_v46 }
 0x18a   :  { %5565 = vmatprep.subr.bf16.mxu0 %v6262_v49 }
 0x18d   :  { %5566 = vmatpush3.bf16.msra.mxu0 %v6264_v50 }
 0x18e   :  { %5567 = vmatprep.subr.bf16.mxu0 %v6267_v15  ;;  %v2226_v15 = vsel %vm261_vm8, %v6275_v48, 0  ;;  %v6314_v48 = vld [vmem:[#allocation8 + $0x2b8] sm:$0xff]  }
 0x191   :  { %5568 = vmatpush3.bf16.msra.mxu0 %v6269_v53 }
 0x192   :  { %5569 = vmatprep.subr.bf16.mxu0 %v6273_v55 }
 0x1a0   :  { %v1454_v58 = vpop.f32.mrf.mxu0 }
 0x1a1   :  { %v1253_v57 = vpop.f32.mrf.mxu1  ;;  %v1455_v13 = vadd.f32 %v1454_v58, %v1304_v7 }
 0x1a2   :  { %v1456_v60 = vpop.f32.mrf.mxu0  ;;  %v1254_v16 = vadd.f32 %v1253_v57, %v1104_v9  ;;  %v6236_v9 = vld [vmem:[#allocation8 + $0x170] sm:$0xff]  }
 0x1a3   :  { %v1255_v59 = vpop.f32.mrf.mxu1  ;;  %v1457_v14 = vadd.f32 %v1456_v60, %v1308_v8  ;;  %v1461_v20 = vmax.f32 %v1455_v13, 0.0 }
 0x1a4   :  { %v1458_v62 = vpop.f32.mrf.mxu0  ;;  %v1256_v17 = vadd.f32 %v1255_v59, %v1108_v12  ;;  %v1260_v23 = vmax.f32 %v1254_v16, 0.0  ;;  %v6238_v12 = vld [vmem:[#allocation8 + $0x1a8] sm:$0xff]  }
 0x1a5   :  { %v1257_v61 = vpop.f32.mrf.mxu1  ;;  %v1462_v21 = vmax.f32 %v1457_v14, 0.0  ;;  %v6274_v62 = vld [vmem:[#allocation8 + $0x9c] sm:$0xff]   ;;  %v6240_v14 = vld [vmem:[#allocation8 + $0x168] sm:$0xff]  }
 0x1a6   :  { %v1459_v0 = vpop.f32.mrf.mxu0  ;;  %v1261_v24 = vmax.f32 %v1256_v17, 0.0  ;;  %v6233_v61 = vld [vmem:[#allocation8 + $0x124] sm:$0xff]   ;;  %5570 = vmatpush3.bf16.msra.mxu0 %v6274_v62 }
 0x1a7   :  { %v1258_v63 = vpop.f32.mrf.mxu1  ;;  %v5519_v34 = vpack.c.bf16 %v1462_v21, %v1461_v20  ;;  %5609 = vmatprep.subr.bf16.mxu0 %v6276_v1  ;;  %v6280_v62 = vld [vmem:[#allocation8 + $0x1c0] sm:$0xff]  }
 0x1a8   :  { %v5518_v36 = vpack.c.bf16 %v1261_v24, %v1260_v23  ;;  %v6244_v23 = vld [vmem:[#allocation8 + $0x160] sm:$0xff]   ;;  %v6246_v24 = vld [vmem:[#allocation8 + $0x198] sm:$0xff]  }
 0x1a9   :  { %v6282_v1 = vld [vmem:[#allocation8 + $0x23c] sm:$0xff]  }
 0x1d3   :  { %v663_v4 = vpop.permute.xlu1 %662 }
 0x1d4   :  { %v458_v3 = vpop.permute.xlu0 %457  ;;  %v664_v6 = vrot.slane %v663_v4, 4 }
 0x1d5   :  { %v459_v5 = vrot.slane %v458_v3, 4 }
 0x1d6   :  { %v665_v11 = vsel %vm7362_vm2, %v664_v6, %v663_v4 }
 0x1d7   :  { %v461_v10 = vsel %vm7365_vm6, %v459_v5, %v458_v3  ;;  %469 = vst.msk [vmem:[#allocation2 + $0xc] sm:$0xf] %vm468_vm0, %v459_v5  ;;  %vm7367_vm0 = vcmask 1043968   ;;  %v6235_v3 = vld [vmem:[#allocation8 + $0x1b0] sm:$0xff]  }
 0x1d8   :  { %467 = vst.msk [vmem:[#allocation2 + $0x4] sm:$0xff] %vm466_vm15, %v461_v10  ;;  %vm870_vm15 = vcmask 1044352   ;;  %vm1074_vm6 = vmor %vm465_vm12, %vm7367_vm0 }
 0x1d9   :  { %670 = vst.msk [vmem:[#allocation2 + $0xc] sm:$0xff] %vm669_vm1, %v665_v11  ;;  %vm866_vm1 = vcmask 916480   ;;  %vm6814_vm2 = vmor %vm465_vm12, %vm870_vm15 }
 0x1df   :  { %v1482_v26 = vld [vmem:[#allocation2] sm:$0xff]  ;;  %v6226_v51 = vld [vmem:[#allocation2 + $0x8] ss:$0 sps:$4 sm:$0xff]  }
 0x1e0   :  { %v1749_v25 = vld [vmem:[#allocation2 + $0x8] sm:$0xff]  ;;  %v5101_v29 = vcombine.low %v1482_v26, %v1482_v26  ;;  %v6790_v30 = vcombine.high %v1482_v26, %v1482_v26  ;;  %v6252_v26 = vld [vmem:[#allocation8 + $0x190] sm:$0xff]  }
 0x1e1   :  { %v5130_v27 = vcombine.high %v1749_v25, %v1749_v25  ;;  %v5129_v28 = vcombine.low %v1749_v25, %v1749_v25  ;;  %v6248_v25 = vld [vmem:[#allocation8 + $0x158] sm:$0xff]  }
 0x1e2   :  { %1696 = vmatprep.mubr.bf16.mxu1 %v6790_v30 }
 0x1e3   :  { %1814 = vrot.lane.b32.xlu1 %v5130_v27, %s6570_s0  ;;  %1812 = vrot.lane.b32.xlu0 %v5129_v28, %s6570_s0 }
 0x1e4   :  { %1697 = vmatmul.mubr.bf16.vlgmr.msra.gmra.mxu1 %v5101_v29 }
 0x1e5   :  { %5849 = vmatpush3.bf16.msra.mxu1 %v1662_v35  ;;  %5856 = vmatprep.mubr.msk.bf16.mxu1 %vm6573_vm10, %v6571_v31 }
 0x1e6   :  { %5850 = vmatprep.subr.bf16.mxu1 %v6571_v31 }
 0x1e7   :  { %1470 = vrot.lane.b32.xlu1 %v5519_v34, %s6574_s2  ;;  %1269 = vrot.lane.b32.xlu0 %v5518_v36, %s6567_s25  ;;  %s6576_s25 = smov 40   ;;  %v6260_v34 = vld [vmem:[#allocation8 + $0x148] sm:$0xff]  }
 0x1e9   :  { %5851 = vmatpush3.bf16.msra.mxu1 %v6223_v39 }
 0x1ea   :  { %5852 = vmatprep.subr.bf16.mxu1 %v6571_v31 }
 0x1eb   :  { %2096 = vrot.lane.b32.xlu0 %v5130_v27, %s6575_s19 }
 0x1ed   :  { %5853 = vmatpush3.bf16.msra.mxu1 %v6224_v44 }
 0x1ee   :  { %5854 = vmatprep.subr.bf16.mxu1 %v6571_v31 }
 0x1ef   :  { %2094 = vrot.lane.b32.xlu0 %v5129_v28, %s6575_s19  ;;  %v6254_v28 = vld [vmem:[#allocation8 + $0x150] sm:$0xff]  }
 0x1f1   :  { %5855 = vmatpush3.bf16.msra.mxu1 %v6225_v47 }
 0x1f2   :  { %5860 = vmatprep.subr.bf16.mxu1 %v6571_v31 }
 0x1f3   :  { %1808 = vrot.lane.b32.xlu0 %v5101_v29, %s6570_s0 }
 0x1f4   :  { %5857 = vmatmul.mubr.msk.bf16.vlgmr.msra.gmra.mxu1 %vm1657_vm14, %v6226_v51 }
 0x1f5   :  { %5861 = vmatpush3.bf16.msra.mxu1 %v1942_v52  ;;  %5868 = vmatprep.mubr.msk.bf16.mxu1 %vm6573_vm10, %v6571_v31 }
 0x1f6   :  { %5862 = vmatprep.subr.bf16.mxu1 %v6571_v31 }
 0x1f7   :  { %v1068_v58 = vpop.permute.xlu1 %1067 }
 0x1f8   :  { %v864_v57 = vpop.permute.xlu0 %863  ;;  %v1069_v60 = vrot.slane %v1068_v58, 4 }
 0x1f9   :  { %v865_v59 = vrot.slane %v864_v57, 4  ;;  %5863 = vmatpush3.bf16.msra.mxu1 %v6232_v54 }
 0x1fa   :  { %5864 = vmatprep.subr.bf16.mxu1 %v6571_v31  ;;  %v1070_v0 = vsel %vm7366_vm5, %v1069_v60, %v1068_v58  ;;  %1077 = vst.msk [vmem:[#allocation2 + $0x20] sm:$0xf] %vm1076_vm4, %v1069_v60  ;;  %vm1275_vm4 = vcmask 785412   ;;  %vm1480_vm5 = vcmask 584704   ;;  %v6279_v60 = vld [vmem:[#allocation8 + $0x244] sm:$0xff]  }
 0x1fb   :  { %v867_v63 = vsel %vm866_vm1, %v865_v59, %v864_v57  ;;  %874 = vst.msk [vmem:[#allocation2 + $0x18] sm:$0xf] %vm873_vm13, %v865_v59  ;;  %vm1473_vm13 = vcmask 982016   ;;  %v6278_v57 = vld [vmem:[#allocation8 + $0x20c] sm:$0xff]  }
 0x1fc   :  { %872 = vst.msk [vmem:[#allocation2 + $0x10] sm:$0xff] %vm6814_vm2, %v867_v63  ;;  %vm1274_vm2 = vcmask 1043584   ;;  %v6281_v63 = vld [vmem:[#allocation8 + $0x204] sm:$0xff]  }
 0x1fd   :  { %1075 = vst.msk [vmem:[#allocation2 + $0x18] sm:$0xff] %vm1074_vm6, %v1070_v0  ;;  %5865 = vmatpush3.bf16.msra.mxu1 %v6233_v61  ;;  %vm1477_vm6 = vcmask 1044416   ;;  %vm1276_vm0 = vmor %vm1275_vm4, %vm1274_vm2  ;;  %vm7372_vm2 = vcmask 654336  }
 0x1fe   :  { %5866 = vmatprep.subr.bf16.mxu1 %v6571_v31  ;;  %vm1478_vm11 = vmor %vm465_vm12, %vm1477_vm6  ;;  %vm2319_vm12 = vcmask 1044224   ;;  %vm2893_vm6 = vcmask 392196  }
 0x201   :  { %5867 = vmatpush3.bf16.msra.mxu1 %v6234_v2 }
 0x202   :  { %5582 = vmatprep.subr.bf16.mxu1 %v6235_v3  ;;  %v6283_v3 = vld [vmem:[#allocation8 + $0x1b8] sm:$0xff]  }
 0x203   :  { %v6227_v4 = vld [vmem:[#allocation2 + $0x10] ss:$0 sps:$4 sm:$0xff]  }
 0x204   :  { %v6229_v5 = vld [vmem:[#allocation2 + $0x18] ss:$0 sps:$4 sm:$0xff]   ;;  %2098 = vrot.lane.b32.xlu1 %v6227_v4, %s6575_s19  ;;  %v2322_v6 = vld [vmem:[#allocation2 + $0x10] sm:$0xff]  ;;  %v6284_v4 = vld [vmem:[#allocation8 + $0x1fc] sm:$0xff]  }
 0x205   :  { %2384 = vrot.lane.b32.xlu0 %v6229_v5, %s6574_s2  ;;  %v5183_v7 = vcombine.high %v2322_v6, %v2322_v6  ;;  %v5182_v8 = vcombine.low %v2322_v6, %v2322_v6  ;;  %v2606_v33 = vld [vmem:[#allocation2 + $0x14] sm:$0xff]  ;;  %v6291_v6 = vld [vmem:[#allocation8 + $0x26c] ss:$0 sps:$4 sm:$0xff]  }
 0x206   :  { %v5209_v35 = vcombine.low %v2606_v33, %v2606_v33  ;;  %v5210_v36 = vcombine.high %v2606_v33, %v2606_v33  ;;  %v6285_v5 = vld [vmem:[#allocation8 + $0x234] sm:$0xff]  }
 0x207   :  { %v6305_v33 = vld [vmem:[#allocation8 + $0x2d0] sm:$0xff]  }
 0x208   :  { %1810 = vrot.lane.b32.xlu1 %v6790_v30, %s6570_s0  ;;  %s6577_s0 = smov 88  }
 0x20c   :  { %2382 = vrot.lane.b32.xlu1 %v5183_v7, %s6574_s2  ;;  %v6286_v7 = vld [vmem:[#allocation8 + $0x1f4] sm:$0xff]  }
 0x210   :  { %2380 = vrot.lane.b32.xlu1 %v5182_v8, %s6574_s2  ;;  %v6287_v8 = vld [vmem:[#allocation8 + $0x22c] sm:$0xff]  }
 0x255   :  { %v1815_v10 = vpop.permute.xlu1 %1814  ;;  %v6832_v11 = vpop.permute.xlu0 %1812 }
 0x256   :  { %v1818_v13 = vsel %vm1320_vm7, %v6832_v11, %v1815_v10  ;;  %v6288_v10 = vld [vmem:[#allocation8 + $0x1ec] sm:$0xff]  }
 0x257   :  { %5869 = vmatmul.mubr.msk.bf16.vlgmr.msra.gmra.mxu1 %vm1657_vm14, %v1818_v13  ;;  %v6290_v13 = vld [vmem:[#allocation8 + $0x1e4] sm:$0xff]  }
 0x258   :  { %5583 = vmatpush3.bf16.msra.mxu1 %v6236_v9  ;;  %v2511_v9 = vsel %vm261_vm8, %v6291_v6, 0  ;;  %v6324_v6 = vld [vmem:[#allocation8 + $0x374] sm:$0xff]  }
 0x259   :  { %v1471_v16 = vpop.permute.xlu1 %1470  ;;  %v1270_v17 = vpop.permute.xlu0 %1269  ;;  %5584 = vmatprep.subr.bf16.mxu1 %v6238_v12  ;;  %v6289_v12 = vld [vmem:[#allocation8 + $0x224] sm:$0xff]  }
 0x25a   :  { %v1472_v19 = vrot.slane %v1471_v16, 4  ;;  %v1271_v20 = vrot.slane %v1270_v17, 4 }
 0x25c   :  { %v1474_v21 = vsel %vm1473_vm13, %v1472_v19, %v1471_v16  ;;  %1481 = vst.msk [vmem:[#allocation2 + $0x28] sm:$0xf] %vm1480_vm5, %v1472_v19  ;;  %v1272_v22 = vsel %vm307_vm3, %v1271_v20, %v1270_v17  ;;  %5585 = vmatpush3.bf16.msra.mxu1 %v6240_v14  ;;  %vm2100_vm3 = vcmask 588800   ;;  %v6297_v14 = vld [vmem:[#allocation8 + $0x25c] sm:$0xff]   ;;  %v6295_v19 = vld [vmem:[#allocation8 + $0x214] sm:$0xff]   ;;  %v6299_v20 = vld [vmem:[#allocation8 + $0x2e8] sm:$0xff]  }
 0x25d   :  { %1277 = vst.msk [vmem:[#allocation2 + $0x20] sm:$0xff] %vm1276_vm0, %v1272_v22  ;;  %5586 = vmatprep.subr.bf16.mxu1 %v6242_v18  ;;  %v2097_v39 = vpop.permute.xlu0 %2096  ;;  %v6292_v16 = vld [vmem:[#allocation8 + $0x21c] sm:$0xff]   ;;  %v6298_v18 = vld [vmem:[#allocation8 + $0x254] sm:$0xff]   ;;  %v6300_v22 = vld [vmem:[#allocation8 + $0x2a8] sm:$0xff]   ;;  %vm1746_vm5 = vcmask 912384  }
 0x25e   :  { %1479 = vst.msk [vmem:[#allocation2 + $0x20] sm:$0xff] %vm1478_vm11, %v1474_v21  ;;  %v6293_v17 = vld [vmem:[#allocation8 + $0x1dc] sm:$0xff]   ;;  %v6296_v21 = vld [vmem:[#allocation8 + $0x1d4] sm:$0xff]   ;;  %vm2960_vm11 = vcmask 719872   ;;  %vm2320_vm0 = vmor %vm262_vm9, %vm2319_vm12  ;;  %vm2603_vm9 = vcmask 523268  }
 0x260   :  { %5587 = vmatpush3.bf16.msra.mxu1 %v6244_v23 }
 0x261   :  { %5588 = vmatprep.subr.bf16.mxu1 %v6246_v24  ;;  %v2095_v47 = vpop.permute.xlu0 %2094  ;;  %v6301_v24 = vld [vmem:[#allocation8 + $0x2e0] sm:$0xff]  }
 0x262   :  { %v2101_v53 = vsel %vm2100_vm3, %v2095_v47, %v2097_v39  ;;  %v6313_v47 = vld [vmem:[#allocation8 + $0x280] sm:$0xff]  }
 0x263   :  { %v6272_v50 = vld [vmem:[#allocation2 + $0x28] ss:$0 sps:$4 sm:$0xff]  }
 0x264   :  { %5589 = vmatpush3.bf16.msra.mxu1 %v6248_v25  ;;  %v6306_v25 = vld [vmem:[#allocation8 + $0x308] ss:$0 sps:$4 sm:$0xff]  }
 0x265   :  { %v2607_v27 = vld [vmem:[#allocation2 + $0x1c] sm:$0xff]  ;;  %5590 = vmatprep.subr.bf16.mxu1 %v6252_v26  ;;  %v6261_v40 = vld [vmem:[#allocation2 + $0x24] ss:$0 sps:$4 sm:$0xff]   ;;  %v1809_v54 = vpop.permute.xlu0 %1808 }
 0x266   :  { %v5212_v29 = vcombine.high %v2607_v27, %v2607_v27  ;;  %v5211_v30 = vcombine.low %v2607_v27, %v2607_v27  ;;  %v3182_v44 = vld [vmem:[#allocation2 + $0x20] sm:$0xff] }
 0x267   :  { %v5265_v46 = vcombine.high %v3182_v44, %v3182_v44  ;;  %v5264_v49 = vcombine.low %v3182_v44, %v3182_v44  ;;  %v6302_v27 = vld [vmem:[#allocation8 + $0x2a0] sm:$0xff]  }
 0x268   :  { %2672 = vrot.lane.b32.xlu1 %v5212_v29, %s6576_s25  ;;  %2670 = vrot.lane.b32.xlu0 %v5211_v30, %s6576_s25  ;;  %v6311_v44 = vld [vmem:[#allocation8 + $0x2c0] sm:$0xff]  }
 0x269   :  { %5591 = vmatpush3.bf16.msra.mxu1 %v6254_v28  ;;  %v6303_v28 = vld [vmem:[#allocation8 + $0x2d8] sm:$0xff]  }
 0x26a   :  { %5592 = vmatprep.subr.bf16.mxu1 %v6258_v32  ;;  %v6309_v32 = vld [vmem:[#allocation8 + $0x300] sm:$0xff]  }
 0x26c   :  { %2666 = vrot.lane.b32.xlu1 %v5209_v35, %s6576_s25  ;;  %2668 = vrot.lane.b32.xlu0 %v5210_v36, %s6576_s25  ;;  %v6312_v35 = vld [vmem:[#allocation8 + $0x2f8] sm:$0xff]  }
 0x26d   :  { %5593 = vmatpush3.bf16.msra.mxu1 %v6260_v34  ;;  %v6307_v34 = vld [vmem:[#allocation8 + $0x290] sm:$0xff]  }
 0x26e   :  { %5594 = vmatprep.subr.bf16.mxu1 %v6263_v37  ;;  %v6308_v37 = vld [vmem:[#allocation8 + $0x2c8] sm:$0xff]  }
 0x270   :  { %2958 = vrot.lane.b32.xlu1 %v6261_v40, %s6577_s0  ;;  %2956 = vrot.lane.b32.xlu0 %v5212_v29, %s6577_s0  ;;  %v2801_v29 = vsel %vm261_vm8, %v6306_v25, 0  ;;  %v6315_v40 = vld [vmem:[#allocation8 + $0x2f0] sm:$0xff]   ;;  %v6334_v25 = vld [vmem:[#allocation8 + $0x31c] sm:$0xff]  }
 0x271   :  { %5595 = vmatpush3.bf16.msra.mxu1 %v6265_v38 }
 0x272   :  { %5596 = vmatprep.subr.bf16.mxu1 %v6268_v43 }
 0x274   :  { %3242 = vrot.lane.b32.xlu1 %v5265_v46, %s6572_s29  ;;  %2954 = vrot.lane.b32.xlu0 %v5211_v30, %s6577_s0  ;;  %v6304_v30 = vld [vmem:[#allocation8 + $0x298] sm:$0xff]  }
 0x275   :  { %5597 = vmatpush3.bf16.msra.mxu1 %v6270_v45  ;;  %v6317_v45 = vld [vmem:[#allocation8 + $0x384] sm:$0xff]  }
 0x276   :  { %5872 = vmatprep.subr.bf16.mxu1 %v6571_v31  ;;  %v2099_v51 = vpop.permute.xlu1 %2098 }
 0x277   :  { %v2102_v52 = vsel %vm2100_vm3, %v2097_v39, %v2099_v51  ;;  %v2385_v61 = vpop.permute.xlu0 %2384  ;;  %v6310_v39 = vld [vmem:[#allocation8 + $0x288] sm:$0xff]  }
 0x278   :  { %3240 = vrot.lane.b32.xlu1 %v5264_v49, %s6572_s29  ;;  %3244 = vrot.lane.b32.xlu0 %v6272_v50, %s6572_s29  ;;  %v6316_v50 = vld [vmem:[#allocation8 + $0x278] sm:$0xff]  }
 0x279   :  { %2260 = vmatprep.mubr.bf16.mxu1 %v2102_v52  ;;  %v6318_v52 = vld [vmem:[#allocation8 + $0x2b0] sm:$0xff]  }
 0x27a   :  { %2261 = vmatmul.mubr.bf16.vlgmr.msra.gmra.mxu1 %v2101_v53  ;;  %v1811_v55 = vpop.permute.xlu1 %1810  ;;  %v6320_v53 = vld [vmem:[#allocation8 + $0x270] sm:$0xff]  }
 0x27b   :  { %5873 = vmatpush3.bf16.msra.mxu1 %v2226_v15  ;;  %5880 = vmatprep.mubr.msk.bf16.mxu1 %vm6573_vm10, %v6571_v31  ;;  %v1816_v58 = vsel %vm1320_vm7, %v1809_v54, %v1811_v55  ;;  %v1817_v59 = vsel %vm1320_vm7, %v1811_v55, %v6832_v11  ;;  %v6294_v11 = vld [vmem:[#allocation8 + $0x264] sm:$0xff]   ;;  %vm2674_vm7 = vcmask 326656  }
 0x27c   :  { %5874 = vmatprep.subr.bf16.mxu1 %v6571_v31  ;;  %1976 = vmatprep.mubr.bf16.mxu0 %v1817_v59 }
 0x27d   :  { %1977 = vmatmul.mubr.bf16.vlgmr.msra.gmra.mxu0 %v1816_v58 }
 0x27e   :  { %5610 = vmatpush3.bf16.msra.mxu0 %v6278_v57  ;;  %v2383_v0 = vpop.permute.xlu1 %2382 }
 0x27f   :  { %5875 = vmatpush3.bf16.msra.mxu1 %v6277_v56  ;;  %5611 = vmatprep.subr.bf16.mxu0 %v6279_v60  ;;  %v2387_v2 = vsel %vm1473_vm13, %v2383_v0, %v2385_v61 }
 0x280   :  { %5876 = vmatprep.subr.bf16.mxu1 %v6571_v31  ;;  %2545 = vmatprep.mubr.bf16.mxu0 %v2387_v2  ;;  %v6323_v2 = vld [vmem:[#allocation8 + $0x3a4] ss:$0 sps:$4 sm:$0xff]  }
 0x282   :  { %5612 = vmatpush3.bf16.msra.mxu0 %v6281_v63  ;;  %v2381_v23 = vpop.permute.xlu1 %2380 }
 0x283   :  { %5877 = vmatpush3.bf16.msra.mxu1 %v6280_v62  ;;  %5613 = vmatprep.subr.bf16.mxu0 %v6282_v1  ;;  %v2386_v26 = vsel %vm1473_vm13, %v2381_v23, %v2383_v0  ;;  %v6321_v0 = vld [vmem:[#allocation8 + $0x37c] sm:$0xff]   ;;  %vm7374_vm13 = vcmask 1043968  }
 0x284   :  { %5878 = vmatprep.subr.bf16.mxu1 %v6571_v31  ;;  %v6333_v23 = vld [vmem:[#allocation8 + $0x35c] sm:$0xff]   ;;  %vm2894_vm3 = vmor %vm2893_vm6, %vm7374_vm13  ;;  %vm3739_vm6 = vcmask 781312  }
 0x286   :  { %5614 = vmatpush3.bf16.msra.mxu0 %v6284_v4 }
 0x287   :  { %5879 = vmatpush3.bf16.msra.mxu1 %v6283_v3  ;;  %5615 = vmatprep.subr.bf16.mxu0 %v6285_v5  ;;  %v6322_v3 = vld [vmem:[#allocation8 + $0x33c] sm:$0xff]  }
 0x288   :  { %5884 = vmatprep.subr.bf16.mxu1 %v6571_v31 }
 0x28a   :  { %5881 = vmatmul.mubr.msk.bf16.vlgmr.msra.gmra.mxu1 %vm1657_vm14, %v2099_v51  ;;  %5616 = vmatpush3.bf16.msra.mxu0 %v6286_v7  ;;  %v5100_v51 = vld [vmem:[%s7352_s4] ss:$0 sm:$0xff] }
 0x28b   :  { %5885 = vmatpush3.bf16.msra.mxu1 %v2511_v9  ;;  %5617 = vmatprep.subr.bf16.mxu0 %v6287_v8  ;;  %v3086_v9 = vsel %vm261_vm8, %v6323_v2, 0  ;;  %v6363_v2 = vld [vmem:[%s7353_s5 + $0x68] sm:$0xff]  }
 0x28c   :  { %5886 = vmatprep.subr.bf16.mxu1 %v6571_v31  ;;  %5892 = vmatprep.mubr.msk.bf16.mxu1 %vm6573_vm10, %v6571_v31 }
 0x28e   :  { %5618 = vmatpush3.bf16.msra.mxu0 %v6288_v10  ;;  %v6325_v10 = vld [vmem:[#allocation8 + $0x334] sm:$0xff]  }
 0x28f   :  { %5887 = vmatpush3.bf16.msra.mxu1 %v6294_v11  ;;  %5619 = vmatprep.subr.bf16.mxu0 %v6289_v12 }
 0x290   :  { %5888 = vmatprep.subr.bf16.mxu1 %v6571_v31 }
 0x292   :  { %5620 = vmatpush3.bf16.msra.mxu0 %v6290_v13  ;;  %v6326_v13 = vld [vmem:[#allocation8 + $0x39c] sm:$0xff]  }
 0x293   :  { %5889 = vmatpush3.bf16.msra.mxu1 %v6297_v14  ;;  %5621 = vmatprep.subr.bf16.mxu0 %v6292_v16  ;;  %v6327_v14 = vld [vmem:[#allocation8 + $0x36c] sm:$0xff]  }
 0x294   :  { %5890 = vmatprep.subr.bf16.mxu1 %v6571_v31 }
 0x296   :  { %5622 = vmatpush3.bf16.msra.mxu0 %v6293_v17  ;;  %v6328_v17 = vld [vmem:[#allocation8 + $0x32c] sm:$0xff]  }
 0x297   :  { %5891 = vmatpush3.bf16.msra.mxu1 %v6298_v18  ;;  %5623 = vmatprep.subr.bf16.mxu0 %v6295_v19  ;;  %v6329_v18 = vld [vmem:[#allocation8 + $0x394] sm:$0xff]   ;;  %v6330_v19 = vld [vmem:[#allocation8 + $0x364] sm:$0xff]  }
 0x298   :  { %5636 = vmatprep.subr.bf16.mxu1 %v6299_v20 }
 0x29a   :  { %5893 = vmatmul.mubr.msk.bf16.vlgmr.msra.gmra.mxu1 %vm1657_vm14, %v2385_v61  ;;  %5624 = vmatpush3.bf16.msra.mxu0 %v6296_v21  ;;  %v6319_v61 = vld [vmem:[#allocation8 + $0x344] sm:$0xff]  }
 0x29b   :  { %5637 = vmatpush3.bf16.msra.mxu1 %v6300_v22  ;;  %5896 = vmatprep.subr.bf16.mxu0 %v6571_v31  ;;  %v6331_v21 = vld [vmem:[#allocation8 + $0x324] sm:$0xff]   ;;  %v6332_v22 = vld [vmem:[#allocation8 + $0x38c] sm:$0xff]  }
 0x29c   :  { %5638 = vmatprep.subr.bf16.mxu1 %v6301_v24  ;;  %v6335_v24 = vld [vmem:[#allocation8 + $0x420] sm:$0xff]  }
 0x29d   :  { %2546 = vmatmul.mubr.bf16.vlgmr.msra.gmra.mxu0 %v2386_v26 }
 0x29e   :  { %5897 = vmatpush3.bf16.msra.mxu0 %v2801_v29  ;;  %5904 = vmatprep.mubr.msk.bf16.mxu0 %vm6573_vm10, %v6571_v31  ;;  %v6339_v29 = vld [vmem:[#allocation8 + $0x418] sm:$0xff]  }
 0x29f   :  { %5639 = vmatpush3.bf16.msra.mxu1 %v6302_v27  ;;  %5898 = vmatprep.subr.bf16.mxu0 %v6571_v31  ;;  %v6336_v27 = vld [vmem:[#allocation8 + $0x3e0] sm:$0xff]  }
 0x2a0   :  { %5640 = vmatprep.subr.bf16.mxu1 %v6303_v28  ;;  %v6337_v28 = vld [vmem:[#allocation8 + $0x354] sm:$0xff]  }
 0x2a2   :  { %5899 = vmatpush3.bf16.msra.mxu0 %v6309_v32 }
 0x2a3   :  { %5641 = vmatpush3.bf16.msra.mxu1 %v6304_v30  ;;  %5900 = vmatprep.subr.bf16.mxu0 %v6571_v31 }
 0x2a4   :  { %v5544_v36 = vpop.f32.mrf.mxu1  ;;  %5642 = vmatprep.subr.bf16.mxu1 %v6305_v33  ;;  %v6338_v33 = vld [vmem:[#allocation8 + $0x314] sm:$0xff]  }
 0x2a6   :  { %v5545_v38 = vpop.f32.mrf.mxu1  ;;  %5901 = vmatpush3.bf16.msra.mxu0 %v6312_v35  ;;  %v6341_v35 = vld [vmem:[#allocation8 + $0x34c] sm:$0xff]  }
 0x2a7   :  { %5643 = vmatpush3.bf16.msra.mxu1 %v6307_v34  ;;  %5902 = vmatprep.subr.bf16.mxu0 %v6571_v31  ;;  %v5546_v49 = vadd.f32 %v5545_v38, %v5544_v36  ;;  %v6340_v34 = vld [vmem:[#allocation8 + $0x3d8] sm:$0xff]   ;;  %v6343_v36 = vld [vmem:[#allocation8 + $0x410] sm:$0xff]  }
 0x2a8   :  { %v5547_v43 = vpop.f32.mrf.mxu1  ;;  %5644 = vmatprep.subr.bf16.mxu1 %v6308_v37  ;;  %v6342_v37 = vld [vmem:[#allocation8 + $0x30c] sm:$0xff]  }
 0x2a9   :  { %v1699_v15 = vadd.f32 %v5546_v49, %v5100_v51  ;;  %v6344_v38 = vld [vmem:[#allocation8 + $0x3d0] sm:$0xff]   ;;  %v6351_v49 = vld [vmem:[#allocation8 + $0x3f8] sm:$0xff]  }
 0x2aa   :  { %v5548_v46 = vpop.f32.mrf.mxu1  ;;  %5903 = vmatpush3.bf16.msra.mxu0 %v6315_v40  ;;  %v6345_v40 = vld [vmem:[#allocation8 + $0x408] sm:$0xff]   ;;  %v6353_v51 = vld [vmem:[#allocation8 + $0x3b8] sm:$0xff]  }
 0x2ab   :  { %5645 = vmatpush3.bf16.msra.mxu1 %v6310_v39  ;;  %5663 = vmatprep.subr.bf16.mxu0 %v6317_v45  ;;  %v6346_v39 = vld [vmem:[#allocation8 + $0x440] ss:$0 sps:$4 sm:$0xff]  }
 0x2ac   :  { %5646 = vmatprep.subr.bf16.mxu1 %v6311_v44  ;;  %v3371_v43 = vsel %vm261_vm8, %v6346_v39, 0  ;;  %v6347_v44 = vld [vmem:[#allocation8 + $0x3c8] sm:$0xff]   ;;  %v6348_v46 = vld [vmem:[#allocation8 + $0x400] sm:$0xff]   ;;  %vm2034_vm8 = vmor %vm1275_vm4, %vm870_vm15  ;;  %vm7371_vm15 = vcmask 1044096  }
 0x2ad   :  { %vm7373_vm4 = vmmov %vm7372_vm2 }
 0x2af   :  { %5647 = vmatpush3.bf16.msra.mxu1 %v6313_v47  ;;  %v6349_v47 = vld [vmem:[#allocation8 + $0x438] sm:$0xff]  }
 0x2b0   :  { %5648 = vmatprep.subr.bf16.mxu1 %v6314_v48  ;;  %v6350_v48 = vld [vmem:[#allocation8 + $0x3c0] sm:$0xff]  }
 0x2b3   :  { %5649 = vmatpush3.bf16.msra.mxu1 %v6316_v50  ;;  %v6352_v50 = vld [vmem:[#allocation8 + $0x430] sm:$0xff]  }
 0x2b4   :  { %v1738_v54 = vpop.f32.mrf.mxu1  ;;  %5650 = vmatprep.subr.bf16.mxu1 %v6318_v52  ;;  %v6354_v52 = vld [vmem:[#allocation8 + $0x3f0] sm:$0xff]  }
 0x2b5   :  { %v1739_v55 = vadd.f32 %v1738_v54, %v1699_v15  ;;  %v6355_v15 = vld [vmem:[#allocation8 + $0x428] sm:$0xff]  }
 0x2b6   :  { %v5858_v56 = vpop.f32.mrf.mxu1  ;;  %v6357_v54 = vld [vmem:[#allocation8 + $0x3e8] sm:$0xff]  }
 0x2b7   :  { %v1744_v57 = vmax.f32 %v1739_v55, 0.0  ;;  %5651 = vmatpush3.bf16.msra.mxu1 %v6320_v53  ;;  %v6356_v53 = vld [vmem:[#allocation8 + $0x3b0] sm:$0xff]   ;;  %v6358_v55 = vld [vmem:[#allocation8 + $0x3a8] sm:$0xff]  }
 0x2b8   :  { %v1741_v58 = vpop.f32.mrf.mxu1  ;;  %5908 = vmatprep.subr.bf16.mxu1 %v6571_v31 }
 0x2b9   :  { %v1745_v59 = vpack.c.bf16 %v1744_v57, %v1744_v57 }
 0x2ba   :  { %v5859_v60 = vpop.f32.mrf.mxu1 }
 0x2bb   :  { %1747 = vst.msk [vmem:[#allocation3] sm:$0xf] %vm1746_vm5, %v1745_v59  ;;  %vm7375_vm5 = vcmask 523264  }
 0x2da   :  { %v2673_v62 = vpop.permute.xlu1 %2672  ;;  %v2671_v63 = vpop.permute.xlu0 %2670 }
 0x2db   :  { %v2677_v1 = vsel %vm2674_vm7, %v2671_v63, %v2673_v62  ;;  %v6359_v62 = vld [vmem:[%s7353_s5 + $0x78] sm:$0xff]  }
 0x2dc   :  { %5905 = vmatmul.mubr.msk.bf16.vlgmr.msra.gmra.mxu0 %vm1657_vm14, %v2677_v1  ;;  %v6362_v1 = vld [vmem:[%s7353_s5 + $0x30] sm:$0xff]  }
 0x2dd   :  { %5664 = vmatpush3.bf16.msra.mxu0 %v6319_v61 }
 0x2de   :  { %v2667_v4 = vpop.permute.xlu1 %2666  ;;  %v2669_v5 = vpop.permute.xlu0 %2668  ;;  %5665 = vmatprep.subr.bf16.mxu0 %v6321_v0  ;;  %v6361_v0 = vld [vmem:[%s7353_s5 + $0x70] sm:$0xff]  }
 0x2df   :  { %v2675_v7 = vsel %vm2674_vm7, %v2667_v4, %v2669_v5  ;;  %v2676_v8 = vsel %vm2674_vm7, %v2669_v5, %v2671_v63  ;;  %v6360_v63 = vld [vmem:[%s7353_s5 + $0x38] sm:$0xff]   ;;  %vm3178_vm7 = vcmask 1043840  }
 0x2e0   :  { %2835 = vmatprep.mubr.bf16.mxu1 %v2676_v8 }
 0x2e1   :  { %5666 = vmatpush3.bf16.msra.mxu0 %v6322_v3  ;;  %2836 = vmatmul.mubr.bf16.vlgmr.msra.gmra.mxu1 %v2675_v7  ;;  %v6364_v3 = vld [vmem:[%s7353_s5 + $0x28] sm:$0xff]   ;;  %v6366_v7 = vld [vmem:[%s7353_s5 + $0x20] sm:$0xff]  }
 0x2e2   :  { %5909 = vmatpush3.bf16.msra.mxu1 %v3086_v9  ;;  %v2959_v11 = vpop.permute.xlu1 %2958  ;;  %v2957_v12 = vpop.permute.xlu0 %2956  ;;  %5667 = vmatprep.subr.bf16.mxu0 %v6324_v6  ;;  %v6365_v6 = vld [vmem:[%s7353_s5 + $0x60] sm:$0xff]  }
 0x2e3   :  { %v2962_v16 = vsel %vm2960_vm11, %v2957_v12, %v2959_v11  ;;  %5910 = vmatprep.subr.bf16.mxu1 %v6571_v31  ;;  %5916 = vmatprep.mubr.msk.bf16.mxu1 %vm6573_vm10, %v6571_v31 }
 0x2e4   :  { %3120 = vmatprep.mubr.bf16.mxu0 %v2962_v16  ;;  %v6368_v16 = vld [vmem:[%s7353_s5 + $0x18] sm:$0xff]  }
 0x2e5   :  { %5668 = vmatpush3.bf16.msra.mxu0 %v6325_v10  ;;  %v5126_v10 = vld [vmem:[%s7352_s4 + $0x1] ss:$0 sm:$0xff] }
 0x2e6   :  { %5911 = vmatpush3.bf16.msra.mxu1 %v6326_v13  ;;  %5669 = vmatprep.subr.bf16.mxu0 %v6327_v14  ;;  %v2955_v20 = vpop.permute.xlu0 %2954  ;;  %v3243_v30 = vpop.permute.xlu1 %3242  ;;  %v6367_v13 = vld [vmem:[%s7353_s5 + $0x58] sm:$0xff]  }
 0x2e7   :  { %5912 = vmatprep.subr.bf16.mxu1 %v6571_v31  ;;  %v2961_v45 = vsel %vm2960_vm11, %v2955_v20, %v2957_v12  ;;  %v6369_v20 = vld [vmem:[%s7353_s5 + $0x50] sm:$0xff]   ;;  %vm3179_vm11 = vcmask 261124  }
 0x2e9   :  { %5670 = vmatpush3.bf16.msra.mxu0 %v6328_v17 }
 0x2ea   :  { %5913 = vmatpush3.bf16.msra.mxu1 %v6329_v18  ;;  %5671 = vmatprep.subr.bf16.mxu0 %v6330_v19  ;;  %v3245_v26 = vpop.permute.xlu0 %3244  ;;  %v3241_v56 = vpop.permute.xlu1 %3240 }
 0x2eb   :  { %5914 = vmatprep.subr.bf16.mxu1 %v6571_v31  ;;  %v3247_v32 = vsel %vm866_vm1, %v3243_v30, %v3245_v26  ;;  %v3246_v57 = vsel %vm866_vm1, %v3241_v56, %v3243_v30 }
 0x2ed   :  { %5672 = vmatpush3.bf16.msra.mxu0 %v6331_v21 }
 0x2ee   :  { %5915 = vmatpush3.bf16.msra.mxu1 %v6332_v22  ;;  %5673 = vmatprep.subr.bf16.mxu0 %v6333_v23  ;;  %v6370_v23 = vld [vmem:[%s7353_s5 + $0x10] sm:$0xff]  }
 0x2ef   :  { %5690 = vmatprep.subr.bf16.mxu1 %v6335_v24  ;;  %v5154_v24 = vld [vmem:[%s7352_s4 + $0x2] ss:$0 sm:$0xff] }
 0x2f1   :  { %5674 = vmatpush3.bf16.msra.mxu0 %v6334_v25  ;;  %5917 = vmatmul.mubr.msk.bf16.vlgmr.msra.gmra.mxu1 %vm1657_vm14, %v2959_v11 }
 0x2f2   :  { %5691 = vmatpush3.bf16.msra.mxu1 %v6336_v27  ;;  %3405 = vmatprep.mubr.bf16.mxu1 %v3247_v32 }
 0x2f3   :  { %5675 = vmatprep.subr.bf16.mxu0 %v6337_v28  ;;  %5692 = vmatprep.subr.bf16.mxu1 %v6339_v29  ;;  %v6372_v29 = vld [vmem:[%s7353_s5 + $0x8] sm:$0xff]  }
 0x2f5   :  { %5676 = vmatpush3.bf16.msra.mxu0 %v6338_v33 }
 0x2f6   :  { %5693 = vmatpush3.bf16.msra.mxu1 %v6340_v34  ;;  %5677 = vmatprep.subr.bf16.mxu0 %v6341_v35  ;;  %v6373_v34 = vld [vmem:[%s7353_s5 + $0x40] sm:$0xff]  }
 0x2f7   :  { %5694 = vmatprep.subr.bf16.mxu1 %v6343_v36  ;;  %v6374_v36 = vld [vmem:[%s7353_s5] sm:$0xff]  }
 0x2f9   :  { %5678 = vmatpush3.bf16.msra.mxu0 %v6342_v37 }
 0x2fa   :  { %5695 = vmatpush3.bf16.msra.mxu1 %v6344_v38  ;;  %5920 = vmatprep.subr.bf16.mxu0 %v6571_v31 }
 0x2fb   :  { %5696 = vmatprep.subr.bf16.mxu1 %v6345_v40  ;;  %v6377_v40 = vld [vmem:[%s7353_s5 + $0xa0] sm:$0xff]  }
 0x2fc   :  { %3121 = vmatmul.mubr.bf16.vlgmr.msra.gmra.mxu0 %v2961_v45 }
 0x2fd   :  { %5921 = vmatpush3.bf16.msra.mxu0 %v3371_v43  ;;  %5928 = vmatprep.mubr.msk.bf16.mxu0 %vm6573_vm10, %v6571_v31  ;;  %v6378_v43 = vld [vmem:[%s7353_s5 + $0x98] sm:$0xff]  }
 0x2fe   :  { %5697 = vmatpush3.bf16.msra.mxu1 %v6347_v44  ;;  %5922 = vmatprep.subr.bf16.mxu0 %v6571_v31 }
 0x2ff   :  { %5698 = vmatprep.subr.bf16.mxu1 %v6348_v46  ;;  %v6379_v46 = vld [vmem:[%s7353_s5 + $0x90] sm:$0xff]  }
 0x301   :  { %5923 = vmatpush3.bf16.msra.mxu0 %v6349_v47 }
 0x302   :  { %5699 = vmatpush3.bf16.msra.mxu1 %v6350_v48  ;;  %5924 = vmatprep.subr.bf16.mxu0 %v6571_v31 }
 0x303   :  { %5700 = vmatprep.subr.bf16.mxu1 %v6351_v49 }
 0x305   :  { %5925 = vmatpush3.bf16.msra.mxu0 %v6352_v50  ;;  %v5181_v50 = vld [vmem:[%s7352_s4 + $0x3] ss:$0 sm:$0xff] }
 0x306   :  { %5701 = vmatpush3.bf16.msra.mxu1 %v6353_v51  ;;  %5926 = vmatprep.subr.bf16.mxu0 %v6571_v31 }
 0x307   :  { %5702 = vmatprep.subr.bf16.mxu1 %v6354_v52 }
 0x309   :  { %5927 = vmatpush3.bf16.msra.mxu0 %v6355_v15  ;;  %v6380_v15 = vld [vmem:[%s7353_s5 + $0x88] sm:$0xff]  }
 0x30a   :  { %5703 = vmatpush3.bf16.msra.mxu1 %v6356_v53  ;;  %5717 = vmatprep.subr.bf16.mxu0 %v6359_v62 }
 0x30b   :  { %5704 = vmatprep.subr.bf16.mxu1 %v6357_v54 }
 0x30c   :  { %5929 = vmatmul.mubr.msk.bf16.vlgmr.msra.gmra.mxu0 %vm1657_vm14, %v3245_v26  ;;  %v6371_v26 = vld [vmem:[%s7353_s5 + $0x48] sm:$0xff]   ;;  %vm2316_vm14 = vcmask 785408  }
 0x30d   :  { %5718 = vmatpush3.bf16.msra.mxu0 %v6360_v63 }
 0x30e   :  { %5705 = vmatpush3.bf16.msra.mxu1 %v6358_v55  ;;  %5719 = vmatprep.subr.bf16.mxu0 %v6361_v0  ;;  %v6381_v55 = vld [vmem:[%s7353_s5 + $0x80] sm:$0xff]  }
 0x30f   :  { %5932 = vmatprep.subr.bf16.mxu1 %v6571_v31 }
 0x311   :  { %3406 = vmatmul.mubr.bf16.vlgmr.msra.gmra.mxu1 %v3246_v57  ;;  %5720 = vmatpush3.bf16.msra.mxu0 %v6362_v1  ;;  %v5208_v1 = vld [vmem:[%s7352_s4 + $0x4] ss:$0 sm:$0xff] }
 0x312   :  { %5942 = vmatprep.mubr.msk.bf16.mxu1 %vm6573_vm10, %v6571_v31  ;;  %5721 = vmatprep.subr.bf16.mxu0 %v6363_v2 }
 0x313   :  { %5933 = vmatpush3.bf16.msra.mxu1 %v6377_v40  ;;  %v5263_v40 = vld [vmem:[%s7352_s4 + $0x6] ss:$0 sm:$0xff] }
 0x314   :  { %5934 = vmatprep.subr.bf16.mxu1 %v6571_v31 }
 0x315   :  { %5722 = vmatpush3.bf16.msra.mxu0 %v6364_v3 }
 0x316   :  { %5723 = vmatprep.subr.bf16.mxu0 %v6365_v6 }
 0x317   :  { %v2018_v58 = vpop.f32.mrf.mxu1  ;;  %5935 = vmatpush3.bf16.msra.mxu1 %v6378_v43 }
 0x318   :  { %5936 = vmatprep.subr.bf16.mxu1 %v6571_v31 }
 0x319   :  { %v5870_v59 = vpop.f32.mrf.mxu1  ;;  %5724 = vmatpush3.bf16.msra.mxu0 %v6366_v7 }
 0x31a   :  { %5725 = vmatprep.subr.bf16.mxu0 %v6367_v13 }
 0x31b   :  { %v2021_v60 = vpop.f32.mrf.mxu1  ;;  %5937 = vmatpush3.bf16.msra.mxu1 %v6379_v46 }
 0x31c   :  { %5938 = vmatprep.subr.bf16.mxu1 %v6571_v31 }
 0x31d   :  { %v5871_v61 = vpop.f32.mrf.mxu1  ;;  %5726 = vmatpush3.bf16.msra.mxu0 %v6368_v16  ;;  %v5236_v16 = vld [vmem:[%s7352_s4 + $0x5] ss:$0 sm:$0xff] }
 0x31e   :  { %5727 = vmatprep.subr.bf16.mxu0 %v6369_v20 }
 0x31f   :  { %5939 = vmatpush3.bf16.msra.mxu1 %v6380_v15 }
 0x320   :  { %5940 = vmatprep.subr.bf16.mxu1 %v6571_v31 }
 0x321   :  { %5728 = vmatpush3.bf16.msra.mxu0 %v6370_v23 }
 0x322   :  { %5729 = vmatprep.subr.bf16.mxu0 %v6371_v26 }
 0x323   :  { %5941 = vmatpush3.bf16.msra.mxu1 %v6381_v55  ;;  %v6390_v55 = vld [vmem:[%s7353_s5 + $0xe0] sm:$0xff]  }
 0x324   :  { %5946 = vmatprep.subr.bf16.mxu1 %v6571_v31 }
 0x325   :  { %5730 = vmatpush3.bf16.msra.mxu0 %v6372_v29 }
 0x326   :  { %5731 = vmatprep.subr.bf16.mxu0 %v6373_v34 }
 0x329   :  { %5732 = vmatpush3.bf16.msra.mxu0 %v6374_v36 }
 0x33a   :  { %v5598_v4 = vpop.f32.mrf.mxu1 }
 0x33c   :  { %v5599_v5 = vpop.f32.mrf.mxu1 }
 0x33d   :  { %v5571_v8 = vpop.f32.mrf.mxu0  ;;  %v5600_v21 = vadd.f32 %v5599_v5, %v5598_v4 }
 0x33e   :  { %v5601_v9 = vpop.f32.mrf.mxu1 }
 0x33f   :  { %v5572_v11 = vpop.f32.mrf.mxu0  ;;  %v2263_v27 = vadd.f32 %v5600_v21, %v5154_v24 }
 0x340   :  { %v5602_v12 = vpop.f32.mrf.mxu1  ;;  %v5573_v14 = vadd.f32 %v5572_v11, %v5571_v8 }
 0x341   :  { %v5574_v17 = vpop.f32.mrf.mxu0 }
 0x342   :  { %v1979_v18 = vadd.f32 %v5573_v14, %v5126_v10 }
 0x343   :  { %v5575_v19 = vpop.f32.mrf.mxu0 }
 0x344   :  { %v2019_v22 = vadd.f32 %v2018_v58, %v1979_v18 }
 0x346   :  { %v2024_v25 = vmax.f32 %v2019_v22, 0.0 }
 0x348   :  { %v5520_v28 = vpack.c.bf16 %v2024_v25, %v2024_v25 }
 0x34a   :  { %v2302_v30 = vpop.f32.mrf.mxu1  ;;  %2029 = vrot.lane.b32.xlu0 %v5520_v28, %s6572_s29 }
 0x34b   :  { %v2303_v32 = vadd.f32 %v2302_v30, %v2263_v27 }
 0x34c   :  { %v5882_v33 = vpop.f32.mrf.mxu1 }
 0x34d   :  { %v2308_v35 = vmax.f32 %v2303_v32, 0.0 }
 0x34e   :  { %v2305_v37 = vpop.f32.mrf.mxu1 }
 0x34f   :  { %v5521_v38 = vpack.c.bf16 %v2308_v35, %v2308_v35 }
 0x350   :  { %v5883_v39 = vpop.f32.mrf.mxu1 }
 0x351   :  { %2313 = vrot.lane.b32.xlu1 %v5521_v38, %s6578_s26 }
 0x35a   :  { %v2587_v44 = vpop.f32.mrf.mxu1 }
 0x35c   :  { %v5894_v45 = vpop.f32.mrf.mxu1 }
 0x35d   :  { %v5625_v47 = vpop.f32.mrf.mxu0 }
 0x35e   :  { %v2590_v48 = vpop.f32.mrf.mxu1 }
 0x35f   :  { %v5626_v49 = vpop.f32.mrf.mxu0 }
 0x360   :  { %v5895_v51 = vpop.f32.mrf.mxu1  ;;  %v5627_v52 = vadd.f32 %v5626_v49, %v5625_v47 }
 0x361   :  { %v5628_v53 = vpop.f32.mrf.mxu0 }
 0x362   :  { %v2548_v54 = vadd.f32 %v5627_v52, %v5181_v50 }
 0x363   :  { %v5629_v56 = vpop.f32.mrf.mxu0 }
 0x364   :  { %v2588_v57 = vadd.f32 %v2587_v44, %v2548_v54  ;;  %v6389_v54 = vld [vmem:[%s7353_s5 + $0x120] sm:$0xff]   ;;  %v6391_v56 = vld [vmem:[%s7353_s5 + $0x118] sm:$0xff]  }
 0x365   :  { %5745 = vmatprep.subr.bf16.mxu0 %v6389_v54 }
 0x366   :  { %v2593_v58 = vmax.f32 %v2588_v57, 0.0  ;;  %v6393_v57 = vld [vmem:[%s7353_s5 + $0x148] sm:$0xff]  }
 0x368   :  { %v5522_v59 = vpack.c.bf16 %v2593_v58, %v2593_v58  ;;  %v6392_v58 = vld [vmem:[%s7353_s5 + $0xd8] sm:$0xff]  }
 0x36a   :  { %2598 = vrot.lane.b32.xlu0 %v5522_v59, %s6569_s16  ;;  %v6394_v59 = vld [vmem:[%s7353_s5 + $0x110] sm:$0xff]  }
 0x39c   :  { %v2877_v60 = vpop.f32.mrf.mxu0 }
 0x39e   :  { %v5906_v61 = vpop.f32.mrf.mxu0 }
 0x39f   :  { %v6395_v61 = vld [vmem:[%s7353_s5 + $0xd0] sm:$0xff]  }
 0x3a0   :  { %v2880_v62 = vpop.f32.mrf.mxu0 }
 0x3a1   :  { %v5652_v63 = vpop.f32.mrf.mxu1 }
 0x3a2   :  { %v5907_v0 = vpop.f32.mrf.mxu0 }
 0x3a3   :  { %v5653_v2 = vpop.f32.mrf.mxu1  ;;  %v6396_v0 = vld [vmem:[%s7353_s5 + $0x140] sm:$0xff]  }
 0x3a4   :  { %v5654_v3 = vadd.f32 %v5653_v2, %v5652_v63  ;;  %v6398_v2 = vld [vmem:[%s7353_s5 + $0xc8] sm:$0xff]  }
 0x3a5   :  { %v5655_v4 = vpop.f32.mrf.mxu1 }
 0x3a6   :  { %v2838_v5 = vadd.f32 %v5654_v3, %v5208_v1  ;;  %v6397_v1 = vld [vmem:[%s7353_s5 + $0x108] sm:$0xff]   ;;  %v6399_v3 = vld [vmem:[%s7353_s5 + $0x138] sm:$0xff]   ;;  %v6400_v4 = vld [vmem:[%s7353_s5 + $0x100] sm:$0xff]  }
 0x3a7   :  { %v5656_v6 = vpop.f32.mrf.mxu1 }
 0x3a8   :  { %v2878_v7 = vadd.f32 %v2877_v60, %v2838_v5  ;;  %v6401_v5 = vld [vmem:[%s7353_s5 + $0xc0] sm:$0xff]   ;;  %v6402_v6 = vld [vmem:[%s7353_s5 + $0x130] sm:$0xff]  }
 0x3aa   :  { %v2883_v8 = vmax.f32 %v2878_v7, 0.0  ;;  %v6403_v7 = vld [vmem:[%s7353_s5 + $0xf8] sm:$0xff]  }
 0x3ac   :  { %v5523_v9 = vpack.c.bf16 %v2883_v8, %v2883_v8  ;;  %v6404_v8 = vld [vmem:[%s7353_s5 + $0xb8] sm:$0xff]  }
 0x3ae   :  { %2888 = vrot.lane.b32.xlu1 %v5523_v9, %s6564_s18  ;;  %v6406_v9 = vld [vmem:[%s7353_s5 + $0xf0] sm:$0xff]  }
 0x3b1   :  { %v3162_v10 = vpop.f32.mrf.mxu1 }
 0x3b3   :  { %v5918_v11 = vpop.f32.mrf.mxu1 }
 0x3b4   :  { %v6407_v11 = vld [vmem:[%s7353_s5 + $0xb0] sm:$0xff]  }
 0x3b5   :  { %v3165_v12 = vpop.f32.mrf.mxu1 }
 0x3b7   :  { %v5919_v13 = vpop.f32.mrf.mxu1 }
 0x3b8   :  { %v6408_v13 = vld [vmem:[%s7353_s5 + $0x1c8] sm:$0xff]  }
 0x3bc   :  { %v5679_v14 = vpop.f32.mrf.mxu0  ;;  %v2030_v18 = vpop.permute.xlu0 %2029 }
 0x3bd   :  { %v2031_v20 = vrot.slane %v2030_v18, 4 }
 0x3be   :  { %v5680_v17 = vpop.f32.mrf.mxu0 }
 0x3bf   :  { %v5681_v19 = vadd.f32 %v5680_v17, %v5679_v14  ;;  %v2032_v23 = vsel %vm866_vm1, %v2031_v20, %v2030_v18  ;;  %vm2604_vm1 = vmor %vm2603_vm9, %vm7371_vm15  ;;  %v6411_v18 = vld [vmem:[%s7353_s5 + $0xa8] sm:$0xff]   ;;  %vm3463_vm15 = vcmask 130052  }
 0x3c0   :  { %v5682_v21 = vpop.f32.mrf.mxu0  ;;  %2035 = vst.msk [vmem:[#allocation3] sm:$0xff] %vm2034_vm8, %v2032_v23  ;;  %vm3180_vm8 = vmor %vm3179_vm11, %vm3178_vm7 }
 0x3c1   :  { %v3123_v22 = vadd.f32 %v5681_v19, %v5236_v16  ;;  %v6410_v16 = vld [vmem:[%s7353_s5 + $0xe8] sm:$0xff]  }
 0x3c2   :  { %v5683_v24 = vpop.f32.mrf.mxu0 }
 0x3c3   :  { %v3163_v25 = vadd.f32 %v3162_v10, %v3123_v22  ;;  %v2314_v26 = vpop.permute.xlu1 %2313  ;;  %v6405_v10 = vld [vmem:[%s7353_s5 + $0x128] sm:$0xff]  }
 0x3c4   :  { %v2315_v27 = vrot.slane %v2314_v26, 4 }
 0x3c5   :  { %v3168_v28 = vmax.f32 %v3163_v25, 0.0 }
 0x3c6   :  { %v2317_v29 = vsel %vm2316_vm14, %v2315_v27, %v2314_v26 }
 0x3c7   :  { %v5524_v30 = vpack.c.bf16 %v3168_v28, %v3168_v28  ;;  %2321 = vst.msk [vmem:[#allocation3 + $0x4] sm:$0xff] %vm2320_vm0, %v2317_v29  ;;  %vm7376_vm0 = vcmask 392192  }
 0x3c9   :  { %3173 = vrot.lane.b32.xlu0 %v5524_v30, %s6568_s28 }
 0x3cc   :  { %v3447_v32 = vpop.f32.mrf.mxu0 }
 0x3ce   :  { %v5930_v33 = vpop.f32.mrf.mxu0  ;;  %v3466_v34 = vld [vmem:[#allocation3] sm:$0xff] }
 0x3cf   :  { %v5290_v36 = vcombine.low %v3466_v34, %v3466_v34  ;;  %v5291_v37 = vcombine.high %v3466_v34, %v3466_v34 }
 0x3d0   :  { %v3450_v35 = vpop.f32.mrf.mxu0 }
 0x3d1   :  { %v5706_v38 = vpop.f32.mrf.mxu1  ;;  %3689 = vmatprep.mubr.bf16.mxu0 %v5291_v37  ;;  %v5289_v37 = vld [vmem:[%s7354_s6] ss:$0 sm:$0xff] }
 0x3d2   :  { %v5931_v39 = vpop.f32.mrf.mxu0  ;;  %3690 = vmatmul.mubr.bf16.vlgmr.msra.gmra.mxu0 %v5290_v36 }
 0x3d3   :  { %v5707_v43 = vpop.f32.mrf.mxu1  ;;  %5746 = vmatpush3.bf16.msra.mxu0 %v6390_v55  ;;  %v6414_v55 = vld [vmem:[%s7353_s5 + $0x1f0] sm:$0xff]  }
 0x3d4   :  { %v5708_v44 = vadd.f32 %v5707_v43, %v5706_v38  ;;  %5747 = vmatprep.subr.bf16.mxu0 %v6391_v56  ;;  %v6415_v56 = vld [vmem:[%s7353_s5 + $0x1b8] sm:$0xff]  }
 0x3d5   :  { %v5709_v45 = vpop.f32.mrf.mxu1 }
 0x3d6   :  { %v3408_v46 = vadd.f32 %v5708_v44, %v5263_v40 }
 0x3d7   :  { %v5710_v47 = vpop.f32.mrf.mxu1  ;;  %5748 = vmatpush3.bf16.msra.mxu0 %v6392_v58 }
 0x3d8   :  { %v3448_v48 = vadd.f32 %v3447_v32, %v3408_v46  ;;  %5749 = vmatprep.subr.bf16.mxu0 %v6394_v59  ;;  %v6416_v59 = vld [vmem:[%s7353_s5 + $0x178] sm:$0xff]  }
 0x3da   :  { %v3453_v49 = vmax.f32 %v3448_v48, 0.0  ;;  %v6409_v48 = vld [vmem:[%s7353_s5 + $0x188] sm:$0xff]  }
 0x3db   :  { %5750 = vmatpush3.bf16.msra.mxu0 %v6395_v61  ;;  %v6418_v61 = vld [vmem:[%s7353_s5 + $0x1b0] sm:$0xff]  }
 0x3dc   :  { %v5525_v50 = vpack.c.bf16 %v3453_v49, %v3453_v49  ;;  %v2599_v51 = vpop.permute.xlu0 %2598  ;;  %5751 = vmatprep.subr.bf16.mxu0 %v6397_v1  ;;  %v6422_v1 = vld [vmem:[%s7353_s5 + $0x168] sm:$0xff]  }
 0x3dd   :  { %v2600_v52 = vrot.slane %v2599_v51, 4 }
 0x3de   :  { %3458 = vrot.lane.b32.xlu1 %v5525_v50, %s6566_s3 }
 0x3df   :  { %v2601_v15 = vsel %vm7372_vm2, %v2600_v52, %v2599_v51  ;;  %5752 = vmatpush3.bf16.msra.mxu0 %v6398_v2  ;;  %v6412_v51 = vld [vmem:[%s7353_s5 + $0x1c0] sm:$0xff]   ;;  %v6423_v2 = vld [vmem:[%s7353_s5 + $0x1d8] sm:$0xff]  }
 0x3e0   :  { %2605 = vst.msk [vmem:[#allocation3 + $0x8] sm:$0xff] %vm2604_vm1, %v2601_v15  ;;  %5753 = vmatprep.subr.bf16.mxu0 %v6400_v4  ;;  %vm7377_vm1 = vcmask 1043712   ;;  %v6413_v15 = vld [vmem:[%s7353_s5 + $0x180] sm:$0xff]  }
 0x3e1   :  { %vm3464_vm2 = vmor %vm3463_vm15, %vm7377_vm1  ;;  %v6425_v4 = vld [vmem:[%s7353_s5 + $0x160] sm:$0xff]  }
 0x3e3   :  { %5754 = vmatpush3.bf16.msra.mxu0 %v6401_v5  ;;  %v6426_v5 = vld [vmem:[%s7353_s5 + $0x1d0] sm:$0xff]  }
 0x3e4   :  { %5755 = vmatprep.subr.bf16.mxu0 %v6403_v7 }
 0x3e7   :  { %v6382_v53 = vld [vmem:[#allocation3 + $0x8] ss:$0 sps:$4 sm:$0xff]   ;;  %5756 = vmatpush3.bf16.msra.mxu0 %v6404_v8 }
 0x3e8   :  { %5943 = vmatmul.mubr.msk.bf16.vlgmr.msra.gmra.mxu1 %vm7373_vm4, %v6382_v53  ;;  %5757 = vmatprep.subr.bf16.mxu0 %v6406_v9  ;;  %v3741_v22 = vld [vmem:[#allocation3 + $0x4] sm:$0xff]  ;;  %vm7378_vm4 = vcmask 261120  }
 0x3e9   :  { %5956 = vmatprep.mubr.msk.bf16.mxu1 %vm6573_vm10, %v6571_v31  ;;  %5947 = vmatpush3.bf16.msra.mxu1 %v6393_v57  ;;  %v5359_v23 = vcombine.low %v3741_v22, %v3741_v22  ;;  %v5360_v24 = vcombine.high %v3741_v22, %v3741_v22  ;;  %vm7379_vm13 = vmmov %vm7378_vm4 }
 0x3ea   :  { %5948 = vmatprep.subr.bf16.mxu1 %v6571_v31  ;;  %vm7382_vm7 = vmmov %vm7378_vm4 }
 0x3eb   :  { %5758 = vmatpush3.bf16.msra.mxu0 %v6407_v11  ;;  %v6429_v11 = vld [vmem:[%s7353_s5 + $0x190] sm:$0xff]  }
 0x3ec   :  { %5759 = vmatprep.subr.bf16.mxu0 %v6410_v16 }
 0x3ed   :  { %5949 = vmatpush3.bf16.msra.mxu1 %v6396_v0  ;;  %v6421_v0 = vld [vmem:[%s7353_s5 + $0x1a8] sm:$0xff]  }
 0x3ee   :  { %5950 = vmatprep.subr.bf16.mxu1 %v6571_v31 }
 0x3ef   :  { %5760 = vmatpush3.bf16.msra.mxu0 %v6411_v18 }
 0x3f0   :  { %5960 = vmatprep.subr.bf16.mxu0 %v6571_v31 }
 0x3f1   :  { %5951 = vmatpush3.bf16.msra.mxu1 %v6399_v3  ;;  %v6424_v3 = vld [vmem:[%s7353_s5 + $0x1a0] sm:$0xff]  }
 0x3f2   :  { %5952 = vmatprep.subr.bf16.mxu1 %v6571_v31 }
 0x3f5   :  { %5953 = vmatpush3.bf16.msra.mxu1 %v6402_v6  ;;  %v6427_v6 = vld [vmem:[%s7353_s5 + $0x198] sm:$0xff]  }
 0x3f6   :  { %5954 = vmatprep.subr.bf16.mxu1 %v6571_v31 }
 0x3f9   :  { %5955 = vmatpush3.bf16.msra.mxu1 %v6405_v10  ;;  %v6428_v10 = vld [vmem:[%s7353_s5 + $0x158] sm:$0xff]  }
 0x3fa   :  { %5773 = vmatprep.subr.bf16.mxu1 %v6408_v13 }
 0x420   :  { %v2889_v60 = vpop.permute.xlu1 %2888 }
 0x421   :  { %v2890_v62 = vrot.slane %v2889_v60, 4 }
 0x423   :  { %v2891_v63 = vsel %vm7375_vm5, %v2890_v62, %v2889_v60  ;;  %vm7381_vm5 = vmmov %vm7378_vm4  ;;  %v6417_v60 = vld [vmem:[%s7353_s5 + $0x1e8] sm:$0xff]   ;;  %v6419_v62 = vld [vmem:[%s7353_s5 + $0x170] sm:$0xff]  }
 0x424   :  { %2895 = vst.msk [vmem:[#allocation3 + $0xc] sm:$0xff] %vm2894_vm3, %v2891_v63  ;;  %vm7380_vm3 = vcmask 654336   ;;  %v6420_v63 = vld [vmem:[%s7353_s5 + $0x1e0] sm:$0xff]  }
 0x425   :  { %vm7385_vm15 = vmmov %vm7380_vm3 }
 0x43b   :  { %v3174_v12 = vpop.permute.xlu0 %3173 }
 0x43c   :  { %v3175_v14 = vrot.slane %v3174_v12, 4 }
 0x43e   :  { %v3176_v17 = vsel %vm7376_vm0, %v3175_v14, %v3174_v12  ;;  %v6430_v14 = vld [vmem:[%s7353_s5 + $0x150] sm:$0xff]  }
 0x43f   :  { %3181 = vst.msk [vmem:[#allocation3 + $0x10] sm:$0xff] %vm3180_vm8, %v3176_v17  ;;  %vm7383_vm8 = vcmask 523264  }
 0x440   :  { %vm7384_vm0 = vmmov %vm7383_vm8 }
 0x441   :  { %vm7386_vm1 = vmmov %vm7384_vm0 }
 0x446   :  { %v3742_v19 = vld [vmem:[#allocation3 + $0xc] sm:$0xff] }
 0x447   :  { %v5362_v20 = vcombine.high %v3742_v19, %v3742_v19  ;;  %v5361_v21 = vcombine.low %v3742_v19, %v3742_v19 }
 0x449   :  { %3810 = vrot.lane.b32.xlu1 %v5362_v20, %s6566_s3  ;;  %3808 = vrot.lane.b32.xlu0 %v5361_v21, %s6566_s3 }
 0x44d   :  { %3804 = vrot.lane.b32.xlu1 %v5359_v23, %s6566_s3  ;;  %3806 = vrot.lane.b32.xlu0 %v5360_v24, %s6566_s3  ;;  %v5358_v23 = vld [vmem:[%s7354_s6 + $0x1] ss:$0 sm:$0xff] }
 0x450   :  { %v3459_v25 = vpop.permute.xlu1 %3458 }
 0x451   :  { %v3460_v26 = vrot.slane %v3459_v25, 4  ;;  %4103 = vrot.lane.b32.xlu0 %v5362_v20, %s6564_s18 }
 0x453   :  { %v3461_v27 = vsel %vm7378_vm4, %v3460_v26, %v3459_v25  ;;  %v6431_v26 = vld [vmem:[%s7355_s7 + $0x78] sm:$0xff]  }
 0x454   :  { %3465 = vst.msk [vmem:[#allocation3 + $0x14] sm:$0xff] %vm3464_vm2, %v3461_v27  ;;  %v6432_v27 = vld [vmem:[%s7355_s7 + $0x38] sm:$0xff]   ;;  %vm7387_vm2 = vcmask 1043968  }
 0x455   :  { %4101 = vrot.lane.b32.xlu0 %v5361_v21, %s6564_s18  ;;  %vm4333_vm4 = vmor %vm3179_vm11, %vm7387_vm2 }
 0x45b   :  { %v4039_v28 = vld [vmem:[#allocation3 + $0x14] sm:$0xff] }
 0x45c   :  { %v5432_v29 = vcombine.low %v4039_v28, %v4039_v28  ;;  %v5433_v30 = vcombine.high %v4039_v28, %v4039_v28  ;;  %v6433_v28 = vld [vmem:[%s7355_s7 + $0x70] sm:$0xff]  }
 0x45e   :  { %4105 = vrot.lane.b32.xlu1 %v5432_v29, %s6564_s18 }
 0x462   :  { %4107 = vrot.lane.b32.xlu1 %v5433_v30, %s6564_s18 }
 0x492   :  { %v5733_v32 = vpop.f32.mrf.mxu0 }
 0x494   :  { %v5734_v33 = vpop.f32.mrf.mxu0 }
 0x495   :  { %v5735_v36 = vadd.f32 %v5734_v33, %v5733_v32  ;;  %v6434_v33 = vld [vmem:[%s7355_s7 + $0x30] sm:$0xff]  }
 0x496   :  { %v5736_v34 = vpop.f32.mrf.mxu0 }
 0x497   :  { %v3692_v38 = vadd.f32 %v5735_v36, %v5289_v37  ;;  %v6436_v37 = vld [vmem:[%s7355_s7 + $0x28] sm:$0xff]  }
 0x498   :  { %v5737_v35 = vpop.f32.mrf.mxu0 }
 0x499   :  { %v6435_v35 = vld [vmem:[%s7355_s7 + $0x68] sm:$0xff]  }
 0x4a8   :  { %v3731_v39 = vpop.f32.mrf.mxu1 }
 0x4a9   :  { %v3732_v40 = vadd.f32 %v3731_v39, %v3692_v38  ;;  %v6437_v39 = vld [vmem:[%s7355_s7 + $0x60] sm:$0xff]  }
 0x4aa   :  { %v5944_v43 = vpop.f32.mrf.mxu1 }
 0x4ab   :  { %v3737_v44 = vmax.f32 %v3732_v40, 0.0  ;;  %v6438_v40 = vld [vmem:[%s7355_s7 + $0x20] sm:$0xff]   ;;  %v6439_v43 = vld [vmem:[%s7355_s7 + $0x58] sm:$0xff]  }
 0x4ac   :  { %v3734_v45 = vpop.f32.mrf.mxu1 }
 0x4ad   :  { %v3738_v46 = vpack.c.bf16 %v3737_v44, %v3737_v44  ;;  %v6440_v44 = vld [vmem:[%s7355_s7 + $0x18] sm:$0xff]  }
 0x4ae   :  { %v5945_v47 = vpop.f32.mrf.mxu1 }
 0x4af   :  { %3740 = vst.msk [vmem:[#allocation4] sm:$0xf] %vm3739_vm6, %v3738_v46  ;;  %vm7388_vm6 = vmmov %vm7384_vm0 }
 0x4bb   :  { %v3811_v49 = vpop.permute.xlu1 %3810  ;;  %v3809_v50 = vpop.permute.xlu0 %3808 }
 0x4bc   :  { %v3814_v52 = vsel %vm7379_vm13, %v3809_v50, %v3811_v49 }
 0x4bd   :  { %5957 = vmatmul.mubr.msk.bf16.vlgmr.msra.gmra.mxu1 %vm7380_vm3, %v3814_v52  ;;  %v5429_v52 = vld [vmem:[%s7354_s6 + $0x2] ss:$0 sm:$0xff] }
 0x4be   :  { %5774 = vmatpush3.bf16.msra.mxu1 %v6409_v48 }
 0x4bf   :  { %v3805_v53 = vpop.permute.xlu1 %3804  ;;  %v3807_v54 = vpop.permute.xlu0 %3806  ;;  %5775 = vmatprep.subr.bf16.mxu1 %v6412_v51  ;;  %v6442_v51 = vld [vmem:[%s7355_s7 + $0x10] sm:$0xff]  }
 0x4c0   :  { %v3812_v57 = vsel %vm7381_vm5, %v3805_v53, %v3807_v54  ;;  %v3813_v58 = vsel %vm7382_vm7, %v3807_v54, %v3809_v50  ;;  %v6441_v50 = vld [vmem:[%s7355_s7 + $0x50] sm:$0xff]   ;;  %v6443_v54 = vld [vmem:[%s7355_s7 + $0x48] sm:$0xff]  }
 0x4c1   :  { %3978 = vmatprep.mubr.bf16.mxu0 %v3813_v58  ;;  %v6446_v58 = vld [vmem:[%s7355_s7 + $0x40] sm:$0xff]  }
 0x4c2   :  { %5776 = vmatpush3.bf16.msra.mxu1 %v6413_v15  ;;  %3979 = vmatmul.mubr.bf16.vlgmr.msra.gmra.mxu0 %v3812_v57 }
 0x4c3   :  { %5961 = vmatpush3.bf16.msra.mxu0 %v6414_v55  ;;  %5777 = vmatprep.subr.bf16.mxu1 %v6415_v56  ;;  %v4104_v7 = vpop.permute.xlu0 %4103  ;;  %v6444_v55 = vld [vmem:[%s7355_s7 + $0x88] sm:$0xff]  }
 0x4c4   :  { %5962 = vmatprep.subr.bf16.mxu0 %v6571_v31  ;;  %5970 = vmatprep.mubr.msk.bf16.mxu0 %vm6573_vm10, %v6571_v31  ;;  %v6445_v56 = vld [vmem:[%s7355_s7 + $0x8] sm:$0xff]  }
 0x4c6   :  { %5778 = vmatpush3.bf16.msra.mxu1 %v6416_v59 }
 0x4c7   :  { %5963 = vmatpush3.bf16.msra.mxu0 %v6417_v60  ;;  %5779 = vmatprep.subr.bf16.mxu1 %v6418_v61  ;;  %v4102_v16 = vpop.permute.xlu0 %4101  ;;  %v6447_v60 = vld [vmem:[%s7355_s7 + $0x80] sm:$0xff]  }
 0x4c8   :  { %5964 = vmatprep.subr.bf16.mxu0 %v6571_v31  ;;  %v4109_v17 = vsel %vm7386_vm1, %v4102_v16, %v4104_v7  ;;  %v6460_v16 = vld [vmem:[%s7357_s9 + $0x54] ss:$8 sps:$4 sm:$0xff]  }
 0x4ca   :  { %5780 = vmatpush3.bf16.msra.mxu1 %v6419_v62 }
 0x4cb   :  { %5965 = vmatpush3.bf16.msra.mxu0 %v6420_v63  ;;  %5781 = vmatprep.subr.bf16.mxu1 %v6421_v0  ;;  %v6448_v63 = vld [vmem:[%s7355_s7] sm:$0xff]  }
 0x4cc   :  { %5966 = vmatprep.subr.bf16.mxu0 %v6571_v31 }
 0x4ce   :  { %5782 = vmatpush3.bf16.msra.mxu1 %v6422_v1 }
 0x4cf   :  { %5967 = vmatpush3.bf16.msra.mxu0 %v6423_v2  ;;  %5783 = vmatprep.subr.bf16.mxu1 %v6424_v3  ;;  %v6454_v2 = vld [vmem:[%s7357_s9 + $0x74] ss:$8 sps:$4 sm:$0xff]  }
 0x4d0   :  { %v4106_v8 = vpop.permute.xlu1 %4105  ;;  %5968 = vmatprep.subr.bf16.mxu0 %v6571_v31 }
 0x4d1   :  { %v4110_v9 = vsel %vm7383_vm8, %v4104_v7, %v4106_v8 }
 0x4d2   :  { %5784 = vmatpush3.bf16.msra.mxu1 %v6425_v4  ;;  %4275 = vmatprep.mubr.bf16.mxu1 %v4110_v9  ;;  %v6457_v9 = vld [vmem:[%s7357_s9 + $0x64] ss:$8 sps:$4 sm:$0xff]  }
 0x4d3   :  { %5969 = vmatpush3.bf16.msra.mxu0 %v6426_v5  ;;  %5785 = vmatprep.subr.bf16.mxu1 %v6427_v6 }
 0x4d4   :  { %v4108_v12 = vpop.permute.xlu1 %4107  ;;  %5801 = vmatprep.subr.bf16.mxu0 %v6431_v26  ;;  %v6475_v26 = vld [vmem:[%s7357_s9 + $0x4] ss:$8 sps:$4 sm:$0xff]  }
 0x4d5   :  { %v4111_v13 = vsel %vm7384_vm0, %v4106_v8, %v4108_v12  ;;  %v6452_v8 = vld [vmem:[%s7357_s9 + $0x70] ss:$8 sps:$4 sm:$0xff]  }
 0x4d6   :  { %5786 = vmatpush3.bf16.msra.mxu1 %v6428_v10  ;;  %5971 = vmatmul.mubr.msk.bf16.vlgmr.msra.gmra.mxu0 %vm7385_vm15, %v4111_v13 }
 0x4d7   :  { %5787 = vmatprep.subr.bf16.mxu1 %v6429_v11  ;;  %5802 = vmatpush3.bf16.msra.mxu0 %v6432_v27  ;;  %v6473_v27 = vld [vmem:[%s7357_s9] ss:$8 sps:$4 sm:$0xff]  }
 0x4d8   :  { %5803 = vmatprep.subr.bf16.mxu0 %v6433_v28  ;;  %v6579_v28 = vmov 0  }
 0x4da   :  { %5788 = vmatpush3.bf16.msra.mxu1 %v6430_v14  ;;  %v6455_v14 = vld [vmem:[%s7357_s9 + $0x60] ss:$8 sps:$4 sm:$0xff]  }
 0x4db   :  { %5974 = vmatprep.subr.bf16.mxu1 %v6571_v31  ;;  %5804 = vmatpush3.bf16.msra.mxu0 %v6434_v33  ;;  %v6479_v33 = vld [vmem:[%s7359_s11 + $0x30] sm:$0xff]  }
 0x4dc   :  { %5805 = vmatprep.subr.bf16.mxu0 %v6435_v35  ;;  %v6481_v35 = vld [vmem:[%s7359_s11 + $0x28] sm:$0xff]  }
 0x4dd   :  { %4276 = vmatmul.mubr.bf16.vlgmr.msra.gmra.mxu1 %v4109_v17  ;;  %v6458_v17 = vld [vmem:[%s7357_s9 + $0x50] ss:$8 sps:$4 sm:$0xff]  }
 0x4de   :  { %5978 = vmatprep.mubr.msk.bf16.mxu1 %vm6573_vm10, %v6571_v31  ;;  %5975 = vmatpush3.bf16.msra.mxu1 %v6444_v55  ;;  %vm4036_vm10 = vmor %vm2603_vm9, %vm2319_vm12 }
 0x4df   :  { %5806 = vmatpush3.bf16.msra.mxu0 %v6436_v37  ;;  %5976 = vmatprep.subr.bf16.mxu1 %v6571_v31  ;;  %vm7389_vm12 = vmmov %vm7381_vm5  ;;  %v6483_v37 = vld [vmem:[%s7359_s11 + $0x20] sm:$0xff]  }
 0x4e0   :  { %5807 = vmatprep.subr.bf16.mxu0 %v6437_v39  ;;  %v6485_v39 = vld [vmem:[%s7359_s11 + $0x18] sm:$0xff]  }
 0x4e2   :  { %5977 = vmatpush3.bf16.msra.mxu1 %v6447_v60  ;;  %v6490_v60 = vld [vmem:[%s7359_s11 + $0x40] sm:$0xff]  }
 0x4e3   :  { %5808 = vmatpush3.bf16.msra.mxu0 %v6438_v40  ;;  %4694 = vmatprep.subr.bf16.mxu1 %v6454_v2  ;;  %v6486_v40 = vld [vmem:[%s7359_s11 + $0x50] sm:$0xff]  }
 0x4e4   :  { %5809 = vmatprep.subr.bf16.mxu0 %v6439_v43  ;;  %v6487_v43 = vld [vmem:[%s7359_s11 + $0x10] sm:$0xff]  }
 0x4e7   :  { %5810 = vmatpush3.bf16.msra.mxu0 %v6440_v44 }
 0x4e8   :  { %5811 = vmatprep.subr.bf16.mxu0 %v6441_v50 }
 0x4eb   :  { %5812 = vmatpush3.bf16.msra.mxu0 %v6442_v51 }
 0x4ec   :  { %5813 = vmatprep.subr.bf16.mxu0 %v6443_v54 }
 0x4ef   :  { %5814 = vmatpush3.bf16.msra.mxu0 %v6445_v56 }
 0x4f0   :  { %5815 = vmatprep.subr.bf16.mxu0 %v6446_v58  ;;  %v6488_v58 = vld [vmem:[%s7359_s11 + $0x48] sm:$0xff]  }
 0x4f3   :  { %5816 = vmatpush3.bf16.msra.mxu0 %v6448_v63 }
 0x57d   :  { %v4020_v18 = vpop.f32.mrf.mxu1 }
 0x57f   :  { %v5958_v19 = vpop.f32.mrf.mxu1 }
 0x580   :  { %v6461_v19 = vld [vmem:[%s7357_s9 + $0x40] ss:$8 sps:$4 sm:$0xff]  }
 0x581   :  { %v4023_v20 = vpop.f32.mrf.mxu1 }
 0x582   :  { %v5761_v21 = vpop.f32.mrf.mxu0  ;;  %v6466_v20 = vld [vmem:[%s7357_s9 + $0x34] ss:$8 sps:$4 sm:$0xff]  }
 0x583   :  { %v5959_v22 = vpop.f32.mrf.mxu1 }
 0x584   :  { %v5762_v24 = vpop.f32.mrf.mxu0  ;;  %v6469_v22 = vld [vmem:[%s7357_s9 + $0x24] ss:$8 sps:$4 sm:$0xff]  }
 0x585   :  { %v5763_v25 = vadd.f32 %v5762_v24, %v5761_v21  ;;  %v6464_v21 = vld [vmem:[%s7357_s9 + $0x30] ss:$8 sps:$4 sm:$0xff]   ;;  %v6472_v24 = vld [vmem:[%s7357_s9 + $0x14] ss:$8 sps:$4 sm:$0xff]  }
 0x586   :  { %v5764_v29 = vpop.f32.mrf.mxu0 }
 0x587   :  { %v3981_v30 = vadd.f32 %v5763_v25, %v5358_v23  ;;  %v6467_v23 = vld [vmem:[%s7357_s9 + $0x20] ss:$8 sps:$4 sm:$0xff]   ;;  %v6470_v25 = vld [vmem:[%s7357_s9 + $0x10] ss:$8 sps:$4 sm:$0xff]  }
 0x588   :  { %v5765_v32 = vpop.f32.mrf.mxu0  ;;  %v6476_v29 = vld [vmem:[%s7359_s11 + $0x78] sm:$0xff]  }
 0x589   :  { %v4021_v34 = vadd.f32 %v4020_v18, %v3981_v30  ;;  %v6463_v18 = vld [vmem:[%s7357_s9 + $0x44] ss:$8 sps:$4 sm:$0xff]   ;;  %v6477_v30 = vld [vmem:[%s7359_s11 + $0x38] sm:$0xff]   ;;  %v6478_v32 = vld [vmem:[%s7359_s11 + $0x70] sm:$0xff]   ;;  %5826 = vmatprep.subr.bf16.mxu0 %v6476_v29 }
 0x58b   :  { %v4026_v36 = vmax.f32 %v4021_v34, 0.0  ;;  %v6480_v34 = vld [vmem:[%s7359_s11 + $0x68] sm:$0xff]  }
 0x58d   :  { %v5526_v38 = vpack.c.bf16 %v4026_v36, %v4026_v36  ;;  %v6482_v36 = vld [vmem:[%s7359_s11 + $0x60] sm:$0xff]  }
 0x58f   :  { %4031 = vrot.lane.b32.xlu0 %v5526_v38, %s6578_s26  ;;  %v6484_v38 = vld [vmem:[%s7359_s11 + $0x58] sm:$0xff]  }
 0x596   :  { %v4317_v45 = vpop.f32.mrf.mxu0 }
 0x598   :  { %v5972_v46 = vpop.f32.mrf.mxu0 }
 0x59a   :  { %v4320_v47 = vpop.f32.mrf.mxu0 }
 0x59b   :  { %v5457_v47 = vld [vmem:[%s7356_s8] ss:$0 sm:$0xff] }
 0x59c   :  { %v5973_v48 = vpop.f32.mrf.mxu0 }
 0x59d   :  { %v5789_v49 = vpop.f32.mrf.mxu1 }
 0x59f   :  { %v5790_v15 = vpop.f32.mrf.mxu1 }
 0x5a0   :  { %v5791_v53 = vadd.f32 %v5790_v15, %v5789_v49 }
 0x5a1   :  { %v5792_v57 = vpop.f32.mrf.mxu1 }
 0x5a2   :  { %v4278_v59 = vadd.f32 %v5791_v53, %v5429_v52 }
 0x5a3   :  { %v5793_v61 = vpop.f32.mrf.mxu1 }
 0x5a4   :  { %v4318_v62 = vadd.f32 %v4317_v45, %v4278_v59  ;;  %v6489_v59 = vld [vmem:[%s7359_s11 + $0x8] sm:$0xff]   ;;  %v6491_v61 = vld [vmem:[%s7359_s11] sm:$0xff]  }
 0x5a6   :  { %v4323_v0 = vmax.f32 %v4318_v62, 0.0  ;;  %v4602_v62 = vld [vmem:[%s7358_s10] sm:$0x3]  ;;  %s6580_s10 = smov [#allocation10]  }
 0x5a7   :  { %v4607_v63 = vrot.slane %v4602_v62, %v6738_v41  ;;  %s4923_s16 = sshll.u32 %s6580_s10, 4  ;;  %s4924_s16 = int_to_ptr.vmem [resolvable:$true] %s4923_s16 }
 0x5a8   :  { %v5527_v1 = vpack.c.bf16 %v4323_v0, %v4323_v0  ;;  %v4611_v0 = vrot.slane %v4602_v62, %v6741_v42  ;;  %s6534_s23 = scalar_lea.vmem %s4924_s16, 64  ;;  %p6539_p11 = scmp.lt.s32.totalorder %s4924_s16, %s4924_s16 }
 0x5a9   :  { %p6535_p10 = scmp.ne.s32.totalorder %s4924_s16, %s6534_s23  ;;  %p6540_p12 = scmp.lt.s32.totalorder %s6534_s23, %s6534_s23 }
 0x5aa   :  { %4328 = vrot.lane.b32.xlu1 %v5527_v1, %s6564_s18 }
 0x5ab   :  { %p6541_p13 = por %p6540_p12, %p6539_p11 }
 0x5ad   :  { %p6542_p0 = pnand %p6541_p13, %p6535_p10 }
 0x601   :  { %v4032_v3 = vpop.permute.xlu0 %4031 }
 0x602   :  { %v4033_v31 = vrot.slane %v4032_v3, 4 }
 0x604   :  { %v4034_v4 = vsel %vm2316_vm14, %v4033_v31, %v4032_v3 }
 0x605   :  { %4037 = vst.msk [vmem:[#allocation4] sm:$0xff] %vm4036_vm10, %v4034_v4 }
 0x61c   :  { %v4329_v5 = vpop.permute.xlu1 %4328 }
 0x61d   :  { %v4330_v6 = vrot.slane %v4329_v5, 4 }
 0x61f   :  { %v4331_v7 = vsel %vm7388_vm6, %v4330_v6, %v4329_v5 }
 0x620   :  { %4334 = vst.msk [vmem:[#allocation4 + $0x4] sm:$0xff] %vm4333_vm4, %v4331_v7 }
 0x627   :  { %v4335_v10 = vld [vmem:[#allocation4] sm:$0xff]  ;;  %v6451_v11 = vld [vmem:[#allocation4 + $0x8] ss:$0 sps:$4 sm:$0xff]  }
 0x628   :  { %v5458_v12 = vcombine.low %v4335_v10, %v4335_v10  ;;  %v5459_v13 = vcombine.high %v4335_v10, %v4335_v10  ;;  %5979 = vmatmul.mubr.msk.bf16.vlgmr.msra.gmra.mxu1 %vm7389_vm12, %v6451_v11  ;;  %v5496_v11 = vld [vmem:[%s7360_s12] ss:$0 sm:$0xff] }
 0x629   :  { %4695 = vmatpush1.bf16.msra.mxu1 %v6452_v8  ;;  %4726 = vmatprep.mubr.bf16.mxu1 %v6579_v28 }
 0x62a   :  { %4534 = vmatprep.mubr.bf16.mxu0 %v5459_v13  ;;  %4696 = vmatprep.subr.bf16.mxu1 %v6457_v9 }
 0x62b   :  { %4535 = vmatmul.mubr.bf16.vlgmr.msra.gmra.mxu0 %v5458_v12 }
 0x62c   :  { %5827 = vmatpush3.bf16.msra.mxu0 %v6477_v30 }
 0x62d   :  { %4697 = vmatpush1.bf16.msra.mxu1 %v6455_v14  ;;  %5828 = vmatprep.subr.bf16.mxu0 %v6478_v32 }
 0x62e   :  { %4698 = vmatprep.subr.bf16.mxu1 %v6460_v16 }
 0x630   :  { %5829 = vmatpush3.bf16.msra.mxu0 %v6479_v33 }
 0x631   :  { %4699 = vmatpush1.bf16.msra.mxu1 %v6458_v17  ;;  %5830 = vmatprep.subr.bf16.mxu0 %v6480_v34 }
 0x632   :  { %4700 = vmatprep.subr.bf16.mxu1 %v6463_v18 }
 0x634   :  { %5831 = vmatpush3.bf16.msra.mxu0 %v6481_v35 }
 0x635   :  { %4701 = vmatpush1.bf16.msra.mxu1 %v6461_v19  ;;  %5832 = vmatprep.subr.bf16.mxu0 %v6482_v36 }
 0x636   :  { %4702 = vmatprep.subr.bf16.mxu1 %v6466_v20 }
 0x638   :  { %5833 = vmatpush3.bf16.msra.mxu0 %v6483_v37 }
 0x639   :  { %4703 = vmatpush1.bf16.msra.mxu1 %v6464_v21  ;;  %5834 = vmatprep.subr.bf16.mxu0 %v6484_v38 }
 0x63a   :  { %4704 = vmatprep.subr.bf16.mxu1 %v6469_v22 }
 0x63c   :  { %5835 = vmatpush3.bf16.msra.mxu0 %v6485_v39 }
 0x63d   :  { %4705 = vmatpush1.bf16.msra.mxu1 %v6467_v23  ;;  %5836 = vmatprep.subr.bf16.mxu0 %v6486_v40 }
 0x63e   :  { %4706 = vmatprep.subr.bf16.mxu1 %v6472_v24 }
 0x640   :  { %5837 = vmatpush3.bf16.msra.mxu0 %v6487_v43 }
 0x641   :  { %4707 = vmatpush1.bf16.msra.mxu1 %v6470_v25  ;;  %5838 = vmatprep.subr.bf16.mxu0 %v6488_v58 }
 0x642   :  { %4708 = vmatprep.subr.bf16.mxu1 %v6475_v26 }
 0x644   :  { %5839 = vmatpush3.bf16.msra.mxu0 %v6489_v59 }
 0x645   :  { %4709 = vmatpush1.bf16.msra.mxu1 %v6473_v27  ;;  %5840 = vmatprep.subr.bf16.mxu0 %v6490_v60 }
 0x648   :  { %5841 = vmatpush3.bf16.msra.mxu0 %v6491_v61 }
 0x6e8   :  { %v4576_v44 = vpop.f32.mrf.mxu1 }
 0x6ea   :  { %v5980_v46 = vpop.f32.mrf.mxu1 }
 0x6eb   :  { %v5817_v45 = vpop.f32.mrf.mxu0 }
 0x6ec   :  { %v4579_v49 = vpop.f32.mrf.mxu1 }
 0x6ed   :  { %v5818_v48 = vpop.f32.mrf.mxu0 }
 0x6ee   :  { %v5819_v50 = vadd.f32 %v5818_v48, %v5817_v45  ;;  %v5981_v52 = vpop.f32.mrf.mxu1 }
 0x6ef   :  { %v5820_v51 = vpop.f32.mrf.mxu0 }
 0x6f0   :  { %v4537_v15 = vadd.f32 %v5819_v50, %v5457_v47 }
 0x6f1   :  { %v5821_v53 = vpop.f32.mrf.mxu0 }
 0x6f2   :  { %v4577_v54 = vadd.f32 %v4576_v44, %v4537_v15 }
 0x6f4   :  { %vm4582_vm14 = vcmp.ge.f32.partialorder %v4577_v54, 0.0  ;;  %v4583_v55 = vmul.f32 0.01, %v4577_v54 }
 0x6f6   :  { %v4584_v56 = vsel %vm4582_vm14, %v4577_v54, %v4583_v55 }
 0x6f7   :  { %v4585_v57 = vpack.c.bf16 %v4584_v56, %v4584_v56 }
 0x6f9   :  { %4727 = vmatmul.mubr.bf16.vlgmr.msra.gmra.mxu1 %v4585_v57 }
 0x7b9   :  { %v4728_v1 = vpop.f32.mrf.mxu1 }
 0x7ba   :  { %v4729_v2 = vadd.f32 %v4728_v1, %v4607_v63 }
 0x7bb   :  { %v4730_v3 = vpop.f32.mrf.mxu1 }
 0x7bc   :  { %v4731_v31 = vadd.f32 %v4730_v3, %v4611_v0  ;;  %v4735_v4 = vmax.f32 %v4729_v2, 0.0 }
 0x7bd   :  { %v4732_v5 = vpop.f32.mrf.mxu1 }
 0x7be   :  { %v4736_v6 = vmax.f32 %v4731_v31, 0.0  ;;  %v4737_v9 = vpack.c.bf16 %v4735_v4, %v4735_v4 }
 0x7bf   :  { %v4733_v7 = vpop.f32.mrf.mxu1 }
 0x7c0   :  { %v4738_v8 = vpack.c.bf16 %v4736_v6, %v4736_v6 }
 0x7c2   :  { %4906 = vmatprep.mubr.bf16.mxu0 %v4738_v8 }
 0x7c3   :  { %4907 = vmatmul.mubr.bf16.vlgmr.msra.gmra.mxu0 %v4737_v9 }
 0x883   :  { %v5842_v10 = vpop.f32.mrf.mxu0 }
 0x885   :  { %v5843_v41 = vpop.f32.mrf.mxu0 }
 0x886   :  { %v5844_v12 = vadd.f32 %v5843_v41, %v5842_v10 }
 0x887   :  { %v5845_v42 = vpop.f32.mrf.mxu0 }
 0x888   :  { %v4909_v13 = vadd.f32 %v5844_v12, %v5496_v11 }
 0x889   :  { %v5846_v14 = vpop.f32.mrf.mxu0 }
 0x88a   :  { %6492 = vtanh.f32 %v4909_v13 }
 0x897   :  { %v6493_v16 = vpop.eup %6492 }
 0x898   :  { %v4915_v17 = vpack.c.bf16 %v6493_v16, %v6493_v16 }
 0x89a   :  { %4916 = vst [vmem:[#allocation10] sm:$0xf] %v4915_v17 }
 0x89b   :  { %6545 = shalt.err (!%p6542_p0)
}
 0x89c   :  { %4926 = dma.vmem_to_hbm [thread:$0]  %s4924_s16, 64, %s7361_s13, [#allocation7]  }
 0x89d   :  { %6558 = dma.done.wait [#allocation7], 64  }
 0x89e   :  { %6559 = vsyncadd [#allocation7], 4294967232 }
 0x89f   :  { %4930 = vsyncpa [#allocation6], 1 }
 0x8a0   :  { %4931 = vsyncpa [#allocation9], 1 }
 0x8a1   :  { %4932 = vsyncpa [#allocation7], 1 }

</bundles_post_ra>
